<compile_context>
chip_gen: v5e
topology: v5e:2x2
jax: 0.10.0
libtpu: 0.0.40
codegen_flags: <defaults>
</compile_context>

<pallas_src>
import functools
import math

import jax
import jax.numpy as jnp
import numpy as np
from jax.experimental import pallas as pl
from jax.experimental.pallas import tpu as pltpu


def _sinusoidal_kernel(freqs_ref, x_ref, out_ref, *, half_dim: int):
    # freqs_ref: (half_dim, 1) f32 — constant frequency column
    # x_ref:     (1, TN)       f32 — positions, dense on the 128-wide lane axis
    # out_ref:   (TN, dim)     f32 — output tile already in final layout
    angles = freqs_ref[...] * x_ref[...]            # (half_dim, TN), full-lane vregs
    # Lane-dense trig (EUP-optimal), then XLU transposes into the final
    # (positions, dim) layout.  Two direct sub-stores — no concat temporary.
    out_ref[:, :half_dim] = jnp.sin(angles).T       # (TN, half_dim)
    out_ref[:, half_dim:] = jnp.cos(angles).T       # (TN, half_dim)


def sinusoidal_pos_emb(x, dim: int = 16, M: int = 32768, *,
                       max_tile_n: int = 4096, min_pallas_n: int = 2048):
    """Pallas implementation of SinusoidalPosEmb.forward; returns x.shape + (dim,)."""
    assert dim % 2 == 0, "dim must be even"
    half_dim = dim // 2
    emb_scale = math.log(M) / half_dim              # matches torch: log(M) / half_dim
    freqs_np = np.exp(np.arange(half_dim, dtype=np.float32) * np.float32(-emb_scale))
    freqs = jnp.asarray(freqs_np, dtype=jnp.float32)

    orig_shape = x.shape
    xf = jnp.asarray(x, dtype=jnp.float32).reshape(-1)
    n = int(xf.shape[0])

    # Small-N fallback (typical diffusion use: a handful of timesteps) and n==0:
    # one fused XLA expression beats pallas launch + pad + relayout overhead.
    if n == 0 or n < min_pallas_n:
        ang = xf[:, None] * freqs[None, :]
        out = jnp.concatenate([jnp.sin(ang), jnp.cos(ang)], axis=-1)
        return out.reshape(*orig_shape, dim)

    def _rup(a, m):
        return ((a + m - 1) // m) * m

    # Lane-multiple tiles; aim for >=2 tiles so v7x's two TensorCores both work.
    max_tile_n = max(128, (max_tile_n // 128) * 128)
    n_lane = _rup(n, 128)
    tn = min(max_tile_n, max(128, _rup(n_lane // 2, 128)))
    n_pad = _rup(n, tn)
    if n_pad != n:
        xf = jnp.pad(xf, (0, n_pad - n))            # padded tail computes trig(0), sliced off
    x_row = xf.reshape(1, n_pad)
    freqs_col = freqs.reshape(half_dim, 1)

    grid = (n_pad // tn,)

    out = pl.pallas_call(
        functools.partial(_sinusoidal_kernel, half_dim=half_dim),
        out_shape=jax.ShapeDtypeStruct((n_pad, dim), jnp.float32),
        grid=grid,
        in_specs=[
            pl.BlockSpec((half_dim, 1), lambda i: (0, 0)),   # tiny constant freq column
            pl.BlockSpec((1, tn), lambda i: (0, i)),          # lane-dense positions
        ],
        out_specs=pl.BlockSpec((tn, dim), lambda i: (i, 0)),  # final layout, no wrapper transpose
        compiler_params=pltpu.CompilerParams(
            dimension_semantics=("parallel",)),
    )(freqs_col, x_row)

    return out[:n].reshape(*orig_shape, dim)


def _reference(x, dim=16, M=32768):
    half_dim = dim // 2
    emb = math.log(M) / half_dim
    freqs = jnp.exp(jnp.arange(half_dim, dtype=jnp.float32) * -emb)
    ang = jnp.asarray(x, jnp.float32)[..., None] * freqs
    return jnp.concatenate([jnp.sin(ang), jnp.cos(ang)], axis=-1)


if __name__ == "__main__":
    dim, M = 16, 32768
    k1, k2, k3, k4 = jax.random.split(jax.random.PRNGKey(0), 4)

    # 1) Typical diffusion use: batch of 8 scalar timesteps (small-N XLA fallback path).
    x1 = jax.random.uniform(k1, (8,), dtype=jnp.float32) * 100.0
    o1 = jax.block_until_ready(sinusoidal_pos_emb(x1, dim=dim, M=M))
    np.testing.assert_allclose(np.asarray(o1), np.asarray(_reference(x1, dim, M)),
                               atol=1e-5, rtol=1e-5)
    assert o1.shape == (8, dim)

    # 2) Multi-dim input (batch, seq) of integer-like timesteps (fallback path).
    x2 = jax.random.randint(k2, (2, 4), 0, 100).astype(jnp.float32)
    o2 = jax.block_until_ready(sinusoidal_pos_emb(x2, dim=dim, M=M))
    np.testing.assert_allclose(np.asarray(o2), np.asarray(_reference(x2, dim, M)),
                               atol=1e-5, rtol=1e-5)
    assert o2.shape == (2, 4, dim)

    # 3) Pallas path, multi-tile grid (N=4096 -> tn=2048, grid=(2,); both v7x TCs busy).
    x3 = jax.random.uniform(k3, (4096,), dtype=jnp.float32) * 100.0
    o3 = jax.block_until_ready(sinusoidal_pos_emb(x3, dim=dim, M=M))
    np.testing.assert_allclose(np.asarray(o3), np.asarray(_reference(x3, dim, M)),
                               atol=2e-4, rtol=2e-4)
    assert o3.shape == (4096, dim)

    # 4) Pallas path, ragged tail with forced small tiles (N=1300, tn=512 -> grid=(3,)).
    x4 = jax.random.uniform(k4, (1300,), dtype=jnp.float32) * 100.0
    o4 = jax.block_until_ready(
        sinusoidal_pos_emb(x4, dim=dim, M=M, max_tile_n=512, min_pallas_n=0))
    np.testing.assert_allclose(np.asarray(o4), np.asarray(_reference(x4, dim, M)),
                               atol=2e-4, rtol=2e-4)
    assert o4.shape == (1300, dim)

    print("KERNEL_OK")
</pallas_src>

<mosaic_0001>
module attributes {stable_mosaic.version = 11 : i64} {
  func.func @_sinusoidal_kernel(%arg0: i32, %arg1: memref<8x1xf32, #tpu.memory_space<vmem>>, %arg2: memref<1x2048xf32, #tpu.memory_space<vmem>>, %arg3: memref<2048x16xf32, #tpu.memory_space<vmem>>) attributes {dimension_semantics = [#tpu.dimension_semantics<parallel>], iteration_bounds = array<i64: 2>, scalar_prefetch = 0 : i64, scratch_operands = 0 : i64, tpu.core_type = #tpu.core_type<tc>, window_params = [{pipeline_mode = #tpu.pipeline_mode<synchronous>, transform_indices = @transform_0, window_bounds = array<i64: 8, 1>}, {transform_indices = @transform_1, window_bounds = array<i64: 1, 2048>}, {transform_indices = @transform_2, window_bounds = array<i64: 2048, 16>}]} {
    %c0 = arith.constant 0 : index
    %c0_0 = arith.constant 0 : index
    %0 = vector.load %arg1[%c0, %c0_0] : memref<8x1xf32, #tpu.memory_space<vmem>>, vector<8x1xf32>
    %c0_1 = arith.constant 0 : index
    %c0_2 = arith.constant 0 : index
    %1 = vector.load %arg2[%c0_1, %c0_2] : memref<1x2048xf32, #tpu.memory_space<vmem>>, vector<1x2048xf32>
    %2 = vector.broadcast %0 : vector<8x1xf32> to vector<8x2048xf32>
    %3 = vector.broadcast %1 : vector<1x2048xf32> to vector<8x2048xf32>
    %4 = arith.mulf %2, %3 : vector<8x2048xf32>
    %5 = math.sin %4 : vector<8x2048xf32>
    %6 = tpu.transpose %5, [1, 0] : vector<8x2048xf32> -> vector<2048x8xf32>
    %c0_3 = arith.constant 0 : index
    %c0_4 = arith.constant 0 : index
    %7 = vector.load %arg3[%c0_3, %c0_4] : memref<2048x16xf32, #tpu.memory_space<vmem>>, vector<2048x8xf32>
    tpu.vector_store %arg3[%c0_3, %c0_4], %6 {strides = array<i32>} : memref<2048x16xf32, #tpu.memory_space<vmem>>, vector<2048x8xf32>,
    %8 = math.cos %4 : vector<8x2048xf32>
    %9 = tpu.transpose %8, [1, 0] : vector<8x2048xf32> -> vector<2048x8xf32>
    %c0_5 = arith.constant 0 : index
    %c8 = arith.constant 8 : index
    %10 = vector.load %arg3[%c0_5, %c8] : memref<2048x16xf32, #tpu.memory_space<vmem>>, vector<2048x8xf32>
    tpu.vector_store %arg3[%c0_5, %c8], %9 {strides = array<i32>} : memref<2048x16xf32, #tpu.memory_space<vmem>>, vector<2048x8xf32>,
    return
  }
  func.func @transform_0(%arg0: i32) -> (i32, i32) {
    %c0_i32 = arith.constant 0 : i32
    %c0_i32_0 = arith.constant 0 : i32
    %c0_i32_1 = arith.constant 0 : i32
    return %c0_i32, %c0_i32_0 : i32, i32
  }
  func.func @transform_1(%arg0: i32) -> (i32, i32) {
    %c0_i32 = arith.constant 0 : i32
    %c0_i32_0 = arith.constant 0 : i32
    return %c0_i32, %arg0 : i32, i32
  }
  func.func @transform_2(%arg0: i32) -> (i32, i32) {
    %c0_i32 = arith.constant 0 : i32
    %c0_i32_0 = arith.constant 0 : i32
    return %arg0, %c0_i32 : i32, i32
  }
}

</mosaic_0001>

<bundles_post_ra>
// kernel: tpu_custom_call.1
= control target key start
LH: loop header
LB: loop body
LE: loop exit
PB: predicated region body
PF: predicated region fallthrough
CT: control target
= control target key end

     0   :  { %7 = vsyncpa [#allocation3], 0  ;;  %s12536_s0 = inlined_call_operand.vmem [shape: f32[8,1], index: 0, kind: input, shape index: {}]   ;;  %s12537_s1 = inlined_call_operand.hbm [shape: f32[1,4096], index: 1, kind: input, shape index: {}]   ;;  %s12538_s2 = inlined_call_operand.vmem [shape: f32[4096,16], index: 2, kind: output, shape index: {}]  }
   0x1   :  { %9 = vsyncpa [#allocation3 + $0x1], 0  ;;  %s8045_s9 = smov 0   ;;  %s8047_s10 = smov 0  }
   0x2   :  { %s8049_s11 = smov 0   ;;  %s8051_s12 = smov 0  }
   0x3 LB: > { %s7796_s13 = sadd.s32 4294967295, %s8020_s12   ;;  %s8065_s14 = sadd.s32 1, %s8020_s12   ;;  %s8020_s12 = sphi %s8051_s12, %s13061_s12   ;;  %s8016_s11 = sphi %s8049_s11, %s13060_s11   ;;  %s8012_s10 = sphi %s8047_s10, %s13059_s10   ;;  %s8008_s9 = sphi %s8045_s9, %s13058_s9  }
   0x4   : > { %s40_s15 = ssub.s32 %s8020_s12, %s8065_s14  ;;  %s43_s16 = sadd.s32 1, %s8016_s11 }
   0x5   : > { %p41_p0 = scmp.eq.s32.totalorder %s40_s15, 0  ;;  %p50_p1 = scmp.ne.s32.totalorder %s8016_s11, %s8012_s10 }
   0x6   : > { %p51_p2 = scmp.eq.s32.totalorder %s8020_s12, 0  ;;  %p56_p3 = scmp.ne.s32.totalorder %s8012_s10, %s8008_s9 }
   0x7   : > { %s8075_s17 = scalar_select %p41_p0, %s8016_s11, %s43_s16  }
   0x8   : > { %p8077_p4 = por %p51_p2, %p50_p1  ;;  %p57_p5 = scmp.eq.s32.totalorder %s7796_s13, 0 }
   0x9   : > { %p7910_p6 = scmp.lt.s32.totalorder %s8020_s12, 2  ;;  %s109_s20 = sand.u32 1, %s8016_s11  }
   0xa   : > { %p8084_p7 = por %p57_p5, %p56_p3  ;;  %s7800_s21 = sshll.u32 %s109_s20, 4 }
   0xb   : > { %s7801_s22 = sshll.u32 %s8020_s12, 4  ;;  %s113_s26 = scalar_lea.vmem [#allocation2], %s7800_s21 }
   0xc   : > { %s117_s25 = scalar_lea.hbm %s12537_s1, %s7801_s22  ;;  %s121_s27 = sshll.u32 %s113_s26, 4  ;;  %s122_s27 = int_to_ptr.vmem [resolvable:$true] %s121_s27 }
   0xd   : > { %s119_s28 = sshll.u32 %s117_s25, 4  ;;  %p8095_p8 = pnand %p7910_p6, %p8077_p4  ;;  %s120_s28 = int_to_ptr.hbm [resolvable:$true] %s119_s28 }
   0xe   : > { %p7802_p9 = scmp.ge.s32.totalorder %s8020_s12, 1  ;;  %p126_p10 = scmp.lt.s32.totalorder %s8020_s12, 3 }
   0xf   : > { %s110_s30 = scalar_lea.sflag [#allocation3], %s109_s20  ;;  %s7956_s3 = sshra.s32 %s120_s28, 4  ;;  %s7957_s3 = int_to_ptr.hbm [resolvable:$true] %s7956_s3 }
  0x10   : > { %s7958_s4 = scalar_lea.hbm %s7957_s3, 16  ;;  %p7960_p12 = pneg %p8095_p8 }
  0x11   : > { %p7959_p11 = scmp.ne.s32.totalorder %s7957_s3, %s7958_s4  ;;  %s7963_s7 = scalar_lea.hbm %s12537_s1, 32 }
  0x12   : > { %p7964_p1 = scmp.lt.s32.totalorder %s7957_s3, %s12537_s1  ;;  %p7965_p2 = scmp.lt.s32.totalorder %s7963_s7, %s7958_s4 }
  0x13   : > { %p7961_p13 = pnand %p7960_p12, %p7959_p11 }
  0x14   : > { %p7966_p3 = por %p7965_p2, %p7964_p1 }
  0x15   : > { %p7962_p0 = pneg %p7961_p13 }
  0x17   : > { %p7967_p4 = pnand %p7966_p3, %p7962_p0 }
  0x19   : > { %7970 = shalt.err (!%p7967_p4)
}
  0x1a   : > { %7909 = dma.hbm_to_vmem [thread:$0]  (!%p8095_p8), %s120_s28, 256, %s122_s27, %s110_s30  }
  0x1b   : > { %p127_p5 = pnand %p7802_p9, %p126_p10 }
  0x1d   : > { %130 = sbr.rel (%p127_p5) target bundleno = 2537 (0x9e9), region = 28 }
  0x22   : > { %s132_s15 = sand.u32 1, %s8012_s10  }
  0x23   : > { %s7803_s16 = sshll.u32 %s132_s15, 4  ;;  %s133_s18 = scalar_lea.sflag [#allocation3], %s132_s15 }
  0x24   : > { %s8116_s20 = scalar_lea.vmem [#allocation2], %s7803_s16 }
  0x25   : > { %8003 = dma.done.wait (%p8084_p7), %s133_s18, 256  }
  0x26   : > { %8005 = vsyncadd (%p8084_p7), %s133_s18, 4294967040  ;;  %v12563_v0 = vmov 0   ;;  %v165_v1 = vld [vmem:[%s12536_s0] sm:$0xff]  ;;  %v12552_v37 = vmov 683565275   ;;  %s8918_s19 = sshll.u32 %s7796_s13, 8 }
  0x27   : > { %7952 = vset.pattern.permute.xlu0 %v12563_v0  ;;  %v8127_v2 = vld [vmem:[%s8116_s20] sm:$0xff]  ;;  %v12559_v39 = vmov 2475754826   ;;  %v12557_v43 = vmov 2131351028   ;;  %p160_p6 = scmp.lt.s32.totalorder %s8918_s19, 511 }
  0x28   : > { %170 = vperm.xlu0 %7952, %v165_v1   ;;  %v178_v3 = vperm.slane %v8127_v2, 3  ;;  %v176_v4 = vperm.slane %v8127_v2, 1  ;;  %v175_v5 = vperm.slane %v8127_v2, 0  ;;  %v12550_v46 = vmov 2102212464   ;;  %s8029_s25 = smov 8  }
  0x29   : > { %v12555_v49 = vmov 920167782   ;;  %v12548_v52 = vmov 1326507024   ;;  %s13063_s19 = smov (!%p160_p6, %s8918_s19), 511 }
  0x2a   : > { %s7805_s12 = sshll.u32 %s13063_s19, 3 }
  0x2b   : > { %s8950_s24 = scalar_lea.vmem %s12538_s2, %s7805_s12 }
  0x9a   : > { %v8132_v6 = vpop.permute.xlu0 %170 }
  0x9b   : > { %v8135_v7 = vmul.f32 %v178_v3, %v8132_v6  ;;  %v8138_v8 = vmul.f32 %v176_v4, %v8132_v6  ;;  %v8141_v9 = vmul.f32 %v175_v5, %v8132_v6 }
  0x9d   : > { %v688_v10 = vand.u32 2147483647, %v8135_v7  ;;  %v691_v11 = vand.u32 2139095040, %v8135_v7  ;;  %v378_v12 = vand.u32 2147483647, %v8138_v8  ;;  %v381_v13 = vand.u32 2139095040, %v8138_v8 }
  0x9e   : > { %v226_v18 = vand.u32 2139095040, %v8141_v9 }
  0x9f   : > { %v692_v14 = vshrl.u32 %v691_v11, 23  ;;  %v695_v15 = vand.u32 8388607, %v688_v10  ;;  %v382_v16 = vshrl.u32 %v381_v13, 23  ;;  %v385_v17 = vand.u32 8388607, %v378_v12 }
  0xa0   : > { %v227_v25 = vshrl.u32 %v226_v18, 23 }
  0xa1   : > { %v7815_v19 = vadd.s32 4294967169, %v692_v14  ;;  %v696_v20 = vor.u32 8388608, %v695_v15  ;;  %v7809_v21 = vadd.s32 4294967169, %v382_v16  ;;  %v386_v22 = vor.u32 8388608, %v385_v17 }
  0xa2   : > { %v8156_v31 = vadd.s32 4294967169, %v227_v25 }
  0xa3   : > { %v698_v23 = vadd.s32 1, %v7815_v19  ;;  %v388_v24 = vadd.s32 1, %v7809_v21  ;;  %v8152_v26 = vshll.u32 %v696_v20, 8  ;;  %v8154_v28 = vshll.u32 %v386_v22, 8 }
  0xa5   : > { %vm699_vm0 = vcmp.gt.s32.totalorder %v698_v23, 0  ;;  %vm389_vm1 = vcmp.gt.s32.totalorder %v388_v24, 0  ;;  %v8159_v33 = vand.u32 65535, %v8152_v26  ;;  %v8162_v34 = vshrl.u32 %v8152_v26, 16 }
  0xa6   : > { %v700_v27 = vsel %vm699_vm0, %v698_v23, 0  ;;  %v390_v30 = vsel %vm389_vm1, %v388_v24, 0  ;;  %v8171_v41 = vand.u32 65535, %v8154_v28 }
  0xa7   : > { %v702_v29 = vand.u32 31, %v700_v27  ;;  %v8164_v35 = vand.u32 31, %v390_v30  ;;  %v8166_v36 = vshrl.u32 %v700_v27, 5  ;;  %v8213_v24 = vshrl.u32 %v390_v30, 5 }
  0xa9   : > { %v703_v32 = vsub.s32 32, %v702_v29  ;;  %v705_v38 = vshll.u32 %v12552_v37, %v702_v29  ;;  %v708_v40 = vshll.u32 %v12559_v39, %v702_v29  ;;  %v711_v45 = vshll.u32 %v12557_v43, %v702_v29 }
  0xaa   : > { %v714_v48 = vshll.u32 %v12550_v46, %v702_v29  ;;  %v717_v51 = vshll.u32 %v12555_v49, %v702_v29  ;;  %v8182_v57 = vsub.s32 32, %v8164_v35  ;;  %vm720_vm2 = vcmp.lt.s32.totalorder %v8166_v36, 1 }
  0xab   : > { %v706_v42 = vshrl.u32 %v12559_v39, %v703_v32  ;;  %v709_v44 = vshrl.u32 %v12557_v43, %v703_v32  ;;  %v712_v47 = vshrl.u32 %v12550_v46, %v703_v32  ;;  %v715_v50 = vshrl.u32 %v12555_v49, %v703_v32 }
  0xac   : > { %v718_v53 = vshrl.u32 %v12548_v52, %v703_v32  ;;  %vm721_vm3 = vcmp.lt.s32.totalorder %v8166_v36, 2  ;;  %v704_v60 = vshrl.u32 %v12552_v37, %v703_v32  ;;  %vm723_vm4 = vcmp.lt.s32.totalorder %v8166_v36, 4 }
  0xad   : > { %v707_v54 = vor.u32 %v706_v42, %v705_v38  ;;  %v710_v55 = vor.u32 %v709_v44, %v708_v40  ;;  %v713_v56 = vor.u32 %v712_v47, %v711_v45  ;;  %v716_v58 = vor.u32 %v715_v50, %v714_v48 }
  0xae   : > { %v719_v59 = vor.u32 %v718_v53, %v717_v51  ;;  %vm722_vm5 = vcmp.lt.s32.totalorder %v8166_v36, 3  ;;  %v395_v3 = vshll.u32 %v12552_v37, %v8164_v35  ;;  %v396_v13 = vshrl.u32 %v12559_v39, %v8182_v57 }
  0xaf   : > { %v728_v61 = vsel %vm720_vm2, %v707_v54, %v710_v55  ;;  %v732_v62 = vsel %vm720_vm2, %v710_v55, %v713_v56  ;;  %v729_v63 = vsel %vm723_vm4, %v716_v58, 920167782  ;;  %v725_v4 = vsel %vm723_vm4, %v713_v56, 2102212464 }
  0xb0   : > { %v733_v1 = vsel %vm723_vm4, %v719_v59, 1326507024  ;;  %v730_v5 = vsel %vm722_vm5, %v713_v56, %v729_v63  ;;  %v398_v16 = vshll.u32 %v12559_v39, %v8164_v35  ;;  %v399_v17 = vshrl.u32 %v12557_v43, %v8182_v57 }
  0xb1   : > { %v734_v11 = vsel %vm722_vm5, %v716_v58, %v733_v1  ;;  %v731_v14 = vsel %vm721_vm3, %v728_v61, %v730_v5  ;;  %v724_v22 = vsel %vm720_vm2, %v704_v60, %v707_v54  ;;  %v726_v23 = vsel %vm722_vm5, %v710_v55, %v725_v4 }
  0xb2   : > { %v735_v15 = vsel %vm721_vm3, %v732_v62, %v734_v11  ;;  %v761_v20 = vand.u32 65535, %v731_v14  ;;  %v762_v21 = vshrl.u32 %v731_v14, 16  ;;  %v8215_v25 = vor.u32 %v396_v13, %v395_v3 }
  0xb3   : > { %v739_v18 = vand.u32 65535, %v735_v15  ;;  %v740_v19 = vshrl.u32 %v735_v15, 16  ;;  %v8219_v32 = vor.u32 %v399_v17, %v398_v16  ;;  %v402_v38 = vshrl.u32 %v12550_v46, %v8182_v57 }
  0xb4   : > { %v764_v42 = vmul.u32 %v762_v21, %v8159_v33  ;;  %v765_v44 = vmul.u32 %v761_v20, %v8162_v34  ;;  %v401_v30 = vshll.u32 %v12557_v43, %v8164_v35  ;;  %v763_v48 = vmul.u32 %v761_v20, %v8159_v33 }
  0xb5   : > { %v742_v27 = vmul.u32 %v740_v19, %v8159_v33  ;;  %v743_v29 = vmul.u32 %v739_v18, %v8162_v34  ;;  %v741_v40 = vmul.u32 %v739_v18, %v8159_v33  ;;  %v744_v45 = vmul.u32 %v740_v19, %v8162_v34 }
  0xb6   : > { %v766_v50 = vmul.u32 %v762_v21, %v8162_v34  ;;  %v767_v55 = vshll.u32 %v764_v42, 16  ;;  %v769_v58 = vshll.u32 %v765_v44, 16  ;;  %v403_v59 = vor.u32 %v402_v38, %v401_v30 }
  0xb7   : > { %v745_v47 = vshll.u32 %v742_v27, 16  ;;  %v746_v51 = vshrl.u32 %v742_v27, 16  ;;  %v747_v53 = vshll.u32 %v743_v29, 16  ;;  %v748_v54 = vshrl.u32 %v743_v29, 16 }
  0xb8   : > { %vm771_vm7 = vc.u32 %v763_v48, %v767_v55  ;;  %v773_v61 = vadd.s32 %v767_v55, %v763_v48  ;;  %v405_v62 = vshrl.u32 %v12555_v49, %v8182_v57  ;;  %v404_v34 = vshll.u32 %v12550_v46, %v8164_v35 }
  0xb9   : > { %vm749_vm6 = vc.u32 %v741_v40, %v745_v47  ;;  %v751_v56 = vadd.s32 %v745_v47, %v741_v40  ;;  %v772_v33 = vsel %vm771_vm7, 1, %v12563_v0  ;;  %v407_v4 = vshll.u32 %v12555_v49, %v8164_v35 }
  0xba   : > { %v750_v60 = vsel %vm749_vm6, 1, %v12563_v0  ;;  %v774_v3 = vadd.s32 %v772_v33, %v766_v50  ;;  %vm775_vm9 = vc.u32 %v773_v61, %v769_v58  ;;  %v406_v13 = vor.u32 %v405_v62, %v404_v34 }
  0xbb   : > { %v752_v63 = vadd.s32 %v750_v60, %v744_v45  ;;  %vm753_vm8 = vc.u32 %v751_v56, %v747_v53  ;;  %v776_v11 = vsel %vm775_vm9, 1, %v12563_v0  ;;  %v408_v14 = vshrl.u32 %v12548_v52, %v8182_v57 }
  0xbc   : > { %v754_v1 = vsel %vm753_vm8, 1, %v12563_v0  ;;  %v768_v15 = vshrl.u32 %v764_v42, 16  ;;  %v770_v16 = vshrl.u32 %v765_v44, 16  ;;  %v8243_v17 = vadd.s32 %v773_v61, %v769_v58 }
  0xbd   : > { %v756_v5 = vadd.s32 %v754_v1, %v752_v63  ;;  %v778_v18 = vadd.s32 %v776_v11, %v774_v3  ;;  %v409_v20 = vor.u32 %v408_v14, %v407_v4  ;;  %vm410_vm10 = vcmp.lt.s32.totalorder %v8213_v24, 1 }
  0xbe   : > { %vm413_vm11 = vcmp.lt.s32.totalorder %v8213_v24, 4  ;;  %vm412_vm12 = vcmp.lt.s32.totalorder %v8213_v24, 3  ;;  %v418_v35 = vsel %vm410_vm10, %v8215_v25, %v8219_v32  ;;  %vm411_vm13 = vcmp.lt.s32.totalorder %v8213_v24, 2 }
  0xbf   : > { %v757_v19 = vadd.s32 %v756_v5, %v746_v51  ;;  %v779_v21 = vadd.s32 %v778_v18, %v768_v15  ;;  %v419_v27 = vsel %vm413_vm11, %v406_v13, 920167782  ;;  %v422_v40 = vsel %vm410_vm10, %v8219_v32, %v403_v59 }
  0xc0   : > { %v420_v38 = vsel %vm412_vm12, %v403_v59, %v419_v27  ;;  %v727_v42 = vsel %vm721_vm3, %v724_v22, %v726_v23  ;;  %v423_v45 = vsel %vm413_vm11, %v409_v20, 1326507024  ;;  %v428_v48 = vshrl.u32 %v8154_v28, 16 }
  0xc1   : > { %v8254_v29 = vadd.s32 %v757_v19, %v748_v54  ;;  %v780_v44 = vadd.s32 %v779_v21, %v770_v16  ;;  %v421_v30 = vsel %vm411_vm13, %v418_v35, %v420_v38  ;;  %v424_v47 = vsel %vm412_vm12, %v406_v13, %v423_v45 }
  0xc2   : > { %v451_v50 = vand.u32 65535, %v421_v30  ;;  %v425_v36 = vsel %vm411_vm13, %v422_v40, %v424_v47  ;;  %v452_v22 = vshrl.u32 %v421_v30, 16  ;;  %v233_v23 = vadd.s32 1, %v8156_v31 }
  0xc3   : > { %vm783_vm14 = vc.u32 %v8254_v29, %v8243_v17  ;;  %v784_v51 = vadd.s32 1, %v780_v44  ;;  %v781_v53 = vmul.u32 %v8152_v26, %v727_v42  ;;  %v429_v54 = vand.u32 65535, %v425_v36 }
  0xc4   : > { %v430_v55 = vshrl.u32 %v425_v36, 16  ;;  %v223_v56 = vand.u32 2147483647, %v8141_v9  ;;  %v394_v60 = vshrl.u32 %v12552_v37, %v8182_v57  ;;  %v454_v61 = vmul.u32 %v452_v22, %v8171_v41 }
  0xc5   : > { %v785_v58 = vsel %vm783_vm14, %v784_v51, %v780_v44  ;;  %v455_v62 = vmul.u32 %v451_v50, %v428_v48  ;;  %v415_v33 = vsel %vm413_vm11, %v403_v59, 2102212464  ;;  %v433_v31 = vmul.u32 %v429_v54, %v428_v48 }
  0xc6   : > { %v786_v63 = vadd.s32 %v785_v58, %v781_v53  ;;  %v432_v34 = vmul.u32 %v430_v55, %v8171_v41  ;;  %v453_v26 = vmul.u32 %v451_v50, %v8171_v41  ;;  %v456_v1 = vmul.u32 %v452_v22, %v428_v48 }
  0xc7   : > { %v457_v3 = vshll.u32 %v454_v61, 16  ;;  %vm234_vm15 = vcmp.gt.s32.totalorder %v233_v23, 0  ;;  %v431_v5 = vmul.u32 %v429_v54, %v8171_v41  ;;  %v434_v11 = vmul.u32 %v430_v55, %v428_v48 }
  0xc8   : > { %v787_v4 = vadd.s32 536870912, %v786_v63  ;;  %v435_v57 = vshll.u32 %v432_v34, 16  ;;  %v437_v13 = vshll.u32 %v433_v31, 16  ;;  %v459_v14 = vshll.u32 %v455_v62, 16 }
  0xc9   : > { %vm461_vm0 = vc.u32 %v453_v26, %v457_v3  ;;  %v463_v15 = vadd.s32 %v457_v3, %v453_v26  ;;  %v414_v19 = vsel %vm410_vm10, %v394_v60, %v8215_v25  ;;  %v416_v35 = vsel %vm412_vm12, %v8219_v32, %v415_v33 }
  0xca   : > { %v788_v16 = vshrl.u32 %v787_v4, 30  ;;  %vm439_vm1 = vc.u32 %v431_v5, %v435_v57  ;;  %v441_v59 = vadd.s32 %v435_v57, %v431_v5  ;;  %v462_v18 = vsel %vm461_vm0, 1, %v12563_v0 }
  0xcb   : > { %v440_v20 = vsel %vm439_vm1, 1, %v12563_v0  ;;  %v464_v21 = vadd.s32 %v462_v18, %v456_v1  ;;  %vm465_vm2 = vc.u32 %v463_v15, %v459_v14  ;;  %v436_v38 = vshrl.u32 %v432_v34, 16 }
  0xcc   : > { %v789_v41 = vshll.u32 %v788_v16, 30  ;;  %v442_v27 = vadd.s32 %v440_v20, %v434_v11  ;;  %vm443_vm3 = vc.u32 %v441_v59, %v437_v13  ;;  %v466_v42 = vsel %vm465_vm2, 1, %v12563_v0 }
  0xcd   : > { %v444_v40 = vsel %vm443_vm3, 1, %v12563_v0  ;;  %v235_v44 = vsel %vm234_vm15, %v233_v23, 0  ;;  %v812_v25 = vsub.s32 4, %v788_v16  ;;  %v468_v47 = vadd.s32 %v466_v42, %v464_v21 }
  0xce   : > { %v790_v30 = vsub.s32 %v786_v63, %v789_v41  ;;  %v446_v45 = vadd.s32 %v444_v40, %v442_v27  ;;  %v458_v48 = vshrl.u32 %v454_v61, 16  ;;  %v230_v50 = vand.u32 8388607, %v223_v56 }
  0xcf   : > { %v237_v51 = vand.u32 31, %v235_v44  ;;  %v438_v36 = vshrl.u32 %v433_v31, 16  ;;  %vm690_vm5 = vcmp.lt.s32.totalorder %v8135_v7, 0  ;;  %v417_v53 = vsel %vm411_vm13, %v414_v19, %v416_v35 }
  0xd0   : > { %vm791_vm4 = vcmp.lt.s32.totalorder %v790_v30, 0  ;;  %v792_v32 = vsub.s32 0, %v790_v30  ;;  %v447_v22 = vadd.s32 %v446_v45, %v436_v38  ;;  %v460_v54 = vshrl.u32 %v455_v62, 16 }
  0xd1   : > { %v469_v23 = vadd.s32 %v468_v47, %v458_v48  ;;  %v813_v58 = vsel %vm690_vm5, %v812_v25, %v788_v16  ;;  %v8306_v61 = vsub.s32 32, %v237_v51  ;;  %v8308_v33 = vadd.s32 %v463_v15, %v459_v14 }
  0xd2   : > { %v793_v55 = vsel %vm791_vm4, %v792_v32, %v790_v30  ;;  %v8304_v60 = vadd.s32 %v447_v22, %v438_v36  ;;  %vm8312_vm6 = vcmp.le.f32.partialorder %v688_v10, 0.7853982  ;;  %v782_v24 = vadd.s32 %v8243_v17, %v8254_v29 }
  0xd3   : > { %v794_v63 = vclz %v793_v55  ;;  %v470_v34 = vadd.s32 %v469_v23, %v460_v54  ;;  %v471_v62 = vmul.u32 %v8154_v28, %v417_v53  ;;  %v231_v26 = vor.u32 8388608, %v230_v50 }
  0xd4   : > { %v8321_v3 = vsel %vm8312_vm6, 0, %v813_v58  ;;  %vm473_vm7 = vc.u32 %v8304_v60, %v8308_v33  ;;  %v8325_v5 = vshrl.u32 %v235_v44, 5  ;;  %v240_v10 = vshll.u32 %v12552_v37, %v237_v51 }
  0xd5   : > { %v7816_v1 = vadd.s32 4294967294, %v794_v63  ;;  %v474_v4 = vadd.s32 1, %v470_v34  ;;  %v241_v11 = vshrl.u32 %v12559_v39, %v8306_v61  ;;  %v250_v28 = vshrl.u32 %v12555_v49, %v8306_v61 }
  0xd6   : > { %v244_v29 = vshrl.u32 %v12557_v43, %v8306_v61  ;;  %v249_v57 = vshll.u32 %v12550_v46, %v237_v51  ;;  %v247_v15 = vshrl.u32 %v12550_v46, %v8306_v61  ;;  %v253_v16 = vshrl.u32 %v12548_v52, %v8306_v61 }
  0xd7   : > { %vm7817_vm8 = vcmp.lt.s32.totalorder %v7816_v1, 0  ;;  %v475_v17 = vsel %vm473_vm7, %v474_v4, %v470_v34  ;;  %v243_v19 = vshll.u32 %v12559_v39, %v237_v51  ;;  %v242_v41 = vor.u32 %v241_v11, %v240_v10 }
  0xd8   : > { %v797_v13 = vsel %vm7817_vm8, 0, %v7816_v1  ;;  %v476_v14 = vadd.s32 %v475_v17, %v471_v62  ;;  %v251_v20 = vor.u32 %v250_v28, %v249_v57  ;;  %v246_v35 = vshll.u32 %v12557_v43, %v237_v51 }
  0xd9   : > { %v798_v59 = vsub.s32 32, %v797_v13  ;;  %v802_v18 = vsub.s32 4294967266, %v797_v13  ;;  %v252_v27 = vshll.u32 %v12555_v49, %v237_v51  ;;  %v799_v38 = vshll.u32 %v790_v30, %v797_v13 }
  0xda   : > { %v477_v21 = vadd.s32 536870912, %v476_v14  ;;  %v245_v44 = vor.u32 %v244_v29, %v243_v19  ;;  %v248_v45 = vor.u32 %v247_v15, %v246_v35  ;;  %vm258_vm9 = vcmp.lt.s32.totalorder %v8325_v5, 4 }
  0xdb   : > { %v800_v40 = vshrl.u32 %v782_v24, %v798_v59  ;;  %v803_v42 = vadd.s32 127, %v802_v18  ;;  %v254_v47 = vor.u32 %v253_v16, %v252_v27  ;;  %v264_v32 = vsel %vm258_vm9, %v251_v20, 920167782 }
  0xdc   : > { %v478_v25 = vshrl.u32 %v477_v21, 30  ;;  %vm255_vm10 = vcmp.lt.s32.totalorder %v8325_v5, 1  ;;  %v8346_v22 = vshll.u32 %v231_v26, 8  ;;  %v832_v30 = vadd.s32 3, %v8321_v3 }
  0xdd   : > { %v801_v48 = vor.u32 %v800_v40, %v799_v38  ;;  %v804_v50 = vshll.u32 %v803_v42, 23  ;;  %vm257_vm11 = vcmp.lt.s32.totalorder %v8325_v5, 3  ;;  %v263_v53 = vsel %vm255_vm10, %v242_v41, %v245_v44 }
  0xde   : > { %v479_v36 = vshll.u32 %v478_v25, 30  ;;  %v265_v23 = vsel %vm257_vm11, %v248_v45, %v264_v32  ;;  %v267_v55 = vsel %vm255_vm10, %v245_v44, %v248_v45  ;;  %v268_v58 = vsel %vm258_vm9, %v254_v47, 1326507024 }
  0xdf   : > { %v805_v51 = vor.u32 4788187, %v804_v50  ;;  %v808_v34 = vcvt.s32.f32 %v801_v48  ;;  %vm380_vm12 = vcmp.lt.s32.totalorder %v8138_v8, 0  ;;  %v269_v24 = vsel %vm257_vm11, %v251_v20, %v268_v58 }
  0xe0   : > { %v8352_v54 = vsub.s32 %v476_v14, %v479_v36  ;;  %vm256_vm14 = vcmp.lt.s32.totalorder %v8325_v5, 2  ;;  %v272_v26 = vand.u32 65535, %v8346_v22  ;;  %v8367_v4 = vand.u32 3, %v832_v30 }
  0xe1   : > { %v806_v63 = vand.u32 2147483647, %v805_v51  ;;  %v266_v10 = vsel %vm256_vm14, %v263_v53, %v265_v23  ;;  %v270_v11 = vsel %vm256_vm14, %v267_v55, %v269_v24  ;;  %v502_v17 = vsub.s32 4, %v478_v25 }
  0xe2   : > { %vm481_vm13 = vcmp.lt.s32.totalorder %v8352_v54, 0  ;;  %v482_v62 = vsub.s32 0, %v8352_v54  ;;  %v239_v29 = vshrl.u32 %v12552_v37, %v8306_v61  ;;  %v260_v57 = vsel %vm258_vm9, %v248_v45, 2102212464 }
  0xe3   : > { %v809_v1 = vmul.f32 %v808_v34, %v806_v63  ;;  %v273_v15 = vshrl.u32 %v8346_v22, 16  ;;  %v274_v16 = vand.u32 65535, %v270_v11  ;;  %v472_v59 = vadd.s32 %v8308_v33, %v8304_v60 }
  0xe4   : > { %v483_v28 = vsel %vm481_vm13, %v482_v62, %v8352_v54  ;;  %v8383_v18 = vsel %vm255_vm10, %v239_v29, %v242_v41  ;;  %v275_v19 = vshrl.u32 %v270_v11, 16  ;;  %v297_v20 = vshrl.u32 %v266_v10, 16 }
  0xe5   : > { %v810_v13 = vxor.u32 2147483648, %v809_v1  ;;  %v484_v14 = vclz %v483_v28  ;;  %v8387_v35 = vmul.u32 %v274_v16, %v273_v15  ;;  %v296_v27 = vand.u32 65535, %v266_v10 }
  0xe6   : > { %v8396_v60 = vsel %vm380_vm12, %v502_v17, %v478_v25  ;;  %v8400_v33 = vsel %vm257_vm11, %v245_v44, %v260_v57  ;;  %v277_v41 = vmul.u32 %v275_v19, %v272_v26  ;;  %v276_v42 = vmul.u32 %v274_v16, %v272_v26 }
  0xe7   : > { %v811_v61 = vsel %vm690_vm5, %v810_v13, %v809_v1  ;;  %v7810_v21 = vadd.s32 4294967294, %v484_v14  ;;  %v279_v45 = vmul.u32 %v275_v19, %v273_v15  ;;  %v282_v31 = vshll.u32 %v8387_v35, 16 }
  0xe8   : > { %v8392_v38 = vsel %vm8312_vm6, %v8135_v7, %v811_v61  ;;  %v280_v48 = vshll.u32 %v277_v41, 16  ;;  %v299_v50 = vmul.u32 %v297_v20, %v272_v26  ;;  %v8405_v51 = vmul.u32 %v296_v27, %v273_v15 }
  0xe9   : > { %v816_v40 = vmul.f32 %v8392_v38, %v8392_v38  ;;  %vm7811_vm15 = vcmp.lt.s32.totalorder %v7810_v21, 0  ;;  %v298_v28 = vmul.u32 %v296_v27, %v272_v26  ;;  %vm8412_vm2 = vcmp.le.f32.partialorder %v378_v12, 0.7853982 }
  0xea   : > { %v487_v47 = vsel %vm7811_vm15, 0, %v7810_v21  ;;  %vm284_vm0 = vc.u32 %v276_v42, %v280_v48  ;;  %v286_v53 = vadd.s32 %v280_v48, %v276_v42  ;;  %v302_v62 = vshll.u32 %v299_v50, 16 }
  0xeb   : > { %v817_v32 = vmul.f32 -0.001358992, %v816_v40  ;;  %v824_v36 = vmul.f32 -0.00019511016, %v816_v40  ;;  %v488_v25 = vsub.s32 32, %v487_v47  ;;  %v489_v44 = vshll.u32 %v8352_v54, %v487_v47 }
  0xec   : > { %v492_v30 = vsub.s32 4294967266, %v487_v47  ;;  %v285_v63 = vsel %vm284_vm0, 1, %v12563_v0  ;;  %vm288_vm1 = vc.u32 %v286_v53, %v282_v31  ;;  %v281_v57 = vshrl.u32 %v277_v41, 16 }
  0xed   : > { %v818_v23 = vadd.f32 0.041655596, %v817_v32  ;;  %v825_v55 = vadd.f32 0.008332121, %v824_v36  ;;  %v490_v58 = vshrl.u32 %v472_v59, %v488_v25  ;;  %v287_v24 = vadd.s32 %v285_v63, %v279_v45 }
  0xee   : > { %v493_v34 = vadd.s32 127, %v492_v30  ;;  %v289_v11 = vsel %vm288_vm1, 1, %v12563_v0  ;;  %v301_v59 = vmul.u32 %v297_v20, %v273_v15  ;;  %v304_v19 = vshll.u32 %v8405_v51, 16 }
  0xef   : > { %v819_v1 = vmul.f32 %v818_v23, %v816_v40  ;;  %v826_v10 = vmul.f32 %v825_v55, %v816_v40  ;;  %v491_v17 = vor.u32 %v490_v58, %v489_v44  ;;  %v291_v13 = vadd.s32 %v289_v11, %v287_v24 }
  0xf0   : > { %v494_v29 = vshll.u32 %v493_v34, 23  ;;  %vm835_vm3 = vcmp.eq.s32.totalorder %v8367_v4, 0  ;;  %vm306_vm4 = vc.u32 %v298_v28, %v302_v62  ;;  %v308_v26 = vadd.s32 %v302_v62, %v298_v28 }
  0xf1   : > { %v820_v14 = vadd.f32 -0.4999988, %v819_v1  ;;  %v827_v16 = vadd.f32 -0.16666654, %v826_v10  ;;  %v292_v21 = vadd.s32 %v291_v13, %v281_v57  ;;  %vm834_vm5 = vcmp.lt.s32.totalorder %v8367_v4, 2 }
  0xf2   : > { %v495_v61 = vor.u32 4788187, %v494_v29  ;;  %v283_v42 = vshrl.u32 %v8387_v35, 16  ;;  %v307_v41 = vsel %vm306_vm4, 1, %v12563_v0  ;;  %v498_v47 = vcvt.s32.f32 %v491_v17 }
  0xf3   : > { %v821_v27 = vmul.f32 %v820_v14, %v816_v40  ;;  %v828_v12 = vmul.f32 %v827_v16, %v816_v40  ;;  %v309_v48 = vadd.s32 %v307_v41, %v301_v59  ;;  %vm310_vm6 = vc.u32 %v308_v26, %v304_v19 }
  0xf4   : > { %v496_v45 = vand.u32 2147483647, %v495_v61  ;;  %v303_v31 = vshrl.u32 %v299_v50, 16  ;;  %v311_v32 = vsel %vm310_vm6, 1, %v12563_v0  ;;  %v8424_v25 = vadd.s32 %v292_v21, %v283_v42 }
  0xf5   : > { %v8421_v15 = vadd.f32 1.0, %v821_v27  ;;  %v829_v20 = vadd.f32 1.0, %v828_v12  ;;  %v313_v40 = vadd.s32 %v311_v32, %v309_v48  ;;  %v179_v44 = vperm.slane %v8127_v2, 4 }
  0xf6   : > { %v499_v36 = vmul.f32 %v498_v47, %v496_v45  ;;  %vm838_vm7 = vcmp.eq.s32.totalorder %v8367_v4, 2  ;;  %v305_v53 = vshrl.u32 %v8405_v51, 16  ;;  %v8433_v55 = vadd.s32 %v308_v26, %v304_v19 }
  0xf7   : > { %v8428_v35 = vmul.f32 %v829_v20, %v8392_v38  ;;  %v12539_v30 = vxor.u32 2147483648, %v8421_v15  ;;  %v314_v50 = vadd.s32 %v313_v40, %v303_v31  ;;  %v8436_v58 = vmul.f32 %v179_v44, %v8132_v6 }
  0xf8   : > { %v500_v23 = vxor.u32 2147483648, %v499_v36  ;;  %v505_v38 = vsel %vm8412_vm2, 0, %v8396_v60  ;;  %v262_v34 = vsel %vm256_vm14, %v8383_v18, %v8400_v33  ;;  %v177_v51 = vperm.slane %v8127_v2, 2 }
  0xf9   : > { %v12540_v63 = vxor.u32 2147483648, %v8428_v35  ;;  %v840_v24 = vsel %vm838_vm7, %v12539_v30, %v8428_v35  ;;  %v315_v1 = vadd.s32 %v314_v50, %v305_v53  ;;  %vm318_vm8 = vc.u32 %v8424_v25, %v8433_v55 }
  0xfa   : > { %v501_v62 = vsel %vm380_vm12, %v500_v23, %v499_v36  ;;  %v843_v18 = vand.u32 2147483647, %v8436_v58  ;;  %v846_v60 = vand.u32 2139095040, %v8436_v58  ;;  %vm831_vm9 = vweird.f32 %v8135_v7 }
  0xfb   : > { %v837_v5 = vsel %vm835_vm3, %v8421_v15, %v12540_v63  ;;  %v504_v2 = vsel %vm8412_vm2, %v8138_v8, %v501_v62  ;;  %v319_v11 = vadd.s32 1, %v315_v1  ;;  %v316_v17 = vmul.u32 %v8346_v22, %v262_v34 }
  0xfc   : > { %v841_v33 = vsel %vm834_vm5, %v837_v5, %v840_v24  ;;  %v506_v10 = vmul.f32 %v504_v2, %v504_v2  ;;  %v847_v29 = vshrl.u32 %v846_v60, 23  ;;  %v8471_v54 = vmul.f32 %v177_v51, %v8132_v6 }
  0xfd   : > { %v842_v28 = vsel %vm831_vm9, nan, %v841_v33  ;;  %v522_v14 = vadd.s32 3, %v505_v38  ;;  %v320_v4 = vsel %vm318_vm8, %v319_v11, %v315_v1  ;;  %v8476_v16 = vand.u32 3, %v505_v38 }
  0xfe   : > { %12627 = vst [vmem:[#allocation5_spill] sm:$0xff] %v8471_v54  ;;  %2799 = vxpose.xlu2.b32.start.end [1/1] (short) %v842_v28, 128  ;;  %v507_v57 = vmul.f32 -0.001358992, %v506_v10  ;;  %v514_v13 = vmul.f32 -0.00019511016, %v506_v10  ;;  %v321_v59 = vadd.s32 %v320_v4, %v316_v17  ;;  %v7818_v19 = vadd.s32 4294967169, %v847_v29 }
  0xff   : > { %v850_v61 = vand.u32 8388607, %v843_v18  ;;  %v536_v26 = vand.u32 2139095040, %v8471_v54  ;;  %vm225_vm10 = vcmp.lt.s32.totalorder %v8141_v9, 0  ;;  %v523_v45 = vand.u32 3, %v522_v14 }
 0x100   : > { %v508_v22 = vadd.f32 0.041655596, %v507_v57  ;;  %v515_v21 = vadd.f32 0.008332121, %v514_v13  ;;  %v322_v27 = vadd.s32 536870912, %v321_v59  ;;  %v853_v12 = vadd.s32 1, %v7818_v19 }
 0x101   : > { %v537_v47 = vshrl.u32 %v536_v26, 23  ;;  %vm3775_vm11 = vcmp.eq.s32.totalorder %v8476_v16, 2  ;;  %vm8485_vm12 = vcmp.le.f32.partialorder %v223_v56, 0.7853982  ;;  %v851_v36 = vor.u32 8388608, %v850_v61 }
 0x102   : > { %v509_v42 = vmul.f32 %v508_v22, %v506_v10  ;;  %v516_v41 = vmul.f32 %v515_v21, %v506_v10  ;;  %v323_v20 = vshrl.u32 %v322_v27, 30  ;;  %vm854_vm13 = vcmp.gt.s32.totalorder %v853_v12, 0 }
 0x103   : > { %v855_v40 = vsel %vm854_vm13, %v853_v12, 0  ;;  %vm3772_vm14 = vcmp.eq.s32.totalorder %v8476_v16, 0  ;;  %v533_v50 = vand.u32 2147483647, %v8471_v54  ;;  %vm524_vm15 = vcmp.lt.s32.totalorder %v523_v45, 2 }
 0x104   : > { %v510_v31 = vadd.f32 -0.4999988, %v509_v42  ;;  %v517_v32 = vadd.f32 -0.16666654, %v516_v41  ;;  %v324_v44 = vshll.u32 %v323_v20, 30  ;;  %v347_v53 = vsub.s32 4, %v323_v20 }
 0x105   : > { %v857_v23 = vand.u32 31, %v855_v40  ;;  %vm525_vm0 = vcmp.eq.s32.totalorder %v523_v45, 0  ;;  %vm3771_vm1 = vcmp.lt.s32.totalorder %v8476_v16, 2  ;;  %v7812_v56 = vadd.s32 4294967169, %v537_v47 }
 0x106   : > { %v511_v38 = vmul.f32 %v510_v31, %v506_v10  ;;  %v518_v34 = vmul.f32 %v517_v32, %v506_v10  ;;  %vm521_vm2 = vweird.f32 %v8138_v8  ;;  %vm528_vm3 = vcmp.eq.s32.totalorder %v523_v45, 2 }
 0x107   : > { %v317_v51 = vadd.s32 %v8433_v55, %v8424_v25  ;;  %v325_v24 = vsub.s32 %v321_v59, %v324_v44  ;;  %v858_v62 = vsub.s32 32, %v857_v23  ;;  %v348_v60 = vsel %vm225_vm10, %v347_v53, %v323_v20 }
 0x108   : > { %v512_v1 = vadd.f32 1.0, %v511_v38  ;;  %v519_v5 = vadd.f32 1.0, %v518_v34  ;;  %v8497_v33 = vshll.u32 %v851_v36, 8  ;;  %v8499_v11 = vshrl.u32 %v855_v40, 5 }
 0x109   : > { %vm326_vm4 = vcmp.lt.s32.totalorder %v325_v24, 0  ;;  %v327_v10 = vsub.s32 0, %v325_v24  ;;  %v8503_v28 = vand.u32 8388607, %v533_v50  ;;  %v861_v25 = vshrl.u32 %v12559_v39, %v858_v62 }
 0x10a   : > { %v520_v17 = vmul.f32 %v519_v5, %v504_v2  ;;  %v529_v29 = vxor.u32 2147483648, %v512_v1  ;;  %v8506_v55 = vadd.s32 1, %v7812_v56  ;;  %v8510_v13 = vsel %vm8485_vm12, 0, %v348_v60 }
 0x10b   : > { %v328_v57 = vsel %vm326_vm4, %v327_v10, %v325_v24  ;;  %v860_v14 = vshll.u32 %v12552_v37, %v857_v23  ;;  %v867_v4 = vshrl.u32 %v12550_v46, %v858_v62  ;;  %v863_v2 = vshll.u32 %v12559_v39, %v857_v23 }
 0x10c   : > { %v526_v59 = vxor.u32 2147483648, %v520_v17  ;;  %v3777_v19 = vsel %vm3775_vm11, %v529_v29, %v520_v17  ;;  %v329_v61 = vclz %v328_v57  ;;  %v530_v22 = vsel %vm528_vm3, %v529_v29, %v520_v17 }
 0x10d   : > { %v859_v21 = vshrl.u32 %v12552_v37, %v858_v62  ;;  %v864_v26 = vshrl.u32 %v12557_v43, %v858_v62  ;;  %v866_v27 = vshll.u32 %v12557_v43, %v857_v23  ;;  %v862_v47 = vor.u32 %v861_v25, %v860_v14 }
 0x10e   : > { %v527_v12 = vsel %vm525_vm0, %v512_v1, %v526_v59  ;;  %v3774_v42 = vsel %vm3772_vm14, %v512_v1, %v526_v59  ;;  %v7807_v41 = vadd.s32 4294967294, %v329_v61  ;;  %v869_v36 = vshll.u32 %v12550_v46, %v857_v23 }
 0x10f   : > { %v531_v20 = vsel %vm524_vm15, %v527_v12, %v530_v22  ;;  %v3778_v31 = vsel %vm3771_vm1, %v3774_v42, %v3777_v19  ;;  %v868_v32 = vor.u32 %v867_v4, %v866_v27  ;;  %v870_v53 = vshrl.u32 %v12555_v49, %v858_v62 }
 0x110   : > { %v532_v40 = vsel %vm521_vm2, nan, %v531_v20  ;;  %v8532_v44 = vsel %vm521_vm2, nan, %v3778_v31  ;;  %vm7808_vm5 = vcmp.lt.s32.totalorder %v7807_v41, 0  ;;  %v865_v45 = vor.u32 %v864_v26, %v863_v2 }
 0x111   : > { %2735 = vxpose.xlu1.b32.start.end [1/1] (short) %v532_v40, 128  ;;  %v332_v38 = vsel %vm7808_vm5, 0, %v7807_v41  ;;  %v872_v34 = vshll.u32 %v12555_v49, %v857_v23  ;;  %v873_v16 = vshrl.u32 %v12548_v52, %v858_v62  ;;  %v871_v5 = vor.u32 %v870_v53, %v869_v36 }
 0x112   : > { %v333_v56 = vsub.s32 32, %v332_v38  ;;  %v337_v1 = vsub.s32 4294967266, %v332_v38  ;;  %vm875_vm6 = vcmp.lt.s32.totalorder %v8499_v11, 1  ;;  %v334_v60 = vshll.u32 %v325_v24, %v332_v38 }
 0x113   : > { %v874_v10 = vor.u32 %v873_v16, %v872_v34  ;;  %vm876_vm7 = vcmp.lt.s32.totalorder %v8499_v11, 2  ;;  %vm878_vm8 = vcmp.lt.s32.totalorder %v8499_v11, 4  ;;  %vm877_vm11 = vcmp.lt.s32.totalorder %v8499_v11, 3 }
 0x114   : > { %v335_v8 = vshrl.u32 %v317_v51, %v333_v56  ;;  %v338_v17 = vadd.s32 127, %v337_v1  ;;  %v880_v29 = vsel %vm878_vm8, %v868_v32, 2102212464  ;;  %v879_v23 = vsel %vm875_vm6, %v859_v21, %v862_v47 }
 0x115   : > { %v881_v62 = vsel %vm877_vm11, %v865_v45, %v880_v29  ;;  %v883_v25 = vsel %vm875_vm6, %v862_v47, %v865_v45  ;;  %v884_v57 = vsel %vm878_vm8, %v871_v5, 920167782  ;;  %v887_v59 = vsel %vm875_vm6, %v865_v45, %v868_v32 }
 0x116   : > { %v336_v14 = vor.u32 %v335_v8, %v334_v60  ;;  %v339_v24 = vshll.u32 %v338_v17, 23  ;;  %v885_v4 = vsel %vm877_vm11, %v868_v32, %v884_v57  ;;  %v367_v51 = vadd.s32 3, %v8510_v13 }
 0x117   : > { %v886_v19 = vsel %vm876_vm7, %v883_v25, %v885_v4  ;;  %v888_v61 = vsel %vm878_vm8, %v874_v10, 1326507024  ;;  %v892_v2 = vand.u32 65535, %v8497_v33  ;;  %v893_v26 = vshrl.u32 %v8497_v33, 16 }
 0x118   : > { %v340_v22 = vor.u32 4788187, %v339_v24  ;;  %v889_v21 = vsel %vm877_vm11, %v871_v5, %v888_v61  ;;  %v916_v27 = vand.u32 65535, %v886_v19  ;;  %v8554_v12 = vsel %vm876_vm7, %v879_v23, %v881_v62 }
 0x119   : > { %v890_v42 = vsel %vm876_vm7, %v887_v59, %v889_v21  ;;  %v917_v41 = vshrl.u32 %v886_v19, 16  ;;  %vm544_vm13 = vcmp.gt.s32.totalorder %v8506_v55, 0  ;;  %v343_v20 = vcvt.s32.f32 %v336_v14 }
 0x11a   : > { %v341_v47 = vand.u32 2147483647, %v340_v22  ;;  %v894_v31 = vand.u32 65535, %v890_v42  ;;  %v895_v32 = vshrl.u32 %v890_v42, 16  ;;  %v8559_v36 = vand.u32 3, %v367_v51 }
 0x11b   : > { %v919_v40 = vmul.u32 %v917_v41, %v892_v2  ;;  %v920_v53 = vmul.u32 %v916_v27, %v893_v26  ;;  %v541_v38 = vor.u32 8388608, %v8503_v28  ;;  %v936_v11 = vmul.u32 %v8497_v33, %v8554_v12 }
 0x11c   : > { %v344_v45 = vmul.f32 %v343_v20, %v341_v47  ;;  %v897_v34 = vmul.u32 %v895_v32, %v892_v2  ;;  %v898_v16 = vmul.u32 %v894_v31, %v893_v26  ;;  %v918_v56 = vmul.u32 %v916_v27, %v892_v2 }
 0x11d   : > { %v921_v1 = vmul.u32 %v917_v41, %v893_v26  ;;  %v922_v5 = vshll.u32 %v919_v40, 16  ;;  %v545_v60 = vsel %vm544_vm13, %v8506_v55, 0  ;;  %v896_v8 = vmul.u32 %v894_v31, %v892_v2 }
 0x11e   : > { %v345_v10 = vxor.u32 2147483648, %v344_v45  ;;  %v899_v17 = vmul.u32 %v895_v32, %v893_v26  ;;  %v900_v29 = vshll.u32 %v897_v34, 16  ;;  %v902_v23 = vshll.u32 %v898_v16, 16 }
 0x11f   : > { %v924_v62 = vshll.u32 %v920_v53, 16  ;;  %vm926_vm14 = vc.u32 %v918_v56, %v922_v5  ;;  %v928_v25 = vadd.s32 %v922_v5, %v918_v56  ;;  %v923_v22 = vshrl.u32 %v919_v40, 16 }
 0x120   : > { %v346_v57 = vsel %vm225_vm10, %v345_v10, %v344_v45  ;;  %vm904_vm15 = vc.u32 %v896_v8, %v900_v29  ;;  %v906_v14 = vadd.s32 %v900_v29, %v896_v8  ;;  %v927_v24 = vsel %vm926_vm14, 1, %v12563_v0 }
 0x121   : > { %v349_v4 = vsel %vm8485_vm12, %v8141_v9, %v346_v57  ;;  %v905_v55 = vsel %vm904_vm15, 1, %v12563_v0  ;;  %v929_v59 = vadd.s32 %v927_v24, %v921_v1  ;;  %vm930_vm0 = vc.u32 %v928_v25, %v924_v62 }
 0x122   : > { %v351_v51 = vmul.f32 %v349_v4, %v349_v4  ;;  %v907_v19 = vadd.s32 %v905_v55, %v899_v17  ;;  %vm908_vm1 = vc.u32 %v906_v14, %v902_v23  ;;  %v931_v61 = vsel %vm930_vm0, 1, %v12563_v0 }
 0x123   : > { %v909_v2 = vsel %vm908_vm1, 1, %v12563_v0  ;;  %v933_v21 = vadd.s32 %v931_v61, %v929_v59  ;;  %v547_v26 = vand.u32 31, %v545_v60  ;;  %v901_v41 = vshrl.u32 %v897_v34, 16 }
 0x124   : > { %v352_v27 = vmul.f32 -0.001358992, %v351_v51  ;;  %v359_v42 = vmul.f32 -0.00019511016, %v351_v51  ;;  %v911_v47 = vadd.s32 %v909_v2, %v907_v19  ;;  %v925_v48 = vshrl.u32 %v920_v53, 16 }
 0x125   : > { %v934_v20 = vadd.s32 %v933_v21, %v923_v22  ;;  %v8576_v31 = vshrl.u32 %v545_v60, 5  ;;  %v8578_v32 = vsub.s32 32, %v547_v26  ;;  %v903_v1 = vshrl.u32 %v898_v16, 16 }
 0x126   : > { %v353_v45 = vadd.f32 0.041655596, %v352_v27  ;;  %v360_v56 = vadd.f32 0.008332121, %v359_v42  ;;  %v912_v5 = vadd.s32 %v911_v47, %v901_v41  ;;  %v8580_v10 = vadd.s32 %v928_v25, %v924_v62 }
 0x127   : > { %v935_v8 = vadd.s32 %v934_v20, %v925_v48  ;;  %v550_v40 = vshll.u32 %v12552_v37, %v547_v26  ;;  %v551_v17 = vshrl.u32 %v12559_v39, %v8578_v32  ;;  %v553_v60 = vshll.u32 %v12559_v39, %v547_v26 }
 0x128   : > { %v354_v34 = vmul.f32 %v353_v45, %v351_v51  ;;  %v361_v29 = vmul.f32 %v360_v56, %v351_v51  ;;  %v8585_v53 = vadd.s32 %v912_v5, %v903_v1  ;;  %v554_v57 = vshrl.u32 %v12557_v43, %v8578_v32 }
 0x129   : > { %v939_v23 = vadd.s32 1, %v935_v8  ;;  %v556_v16 = vshll.u32 %v12557_v43, %v547_v26  ;;  %v557_v62 = vshrl.u32 %v12550_v46, %v8578_v32  ;;  %v8595_v24 = vor.u32 %v551_v17, %v550_v40 }
 0x12a   : > { %v355_v25 = vadd.f32 -0.4999988, %v354_v34  ;;  %v362_v14 = vadd.f32 -0.16666654, %v361_v29  ;;  %vm938_vm10 = vc.u32 %v8585_v53, %v8580_v10  ;;  %v559_v59 = vshll.u32 %v12550_v46, %v547_v26 }
 0x12b   : > { %v940_v55 = vsel %vm938_vm10, %v939_v23, %v935_v8  ;;  %v560_v19 = vshrl.u32 %v12555_v49, %v8578_v32  ;;  %v562_v61 = vshll.u32 %v12555_v49, %v547_v26  ;;  %v563_v27 = vshrl.u32 %v12548_v52, %v8578_v32 }
 0x12c   : > { %v356_v2 = vmul.f32 %v355_v25, %v351_v51  ;;  %v363_v22 = vmul.f32 %v362_v14, %v351_v51  ;;  %v941_v21 = vadd.s32 %v940_v55, %v936_v11  ;;  %v8606_v42 = vor.u32 %v554_v57, %v553_v60 }
 0x12d   : > { %v8608_v41 = vor.u32 %v557_v62, %v556_v16  ;;  %v561_v47 = vor.u32 %v560_v19, %v559_v59  ;;  %vm568_vm12 = vcmp.lt.s32.totalorder %v8576_v31, 4  ;;  %v564_v45 = vor.u32 %v563_v27, %v562_v61 }
 0x12e   : > { %v8611_v48 = vadd.f32 1.0, %v356_v2  ;;  %v364_v20 = vadd.f32 1.0, %v363_v22  ;;  %v942_v26 = vadd.s32 536870912, %v941_v21  ;;  %vm366_vm2 = vweird.f32 %v8141_v9 }
 0x12f   : > { %vm565_vm3 = vcmp.lt.s32.totalorder %v8576_v31, 1  ;;  %v574_v33 = vsel %vm568_vm12, %v561_v47, 920167782  ;;  %v8619_v12 = vshll.u32 %v541_v38, 8  ;;  %vm567_vm4 = vcmp.lt.s32.totalorder %v8576_v31, 3 }
 0x130   : > { %v8621_v11 = vmul.f32 %v364_v20, %v349_v4  ;;  %v12543_v51 = vxor.u32 2147483648, %v8611_v48  ;;  %v8624_v56 = vshrl.u32 %v942_v26, 30  ;;  %v573_v1 = vsel %vm565_vm3, %v8595_v24, %v8606_v42 }
 0x131   : > { %v575_v5 = vsel %vm567_vm4, %v8608_v41, %v574_v33  ;;  %v577_v28 = vsel %vm565_vm3, %v8606_v42, %v8608_v41  ;;  %v578_v38 = vsel %vm568_vm12, %v564_v45, 1326507024  ;;  %vm369_vm5 = vcmp.lt.s32.totalorder %v8559_v36, 2 }
 0x132   : > { %v12544_v4 = vxor.u32 2147483648, %v8621_v11  ;;  %vm373_vm6 = vcmp.eq.s32.totalorder %v8559_v36, 2  ;;  %v944_v8 = vshll.u32 %v8624_v56, 30  ;;  %vm370_vm7 = vcmp.eq.s32.totalorder %v8559_v36, 0 }
 0x133   : > { %v375_v40 = vsel %vm373_vm6, %v12543_v51, %v8621_v11  ;;  %vm566_vm8 = vcmp.lt.s32.totalorder %v8576_v31, 2  ;;  %v579_v17 = vsel %vm567_vm4, %v561_v47, %v578_v38  ;;  %v582_v57 = vand.u32 65535, %v8619_v12 }
 0x134   : > { %v372_v34 = vsel %vm370_vm7, %v8611_v48, %v12544_v4  ;;  %v945_v29 = vsub.s32 %v941_v21, %v944_v8  ;;  %v576_v60 = vsel %vm566_vm8, %v573_v1, %v575_v5  ;;  %v580_v36 = vsel %vm566_vm8, %v577_v28, %v579_v17 }
 0x135   : > { %v376_v23 = vsel %vm369_vm5, %v372_v34, %v375_v40  ;;  %v584_v16 = vand.u32 65535, %v580_v36  ;;  %v585_v62 = vshrl.u32 %v580_v36, 16  ;;  %v583_v55 = vshrl.u32 %v8619_v12, 16 }
 0x136   : > { %v377_v25 = vsel %vm366_vm2, nan, %v376_v23  ;;  %vm946_vm11 = vcmp.lt.s32.totalorder %v945_v29, 0  ;;  %v947_v14 = vsub.s32 0, %v945_v29  ;;  %v606_v22 = vand.u32 65535, %v576_v60 }
 0x137   : > { %2703 = vxpose.xlu0.b32.start.end [1/1] (short) %v377_v25, 128  ;;  %v587_v59 = vmul.u32 %v585_v62, %v582_v57  ;;  %v588_v61 = vmul.u32 %v584_v16, %v583_v55  ;;  %v586_v21 = vmul.u32 %v584_v16, %v582_v57  ;;  %v549_v20 = vshrl.u32 %v12552_v37, %v8578_v32 }
 0x138   : > { %v948_v19 = vsel %vm946_vm11, %v947_v14, %v945_v29  ;;  %v589_v26 = vmul.u32 %v585_v62, %v583_v55  ;;  %v607_v1 = vshrl.u32 %v576_v60, 16  ;;  %v937_v5 = vadd.s32 %v8580_v10, %v8585_v53 }
 0x139   : > { %v949_v2 = vclz %v948_v19  ;;  %v590_v27 = vshll.u32 %v587_v59, 16  ;;  %v592_v45 = vshll.u32 %v588_v61, 16  ;;  %v610_v38 = vmul.u32 %v606_v22, %v583_v55 }
 0x13a   : > { %v609_v17 = vmul.u32 %v607_v1, %v582_v57  ;;  %v570_v32 = vsel %vm568_vm12, %v8608_v41, 2102212464  ;;  %v591_v60 = vshrl.u32 %v587_v59, 16  ;;  %v608_v10 = vmul.u32 %v606_v22, %v582_v57  ;;  %v8673_v41 = vld [vmem:[%s8116_s20] sm:$0xff] }
 0x13b   : > { %v7819_v47 = vadd.s32 4294967294, %v949_v2  ;;  %vm594_vm13 = vc.u32 %v586_v21, %v590_v27  ;;  %v596_v33 = vadd.s32 %v590_v27, %v586_v21  ;;  %v611_v19 = vmul.u32 %v607_v1, %v583_v55 }
 0x13c   : > { %v595_v28 = vsel %vm594_vm13, 1, %v12563_v0  ;;  %v612_v53 = vshll.u32 %v609_v17, 16  ;;  %v614_v21 = vshll.u32 %v610_v38, 16  ;;  %v569_v57 = vsel %vm565_vm3, %v549_v20, %v8595_v24 }
 0x13d   : > { %vm7820_vm14 = vcmp.lt.s32.totalorder %v7819_v47, 0  ;;  %v597_v40 = vadd.s32 %v595_v28, %v589_v26  ;;  %vm598_vm15 = vc.u32 %v596_v33, %v592_v45  ;;  %v180_v33 = vperm.slane %v8673_v41, 5 }
 0x13e   : > { %v952_v8 = vsel %vm7820_vm14, 0, %v7819_v47  ;;  %v599_v23 = vsel %vm598_vm15, 1, %v12563_v0  ;;  %vm616_vm0 = vc.u32 %v608_v10, %v612_v53  ;;  %v618_v27 = vadd.s32 %v612_v53, %v608_v10 }
 0x13f   : > { %v953_v34 = vsub.s32 32, %v952_v8  ;;  %v957_v36 = vsub.s32 4294967266, %v952_v8  ;;  %v601_v16 = vadd.s32 %v599_v23, %v597_v40  ;;  %v954_v62 = vshll.u32 %v945_v29, %v952_v8 }
 0x140   : > { %v617_v45 = vsel %vm616_vm0, 1, %v12563_v0  ;;  %v571_v29 = vsel %vm567_vm4, %v8606_v42, %v570_v32  ;;  %vm620_vm1 = vc.u32 %v618_v27, %v614_v21  ;;  %v593_v22 = vshrl.u32 %v588_v61, 16 }
 0x141   : > { %v955_v25 = vshrl.u32 %v937_v5, %v953_v34  ;;  %v958_v14 = vadd.s32 127, %v957_v36  ;;  %v602_v2 = vadd.s32 %v601_v16, %v591_v60  ;;  %v619_v55 = vadd.s32 %v617_v45, %v611_v19 }
 0x142   : > { %v621_v1 = vsel %vm620_vm1, 1, %v12563_v0  ;;  %v8684_v5 = vmul.f32 %v180_v33, %v8132_v6  ;;  %v967_v28 = vsub.s32 4, %v8624_v56  ;;  %v613_v8 = vshrl.u32 %v609_v17, 16 }
 0x143   : > { %v956_v47 = vor.u32 %v955_v25, %v954_v62  ;;  %v959_v26 = vshll.u32 %v958_v14, 23  ;;  %v623_v40 = vadd.s32 %v621_v1, %v619_v55  ;;  %v182_v34 = vperm.slane %v8673_v41, 7 }
 0x144   : > { %12630 = vst [vmem:[#allocation6_spill] sm:$0xff] %v8684_v5  ;;  %v603_v36 = vadd.s32 %v602_v2, %v593_v22  ;;  %v1001_v42 = vand.u32 2139095040, %v8684_v5  ;;  %v615_v32 = vshrl.u32 %v610_v38, 16  ;;  %v998_v61 = vand.u32 2147483647, %v8684_v5 }
 0x145   : > { %v960_v59 = vor.u32 4788187, %v959_v26  ;;  %v963_v20 = vcvt.s32.f32 %v956_v47  ;;  %v624_v23 = vadd.s32 %v623_v40, %v613_v8  ;;  %v8691_v60 = vmul.f32 %v182_v34, %v8132_v6 }
 0x146   : > { %v622_v10 = vadd.s32 %v618_v27, %v614_v21  ;;  %v1002_v53 = vshrl.u32 %v1001_v42, 23  ;;  %vm845_vm10 = vcmp.lt.s32.totalorder %v8436_v58, 0  ;;  %v572_v17 = vsel %vm566_vm8, %v569_v57, %v571_v29 }
 0x147   : > { %v961_v24 = vand.u32 2147483647, %v960_v59  ;;  %v625_v62 = vadd.s32 %v624_v23, %v615_v32  ;;  %v968_v14 = vsel %vm845_vm10, %v967_v28, %v8624_v56  ;;  %v1005_v2 = vand.u32 8388607, %v998_v61 }
 0x148   : > { %vm628_vm12 = vc.u32 %v603_v36, %v622_v10  ;;  %v7821_v38 = vadd.s32 4294967169, %v1002_v53  ;;  %v1311_v47 = vand.u32 2139095040, %v8691_v60  ;;  %vm844_vm3 = vcmp.le.f32.partialorder %v843_v18, 0.7853982 }
 0x149   : > { %v964_v16 = vmul.f32 %v963_v20, %v961_v24  ;;  %v629_v19 = vadd.s32 1, %v625_v62  ;;  %v626_v27 = vmul.u32 %v8619_v12, %v572_v17  ;;  %v970_v45 = vsel %vm844_vm3, 0, %v968_v14 }
 0x14a   : > { %v1008_v31 = vadd.s32 1, %v7821_v38  ;;  %v1006_v29 = vor.u32 8388608, %v1005_v2  ;;  %v1312_v59 = vshrl.u32 %v1311_v47, 23  ;;  %v987_v28 = vadd.s32 3, %v970_v45 }
 0x14b   : > { %v965_v25 = vxor.u32 2147483648, %v964_v16  ;;  %v630_v33 = vsel %vm628_vm12, %v629_v19, %v625_v62  ;;  %v8704_v40 = vand.u32 3, %v970_v45  ;;  %vm535_vm5 = vcmp.lt.s32.totalorder %v8471_v54, 0 }
 0x14c   : > { %v631_v57 = vadd.s32 %v630_v33, %v626_v27  ;;  %vm1009_vm4 = vcmp.gt.s32.totalorder %v1008_v31, 0  ;;  %v8707_v20 = vshll.u32 %v1006_v29, 8  ;;  %v1308_v42 = vand.u32 2147483647, %v8691_v60 }
 0x14d   : > { %v966_v21 = vsel %vm845_vm10, %v965_v25, %v964_v16  ;;  %v1010_v55 = vsel %vm1009_vm4, %v1008_v31, 0  ;;  %v7827_v32 = vadd.s32 4294967169, %v1312_v59  ;;  %v8710_v53 = vand.u32 3, %v987_v28 }
 0x14e   : > { %v969_v26 = vsel %vm844_vm3, %v8436_v58, %v966_v21  ;;  %v632_v8 = vadd.s32 536870912, %v631_v57  ;;  %v1012_v18 = vand.u32 31, %v1010_v55  ;;  %vm8714_vm6 = vcmp.le.f32.partialorder %v533_v50, 0.7853982 }
 0x14f   : > { %v971_v56 = vmul.f32 %v969_v26, %v969_v26  ;;  %vm4237_vm7 = vcmp.eq.s32.totalorder %v8704_v40, 2  ;;  %v8719_v25 = vadd.s32 %v622_v10, %v603_v36  ;;  %v8721_v14 = vshrl.u32 %v1010_v55, 5 }
 0x150   : > { %v633_v24 = vshrl.u32 %v632_v8, 30  ;;  %v1013_v38 = vsub.s32 32, %v1012_v18  ;;  %vm4234_vm8 = vcmp.eq.s32.totalorder %v8704_v40, 0  ;;  %v8727_v50 = vand.u32 65535, %v8707_v20 }
 0x151   : > { %v972_v22 = vmul.f32 -0.001358992, %v971_v56  ;;  %v979_v1 = vmul.f32 -0.00019511016, %v971_v56  ;;  %v8730_v27 = vshrl.u32 %v8707_v20, 16  ;;  %v8736_v10 = vadd.s32 1, %v7827_v32 }
 0x152   : > { %v634_v62 = vshll.u32 %v633_v24, 30  ;;  %v657_v21 = vsub.s32 4, %v633_v24  ;;  %v8734_v36 = vand.u32 8388607, %v1308_v42  ;;  %vm4233_vm11 = vcmp.lt.s32.totalorder %v8704_v40, 2 }
 0x153   : > { %v973_v34 = vadd.f32 0.041655596, %v972_v22  ;;  %v980_v12 = vadd.f32 0.008332121, %v979_v1  ;;  %vm986_vm14 = vweird.f32 %v8436_v58  ;;  %v1016_v29 = vshrl.u32 %v12559_v39, %v1013_v38 }
 0x154   : > { %v8723_v47 = vsub.s32 %v631_v57, %v634_v62  ;;  %v1015_v57 = vshll.u32 %v12552_v37, %v1012_v18  ;;  %v1018_v55 = vshll.u32 %v12559_v39, %v1012_v18  ;;  %v1019_v59 = vshrl.u32 %v12557_v43, %v1013_v38 }
 0x155   : > { %v974_v23 = vmul.f32 %v973_v34, %v971_v56  ;;  %v981_v16 = vmul.f32 %v980_v12, %v971_v56  ;;  %vm1030_vm15 = vcmp.lt.s32.totalorder %v8721_v14, 1  ;;  %v658_v28 = vsel %vm535_vm5, %v657_v21, %v633_v24 }
 0x156   : > { %vm636_vm13 = vcmp.lt.s32.totalorder %v8723_v47, 0  ;;  %v637_v33 = vsub.s32 0, %v8723_v47  ;;  %v1022_v34 = vshrl.u32 %v12550_v46, %v1013_v38  ;;  %v1025_v12 = vshrl.u32 %v12555_v49, %v1013_v38 }
 0x157   : > { %v975_v19 = vadd.f32 -0.4999988, %v974_v23  ;;  %v982_v2 = vadd.f32 -0.16666654, %v981_v16  ;;  %v1028_v32 = vshrl.u32 %v12548_v52, %v1013_v38  ;;  %vm990_vm0 = vcmp.eq.s32.totalorder %v8710_v53, 0 }
 0x158   : > { %v638_v1 = vsel %vm636_vm13, %v637_v33, %v8723_v47  ;;  %v1014_v62 = vshrl.u32 %v12552_v37, %v1013_v38  ;;  %vm1319_vm1 = vcmp.gt.s32.totalorder %v8736_v10, 0  ;;  %v8759_v24 = vsel %vm8714_vm6, 0, %v658_v28 }
 0x159   : > { %v976_v31 = vmul.f32 %v975_v19, %v971_v56  ;;  %v983_v45 = vmul.f32 %v982_v2, %v971_v56  ;;  %v639_v8 = vclz %v638_v1  ;;  %v1021_v19 = vshll.u32 %v12557_v43, %v1012_v18 }
 0x15a   : > { %v1024_v21 = vshll.u32 %v12550_v46, %v1012_v18  ;;  %vm993_vm10 = vcmp.eq.s32.totalorder %v8710_v53, 2  ;;  %v1017_v38 = vor.u32 %v1016_v29, %v1015_v57  ;;  %v1020_v33 = vor.u32 %v1019_v59, %v1018_v55 }
 0x15b   : > { %v977_v22 = vadd.f32 1.0, %v976_v31  ;;  %v984_v56 = vadd.f32 1.0, %v983_v45  ;;  %v7813_v2 = vadd.s32 4294967294, %v639_v8  ;;  %v1027_v31 = vshll.u32 %v12555_v49, %v1012_v18 }
 0x15c   : > { %v1026_v1 = vor.u32 %v1025_v12, %v1024_v21  ;;  %vm989_vm3 = vcmp.lt.s32.totalorder %v8710_v53, 2  ;;  %v8770_v18 = vadd.s32 3, %v8759_v24  ;;  %vm1031_vm4 = vcmp.lt.s32.totalorder %v8721_v14, 2 }
 0x15d   : > { %v985_v23 = vmul.f32 %v984_v56, %v969_v26  ;;  %v994_v16 = vxor.u32 2147483648, %v977_v22  ;;  %vm7814_vm12 = vcmp.lt.s32.totalorder %v7813_v2, 0  ;;  %v1023_v56 = vor.u32 %v1022_v34, %v1021_v19 }
 0x15e   : > { %v1029_v8 = vor.u32 %v1028_v32, %v1027_v31  ;;  %v642_v30 = vsel %vm7814_vm12, 0, %v7813_v2  ;;  %vm1033_vm13 = vcmp.lt.s32.totalorder %v8721_v14, 4  ;;  %v1038_v34 = vsel %vm1030_vm15, %v1017_v38, %v1020_v33 }
 0x15f   : > { %v991_v45 = vxor.u32 2147483648, %v985_v23  ;;  %v4239_v26 = vsel %vm4237_vm7, %v994_v16, %v985_v23  ;;  %v643_v57 = vsub.s32 32, %v642_v30  ;;  %vm1032_vm7 = vcmp.lt.s32.totalorder %v8721_v14, 3 }
 0x160   : > { %v644_v55 = vshll.u32 %v8723_v47, %v642_v30  ;;  %v647_v59 = vsub.s32 4294967266, %v642_v30  ;;  %v1039_v32 = vsel %vm1033_vm13, %v1026_v1, 920167782  ;;  %v1042_v40 = vsel %vm1030_vm15, %v1020_v33, %v1023_v56 }
 0x161   : > { %v4236_v28 = vsel %vm4234_vm8, %v977_v22, %v991_v45  ;;  %v645_v12 = vshrl.u32 %v8719_v25, %v643_v57  ;;  %v1043_v19 = vsel %vm1033_vm13, %v1029_v8, 1326507024  ;;  %v1035_v21 = vsel %vm1033_vm13, %v1023_v56, 2102212464 }
 0x162   : > { %v4240_v63 = vsel %vm4233_vm11, %v4236_v28, %v4239_v26  ;;  %v648_v2 = vadd.s32 127, %v647_v59  ;;  %v1040_v31 = vsel %vm1032_vm7, %v1023_v56, %v1039_v32  ;;  %v992_v30 = vsel %vm990_vm0, %v977_v22, %v991_v45 }
 0x163   : > { %v8779_v29 = vsel %vm986_vm14, nan, %v4240_v63  ;;  %v1044_v63 = vsel %vm1032_vm7, %v1026_v1, %v1043_v19  ;;  %v646_v47 = vor.u32 %v645_v12, %v644_v55  ;;  %v1041_v25 = vsel %vm1031_vm4, %v1038_v34, %v1040_v31 }
 0x164   : > { %12633 = vst [vmem:[#allocation7_spill] sm:$0xff] %v8779_v29  ;;  %v1045_v26 = vsel %vm1031_vm4, %v1042_v40, %v1044_v63  ;;  %v649_v28 = vshll.u32 %v648_v2, 23  ;;  %v1071_v59 = vand.u32 65535, %v1041_v25  ;;  %v995_v56 = vsel %vm993_vm10, %v994_v16, %v985_v23 }
 0x165   : > { %v1049_v8 = vand.u32 65535, %v1045_v26  ;;  %v1050_v57 = vshrl.u32 %v1045_v26, 16  ;;  %v1034_v1 = vsel %vm1030_vm15, %v1014_v62, %v1017_v38  ;;  %v1072_v32 = vshrl.u32 %v1041_v25, 16 }
 0x166   : > { %v1320_v22 = vsel %vm1319_vm1, %v8736_v10, 0  ;;  %v650_v45 = vor.u32 4788187, %v649_v28  ;;  %v1036_v55 = vsel %vm1032_vm7, %v1020_v33, %v1035_v21  ;;  %v8810_v40 = vsel %vm989_vm3, %v992_v30, %v995_v56 }
 0x167   : > { %v1052_v34 = vmul.u32 %v1050_v57, %v8727_v50  ;;  %v1053_v12 = vmul.u32 %v1049_v8, %v8730_v27  ;;  %v653_v23 = vcvt.s32.f32 %v646_v47  ;;  %v1074_v16 = vmul.u32 %v1072_v32, %v8727_v50 }
 0x168   : > { %v1075_v62 = vmul.u32 %v1071_v59, %v8730_v27  ;;  %v651_v38 = vand.u32 2147483647, %v650_v45  ;;  %v1051_v10 = vmul.u32 %v1049_v8, %v8727_v50  ;;  %v1322_v2 = vand.u32 31, %v1320_v22 }
 0x169   : > { %v1055_v19 = vshll.u32 %v1052_v34, 16  ;;  %v1054_v33 = vmul.u32 %v1050_v57, %v8730_v27  ;;  %v1057_v21 = vshll.u32 %v1053_v12, 16  ;;  %v1073_v31 = vmul.u32 %v1071_v59, %v8727_v50 }
 0x16a   : > { %v1077_v63 = vshll.u32 %v1074_v16, 16  ;;  %v654_v25 = vmul.f32 %v653_v23, %v651_v38  ;;  %v1076_v30 = vmul.u32 %v1072_v32, %v8730_v27  ;;  %v1079_v26 = vshll.u32 %v1075_v62, 16 }
 0x16b   : > { %vm1059_vm8 = vc.u32 %v1051_v10, %v1055_v19  ;;  %v1061_v53 = vadd.s32 %v1055_v19, %v1051_v10  ;;  %v1037_v57 = vsel %vm1031_vm4, %v1034_v1, %v1036_v55  ;;  %v1056_v32 = vshrl.u32 %v1052_v34, 16 }
 0x16c   : > { %v1060_v47 = vsel %vm1059_vm8, 1, %v12563_v0  ;;  %vm1081_vm11 = vc.u32 %v1073_v31, %v1077_v63  ;;  %v1083_v28 = vadd.s32 %v1077_v63, %v1073_v31  ;;  %v655_v56 = vxor.u32 2147483648, %v654_v25 }
 0x16d   : > { %v1062_v8 = vadd.s32 %v1060_v47, %v1054_v33  ;;  %vm1063_vm15 = vc.u32 %v1061_v53, %v1057_v21  ;;  %v1082_v45 = vsel %vm1081_vm11, 1, %v12563_v0  ;;  %v1078_v19 = vshrl.u32 %v1074_v16, 16 }
 0x16e   : > { %v1064_v50 = vsel %vm1063_vm15, 1, %v12563_v0  ;;  %v1084_v59 = vadd.s32 %v1082_v45, %v1076_v30  ;;  %vm1085_vm0 = vc.u32 %v1083_v28, %v1079_v26  ;;  %v656_v27 = vsel %vm535_vm5, %v655_v56, %v654_v25 }
 0x16f   : > { %v1066_v23 = vadd.s32 %v1064_v50, %v1062_v8  ;;  %v1086_v38 = vsel %vm1085_vm0, 1, %v12563_v0  ;;  %v659_v10 = vsel %vm8714_vm6, %v8471_v54, %v656_v27  ;;  %v8829_v21 = vsub.s32 32, %v1322_v2 }
 0x170   : > { %v1088_v33 = vadd.s32 %v1086_v38, %v1084_v59  ;;  %v661_v14 = vmul.f32 %v659_v10, %v659_v10  ;;  %v1058_v1 = vshrl.u32 %v1053_v12, 16  ;;  %v1091_v31 = vmul.u32 %v8707_v20, %v1037_v57 }
 0x171   : > { %v1067_v55 = vadd.s32 %v1066_v23, %v1056_v32  ;;  %v1080_v63 = vshrl.u32 %v1075_v62, 16  ;;  %v8832_v53 = vadd.s32 %v1083_v28, %v1079_v26  ;;  %v8834_v25 = vshrl.u32 %v1320_v22, 5 }
 0x172   : > { %v1089_v34 = vadd.s32 %v1088_v33, %v1078_v19  ;;  %v662_v30 = vmul.f32 -0.001358992, %v661_v14  ;;  %v669_v47 = vmul.f32 -0.00019511016, %v661_v14  ;;  %v1328_v17 = vshll.u32 %v12559_v39, %v1322_v2 }
 0x173   : > { %v8836_v56 = vadd.s32 %v1067_v55, %v1058_v1  ;;  %v1326_v8 = vshrl.u32 %v12559_v39, %v8829_v21  ;;  %v1329_v12 = vshrl.u32 %v12557_v43, %v8829_v21  ;;  %v1332_v20 = vshrl.u32 %v12550_v46, %v8829_v21 }
 0x174   : > { %v1090_v16 = vadd.s32 %v1089_v34, %v1080_v63  ;;  %v663_v62 = vadd.f32 0.041655596, %v662_v30  ;;  %v670_v26 = vadd.f32 0.008332121, %v669_v47  ;;  %v1334_v22 = vshll.u32 %v12550_v46, %v1322_v2 }
 0x175   : > { %vm1093_vm5 = vc.u32 %v8836_v56, %v8832_v53  ;;  %v1335_v45 = vshrl.u32 %v12555_v49, %v8829_v21  ;;  %v1337_v57 = vshll.u32 %v12555_v49, %v1322_v2  ;;  %v1338_v50 = vshrl.u32 %v12548_v52, %v8829_v21 }
 0x176   : > { %v1094_v28 = vadd.s32 1, %v1090_v16  ;;  %v664_v59 = vmul.f32 %v663_v62, %v661_v14  ;;  %v671_v27 = vmul.f32 %v670_v26, %v661_v14  ;;  %v1325_v32 = vshll.u32 %v12552_v37, %v1322_v2 }
 0x177   : > { %v1331_v23 = vshll.u32 %v12557_v43, %v1322_v2  ;;  %v8855_v19 = vor.u32 %v1329_v12, %v1328_v17  ;;  %v1336_v33 = vor.u32 %v1335_v45, %v1334_v22  ;;  %v1339_v1 = vor.u32 %v1338_v50, %v1337_v57 }
 0x178   : > { %v1095_v38 = vsel %vm1093_vm5, %v1094_v28, %v1090_v16  ;;  %v665_v55 = vadd.f32 -0.4999988, %v664_v59  ;;  %v672_v63 = vadd.f32 -0.16666654, %v671_v27  ;;  %v997_v47 = vsel %vm986_vm14, nan, %v8810_v40 }
 0x179   : > { %v1096_v34 = vadd.s32 %v1095_v38, %v1091_v31  ;;  %v1333_v30 = vor.u32 %v1332_v20, %v1331_v23  ;;  %v1316_v62 = vor.u32 8388608, %v8734_v36  ;;  %v8861_v26 = vor.u32 %v1326_v8, %v1325_v32 }
 0x17a   : > { %vm1343_vm6 = vcmp.lt.s32.totalorder %v8834_v25, 4  ;;  %v666_v2 = vmul.f32 %v665_v55, %v661_v14  ;;  %v673_v16 = vmul.f32 %v672_v63, %v661_v14  ;;  %v678_v31 = vand.u32 3, %v8770_v18 }
 0x17b   : > { %v1097_v17 = vadd.s32 536870912, %v1096_v34  ;;  %v1349_v12 = vsel %vm1343_vm6, %v1336_v33, 920167782  ;;  %vm1340_vm1 = vcmp.lt.s32.totalorder %v8834_v25, 1  ;;  %vm1342_vm10 = vcmp.lt.s32.totalorder %v8834_v25, 3 }
 0x17c   : > { %v1353_v58 = vsel %vm1343_vm6, %v1339_v1, 1326507024  ;;  %v8871_v36 = vadd.f32 1.0, %v666_v2  ;;  %v674_v40 = vadd.f32 1.0, %v673_v16  ;;  %v1352_v14 = vsel %vm1340_vm1, %v8855_v19, %v1333_v30 }
 0x17d   : > { %v8873_v8 = vshrl.u32 %v1097_v17, 30  ;;  %v1348_v18 = vsel %vm1340_vm1, %v8861_v26, %v8855_v19  ;;  %v1350_v20 = vsel %vm1342_vm10, %v1333_v30, %v1349_v12  ;;  %v1354_v22 = vsel %vm1342_vm10, %v1336_v33, %v1353_v58 }
 0x17e   : > { %2831 = vxpose.xlu2.b32.start.end [1/1] (short) %v997_v47, 128  ;;  %12634 = vst [vmem:[#allocation8_spill] sm:$0xff] %v8871_v36  ;;  %v8886_v28 = vshll.u32 %v1316_v62, 8  ;;  %v8888_v45 = vmul.f32 %v674_v40, %v659_v10  ;;  %vm1341_vm14 = vcmp.lt.s32.totalorder %v8834_v25, 2  ;;  %vm676_vm12 = vweird.f32 %v8471_v54  ;;  %v8957_v25 = vld [vmem:[%s8116_s20 + $0x8] sm:$0xff] }
 0x17f   : > { %v1099_v57 = vshll.u32 %v8873_v8, 30  ;;  %vm680_vm3 = vcmp.eq.s32.totalorder %v678_v31, 0  ;;  %v1355_v50 = vsel %vm1341_vm14, %v1352_v14, %v1354_v22  ;;  %v12541_v27 = vxor.u32 2147483648, %v8871_v36 }
 0x180   : > { %v12542_v59 = vxor.u32 2147483648, %v8888_v45  ;;  %v1351_v10 = vsel %vm1341_vm14, %v1348_v18, %v1350_v20  ;;  %v1357_v23 = vand.u32 65535, %v8886_v28  ;;  %v1358_v38 = vshrl.u32 %v8886_v28, 16 }
 0x181   : > { %v8897_v32 = vsub.s32 %v1096_v34, %v1099_v57  ;;  %v1359_v33 = vand.u32 65535, %v1355_v50  ;;  %v1360_v1 = vshrl.u32 %v1355_v50, 16  ;;  %vm679_vm4 = vcmp.lt.s32.totalorder %v678_v31, 2 }
 0x182   : > { %v682_v55 = vsel %vm680_vm3, %v8871_v36, %v12542_v59  ;;  %vm683_vm13 = vcmp.eq.s32.totalorder %v678_v31, 2  ;;  %v1382_v62 = vshrl.u32 %v1351_v10, 16  ;;  %v1324_v17 = vshrl.u32 %v12552_v37, %v8829_v21 }
 0x183   : > { %vm1101_vm7 = vcmp.lt.s32.totalorder %v8897_v32, 0  ;;  %v1102_v63 = vsub.s32 0, %v8897_v32  ;;  %v1362_v34 = vmul.u32 %v1360_v1, %v1357_v23  ;;  %v1363_v47 = vmul.u32 %v1359_v33, %v1358_v38 }
 0x184   : > { %v685_v2 = vsel %vm683_vm13, %v12541_v27, %v8888_v45  ;;  %v1381_v12 = vand.u32 65535, %v1351_v10  ;;  %v1361_v14 = vmul.u32 %v1359_v33, %v1357_v23  ;;  %v1092_v31 = vadd.s32 %v8832_v53, %v8836_v56 }
 0x185   : > { %v1103_v16 = vsel %vm1101_vm7, %v1102_v63, %v8897_v32  ;;  %v686_v58 = vsel %vm679_vm4, %v682_v55, %v685_v2  ;;  %v1365_v18 = vshll.u32 %v1362_v34, 16  ;;  %v1345_v20 = vsel %vm1343_vm6, %v1333_v30, 2102212464 }
 0x186   : > { %v1104_v40 = vclz %v1103_v16  ;;  %v1364_v22 = vmul.u32 %v1360_v1, %v1358_v38  ;;  %v1367_v57 = vshll.u32 %v1363_v47, 16  ;;  %v1384_v10 = vmul.u32 %v1382_v62, %v1357_v23 }
 0x187   : > { %vm1369_vm8 = vc.u32 %v1361_v14, %v1365_v18  ;;  %v1371_v21 = vadd.s32 %v1365_v18, %v1361_v14  ;;  %v687_v33 = vsel %vm676_vm12, nan, %v686_v58  ;;  %v1383_v63 = vmul.u32 %v1381_v12, %v1357_v23 }
 0x188   : > { %v7822_v50 = vadd.s32 4294967294, %v1104_v40  ;;  %v1370_v55 = vsel %vm1369_vm8, 1, %v12563_v0  ;;  %v1385_v53 = vmul.u32 %v1381_v12, %v1358_v38  ;;  %v1387_v30 = vshll.u32 %v1384_v10, 16 }
 0x189   : > { %v1372_v56 = vadd.s32 %v1370_v55, %v1364_v22  ;;  %vm1373_vm15 = vc.u32 %v1371_v21, %v1367_v57  ;;  %v1366_v2 = vshrl.u32 %v1362_v34, 16  ;;  %v1386_v40 = vmul.u32 %v1382_v62, %v1358_v38 }
 0x18a   : > { %vm7823_vm11 = vcmp.lt.s32.totalorder %v7822_v50, 0  ;;  %v1374_v16 = vsel %vm1373_vm15, 1, %v12563_v0  ;;  %v1389_v58 = vshll.u32 %v1385_v53, 16  ;;  %vm1391_vm0 = vc.u32 %v1383_v63, %v1387_v30 }
 0x18b   : > { %v1107_v1 = vsel %vm7823_vm11, 0, %v7822_v50  ;;  %v1376_v27 = vadd.s32 %v1374_v16, %v1372_v56  ;;  %v1393_v23 = vadd.s32 %v1387_v30, %v1383_v63  ;;  %v181_v12 = vperm.slane %v8673_v41, 6 }
 0x18c   : > { %v1108_v14 = vsub.s32 32, %v1107_v1  ;;  %v1112_v18 = vsub.s32 4294967266, %v1107_v1  ;;  %v1109_v59 = vshll.u32 %v8897_v32, %v1107_v1  ;;  %v1392_v34 = vsel %vm1391_vm0, 1, %v12563_v0 }
 0x18d   : > { %v1377_v21 = vadd.s32 %v1376_v27, %v1366_v2  ;;  %v1344_v38 = vsel %vm1340_vm1, %v1324_v17, %v8861_v26  ;;  %v1394_v62 = vadd.s32 %v1392_v34, %v1386_v40  ;;  %vm1395_vm5 = vc.u32 %v1393_v23, %v1389_v58 }
 0x18e   : > { %v1110_v22 = vshrl.u32 %v1092_v31, %v1108_v14  ;;  %v1113_v57 = vadd.s32 127, %v1112_v18  ;;  %v8937_v32 = vmul.f32 %v181_v12, %v8132_v6  ;;  %v1368_v41 = vshrl.u32 %v1363_v47, 16 }
 0x18f   : > { %v1396_v31 = vsel %vm1395_vm5, 1, %v12563_v0  ;;  %v1346_v27 = vsel %vm1342_vm10, %v8855_v19, %v1345_v20  ;;  %v1388_v63 = vshrl.u32 %v1384_v10, 16  ;;  %v1122_v17 = vsub.s32 4, %v8873_v8 }
 0x190   : > { %12635 = vst [vmem:[#allocation9_spill] sm:$0xff] %v8937_v32  ;;  %v1111_v50 = vor.u32 %v1110_v22, %v1109_v59  ;;  %v1114_v55 = vshll.u32 %v1113_v57, 23  ;;  %v1156_v56 = vand.u32 2139095040, %v8937_v32  ;;  %v1378_v26 = vadd.s32 %v1377_v21, %v1368_v41 }
 0x191   : > { %2767 = vxpose.xlu1.b32.start.end [1/1] (short) %v687_v33, 128  ;;  %v1398_v33 = vadd.s32 %v1396_v31, %v1394_v62  ;;  %v1390_v1 = vshrl.u32 %v1385_v53, 16  ;;  %v1347_v40 = vsel %vm1341_vm14, %v1344_v38, %v1346_v27  ;;  %v1397_v14 = vadd.s32 %v1393_v23, %v1389_v58 }
 0x192   : > { %v1115_v30 = vor.u32 4788187, %v1114_v55  ;;  %v1157_v59 = vshrl.u32 %v1156_v56, 23  ;;  %v1118_v16 = vcvt.s32.f32 %v1111_v50  ;;  %vm3215_vm6 = vcmask 64512  }
 0x193   : > { %v1399_v2 = vadd.s32 %v1398_v33, %v1388_v63  ;;  %v12546_v10 = vand.u32 2147483647, %v8937_v32  ;;  %vm1000_vm1 = vcmp.lt.s32.totalorder %v8684_v5, 0  ;;  %vm1403_vm10 = vc.u32 %v1378_v26, %v1397_v14 }
 0x194   : > { %v1116_v47 = vand.u32 2147483647, %v1115_v30  ;;  %v7824_v53 = vadd.s32 4294967169, %v1157_v59  ;;  %v1123_v58 = vsel %vm1000_vm1, %v1122_v17, %v8873_v8  ;;  %vm999_vm14 = vcmp.le.f32.partialorder %v998_v61, 0.7853982 }
 0x195   : > { %v1400_v20 = vadd.s32 %v1399_v2, %v1390_v1  ;;  %v1401_v57 = vmul.u32 %v8886_v28, %v1347_v40  ;;  %v1160_v34 = vand.u32 8388607, %v12546_v10  ;;  %v183_v38 = vperm.slane %v8957_v25, 0 }
 0x196   : > { %v1119_v18 = vmul.f32 %v1118_v16, %v1116_v47  ;;  %v1163_v12 = vadd.s32 1, %v7824_v53  ;;  %v8966_v50 = vsel %vm999_vm14, 0, %v1123_v58  ;;  %vm1141_vm15 = vweird.f32 %v8684_v5 }
 0x197   : > { %v2815_v19 = vpop.trf.xlu2  ;;  %v1404_v23 = vadd.s32 1, %v1400_v20  ;;  %12636 = vst [vmem:[#allocation10_spill] sm:$0xff] %v8966_v50  ;;  %v1142_v28 = vadd.s32 3, %v8966_v50  ;;  %v1161_v33 = vor.u32 8388608, %v1160_v34  ;;  %v8971_v56 = vmul.f32 %v183_v38, %v8132_v6 }
 0x198   : > { %3264 = vst.msk [vmem:[%s8950_s24 + $0x180] sm:$0xff] %vm3215_vm6, %v2815_v19  ;;  %v1120_v22 = vxor.u32 2147483648, %v1119_v18  ;;  %vm1164_vm3 = vcmp.gt.s32.totalorder %v1163_v12, 0  ;;  %v8980_v19 = vadd.s32 %v1397_v14, %v1378_v26 }
 0x199   : > { %v1405_v21 = vsel %vm1403_vm10, %v1404_v23, %v1400_v20  ;;  %v1165_v55 = vsel %vm1164_vm3, %v1163_v12, 0  ;;  %12637 = vst [vmem:[#allocation11_spill] sm:$0xff] %v8971_v56  ;;  %v8978_v40 = vand.u32 3, %v1142_v28  ;;  %v8982_v20 = vshll.u32 %v1161_v33, 8 }
 0x19a   : > { %v1121_v62 = vsel %vm1000_vm1, %v1120_v22, %v1119_v18  ;;  %v1406_v8 = vadd.s32 %v1405_v21, %v1401_v57  ;;  %v1167_v31 = vand.u32 31, %v1165_v55  ;;  %v12554_v53 = vand.u32 2147483647, %v8971_v56 }
 0x19b   : > { %v1124_v41 = vsel %vm999_vm14, %v8684_v5, %v1121_v62  ;;  %v1466_v12 = vand.u32 2139095040, %v8971_v56  ;;  %v8988_v22 = vshrl.u32 %v1165_v55, 5  ;;  %vm1145_vm7 = vcmp.eq.s32.totalorder %v8978_v40, 0 }
 0x19c   : > { %v1126_v61 = vmul.f32 %v1124_v41, %v1124_v41  ;;  %v1407_v27 = vadd.s32 536870912, %v1406_v8  ;;  %v1168_v2 = vsub.s32 32, %v1167_v31  ;;  %v1173_v55 = vshll.u32 %v12559_v39, %v1167_v31 }
 0x19d   : > { %v1179_v28 = vshll.u32 %v12550_v46, %v1167_v31  ;;  %vm1148_vm13 = vcmp.eq.s32.totalorder %v8978_v40, 2  ;;  %vm1144_vm8 = vcmp.lt.s32.totalorder %v8978_v40, 2  ;;  %v9014_v4 = vshrl.u32 %v1466_v12, 23 }
 0x19e   : > { %v1127_v30 = vmul.f32 -0.001358992, %v1126_v61  ;;  %v1134_v17 = vmul.f32 -0.00019511016, %v1126_v61  ;;  %v8975_v1 = vshrl.u32 %v1407_v27, 30  ;;  %v1171_v57 = vshrl.u32 %v12559_v39, %v1168_v2 }
 0x19f   : > { %v2816_v63 = vpop.trf.xlu2  ;;  %v1174_v21 = vshrl.u32 %v12557_v43, %v1168_v2  ;;  %v1180_v26 = vshrl.u32 %v12555_v49, %v1168_v2  ;;  %v1177_v27 = vshrl.u32 %v12550_v46, %v1168_v2  ;;  %vm1188_vm11 = vcmp.lt.s32.totalorder %v8988_v22, 4 }
 0x1a0   : > { %3265 = vst.msk [vmem:[%s8950_s24 + $0x188] sm:$0xff] %vm3215_vm6, %v2816_v63  ;;  %v1128_v59 = vadd.f32 0.041655596, %v1127_v30  ;;  %v1135_v47 = vadd.f32 0.008332121, %v1134_v17  ;;  %v1409_v16 = vshll.u32 %v8975_v1, 30  ;;  %v1183_v17 = vshrl.u32 %v12548_v52, %v1168_v2 }
 0x1a1   : > { %vm1185_vm5 = vcmp.lt.s32.totalorder %v8988_v22, 1  ;;  %vm1186_vm1 = vcmp.lt.s32.totalorder %v8988_v22, 2  ;;  %vm1187_vm10 = vcmp.lt.s32.totalorder %v8988_v22, 3  ;;  %vm1310_vm14 = vcmp.lt.s32.totalorder %v8691_v60, 0 }
 0x1a2   : > { %v1129_v18 = vmul.f32 %v1128_v59, %v1126_v61  ;;  %v1136_v58 = vmul.f32 %v1135_v47, %v1126_v61  ;;  %v8985_v23 = vsub.s32 %v1406_v8, %v1409_v16  ;;  %v1170_v8 = vshll.u32 %v12552_v37, %v1167_v31 }
 0x1a3   : > { %v1176_v16 = vshll.u32 %v12557_v43, %v1167_v31  ;;  %vm9064_vm3 = vcmp.le.f32.partialorder %v1308_v42, 0.7853982 }
 0x1a4   : > { %v1130_v14 = vadd.f32 -0.4999988, %v1129_v18  ;;  %v1137_v34 = vadd.f32 -0.16666654, %v1136_v58  ;;  %vm1411_vm4 = vcmp.lt.s32.totalorder %v8985_v23, 0  ;;  %v1412_v38 = vsub.s32 0, %v8985_v23 }
 0x1a5   : > { %v1172_v47 = vor.u32 %v1171_v57, %v1170_v8  ;;  %v1181_v18 = vor.u32 %v1180_v26, %v1179_v28  ;;  %v1178_v8 = vor.u32 %v1177_v27, %v1176_v16 }
 0x1a6   : > { %v1131_v63 = vmul.f32 %v1130_v14, %v1126_v61  ;;  %v1138_v33 = vmul.f32 %v1137_v34, %v1126_v61  ;;  %v1413_v30 = vsel %vm1411_vm4, %v1412_v38, %v8985_v23  ;;  %v9009_v14 = vor.u32 %v1174_v21, %v1173_v55 }
 0x1a7   : > { %v2817_v62 = vpop.trf.xlu2  ;;  %v1414_v59 = vclz %v1413_v30  ;;  %v1182_v61 = vshll.u32 %v12555_v49, %v1167_v31  ;;  %v1202_v38 = vand.u32 65535, %v8982_v20  ;;  %v1169_v21 = vshrl.u32 %v12552_v37, %v1168_v2 }
 0x1a8   : > { %3266 = vst.msk [vmem:[%s8950_s24 + $0x190] sm:$0xff] %vm3215_vm6, %v2817_v62  ;;  %v9006_v58 = vadd.f32 1.0, %v1131_v63  ;;  %v1139_v51 = vadd.f32 1.0, %v1138_v33  ;;  %v1203_v62 = vshrl.u32 %v8982_v20, 16  ;;  %v1194_v31 = vsel %vm1188_vm11, %v1181_v18, 920167782 }
 0x1a9   : > { %v7828_v34 = vadd.s32 4294967294, %v1414_v59  ;;  %v1184_v26 = vor.u32 %v1183_v17, %v1182_v61  ;;  %v1193_v55 = vsel %vm1185_vm5, %v1172_v47, %v9009_v14  ;;  %v1195_v33 = vsel %vm1187_vm10, %v1178_v8, %v1194_v31 }
 0x1aa   : > { %12638 = vst [vmem:[#allocation12_spill] sm:$0xff] %v9006_v58  ;;  %v9016_v57 = vmul.f32 %v1139_v51, %v1124_v41  ;;  %v12547_v51 = vxor.u32 2147483648, %v9006_v58  ;;  %v1197_v30 = vsel %vm1185_vm5, %v9009_v14, %v1178_v8 }
 0x1ab   : > { %vm7829_vm0 = vcmp.lt.s32.totalorder %v7828_v34, 0  ;;  %v1198_v17 = vsel %vm1188_vm11, %v1184_v26, 1326507024 }
 0x1ac   : > { %12639 = vst [vmem:[#allocation13_spill] sm:$0xff] %v9016_v57  ;;  %v12545_v12 = vxor.u32 2147483648, %v9016_v57  ;;  %v1417_v41 = vsel %vm7829_vm0, 0, %v7828_v34  ;;  %v1196_v34 = vsel %vm1186_vm1, %v1193_v55, %v1195_v33  ;;  %v1150_v31 = vsel %vm1148_vm13, %v12547_v51, %v9016_v57 }
 0x1ad   : > { %v1418_v28 = vsub.s32 32, %v1417_v41  ;;  %v1422_v63 = vsub.s32 4294967266, %v1417_v41  ;;  %v1419_v59 = vshll.u32 %v8985_v23, %v1417_v41  ;;  %v1227_v10 = vshrl.u32 %v1196_v34, 16 }
 0x1ae   : > { %v1147_v2 = vsel %vm1145_vm7, %v9006_v58, %v12545_v12  ;;  %v1226_v12 = vand.u32 65535, %v1196_v34  ;;  %v1432_v55 = vsub.s32 4, %v8975_v1 }
 0x1af   : > { %v2818_v27 = vpop.trf.xlu2  ;;  %v1420_v16 = vshrl.u32 %v8980_v19, %v1418_v28  ;;  %v1423_v61 = vadd.s32 127, %v1422_v63  ;;  %v1151_v23 = vsel %vm1144_vm8, %v1147_v2, %v1150_v31  ;;  %v1229_v33 = vmul.u32 %v1227_v10, %v1202_v38 }
 0x1b0   : > { %3267 = vst.msk [vmem:[%s8950_s24 + $0x198] sm:$0xff] %vm3215_vm6, %v2818_v27  ;;  %v1199_v27 = vsel %vm1187_vm10, %v1181_v18, %v1198_v17  ;;  %v1189_v2 = vsel %vm1185_vm5, %v1169_v21, %v1172_v47  ;;  %v1230_v17 = vmul.u32 %v1226_v12, %v1203_v62  ;;  %v1228_v34 = vmul.u32 %v1226_v12, %v1202_v38 }
 0x1b1   : > { %v1421_v19 = vor.u32 %v1420_v16, %v1419_v59  ;;  %v1424_v26 = vshll.u32 %v1423_v61, 23  ;;  %v1200_v41 = vsel %vm1186_vm1, %v1197_v30, %v1199_v27  ;;  %v1190_v30 = vsel %vm1188_vm11, %v1178_v8, 2102212464 }
 0x1b2   : > { %v1204_v28 = vand.u32 65535, %v1200_v41  ;;  %v1205_v63 = vshrl.u32 %v1200_v41, 16  ;;  %v1152_v59 = vsel %vm1141_vm15, nan, %v1151_v23  ;;  %v1231_v27 = vmul.u32 %v1227_v10, %v1203_v62 }
 0x1b3   : > { %v1425_v40 = vor.u32 4788187, %v1424_v26  ;;  %v1428_v31 = vcvt.s32.f32 %v1421_v19  ;;  %v1232_v26 = vshll.u32 %v1229_v33, 16  ;;  %v1234_v21 = vshll.u32 %v1230_v17, 16 }
 0x1b4   : > { %v1207_v16 = vmul.u32 %v1205_v63, %v1202_v38  ;;  %v1208_v61 = vmul.u32 %v1204_v28, %v1203_v62  ;;  %v1206_v41 = vmul.u32 %v1204_v28, %v1202_v38  ;;  %v1209_v52 = vmul.u32 %v1205_v63, %v1203_v62 }
 0x1b5   : > { %v2751_v51 = vpop.trf.xlu1  ;;  %v1426_v42 = vand.u32 2147483647, %v1425_v40  ;;  %vm1236_vm4 = vc.u32 %v1228_v34, %v1232_v26  ;;  %v1238_v37 = vadd.s32 %v1232_v26, %v1228_v34  ;;  %v7830_v12 = vadd.s32 4294967169, %v9014_v4 }
 0x1b6   : > { %3232 = vst.msk [vmem:[%s8950_s24 + $0x80] sm:$0xff] %vm3215_vm6, %v2751_v51  ;;  %v1210_v47 = vshll.u32 %v1207_v16, 16  ;;  %v1212_v8 = vshll.u32 %v1208_v61, 16  ;;  %v1237_v51 = vsel %vm1236_vm4, 1, %v12563_v0  ;;  %v1191_v62 = vsel %vm1187_vm10, %v9009_v14, %v1190_v30 }
 0x1b7   : > { %2863 = vxpose.xlu0.b32.start.end [1/1] (short) %v1152_v59, 128  ;;  %v1429_v46 = vmul.f32 %v1428_v31, %v1426_v42  ;;  %v1239_v19 = vadd.s32 %v1237_v51, %v1231_v27  ;;  %vm1240_vm13 = vc.u32 %v1238_v37, %v1234_v21  ;;  %v2819_v38 = vpop.trf.xlu2  ;;  %v1233_v42 = vshrl.u32 %v1229_v33, 16 }
 0x1b8   : > { %vm1214_vm7 = vc.u32 %v1206_v41, %v1210_v47  ;;  %v1216_v23 = vadd.s32 %v1210_v47, %v1206_v41  ;;  %v1241_v63 = vsel %vm1240_vm13, 1, %v12563_v0  ;;  %3268 = vst.msk [vmem:[%s8950_s24 + $0x1a0] sm:$0xff] %vm3215_vm6, %v2819_v38  ;;  %v1473_v27 = vadd.s32 1, %v7830_v12 }
 0x1b9   : > { %v1430_v40 = vxor.u32 2147483648, %v1429_v46  ;;  %v1215_v10 = vsel %vm1214_vm7, 1, %v12563_v0  ;;  %v1243_v31 = vadd.s32 %v1241_v63, %v1239_v19  ;;  %v1433_v26 = vsel %vm1310_vm14, %v1432_v55, %v8975_v1 }
 0x1ba   : > { %v1217_v28 = vadd.s32 %v1215_v10, %v1209_v52  ;;  %vm1218_vm8 = vc.u32 %v1216_v23, %v1212_v8  ;;  %v1211_v52 = vshrl.u32 %v1207_v16, 16  ;;  %v1235_v47 = vshrl.u32 %v1230_v17, 16 }
 0x1bb   : > { %v1431_v4 = vsel %vm1310_vm14, %v1430_v40, %v1429_v46  ;;  %v1219_v34 = vsel %vm1218_vm8, 1, %v12563_v0  ;;  %v1244_v46 = vadd.s32 %v1243_v31, %v1233_v42  ;;  %v1192_v33 = vsel %vm1186_vm1, %v1189_v2, %v1191_v62 }
 0x1bc   : > { %v1434_v14 = vsel %vm9064_vm3, %v8691_v60, %v1431_v4  ;;  %v1221_v30 = vadd.s32 %v1219_v34, %v1217_v28  ;;  %v1213_v8 = vshrl.u32 %v1208_v61, 16  ;;  %vm1474_vm11 = vcmp.gt.s32.totalorder %v1473_v27, 0 }
 0x1bd   : > { %v2752_v59 = vpop.trf.xlu1  ;;  %v1436_v41 = vmul.f32 %v1434_v14, %v1434_v14  ;;  %v1245_v10 = vadd.s32 %v1244_v46, %v1235_v47  ;;  %v1475_v16 = vsel %vm1474_vm11, %v1473_v27, 0  ;;  %v9100_v12 = vsel %vm9064_vm3, 0, %v1433_v26 }
 0x1be   : > { %3233 = vst.msk [vmem:[%s8950_s24 + $0x88] sm:$0xff] %vm3215_vm6, %v2752_v59  ;;  %v1222_v23 = vadd.s32 %v1221_v30, %v1211_v52  ;;  %v9104_v1 = vadd.s32 %v1238_v37, %v1234_v21  ;;  %v1477_v55 = vand.u32 31, %v1475_v16  ;;  %v1246_v38 = vmul.u32 %v8982_v20, %v1192_v33 }
 0x1bf   : > { %v1437_v51 = vmul.f32 -0.001358992, %v1436_v41  ;;  %v1444_v40 = vmul.f32 -0.00019511016, %v1436_v41  ;;  %v1249_v17 = vadd.s32 1, %v1245_v10  ;;  %v2820_v61 = vpop.trf.xlu2  ;;  %v4694_v63 = vand.u32 3, %v9100_v12 }
 0x1c0   : > { %v9102_v19 = vadd.s32 %v1222_v23, %v1213_v8  ;;  %v1470_v18 = vand.u32 8388607, %v12554_v53  ;;  %v9111_v62 = vsub.s32 32, %v1477_v55  ;;  %3269 = vst.msk [vmem:[%s8950_s24 + $0x1a8] sm:$0xff] %vm3215_vm6, %v2820_v61  ;;  %v9126_v33 = vshrl.u32 %v1475_v16, 5 }
 0x1c1   : > { %v1438_v22 = vadd.f32 0.041655596, %v1437_v51  ;;  %v1445_v2 = vadd.f32 0.008332121, %v1444_v40  ;;  %vm4695_vm5 = vcmp.lt.s32.totalorder %v4694_v63, 2  ;;  %v1483_v51 = vshll.u32 %v12559_v39, %v1477_v55 }
 0x1c2   : > { %vm1248_vm0 = vc.u32 %v9102_v19, %v9104_v1  ;;  %v1481_v31 = vshrl.u32 %v12559_v39, %v9111_v62  ;;  %v1484_v52 = vshrl.u32 %v12557_v43, %v9111_v62  ;;  %v1471_v26 = vor.u32 8388608, %v1470_v18 }
 0x1c3   : > { %v1439_v37 = vmul.f32 %v1438_v22, %v1436_v41  ;;  %v1446_v21 = vmul.f32 %v1445_v2, %v1436_v41  ;;  %v1250_v59 = vsel %vm1248_vm0, %v1249_v17, %v1245_v10  ;;  %v1490_v47 = vshrl.u32 %v12555_v49, %v9111_v62 }
 0x1c4   : > { %v1251_v4 = vadd.s32 %v1250_v59, %v1246_v38  ;;  %v12642_v8 = vmov 683565275   ;;  %v1485_v18 = vor.u32 %v1484_v52, %v1483_v51  ;;  %v1486_v16 = vshll.u32 %v12557_v43, %v1477_v55 }
 0x1c5   : > { %v2753_v28 = vpop.trf.xlu1  ;;  %v1440_v20 = vadd.f32 -0.4999988, %v1439_v37  ;;  %v1447_v34 = vadd.f32 -0.16666654, %v1446_v21  ;;  %v1480_v23 = vshll.u32 %v12642_v8, %v1477_v55  ;;  %vm4696_vm1 = vcmp.eq.s32.totalorder %v4694_v63, 0 }
 0x1c6   : > { %3234 = vst.msk [vmem:[%s8950_s24 + $0x90] sm:$0xff] %vm3215_vm6, %v2753_v28  ;;  %v1252_v42 = vadd.s32 536870912, %v1251_v4  ;;  %vm4699_vm10 = vcmp.eq.s32.totalorder %v4694_v63, 2  ;;  %vm1495_vm3 = vcmp.lt.s32.totalorder %v9126_v33, 1  ;;  %vm1498_vm4 = vcmp.lt.s32.totalorder %v9126_v33, 4 }
 0x1c7   : > { %v1441_v30 = vmul.f32 %v1440_v20, %v1436_v41  ;;  %v1448_v27 = vmul.f32 %v1447_v34, %v1436_v41  ;;  %v12643_v41 = vmov 2102212464   ;;  %v2821_v17 = vpop.trf.xlu2  ;;  %v1482_v38 = vor.u32 %v1481_v31, %v1480_v23 }
 0x1c8   : > { %v9124_v46 = vshrl.u32 %v1252_v42, 30  ;;  %v1487_v22 = vshrl.u32 %v12643_v41, %v9111_v62  ;;  %v1489_v2 = vshll.u32 %v12643_v41, %v1477_v55  ;;  %3270 = vst.msk [vmem:[%s8950_s24 + $0x1b0] sm:$0xff] %vm3215_vm6, %v2821_v17  ;;  %v12644_v20 = vmov 1326507024  }
 0x1c9   : > { %v9130_v40 = vadd.f32 1.0, %v1441_v30  ;;  %v1449_v10 = vadd.f32 1.0, %v1448_v27  ;;  %v1493_v34 = vshrl.u32 %v12644_v20, %v9111_v62  ;;  %v9148_v31 = vshll.u32 %v1471_v26, 8 }
 0x1ca   : > { %v1254_v61 = vshll.u32 %v9124_v46, 30  ;;  %v1491_v59 = vor.u32 %v1490_v47, %v1489_v2  ;;  %v1488_v30 = vor.u32 %v1487_v22, %v1486_v16  ;;  %v1492_v27 = vshll.u32 %v12555_v49, %v1477_v55 }
 0x1cb   : > { %v9139_v37 = vmul.f32 %v1449_v10, %v1434_v14  ;;  %v12561_v21 = vxor.u32 2147483648, %v9130_v40  ;;  %v1503_v23 = vsel %vm1495_vm3, %v1482_v38, %v1485_v18  ;;  %vm1451_vm7 = vweird.f32 %v8691_v60 }
 0x1cc   : > { %v9146_v42 = vsub.s32 %v1251_v4, %v1254_v61  ;;  %v1494_v26 = vor.u32 %v1493_v34, %v1492_v27  ;;  %v1504_v55 = vsel %vm1498_vm4, %v1491_v59, 920167782  ;;  %vm1497_vm13 = vcmp.lt.s32.totalorder %v9126_v33, 3 }
 0x1cd   : > { %v2754_v28 = vpop.trf.xlu1  ;;  %v12562_v52 = vxor.u32 2147483648, %v9139_v37  ;;  %v4701_v14 = vsel %vm4699_vm10, %v12561_v21, %v9139_v37  ;;  %vm1496_vm8 = vcmp.lt.s32.totalorder %v9126_v33, 2  ;;  %v1505_v17 = vsel %vm1497_vm13, %v1488_v30, %v1504_v55 }
 0x1ce   : > { %3235 = vst.msk [vmem:[%s8950_s24 + $0x98] sm:$0xff] %vm3215_vm6, %v2754_v28  ;;  %vm1256_vm14 = vcmp.lt.s32.totalorder %v9146_v42, 0  ;;  %v1257_v47 = vsub.s32 0, %v9146_v42  ;;  %v9178_v16 = vadd.s32 3, %v9100_v12  ;;  %v1506_v63 = vsel %vm1496_vm8, %v1503_v23, %v1505_v17 }
 0x1cf   : > { %v4698_v4 = vsel %vm4696_vm1, %v9130_v40, %v12562_v52  ;;  %v2822_v61 = vpop.trf.xlu2  ;;  %v1512_v28 = vand.u32 65535, %v9148_v31  ;;  %v185_v34 = vperm.slane %v8957_v25, 2  ;;  %v1536_v55 = vand.u32 65535, %v1506_v63 }
 0x1d0   : > { %v4702_v51 = vsel %vm4695_vm5, %v4698_v4, %v4701_v14  ;;  %v1258_v10 = vsel %vm1256_vm14, %v1257_v47, %v9146_v42  ;;  %3271 = vst.msk [vmem:[%s8950_s24 + $0x1b8] sm:$0xff] %vm3215_vm6, %v2822_v61  ;;  %v1507_v47 = vsel %vm1495_vm3, %v1485_v18, %v1488_v30  ;;  %v1508_v4 = vsel %vm1498_vm4, %v1494_v26, 1326507024 }
 0x1d1   : > { %v9172_v22 = vsel %vm1451_vm7, nan, %v4702_v51  ;;  %v1259_v2 = vclz %v1258_v10  ;;  %v1247_v12 = vadd.s32 %v9104_v1, %v9102_v19  ;;  %v1509_v23 = vsel %vm1497_vm13, %v1491_v59, %v1508_v4 }
 0x1d2   : > { %12645 = vst [vmem:[#allocation14_spill] sm:$0xff] %v9172_v22  ;;  %v1513_v51 = vshrl.u32 %v9148_v31, 16  ;;  %v1537_v10 = vshrl.u32 %v1506_v63, 16  ;;  %v1500_v17 = vsel %vm1498_vm4, %v1488_v30, 2102212464  ;;  %v1510_v26 = vsel %vm1496_vm8, %v1507_v47, %v1509_v23 }
 0x1d3   : > { %v7825_v27 = vadd.s32 4294967294, %v1259_v2  ;;  %v1479_v2 = vshrl.u32 %v12642_v8, %v9111_v62  ;;  %v1515_v19 = vshrl.u32 %v1510_v26, 16  ;;  %v1501_v62 = vsel %vm1497_vm13, %v1485_v18, %v1500_v17 }
 0x1d4   : > { %v1539_v1 = vmul.u32 %v1537_v10, %v1512_v28  ;;  %v1540_v4 = vmul.u32 %v1536_v55, %v1513_v51  ;;  %v1538_v43 = vmul.u32 %v1536_v55, %v1512_v28  ;;  %v1541_v0 = vmul.u32 %v1537_v10, %v1513_v51 }
 0x1d5   : > { %v2755_v14 = vpop.trf.xlu1  ;;  %vm7826_vm11 = vcmp.lt.s32.totalorder %v7825_v27, 0  ;;  %v1499_v63 = vsel %vm1495_vm3, %v1479_v2, %v1482_v38  ;;  %v1517_v49 = vmul.u32 %v1515_v19, %v1512_v28  ;;  %v1519_v38 = vmul.u32 %v1515_v19, %v1513_v51 }
 0x1d6   : > { %3236 = vst.msk [vmem:[%s8950_s24 + $0xa0] sm:$0xff] %vm3215_vm6, %v2755_v14  ;;  %v1262_v61 = vsel %vm7826_vm11, 0, %v7825_v27  ;;  %v1514_v14 = vand.u32 65535, %v1510_v26  ;;  %v1542_v26 = vshll.u32 %v1539_v1, 16  ;;  %v1544_v5 = vshll.u32 %v1540_v4, 16 }
 0x1d7   : > { %v1263_v53 = vsub.s32 32, %v1262_v61  ;;  %v1267_v59 = vsub.s32 4294967266, %v1262_v61  ;;  %v1264_v27 = vshll.u32 %v9146_v42, %v1262_v61  ;;  %v2823_v21 = vpop.trf.xlu2  ;;  %v1520_v2 = vshll.u32 %v1517_v49, 16 }
 0x1d8   : > { %v1518_v30 = vmul.u32 %v1514_v14, %v1513_v51  ;;  %v1516_v52 = vmul.u32 %v1514_v14, %v1512_v28  ;;  %3272 = vst.msk [vmem:[%s8950_s24 + $0x1c0] sm:$0xff] %vm3215_vm6, %v2823_v21  ;;  %vm1546_vm5 = vc.u32 %v1538_v43, %v1542_v26  ;;  %v1548_v42 = vadd.s32 %v1542_v26, %v1538_v43 }
 0x1d9   : > { %v1265_v47 = vshrl.u32 %v1247_v12, %v1263_v53  ;;  %v1268_v23 = vadd.s32 127, %v1267_v59  ;;  %v9217_v51 = vmul.f32 %v185_v34, %v8132_v6  ;;  %v1521_v43 = vshrl.u32 %v1517_v49, 16 }
 0x1da   : > { %v1522_v55 = vshll.u32 %v1518_v30, 16  ;;  %vm1524_vm0 = vc.u32 %v1516_v52, %v1520_v2  ;;  %v1526_v53 = vadd.s32 %v1520_v2, %v1516_v52  ;;  %vm1550_vm10 = vc.u32 %v1548_v42, %v1544_v5 }
 0x1db   : > { %v2719_v39 = vpop.trf.xlu0  ;;  %v1266_v18 = vor.u32 %v1265_v47, %v1264_v27  ;;  %v1269_v17 = vshll.u32 %v1268_v23, 23  ;;  %12647 = vst [vmem:[#allocation15_spill] sm:$0xff] %v9217_v51  ;;  %v1543_v27 = vshrl.u32 %v1539_v1, 16  ;;  %vm1155_vm14 = vcmp.lt.s32.totalorder %v8937_v32, 0 }
 0x1dc   : > { %3216 = vst.msk [vmem:[%s8950_s24] sm:$0xff] %vm3215_vm6, %v2719_v39  ;;  %v12646_v39 = vmov 0   ;;  %vm1528_vm1 = vc.u32 %v1526_v53, %v1522_v55  ;;  %v1277_v26 = vsub.s32 4, %v9124_v46  ;;  %v1453_v49 = vand.u32 3, %v9178_v16 }
 0x1dd   : > { %v2756_v22 = vpop.trf.xlu1  ;;  %v1270_v12 = vor.u32 4788187, %v1269_v17  ;;  %v1525_v61 = vsel %vm1524_vm0, 1, %v12646_v39  ;;  %v1547_v28 = vsel %vm1546_vm5, 1, %v12646_v39  ;;  %v1273_v19 = vcvt.s32.f32 %v1266_v18 }
 0x1de   : > { %3237 = vst.msk [vmem:[%s8950_s24 + $0xa8] sm:$0xff] %vm3215_vm6, %v2756_v22  ;;  %v1527_v10 = vadd.s32 %v1525_v61, %v1519_v38  ;;  %v1549_v21 = vadd.s32 %v1547_v28, %v1541_v0  ;;  %v1529_v22 = vsel %vm1528_vm1, 1, %v12646_v39  ;;  %v1551_v52 = vsel %vm1550_vm10, 1, %v12646_v39 }
 0x1df   : > { %v1271_v14 = vand.u32 2147483647, %v1270_v12  ;;  %v1776_v0 = vand.u32 2139095040, %v9217_v51  ;;  %v1523_v38 = vshrl.u32 %v1518_v30, 16  ;;  %v1545_v18 = vshrl.u32 %v1540_v4, 16 }
 0x1e0   : > { %v1531_v59 = vadd.s32 %v1529_v22, %v1527_v10  ;;  %v1553_v47 = vadd.s32 %v1551_v52, %v1549_v21  ;;  %v1502_v53 = vsel %vm1496_vm8, %v1499_v63, %v1501_v62  ;;  %v1552_v28 = vadd.s32 %v1548_v42, %v1544_v5 }
 0x1e1   : > { %v1274_v34 = vmul.f32 %v1273_v19, %v1271_v14  ;;  %v1777_v12 = vshrl.u32 %v1776_v0, 23  ;;  %v12566_v21 = vand.u32 2147483647, %v9217_v51  ;;  %v12648_v30 = vand.u32 2147483647, %v8937_v32 }
 0x1e2   : > { %v1532_v2 = vadd.s32 %v1531_v59, %v1521_v43  ;;  %v1554_v17 = vadd.s32 %v1553_v47, %v1543_v27  ;;  %v1278_v16 = vsel %vm1155_vm14, %v1277_v26, %v9124_v46  ;;  %v184_v62 = vperm.slane %v8957_v25, 1 }
 0x1e3   : > { %v2720_v23 = vpop.trf.xlu0  ;;  %v1275_v1 = vxor.u32 2147483648, %v1274_v34  ;;  %vm1154_vm3 = vcmp.le.f32.partialorder %v12648_v30, 0.7853982  ;;  %v7836_v33 = vadd.s32 4294967169, %v1777_v12  ;;  %vm1455_vm13 = vcmp.eq.s32.totalorder %v1453_v49, 0 }
 0x1e4   : > { %3217 = vst.msk [vmem:[%s8950_s24 + $0x8] sm:$0xff] %vm3215_vm6, %v2720_v23  ;;  %v1533_v61 = vadd.s32 %v1532_v2, %v1523_v38  ;;  %v1555_v10 = vadd.s32 %v1554_v17, %v1545_v18  ;;  %v1556_v14 = vmul.u32 %v9148_v31, %v1502_v53  ;;  %v12649_v22 = vxor.u32 2147483648, %v9139_v37 }
 0x1e5   : > { %v2757_v55 = vpop.trf.xlu1  ;;  %v1276_v4 = vsel %vm1155_vm14, %v1275_v1, %v1274_v34  ;;  %v1783_v19 = vadd.s32 1, %v7836_v33  ;;  %v9249_v52 = vsel %vm1154_vm3, 0, %v1278_v16  ;;  %v1780_v59 = vand.u32 8388607, %v12566_v21 }
 0x1e6   : > { %3238 = vst.msk [vmem:[%s8950_s24 + $0xb0] sm:$0xff] %vm3215_vm6, %v2757_v55  ;;  %v9240_v63 = vsel %vm1154_vm3, %v8937_v32, %v1276_v4  ;;  %vm1558_vm4 = vc.u32 %v1533_v61, %v1552_v28  ;;  %v1559_v5 = vadd.s32 1, %v1555_v10  ;;  %v1457_v46 = vsel %vm1455_vm13, %v9130_v40, %v12649_v22 }
 0x1e7   : > { %v1281_v42 = vmul.f32 %v9240_v63, %v9240_v63  ;;  %12650 = vst [vmem:[#allocation16_spill] sm:$0xff] %v9249_v52  ;;  %vm1784_vm8 = vcmp.gt.s32.totalorder %v1783_v19, 0  ;;  %vm1454_vm11 = vcmp.lt.s32.totalorder %v1453_v49, 2  ;;  %vm1458_vm0 = vcmp.eq.s32.totalorder %v1453_v49, 2 }
 0x1e8   : > { %v1560_v43 = vsel %vm1558_vm4, %v1559_v5, %v1555_v10  ;;  %v1785_v31 = vsel %vm1784_vm8, %v1783_v19, 0  ;;  %v9256_v34 = vmul.f32 %v184_v62, %v8132_v6  ;;  %v12652_v0 = vxor.u32 2147483648, %v9130_v40 }
 0x1e9   : > { %v1282_v25 = vmul.f32 -0.001358992, %v1281_v42  ;;  %v1289_v47 = vmul.f32 -0.00019511016, %v1281_v42  ;;  %v1561_v23 = vadd.s32 %v1560_v43, %v1556_v14  ;;  %v1297_v1 = vadd.s32 3, %v9249_v52 }
 0x1ea   : > { %12651 = vst [vmem:[#allocation17_spill] sm:$0xff] %v9256_v34  ;;  %v1460_v38 = vsel %vm1458_vm0, %v12652_v0, %v9139_v37  ;;  %v1787_v53 = vand.u32 31, %v1785_v31  ;;  %v1781_v30 = vor.u32 8388608, %v1780_v59  ;;  %v1621_v16 = vand.u32 2139095040, %v9256_v34 }
 0x1eb   : > { %v2721_v27 = vpop.trf.xlu0  ;;  %v1283_v2 = vadd.f32 0.041655596, %v1282_v25  ;;  %v1290_v18 = vadd.f32 0.008332121, %v1289_v47  ;;  %v1562_v17 = vadd.s32 536870912, %v1561_v23  ;;  %v1461_v55 = vsel %vm1454_vm11, %v1457_v46, %v1460_v38 }
 0x1ec   : > { %3218 = vst.msk [vmem:[%s8950_s24 + $0x10] sm:$0xff] %vm3215_vm6, %v2721_v27  ;;  %v1788_v4 = vsub.s32 32, %v1787_v53  ;;  %v1462_v5 = vsel %vm1451_vm7, nan, %v1461_v55  ;;  %v9270_v62 = vand.u32 3, %v1297_v1  ;;  %v1557_v46 = vadd.s32 %v1552_v28, %v1533_v61 }
 0x1ed   : > { %v2758_v26 = vpop.trf.xlu1  ;;  %v1284_v12 = vmul.f32 %v1283_v2, %v1281_v42  ;;  %v1291_v49 = vmul.f32 %v1290_v18, %v1281_v42  ;;  %v9264_v10 = vshrl.u32 %v1562_v17, 30  ;;  %v9275_v59 = vshll.u32 %v1781_v30, 8 }
 0x1ee   : > { %3239 = vst.msk [vmem:[%s8950_s24 + $0xb8] sm:$0xff] %vm3215_vm6, %v2758_v26  ;;  %v1790_v27 = vshll.u32 %v12642_v8, %v1787_v53  ;;  %v12653_v25 = vmov 2475754826   ;;  %v12654_v26 = vmov 2131351028   ;;  %v1622_v0 = vshrl.u32 %v1621_v16, 23 }
 0x1ef   : > { %v1285_v40 = vadd.f32 -0.4999988, %v1284_v12  ;;  %v1292_v37 = vadd.f32 -0.16666654, %v1291_v49  ;;  %v1564_v33 = vshll.u32 %v9264_v10, 30  ;;  %v1791_v47 = vshrl.u32 %v12653_v25, %v1788_v4 }
 0x1f0   : > { %v1794_v60 = vshrl.u32 %v12654_v26, %v1788_v4  ;;  %v1797_v61 = vshrl.u32 %v12643_v41, %v1788_v4  ;;  %v1799_v18 = vshll.u32 %v12643_v41, %v1787_v53  ;;  %v12655_v17 = vmov 920167782  }
 0x1f1   : > { %v1293_v22 = vmul.f32 %v1292_v37, %v1281_v42  ;;  %v9273_v43 = vsub.s32 %v1561_v23, %v1564_v33  ;;  %v1286_v38 = vmul.f32 %v1285_v40, %v1281_v42  ;;  %v1793_v23 = vshll.u32 %v12653_v25, %v1787_v53 }
 0x1f2   : > { %v1800_v55 = vshrl.u32 %v12655_v17, %v1788_v4  ;;  %v9289_v12 = vshrl.u32 %v1785_v31, 5  ;;  %v1796_v49 = vshll.u32 %v12654_v26, %v1787_v53  ;;  %v1803_v42 = vshrl.u32 %v12644_v20, %v1788_v4 }
 0x1f3   : > { %v2722_v19 = vpop.trf.xlu0  ;;  %vm1566_vm7 = vcmp.lt.s32.totalorder %v9273_v43, 0  ;;  %v1567_v2 = vsub.s32 0, %v9273_v43  ;;  %v1294_v28 = vadd.f32 1.0, %v1293_v22  ;;  %vm1303_vm5 = vcmp.eq.s32.totalorder %v9270_v62, 2 }
 0x1f4   : > { %3219 = vst.msk [vmem:[%s8950_s24 + $0x18] sm:$0xff] %vm3215_vm6, %v2722_v19  ;;  %v1792_v16 = vor.u32 %v1791_v47, %v1790_v27  ;;  %v1795_v40 = vor.u32 %v1794_v60, %v1793_v23  ;;  %v1801_v37 = vor.u32 %v1800_v55, %v1799_v18  ;;  %v9294_v33 = vadd.f32 1.0, %v1286_v38 }
 0x1f5   : > { %v1568_v1 = vsel %vm1566_vm7, %v1567_v2, %v9273_v43  ;;  %v1798_v19 = vor.u32 %v1797_v61, %v1796_v49  ;;  %v1802_v22 = vshll.u32 %v12655_v17, %v1787_v53  ;;  %v1822_v2 = vand.u32 65535, %v9275_v59 }
 0x1f6   : > { %v1569_v30 = vclz %v1568_v1  ;;  %12656 = vst [vmem:[#allocation18_spill] sm:$0xff] %v9294_v33  ;;  %v9299_v31 = vmul.f32 %v1294_v28, %v9240_v63  ;;  %vm1300_vm1 = vcmp.eq.s32.totalorder %v9270_v62, 0  ;;  %v1823_v14 = vshrl.u32 %v9275_v59, 16 }
 0x1f7   : > { %v7833_v1 = vadd.s32 4294967169, %v1622_v0  ;;  %v1804_v60 = vor.u32 %v1803_v42, %v1802_v22  ;;  %vm1805_vm10 = vcmp.lt.s32.totalorder %v9289_v12, 1  ;;  %vm1808_vm14 = vcmp.lt.s32.totalorder %v9289_v12, 4 }
 0x1f8   : > { %12657 = vst [vmem:[#allocation19_spill] sm:$0xff] %v9299_v31  ;;  %v7831_v21 = vadd.s32 4294967294, %v1569_v30  ;;  %vm1807_vm4 = vcmp.lt.s32.totalorder %v9289_v12, 3  ;;  %v1813_v63 = vsel %vm1805_vm10, %v1792_v16, %v1795_v40  ;;  %v1814_v53 = vsel %vm1808_vm14, %v1801_v37, 920167782 }
 0x1f9   : > { %v12567_v0 = vxor.u32 2147483648, %v9294_v33  ;;  %v1789_v61 = vshrl.u32 %v12642_v8, %v1788_v4  ;;  %v1815_v28 = vsel %vm1807_vm4, %v1798_v19, %v1814_v53  ;;  %v12568_v23 = vxor.u32 2147483648, %v9299_v31 }
 0x1fa   : > { %vm7832_vm3 = vcmp.lt.s32.totalorder %v7831_v21, 0  ;;  %vm1806_vm13 = vcmp.lt.s32.totalorder %v9289_v12, 2  ;;  %v1818_v4 = vsel %vm1808_vm14, %v1804_v60, 1326507024  ;;  %vm1299_vm8 = vcmp.lt.s32.totalorder %v9270_v62, 2 }
 0x1fb   : > { %v2723_v27 = vpop.trf.xlu0  ;;  %v1572_v38 = vsel %vm7832_vm3, 0, %v7831_v21  ;;  %v1816_v42 = vsel %vm1806_vm13, %v1813_v63, %v1815_v28  ;;  %v1817_v21 = vsel %vm1805_vm10, %v1795_v40, %v1798_v19  ;;  %v1810_v63 = vsel %vm1808_vm14, %v1798_v19, 2102212464 }
 0x1fc   : > { %3220 = vst.msk [vmem:[%s8950_s24 + $0x20] sm:$0xff] %vm3215_vm6, %v2723_v27  ;;  %v1573_v18 = vsub.s32 32, %v1572_v38  ;;  %v1577_v55 = vsub.s32 4294967266, %v1572_v38  ;;  %v1574_v49 = vshll.u32 %v9273_v43, %v1572_v38  ;;  %v1846_v27 = vand.u32 65535, %v1816_v42 }
 0x1fd   : > { %v1305_v43 = vsel %vm1303_vm5, %v12567_v0, %v9299_v31  ;;  %v1847_v38 = vshrl.u32 %v1816_v42, 16  ;;  %vm1465_vm11 = vcmp.lt.s32.totalorder %v8971_v56, 0  ;;  %v1809_v19 = vsel %vm1805_vm10, %v1789_v61, %v1792_v16 }
 0x1fe   : > { %2927 = vxpose.xlu2.b32.start.end [1/1] (short) %v1462_v5, 128  ;;  %v1575_v30 = vshrl.u32 %v1557_v46, %v1573_v18  ;;  %v1578_v22 = vadd.s32 127, %v1577_v55  ;;  %v1819_v5 = vsel %vm1807_vm4, %v1801_v37, %v1818_v4  ;;  %v1302_v18 = vsel %vm1300_vm1, %v9294_v33, %v12568_v23 }
 0x1ff   : > { %v1820_v53 = vsel %vm1806_vm13, %v1817_v21, %v1819_v5  ;;  %v1849_v55 = vmul.u32 %v1847_v38, %v1822_v2  ;;  %v1850_v21 = vmul.u32 %v1846_v27, %v1823_v14  ;;  %v12658_v42 = vand.u32 2147483647, %v8971_v56 }
 0x200   : > { %v1576_v46 = vor.u32 %v1575_v30, %v1574_v49  ;;  %v1579_v60 = vshll.u32 %v1578_v22, 23  ;;  %v1824_v28 = vand.u32 65535, %v1820_v53  ;;  %v1825_v37 = vshrl.u32 %v1820_v53, 16 }
 0x201   : > { %vm9348_vm0 = vcmp.le.f32.partialorder %v12658_v42, 0.7853982  ;;  %v1811_v30 = vsel %vm1807_vm4, %v1795_v40, %v1810_v63  ;;  %v1628_v5 = vadd.s32 1, %v7833_v1  ;;  %v1848_v0 = vmul.u32 %v1846_v27, %v1822_v2 }
 0x202   : > { %v1580_v4 = vor.u32 4788187, %v1579_v60  ;;  %v1827_v22 = vmul.u32 %v1825_v37, %v1822_v2  ;;  %v1828_v53 = vmul.u32 %v1824_v28, %v1823_v14  ;;  %v1851_v23 = vmul.u32 %v1847_v38, %v1823_v14 }
 0x203   : > { %v1852_v47 = vshll.u32 %v1849_v55, 16  ;;  %vm1296_vm7 = vweird.f32 %v8937_v32  ;;  %v1583_v61 = vcvt.s32.f32 %v1576_v46  ;;  %v1826_v58 = vmul.u32 %v1824_v28, %v1822_v2 }
 0x204   : > { %v1581_v16 = vand.u32 2147483647, %v1580_v4  ;;  %v1830_v57 = vshll.u32 %v1827_v22, 16  ;;  %v1829_v42 = vmul.u32 %v1825_v37, %v1823_v14  ;;  %v1832_v50 = vshll.u32 %v1828_v53, 16 }
 0x205   : > { %v1854_v33 = vshll.u32 %v1850_v21, 16  ;;  %vm1856_vm5 = vc.u32 %v1848_v0, %v1852_v47  ;;  %v1858_v27 = vadd.s32 %v1852_v47, %v1848_v0  ;;  %vm1629_vm10 = vcmp.gt.s32.totalorder %v1628_v5, 0 }
 0x206   : > { %v1584_v60 = vmul.f32 %v1583_v61, %v1581_v16  ;;  %vm1834_vm1 = vc.u32 %v1826_v58, %v1830_v57  ;;  %v1836_v31 = vadd.s32 %v1830_v57, %v1826_v58  ;;  %v1857_v40 = vsel %vm1856_vm5, 1, %v12646_v39 }
 0x207   : > { %v1835_v1 = vsel %vm1834_vm1, 1, %v12646_v39  ;;  %v1859_v63 = vadd.s32 %v1857_v40, %v1851_v23  ;;  %v1630_v46 = vsel %vm1629_vm10, %v1628_v5, 0  ;;  %v1306_v14 = vsel %vm1299_vm8, %v1302_v18, %v1305_v43 }
 0x208   : > { %v1585_v38 = vxor.u32 2147483648, %v1584_v60  ;;  %v1837_v52 = vadd.s32 %v1835_v1, %v1829_v42  ;;  %vm1838_vm14 = vc.u32 %v1836_v31, %v1832_v50  ;;  %v1831_v2 = vshrl.u32 %v1827_v22, 16 }
 0x209   : > { %v1839_v28 = vsel %vm1838_vm14, 1, %v12646_v39  ;;  %vm1860_vm3 = vc.u32 %v1858_v27, %v1854_v33  ;;  %v1632_v47 = vand.u32 31, %v1630_v46  ;;  %v1812_v50 = vsel %vm1806_vm13, %v1809_v19, %v1811_v30 }
 0x20a   : > { %v1586_v58 = vsel %vm1465_vm11, %v1585_v38, %v1584_v60  ;;  %v1841_v57 = vadd.s32 %v1839_v28, %v1837_v52  ;;  %v1861_v37 = vsel %vm1860_vm3, 1, %v12646_v39  ;;  %v1853_v62 = vshrl.u32 %v1849_v55, 16 }
 0x20b   : > { %v9366_v0 = vsel %vm9348_vm0, %v8971_v56, %v1586_v58  ;;  %v1863_v31 = vadd.s32 %v1861_v37, %v1859_v63  ;;  %v1833_v43 = vshrl.u32 %v1828_v53, 16  ;;  %v9374_v52 = vsub.s32 32, %v1632_v47 }
 0x20c   : > { %v9372_v23 = vmul.f32 %v9366_v0, %v9366_v0  ;;  %v1842_v18 = vadd.s32 %v1841_v57, %v1831_v2  ;;  %v1307_v4 = vsel %vm1296_vm7, nan, %v1306_v14  ;;  %v1855_v22 = vshrl.u32 %v1850_v21, 16 }
 0x20d   : > { %v1864_v5 = vadd.s32 %v1863_v31, %v1853_v62  ;;  %v12661_v16 = vand.u32 2147483647, %v9256_v34  ;;  %v9384_v30 = vadd.s32 %v1858_v27, %v1854_v33  ;;  %v12662_v53 = vsub.s32 4, %v9264_v10 }
 0x20e   : > { %v1592_v12 = vmul.f32 -0.001358992, %v9372_v23  ;;  %v1599_v19 = vmul.f32 -0.00019511016, %v9372_v23  ;;  %v9382_v55 = vadd.s32 %v1842_v18, %v1833_v43  ;;  %v1866_v60 = vmul.u32 %v9275_v59, %v1812_v50 }
 0x20f   : > { %v1625_v61 = vand.u32 8388607, %v12661_v16  ;;  %v1588_v42 = vsel %vm1465_vm11, %v12662_v53, %v9264_v10  ;;  %v1865_v21 = vadd.s32 %v1864_v5, %v1855_v22  ;;  %v1639_v40 = vshrl.u32 %v12654_v26, %v9374_v52  ;;  %v2824_v22 = vpop.trf.xlu2  ;;  %v2759_v53 = vpop.trf.xlu1 }
 0x210   : > { %v1600_v1 = vadd.f32 0.008332121, %v1599_v19  ;;  %vm1868_vm4 = vc.u32 %v9382_v55, %v9384_v30  ;;  %v9396_v63 = vshrl.u32 %v1630_v46, 5  ;;  %v1642_v33 = vshrl.u32 %v12643_v41, %v9374_v52  ;;  %3273 = vst.msk [vmem:[%s8950_s24 + $0x1c8] sm:$0xff] %vm3215_vm6, %v2824_v22 }
 0x211   : > { %2895 = vxpose.xlu1.b32.start.end [1/1] (short) %v1307_v4, 128  ;;  %v1869_v27 = vadd.s32 1, %v1865_v21  ;;  %v1635_v38 = vshll.u32 %v12642_v8, %v1632_v47  ;;  %v1636_v10 = vshrl.u32 %v12653_v25, %v9374_v52  ;;  %v1638_v59 = vshll.u32 %v12653_v25, %v1632_v47  ;;  %v2724_v4 = vpop.trf.xlu0  ;;  %3240 = vst.msk [vmem:[%s8950_s24 + $0xc0] sm:$0xff] %vm3215_vm6, %v2759_v53 }
 0x212   : > { %v1593_v14 = vadd.f32 0.041655596, %v1592_v12  ;;  %v1641_v2 = vshll.u32 %v12654_v26, %v1632_v47  ;;  %v1644_v28 = vshll.u32 %v12643_v41, %v1632_v47  ;;  %v1645_v46 = vshrl.u32 %v12655_v17, %v9374_v52  ;;  %3221 = vst.msk [vmem:[%s8950_s24 + $0x28] sm:$0xff] %vm3215_vm6, %v2724_v4 }
 0x213   : > { %v1870_v58 = vsel %vm1868_vm4, %v1869_v27, %v1865_v21  ;;  %v9408_v57 = vor.u32 %v1639_v40, %v1638_v59  ;;  %v1647_v37 = vshll.u32 %v12655_v17, %v1632_v47  ;;  %v1648_v50 = vshrl.u32 %v12644_v20, %v9374_v52 }
 0x214   : > { %v1601_v62 = vmul.f32 %v1600_v1, %v9372_v23  ;;  %v1871_v31 = vadd.s32 %v1870_v58, %v1866_v60  ;;  %v1643_v43 = vor.u32 %v1642_v33, %v1641_v2  ;;  %v1646_v18 = vor.u32 %v1645_v46, %v1644_v28 }
 0x215   : > { %v1626_v5 = vor.u32 8388608, %v1625_v61  ;;  %v9414_v16 = vor.u32 %v1636_v10, %v1635_v38  ;;  %v1649_v12 = vor.u32 %v1648_v50, %v1647_v37  ;;  %v9418_v19 = vsel %vm9348_vm0, 0, %v1588_v42 }
 0x216   : > { %12663 = vst [vmem:[#allocation20_spill] sm:$0xff] %v9418_v19  ;;  %v1594_v47 = vmul.f32 %v1593_v14, %v9372_v23  ;;  %v1872_v21 = vadd.s32 536870912, %v1871_v31  ;;  %vm1653_vm13 = vcmp.lt.s32.totalorder %v9396_v63, 4  ;;  %vm1650_vm8 = vcmp.lt.s32.totalorder %v9396_v63, 1 }
 0x217   : > { %v1659_v61 = vsel %vm1653_vm13, %v1646_v18, 920167782  ;;  %v1663_v49 = vsel %vm1653_vm13, %v1649_v12, 1326507024  ;;  %v1602_v42 = vadd.f32 -0.16666654, %v1601_v62  ;;  %v1662_v40 = vsel %vm1650_vm8, %v9408_v57, %v1643_v43  ;;  %v2825_v50 = vpop.trf.xlu2  ;;  %v2760_v12 = vpop.trf.xlu1 }
 0x218   : > { %v9433_v60 = vshrl.u32 %v1872_v21, 30  ;;  %vm1652_vm11 = vcmp.lt.s32.totalorder %v9396_v63, 3  ;;  %v1658_v1 = vsel %vm1650_vm8, %v9414_v16, %v9408_v57  ;;  %v9447_v38 = vshll.u32 %v1626_v5, 8  ;;  %3274 = vst.msk [vmem:[%s8950_s24 + $0x1d0] sm:$0xff] %vm3215_vm6, %v2825_v50 }
 0x219   : > { %v1660_v33 = vsel %vm1652_vm11, %v1643_v43, %v1659_v61  ;;  %v1664_v27 = vsel %vm1652_vm11, %v1646_v18, %v1663_v49  ;;  %v1595_v10 = vadd.f32 -0.4999988, %v1594_v47  ;;  %vm1651_vm0 = vcmp.lt.s32.totalorder %v9396_v63, 2  ;;  %v2725_v37 = vpop.trf.xlu0  ;;  %3241 = vst.msk [vmem:[%s8950_s24 + $0xc8] sm:$0xff] %vm3215_vm6, %v2760_v12 }
 0x21a   : > { %v1874_v59 = vshll.u32 %v9433_v60, 30  ;;  %v1607_v14 = vadd.s32 3, %v9418_v19  ;;  %v1665_v2 = vsel %vm1651_vm0, %v1662_v40, %v1664_v27  ;;  %v1603_v28 = vmul.f32 %v1602_v42, %v9372_v23  ;;  %3222 = vst.msk [vmem:[%s8950_s24 + $0x30] sm:$0xff] %vm3215_vm6, %v2725_v37 }
 0x21b   : > { %v1661_v58 = vsel %vm1651_vm0, %v1658_v1, %v1660_v33  ;;  %v1667_v62 = vand.u32 65535, %v9447_v38  ;;  %v1668_v18 = vshrl.u32 %v9447_v38, 16  ;;  %v1669_v4 = vand.u32 65535, %v1665_v2 }
 0x21c   : > { %v9455_v46 = vsub.s32 %v1871_v31, %v1874_v59  ;;  %v1670_v22 = vshrl.u32 %v1665_v2, 16  ;;  %v1596_v5 = vmul.f32 %v1595_v10, %v9372_v23  ;;  %v9466_v47 = vand.u32 3, %v1607_v14 }
 0x21d   : > { %v9470_v21 = vmul.u32 %v1669_v4, %v1668_v18  ;;  %v1692_v61 = vshrl.u32 %v1661_v58, 16  ;;  %v1604_v49 = vadd.f32 1.0, %v1603_v28  ;;  %v9477_v42 = vshrl.u32 %v12642_v8, %v9374_v52 }
 0x21e   : > { %vm1876_vm5 = vcmp.lt.s32.totalorder %v9455_v46, 0  ;;  %v1877_v31 = vsub.s32 0, %v9455_v46  ;;  %v1672_v53 = vmul.u32 %v1670_v22, %v1667_v62  ;;  %v1691_v40 = vand.u32 65535, %v1661_v58 }
 0x21f   : > { %v1867_v1 = vadd.s32 %v9384_v30, %v9382_v55  ;;  %v1671_v27 = vmul.u32 %v1669_v4, %v1667_v62  ;;  %v9481_v59 = vadd.f32 1.0, %v1596_v5  ;;  %v1655_v14 = vsel %vm1653_vm13, %v1643_v43, 2102212464 }
 0x220   : > { %v1878_v23 = vsel %vm1876_vm5, %v1877_v31, %v9455_v46  ;;  %v1675_v10 = vshll.u32 %v1672_v53, 16  ;;  %v1674_v2 = vmul.u32 %v1670_v22, %v1668_v18  ;;  %v1677_v28 = vshll.u32 %v9470_v21, 16  ;;  %v2826_v22 = vpop.trf.xlu2 }
 0x221   : > { %v1879_v33 = vclz %v1878_v23  ;;  %12664 = vst [vmem:[#allocation21_spill] sm:$0xff] %v9481_v59  ;;  %v1694_v50 = vmul.u32 %v1692_v61, %v1667_v62  ;;  %v9487_v58 = vmul.f32 %v1604_v49, %v9366_v0  ;;  %v1693_v30 = vmul.u32 %v1691_v40, %v1667_v62  ;;  %v2726_v43 = vpop.trf.xlu0  ;;  %v2761_v0 = vpop.trf.xlu1 }
 0x222   : > { %vm1679_vm1 = vc.u32 %v1671_v27, %v1675_v10  ;;  %v1681_v52 = vadd.s32 %v1675_v10, %v1671_v27  ;;  %v9490_v4 = vmul.u32 %v1691_v40, %v1668_v18  ;;  %vm1610_vm10 = vcmp.eq.s32.totalorder %v9466_v47, 0  ;;  %3223 = vst.msk [vmem:[%s8950_s24 + $0x38] sm:$0xff] %vm3215_vm6, %v2726_v43 }
 0x223   : > { %v7837_v37 = vadd.s32 4294967294, %v1879_v33  ;;  %12665 = vst [vmem:[#allocation22_spill] sm:$0xff] %v9487_v58  ;;  %v1680_v55 = vsel %vm1679_vm1, 1, %v12646_v39  ;;  %v1697_v12 = vshll.u32 %v1694_v50, 16  ;;  %v1676_v49 = vshrl.u32 %v1672_v53, 16 }
 0x224   : > { %v1682_v5 = vadd.s32 %v1680_v55, %v1674_v2  ;;  %vm1683_vm3 = vc.u32 %v1681_v52, %v1677_v28  ;;  %v1696_v62 = vmul.u32 %v1692_v61, %v1668_v18  ;;  %3275 = vst.msk [vmem:[%s8950_s24 + $0x1d8] sm:$0xff] %vm3215_vm6, %v2826_v22  ;;  %v1699_v10 = vshll.u32 %v9490_v4, 16 }
 0x225   : > { %vm7838_vm14 = vcmp.lt.s32.totalorder %v7837_v37, 0  ;;  %v1684_v23 = vsel %vm1683_vm3, 1, %v12646_v39  ;;  %vm1609_vm4 = vcmp.lt.s32.totalorder %v9466_v47, 2  ;;  %3242 = vst.msk [vmem:[%s8950_s24 + $0xd0] sm:$0xff] %vm3215_vm6, %v2761_v0  ;;  %vm1701_vm13 = vc.u32 %v1693_v30, %v1697_v12 }
 0x226   : > { %v1882_v31 = vsel %vm7838_vm14, 0, %v7837_v37  ;;  %v1686_v27 = vadd.s32 %v1684_v23, %v1682_v5  ;;  %v1703_v28 = vadd.s32 %v1697_v12, %v1693_v30  ;;  %v9504_v37 = vld [vmem:[%s8116_s20 + $0x8] sm:$0xff]  ;;  %v1702_v55 = vsel %vm1701_vm13, 1, %v12646_v39 }
 0x227   : > { %v1883_v40 = vsub.s32 32, %v1882_v31  ;;  %v1887_v33 = vsub.s32 4294967266, %v1882_v31  ;;  %v1884_v2 = vshll.u32 %v9455_v46, %v1882_v31  ;;  %v186_v53 = vperm.slane %v9504_v37, 3 }
 0x228   : > { %v1687_v52 = vadd.s32 %v1686_v27, %v1676_v49  ;;  %v12580_v43 = vxor.u32 2147483648, %v9487_v58  ;;  %v1704_v22 = vadd.s32 %v1702_v55, %v1696_v62  ;;  %vm1705_vm5 = vc.u32 %v1703_v28, %v1699_v10  ;;  %v2827_v62 = vpop.trf.xlu2 }
 0x229   : > { %v1885_v18 = vshrl.u32 %v1867_v1, %v1883_v40  ;;  %v1888_v61 = vadd.s32 127, %v1887_v33  ;;  %v9510_v5 = vmul.f32 %v186_v53, %v8132_v6  ;;  %v1678_v30 = vshrl.u32 %v9470_v21, 16  ;;  %v2727_v40 = vpop.trf.xlu0  ;;  %v2762_v53 = vpop.trf.xlu1  ;;  %3276 = vst.msk [vmem:[%s8950_s24 + $0x1e0] sm:$0xff] %vm3215_vm6, %v2827_v62 }
 0x22a   : > { %v1706_v12 = vsel %vm1705_vm5, 1, %v12646_v39  ;;  %v12579_v1 = vxor.u32 2147483648, %v9481_v59  ;;  %v1698_v31 = vshrl.u32 %v1694_v50, 16  ;;  %v1654_v27 = vsel %vm1650_vm8, %v9477_v42, %v9414_v16  ;;  %3224 = vst.msk [vmem:[%s8950_s24 + $0x40] sm:$0xff] %vm3215_vm6, %v2727_v40 }
 0x22b   : > { %12666 = vst [vmem:[#allocation23_spill] sm:$0xff] %v9510_v5  ;;  %v1886_v46 = vor.u32 %v1885_v18, %v1884_v2  ;;  %v1889_v0 = vshll.u32 %v1888_v61, 23  ;;  %v1708_v49 = vadd.s32 %v1706_v12, %v1704_v22  ;;  %v1931_v23 = vand.u32 2139095040, %v9510_v5 }
 0x22c   : > { %v1656_v21 = vsel %vm1652_vm11, %v9408_v57, %v1655_v14  ;;  %v9523_v2 = vadd.s32 %v1687_v52, %v1678_v30  ;;  %v1612_v50 = vsel %vm1610_vm10, %v9481_v59, %v12580_v43  ;;  %v1700_v18 = vshrl.u32 %v9490_v4, 16  ;;  %3243 = vst.msk [vmem:[%s8950_s24 + $0xd8] sm:$0xff] %vm3215_vm6, %v2762_v53 }
 0x22d   : > { %v1890_v33 = vor.u32 4788187, %v1889_v0  ;;  %v1709_v61 = vadd.s32 %v1708_v49, %v1698_v31  ;;  %v1932_v55 = vshrl.u32 %v1931_v23, 23  ;;  %vm1613_vm8 = vcmp.eq.s32.totalorder %v9466_v47, 2 }
 0x22e   : > { %v1893_v16 = vcvt.s32.f32 %v1886_v46  ;;  %v9536_v42 = vadd.s32 %v1703_v28, %v1699_v10  ;;  %v1615_v14 = vsel %vm1613_vm8, %v12579_v1, %v9487_v58  ;;  %v1657_v52 = vsel %vm1651_vm0, %v1654_v27, %v1656_v21 }
 0x22f   : > { %v1891_v57 = vand.u32 2147483647, %v1890_v33  ;;  %v1710_v4 = vadd.s32 %v1709_v61, %v1700_v18  ;;  %v7839_v22 = vadd.s32 4294967169, %v1932_v55  ;;  %v1616_v0 = vsel %vm1609_vm4, %v1612_v50, %v1615_v14 }
 0x230   : > { %vm1713_vm11 = vc.u32 %v9523_v2, %v9536_v42  ;;  %v12581_v28 = vand.u32 2147483647, %v9510_v5  ;;  %vm12616_vm1 = vweird.f32 %v8971_v56  ;;  %vm1775_vm10 = vcmp.lt.s32.totalorder %v9217_v51, 0  ;;  %v2828_v62 = vpop.trf.xlu2 }
 0x231   : > { %v1894_v30 = vmul.f32 %v1893_v16, %v1891_v57  ;;  %v1714_v10 = vadd.s32 1, %v1710_v4  ;;  %v1938_v46 = vadd.s32 1, %v7839_v22  ;;  %v1711_v12 = vmul.u32 %v9447_v38, %v1657_v52  ;;  %v2728_v40 = vpop.trf.xlu0  ;;  %v2763_v50 = vpop.trf.xlu1  ;;  %3277 = vst.msk [vmem:[%s8950_s24 + $0x1e8] sm:$0xff] %vm3215_vm6, %v2828_v62 }
 0x232   : > { %v1617_v47 = vsel %vm12616_vm1, nan, %v1616_v0  ;;  %v12667_v31 = vand.u32 2147483647, %v9217_v51  ;;  %v1897_v38 = vsub.s32 4, %v9433_v60  ;;  %3225 = vst.msk [vmem:[%s8950_s24 + $0x48] sm:$0xff] %vm3215_vm6, %v2728_v40  ;;  %v1712_v56 = vadd.s32 %v9536_v42, %v9523_v2 }
 0x233   : > { %v1895_v63 = vxor.u32 2147483648, %v1894_v30  ;;  %v1715_v23 = vsel %vm1713_vm11, %v1714_v10, %v1710_v4  ;;  %vm1939_vm14 = vcmp.gt.s32.totalorder %v1938_v46, 0  ;;  %v1935_v18 = vand.u32 8388607, %v12581_v28  ;;  %3244 = vst.msk [vmem:[%s8950_s24 + $0xe0] sm:$0xff] %vm3215_vm6, %v2763_v50 }
 0x234   : > { %vm9557_vm0 = vcmp.le.f32.partialorder %v12667_v31, 0.7853982  ;;  %v1716_v27 = vadd.s32 %v1715_v23, %v1711_v12  ;;  %v1940_v21 = vsel %vm1939_vm14, %v1938_v46, 0  ;;  %v1898_v16 = vsel %vm1775_vm10, %v1897_v38, %v9433_v60 }
 0x235   : > { %v1896_v33 = vsel %vm1775_vm10, %v1895_v63, %v1894_v30  ;;  %v1942_v61 = vand.u32 31, %v1940_v21  ;;  %v188_v4 = vperm.slane %v9504_v37, 5  ;;  %v1936_v22 = vor.u32 8388608, %v1935_v18 }
 0x236   : > { %v9569_v53 = vsel %vm9557_vm0, %v9217_v51, %v1896_v33  ;;  %v1717_v55 = vadd.s32 536870912, %v1716_v27  ;;  %v9592_v30 = vsel %vm9557_vm0, 0, %v1898_v16  ;;  %vm1620_vm10 = vcmp.lt.s32.totalorder %v9256_v34, 0 }
 0x237   : > { %2959 = vxpose.xlu0.b32.start.end [1/1] (short) %v1617_v47, 128  ;;  %v9579_v57 = vmul.f32 %v9569_v53, %v9569_v53  ;;  %v9586_v52 = vsub.s32 32, %v1942_v61  ;;  %12670 = vst [vmem:[#allocation24_spill] sm:$0xff] %v9592_v30  ;;  %v9601_v31 = vmul.f32 %v188_v4, %v8132_v6  ;;  %v9611_v33 = vshll.u32 %v1936_v22, 8 }
 0x238   : > { %v9584_v14 = vshrl.u32 %v1717_v55, 30  ;;  %v2829_v63 = vpop.trf.xlu2  ;;  %v1945_v38 = vshll.u32 %v12642_v8, %v1942_v61  ;;  %v1954_v16 = vshll.u32 %v12643_v41, %v1942_v61  ;;  %v1957_v4 = vshll.u32 %v12655_v17, %v1942_v61 }
 0x239   : > { %v1902_v10 = vmul.f32 -0.001358992, %v9579_v57  ;;  %v2729_v46 = vpop.trf.xlu0  ;;  %v1909_v60 = vmul.f32 -0.00019511016, %v9579_v57  ;;  %v1946_v47 = vshrl.u32 %v12653_v25, %v9586_v52  ;;  %v2764_v49 = vpop.trf.xlu1  ;;  %v1949_v23 = vshrl.u32 %v12654_v26, %v9586_v52  ;;  %3278 = vst.msk [vmem:[%s8950_s24 + $0x1f0] sm:$0xff] %vm3215_vm6, %v2829_v63 }
 0x23a   : > { %v1719_v0 = vshll.u32 %v9584_v14, 30  ;;  %3226 = vst.msk [vmem:[%s8950_s24 + $0x50] sm:$0xff] %vm3215_vm6, %v2729_v46  ;;  %v1955_v40 = vshrl.u32 %v12655_v17, %v9586_v52  ;;  %v1958_v62 = vshrl.u32 %v12644_v20, %v9586_v52  ;;  %v1952_v50 = vshrl.u32 %v12643_v41, %v9586_v52 }
 0x23b   : > { %3245 = vst.msk [vmem:[%s8950_s24 + $0xe8] sm:$0xff] %vm3215_vm6, %v2764_v49  ;;  %v1903_v18 = vadd.f32 0.041655596, %v1902_v10  ;;  %v1910_v22 = vadd.f32 0.008332121, %v1909_v60  ;;  %v9627_v46 = vor.u32 %v1946_v47, %v1945_v38  ;;  %v1951_v63 = vshll.u32 %v12654_v26, %v1942_v61 }
 0x23c   : > { %v9596_v12 = vsub.s32 %v1716_v27, %v1719_v0  ;;  %v1948_v27 = vshll.u32 %v12653_v25, %v1942_v61  ;;  %v9625_v0 = vshrl.u32 %v1940_v21, 5  ;;  %v1956_v28 = vor.u32 %v1955_v40, %v1954_v16 }
 0x23d   : > { %v1959_v10 = vor.u32 %v1958_v62, %v1957_v4  ;;  %v9634_v49 = vadd.s32 3, %v9592_v30  ;;  %v1953_v21 = vor.u32 %v1952_v50, %v1951_v63  ;;  %v1904_v47 = vmul.f32 %v1903_v18, %v9579_v57 }
 0x23e   : > { %vm1721_vm3 = vcmp.lt.s32.totalorder %v9596_v12, 0  ;;  %v1722_v55 = vsub.s32 0, %v9596_v12  ;;  %v9631_v43 = vor.u32 %v1949_v23, %v1948_v27  ;;  %v1977_v61 = vand.u32 65535, %v9611_v33 }
 0x23f   : > { %v2241_v23 = vand.u32 2139095040, %v9601_v31  ;;  %v1911_v62 = vmul.f32 %v1910_v22, %v9579_v57  ;;  %vm1960_vm4 = vcmp.lt.s32.totalorder %v9625_v0, 1  ;;  %vm1963_vm13 = vcmp.lt.s32.totalorder %v9625_v0, 4 }
 0x240   : > { %v1723_v1 = vsel %vm1721_vm3, %v1722_v55, %v9596_v12  ;;  %v2830_v27 = vpop.trf.xlu2  ;;  %vm1962_vm5 = vcmp.lt.s32.totalorder %v9625_v0, 3  ;;  %v1968_v2 = vsel %vm1960_vm4, %v9627_v46, %v9631_v43  ;;  %v1969_v42 = vsel %vm1963_vm13, %v1956_v28, 920167782 }
 0x241   : > { %v1724_v60 = vclz %v1723_v1  ;;  %v2730_v40 = vpop.trf.xlu0  ;;  %v2765_v1 = vpop.trf.xlu1  ;;  %v1973_v50 = vsel %vm1963_vm13, %v1959_v10, 1326507024  ;;  %3279 = vst.msk [vmem:[%s8950_s24 + $0x1f8] sm:$0xff] %vm3215_vm6, %v2830_v27  ;;  %vm1961_vm11 = vcmp.lt.s32.totalorder %v9625_v0, 2  ;;  %v1970_v18 = vsel %vm1962_vm5, %v1953_v21, %v1969_v42 }
 0x242   : > { %3227 = vst.msk [vmem:[%s8950_s24 + $0x58] sm:$0xff] %vm3215_vm6, %v2730_v40  ;;  %v1972_v16 = vsel %vm1960_vm4, %v9631_v43, %v1953_v21  ;;  %v1905_v4 = vadd.f32 -0.4999988, %v1904_v47  ;;  %v1971_v63 = vsel %vm1961_vm11, %v1968_v2, %v1970_v18  ;;  %v1974_v10 = vsel %vm1962_vm5, %v1956_v28, %v1973_v50 }
 0x243   : > { %v7834_v55 = vadd.s32 4294967294, %v1724_v60  ;;  %3246 = vst.msk [vmem:[%s8950_s24 + $0xf0] sm:$0xff] %vm3215_vm6, %v2765_v1  ;;  %v1978_v27 = vshrl.u32 %v9611_v33, 16  ;;  %v2242_v38 = vshrl.u32 %v2241_v23, 23  ;;  %v1912_v42 = vadd.f32 -0.16666654, %v1911_v62 }
 0x244   : > { %v1975_v30 = vsel %vm1961_vm11, %v1972_v16, %v1974_v10  ;;  %v2001_v59 = vand.u32 65535, %v1971_v63  ;;  %v2002_v1 = vshrl.u32 %v1971_v63, 16  ;;  %v9675_v18 = vmul.f32 %v1905_v4, %v9579_v57 }
 0x245   : > { %vm7835_vm8 = vcmp.lt.s32.totalorder %v7834_v55, 0  ;;  %v1979_v2 = vand.u32 65535, %v1975_v30  ;;  %v1944_v28 = vshrl.u32 %v12642_v8, %v9586_v52  ;;  %v1980_v23 = vshrl.u32 %v1975_v30, 16 }
 0x246   : > { %v1727_v22 = vsel %vm7835_vm8, 0, %v7834_v55  ;;  %v2004_v62 = vmul.u32 %v2002_v1, %v1977_v61  ;;  %v1913_v4 = vmul.f32 %v1912_v42, %v9579_v57  ;;  %v1965_v52 = vsel %vm1963_vm13, %v1953_v21, 2102212464 }
 0x247   : > { %v1728_v60 = vsub.s32 32, %v1727_v22  ;;  %v1732_v40 = vsub.s32 4294967266, %v1727_v22  ;;  %v1729_v47 = vshll.u32 %v9596_v12, %v1727_v22  ;;  %v9679_v63 = vmul.u32 %v1979_v2, %v1978_v27 }
 0x248   : > { %v2847_v19 = vpop.trf.xlu2  ;;  %v9681_v12 = vmul.u32 %v2001_v59, %v1978_v27  ;;  %v1982_v30 = vmul.u32 %v1980_v23, %v1977_v61  ;;  %v2007_v22 = vshll.u32 %v2004_v62, 16  ;;  %v2006_v32 = vmul.u32 %v2002_v1, %v1978_v27 }
 0x249   : > { %v1730_v55 = vshrl.u32 %v1712_v56, %v1728_v60  ;;  %v1733_v58 = vadd.s32 127, %v1732_v40  ;;  %v2731_v50 = vpop.trf.xlu0  ;;  %v2766_v56 = vpop.trf.xlu1  ;;  %3280 = vst.msk [vmem:[%s8950_s24 + $0x200] sm:$0xff] %vm3215_vm6, %v2847_v19  ;;  %v1987_v21 = vshll.u32 %v9679_v63, 16 }
 0x24a   : > { %3228 = vst.msk [vmem:[%s8950_s24 + $0x60] sm:$0xff] %vm3215_vm6, %v2731_v50  ;;  %v2003_v50 = vmul.u32 %v2001_v59, %v1977_v61  ;;  %v1985_v42 = vshll.u32 %v1982_v30, 16  ;;  %v2009_v19 = vshll.u32 %v9681_v12, 16 }
 0x24b   : > { %v1731_v16 = vor.u32 %v1730_v55, %v1729_v47  ;;  %v1734_v10 = vshll.u32 %v1733_v58, 23  ;;  %v12671_v58 = vand.u32 2147483647, %v9256_v34  ;;  %v1981_v47 = vmul.u32 %v1979_v2, %v1977_v61  ;;  %3247 = vst.msk [vmem:[%s8950_s24 + $0xf8] sm:$0xff] %vm3215_vm6, %v2766_v56 }
 0x24c   : > { %v1984_v55 = vmul.u32 %v1980_v23, %v1978_v27  ;;  %vm2011_vm14 = vc.u32 %v2003_v50, %v2007_v22  ;;  %v2013_v54 = vadd.s32 %v2007_v22, %v2003_v50  ;;  %v7845_v2 = vadd.s32 4294967169, %v2242_v38 }
 0x24d   : > { %vm9693_vm0 = vcmp.le.f32.partialorder %v12671_v58, 0.7853982  ;;  %v1735_v40 = vor.u32 4788187, %v1734_v10  ;;  %v1738_v57 = vcvt.s32.f32 %v1731_v16  ;;  %vm1989_vm3 = vc.u32 %v1981_v47, %v1985_v42 }
 0x24e   : > { %v1991_v58 = vadd.s32 %v1985_v42, %v1981_v47  ;;  %v2012_v36 = vsel %vm2011_vm14, 1, %v12646_v39  ;;  %v1990_v59 = vsel %vm1989_vm3, 1, %v12646_v39  ;;  %vm2015_vm13 = vc.u32 %v2013_v54, %v2009_v19 }
 0x24f   : > { %v1736_v29 = vand.u32 2147483647, %v1735_v40  ;;  %v2014_v61 = vadd.s32 %v2012_v36, %v2006_v32  ;;  %v1964_v27 = vsel %vm1960_vm4, %v1944_v28, %v9627_v46  ;;  %v1992_v1 = vadd.s32 %v1990_v59, %v1984_v55 }
 0x250   : > { %vm1993_vm8 = vc.u32 %v1991_v58, %v1987_v21  ;;  %v2016_v16 = vsel %vm2015_vm13, 1, %v12646_v39  ;;  %v2848_v56 = vpop.trf.xlu2  ;;  %v1966_v32 = vsel %vm1962_vm5, %v9631_v43, %v1965_v52  ;;  %v1986_v46 = vshrl.u32 %v1982_v30, 16 }
 0x251   : > { %v1739_v23 = vmul.f32 %v1738_v57, %v1736_v29  ;;  %v2732_v10 = vpop.trf.xlu0  ;;  %v1994_v38 = vsel %vm1993_vm8, 1, %v12646_v39  ;;  %v2008_v29 = vshrl.u32 %v2004_v62, 16  ;;  %v2018_v40 = vadd.s32 %v2016_v16, %v2014_v61  ;;  %v2783_v36 = vpop.trf.xlu1  ;;  %3281 = vst.msk [vmem:[%s8950_s24 + $0x208] sm:$0xff] %vm3215_vm6, %v2848_v56 }
 0x252   : > { %3229 = vst.msk [vmem:[%s8950_s24 + $0x68] sm:$0xff] %vm3215_vm6, %v2732_v10  ;;  %v1996_v28 = vadd.s32 %v1994_v38, %v1992_v1  ;;  %v2248_v47 = vadd.s32 1, %v7845_v2  ;;  %v1914_v55 = vadd.f32 1.0, %v1913_v4  ;;  %v2010_v57 = vshrl.u32 %v9681_v12, 16 }
 0x253   : > { %v1740_v22 = vxor.u32 2147483648, %v1739_v23  ;;  %v2019_v62 = vadd.s32 %v2018_v40, %v2008_v29  ;;  %3248 = vst.msk [vmem:[%s8950_s24 + $0x100] sm:$0xff] %vm3215_vm6, %v2783_v36  ;;  %v1988_v43 = vshrl.u32 %v9679_v63, 16  ;;  %v1967_v30 = vsel %vm1961_vm11, %v1964_v27, %v1966_v32 }
 0x254   : > { %v1997_v52 = vadd.s32 %v1996_v28, %v1986_v46  ;;  %vm2249_vm4 = vcmp.gt.s32.totalorder %v2248_v47, 0  ;;  %v9734_v2 = vadd.s32 %v2013_v54, %v2009_v19  ;;  %v9737_v59 = vadd.f32 1.0, %v9675_v18 }
 0x255   : > { %v1741_v50 = vsel %vm1620_vm10, %v1740_v22, %v1739_v23  ;;  %v2020_v12 = vadd.s32 %v2019_v62, %v2010_v57  ;;  %v2250_v21 = vsel %vm2249_vm4, %v2248_v47, 0  ;;  %v9740_v63 = vand.u32 3, %v9634_v49 }
 0x256   : > { %v9723_v42 = vsel %vm9693_vm0, %v9256_v34, %v1741_v50  ;;  %v9732_v58 = vadd.s32 %v1997_v52, %v1988_v43  ;;  %v2252_v23 = vand.u32 31, %v2250_v21  ;;  %12674 = vst [vmem:[#allocation25_spill] sm:$0xff] %v9737_v59  ;;  %v1742_v61 = vsub.s32 4, %v9584_v14 }
 0x257   : > { %v9728_v4 = vmul.f32 %v9723_v42, %v9723_v42  ;;  %v2024_v1 = vadd.s32 1, %v2020_v12  ;;  %v9744_v0 = vmul.f32 %v1914_v55, %v9569_v53  ;;  %v2021_v27 = vmul.u32 %v9611_v33, %v1967_v30 }
 0x258   : > { %vm2023_vm5 = vc.u32 %v9732_v58, %v9734_v2  ;;  %v9749_v54 = vsub.s32 32, %v2252_v23  ;;  %v2849_v19 = vpop.trf.xlu2  ;;  %v12676_v10 = vand.u32 2147483647, %v9601_v31  ;;  %vm1920_vm11 = vcmp.eq.s32.totalorder %v9740_v63, 0 }
 0x259   : > { %12675 = vst [vmem:[#allocation26_spill] sm:$0xff] %v9744_v0  ;;  %v2733_v18 = vpop.trf.xlu0  ;;  %v1754_v16 = vmul.f32 -0.00019511016, %v9728_v4  ;;  %v2025_v49 = vsel %vm2023_vm5, %v2024_v1, %v2020_v12  ;;  %v2784_v53 = vpop.trf.xlu1  ;;  %v12593_v33 = vxor.u32 2147483648, %v9737_v59  ;;  %v1743_v38 = vsel %vm1620_vm10, %v1742_v61, %v9584_v14 }
 0x25a   : > { %v2245_v56 = vand.u32 8388607, %v12676_v10  ;;  %3230 = vst.msk [vmem:[%s8950_s24 + $0x70] sm:$0xff] %vm3215_vm6, %v2733_v18  ;;  %v2026_v22 = vadd.s32 %v2025_v49, %v2021_v27  ;;  %v1747_v29 = vmul.f32 -0.001358992, %v9728_v4  ;;  %v12594_v40 = vxor.u32 2147483648, %v9744_v0 }
 0x25b   : > { %3282 = vst.msk [vmem:[%s8950_s24 + $0x210] sm:$0xff] %vm3215_vm6, %v2849_v19  ;;  %v2256_v32 = vshrl.u32 %v12653_v25, %v9749_v54  ;;  %v2259_v46 = vshrl.u32 %v12654_v26, %v9749_v54  ;;  %v1755_v28 = vadd.f32 0.008332121, %v1754_v16  ;;  %v2255_v55 = vshll.u32 %v12642_v8, %v2252_v23 }
 0x25c   : > { %3249 = vst.msk [vmem:[%s8950_s24 + $0x108] sm:$0xff] %vm3215_vm6, %v2784_v53  ;;  %v2027_v36 = vadd.s32 536870912, %v2026_v22  ;;  %v2246_v47 = vor.u32 8388608, %v2245_v56  ;;  %v2265_v14 = vshrl.u32 %v12655_v17, %v9749_v54  ;;  %v2258_v57 = vshll.u32 %v12653_v25, %v2252_v23 }
 0x25d   : > { %v2262_v62 = vshrl.u32 %v12643_v41, %v9749_v54  ;;  %v2268_v43 = vshrl.u32 %v12644_v20, %v9749_v54  ;;  %vm1919_vm10 = vcmp.lt.s32.totalorder %v9740_v63, 2  ;;  %v1748_v52 = vadd.f32 0.041655596, %v1747_v29 }
 0x25e   : > { %v9774_v50 = vshrl.u32 %v2027_v36, 30  ;;  %v9782_v30 = vshrl.u32 %v2250_v21, 5  ;;  %v2261_v12 = vshll.u32 %v12654_v26, %v2252_v23  ;;  %v2264_v61 = vshll.u32 %v12643_v41, %v2252_v23 }
 0x25f   : > { %v9787_v27 = vor.u32 %v2256_v32, %v2255_v55  ;;  %v9789_v18 = vor.u32 %v2259_v46, %v2258_v57  ;;  %v2267_v19 = vshll.u32 %v12655_v17, %v2252_v23  ;;  %vm1923_vm14 = vcmp.eq.s32.totalorder %v9740_v63, 2 }
 0x260   : > { %v2029_v1 = vshll.u32 %v9774_v50, 30  ;;  %v2850_v49 = vpop.trf.xlu2  ;;  %v9795_v21 = vsel %vm9693_vm0, 0, %v1743_v38  ;;  %v1756_v10 = vmul.f32 %v1755_v28, %v9728_v4  ;;  %v2266_v56 = vor.u32 %v2265_v14, %v2264_v61 }
 0x261   : > { %v2734_v16 = vpop.trf.xlu0  ;;  %12677 = vst [vmem:[#allocation27_spill] sm:$0xff] %v9795_v21  ;;  %v2785_v53 = vpop.trf.xlu1  ;;  %v1925_v29 = vsel %vm1923_vm14, %v12593_v33, %v9744_v0  ;;  %v9805_v36 = vor.u32 %v2262_v62, %v2261_v12  ;;  %v2269_v32 = vor.u32 %v2268_v43, %v2267_v19  ;;  %v1922_v60 = vsel %vm1920_vm11, %v9737_v59, %v12594_v40 }
 0x262   : > { %3231 = vst.msk [vmem:[%s8950_s24 + $0x78] sm:$0xff] %vm3215_vm6, %v2734_v16  ;;  %v9803_v23 = vsub.s32 %v2026_v22, %v2029_v1  ;;  %v1749_v38 = vmul.f32 %v1748_v52, %v9728_v4  ;;  %vm2270_vm0 = vcmp.lt.s32.totalorder %v9782_v30, 1  ;;  %v9816_v46 = vshll.u32 %v2246_v47, 8 }
 0x263   : > { %3283 = vst.msk [vmem:[%s8950_s24 + $0x218] sm:$0xff] %vm3215_vm6, %v2850_v49  ;;  %vm2273_vm13 = vcmp.lt.s32.totalorder %v9782_v30, 4  ;;  %v2278_v28 = vsel %vm2270_vm0, %v9787_v27, %v9789_v18  ;;  %v1757_v55 = vadd.f32 -0.16666654, %v1756_v10  ;;  %vm2271_vm8 = vcmp.lt.s32.totalorder %v9782_v30, 2 }
 0x264   : > { %3250 = vst.msk [vmem:[%s8950_s24 + $0x110] sm:$0xff] %vm3215_vm6, %v2785_v53  ;;  %vm2031_vm3 = vcmp.lt.s32.totalorder %v9803_v23, 0  ;;  %v2032_v22 = vsub.s32 0, %v9803_v23  ;;  %vm2272_vm4 = vcmp.lt.s32.totalorder %v9782_v30, 3  ;;  %v2279_v47 = vsel %vm2273_vm13, %v2266_v56, 920167782 }
 0x265   : > { %v2280_v57 = vsel %vm2272_vm4, %v9805_v36, %v2279_v47  ;;  %v2282_v62 = vsel %vm2270_vm0, %v9789_v18, %v9805_v36  ;;  %v2283_v43 = vsel %vm2273_vm13, %v2269_v32, 1326507024  ;;  %v187_v1 = vperm.slane %v9504_v37, 4 }
 0x266   : > { %v2033_v14 = vsel %vm2031_vm3, %v2032_v22, %v9803_v23  ;;  %v2281_v12 = vsel %vm2271_vm8, %v2278_v28, %v2280_v57  ;;  %v2284_v61 = vsel %vm2272_vm4, %v2266_v56, %v2283_v43  ;;  %vm12613_vm5 = vweird.f32 %v9217_v51 }
 0x267   : > { %v2034_v52 = vclz %v2033_v14  ;;  %v1926_v19 = vsel %vm1919_vm10, %v1922_v60, %v1925_v29  ;;  %v9850_v16 = vadd.s32 3, %v9795_v21  ;;  %v2287_v49 = vand.u32 65535, %v9816_v46 }
 0x268   : > { %v2851_v53 = vpop.trf.xlu2  ;;  %v1750_v32 = vadd.f32 -0.4999988, %v1749_v38  ;;  %v1758_v22 = vmul.f32 %v1757_v55, %v9728_v4  ;;  %v2285_v28 = vsel %vm2271_vm8, %v2282_v62, %v2284_v61  ;;  %v2288_v29 = vshrl.u32 %v9816_v46, 16 }
 0x269   : > { %v2879_v10 = vpop.trf.xlu0  ;;  %v7840_v56 = vadd.s32 4294967294, %v2034_v52  ;;  %v2786_v63 = vpop.trf.xlu1  ;;  %v2289_v60 = vand.u32 65535, %v2285_v28  ;;  %v2290_v47 = vshrl.u32 %v2285_v28, 16  ;;  %v2311_v14 = vand.u32 65535, %v2281_v12  ;;  %3284 = vst.msk [vmem:[%s8950_s24 + $0x220] sm:$0xff] %vm3215_vm6, %v2851_v53 }
 0x26a   : > { %3296 = vst.msk [vmem:[%s8950_s24 + $0x280] sm:$0xff] %vm3215_vm6, %v2879_v10  ;;  %v1927_v57 = vsel %vm12613_vm5, nan, %v1926_v19  ;;  %v2312_v38 = vshrl.u32 %v2281_v12, 16  ;;  %v9864_v55 = vmul.f32 %v187_v1, %v8132_v6  ;;  %v2022_v62 = vadd.s32 %v9734_v2, %v9732_v58 }
 0x26b   : > { %vm7841_vm11 = vcmp.lt.s32.totalorder %v7840_v56, 0  ;;  %3251 = vst.msk [vmem:[%s8950_s24 + $0x118] sm:$0xff] %vm3215_vm6, %v2786_v63  ;;  %v2292_v52 = vmul.u32 %v2290_v47, %v2287_v49  ;;  %v9870_v61 = vmul.u32 %v2289_v60, %v2288_v29  ;;  %v1751_v10 = vmul.f32 %v1750_v32, %v9728_v4 }
 0x26c   : > { %v2037_v43 = vsel %vm7841_vm11, 0, %v7840_v56  ;;  %v1759_v53 = vadd.f32 1.0, %v1758_v22  ;;  %v2291_v19 = vmul.u32 %v2289_v60, %v2287_v49  ;;  %v2313_v12 = vmul.u32 %v2311_v14, %v2287_v49 }
 0x26d   : > { %v2038_v28 = vsub.s32 32, %v2037_v43  ;;  %v2042_v33 = vsub.s32 4294967266, %v2037_v43  ;;  %v2295_v40 = vshll.u32 %v2292_v52, 16  ;;  %v9873_v1 = vmul.u32 %v2311_v14, %v2288_v29 }
 0x26e   : > { %v2039_v63 = vshll.u32 %v9803_v23, %v2037_v43  ;;  %v2314_v58 = vmul.u32 %v2312_v38, %v2287_v49  ;;  %v2294_v2 = vmul.u32 %v2290_v47, %v2288_v29  ;;  %v2297_v56 = vshll.u32 %v9870_v61, 16 }
 0x26f   : > { %v2040_v51 = vshrl.u32 %v2022_v62, %v2038_v28  ;;  %v2043_v59 = vadd.s32 127, %v2042_v33  ;;  %vm2299_vm10 = vc.u32 %v2291_v19, %v2295_v40  ;;  %v2301_v4 = vadd.s32 %v2295_v40, %v2291_v19 }
 0x270   : > { %v2852_v22 = vpop.trf.xlu2  ;;  %v2300_v21 = vsel %vm2299_vm10, 1, %v12646_v39  ;;  %v2317_v14 = vshll.u32 %v2314_v58, 16  ;;  %vm1930_vm14 = vcmp.lt.s32.totalorder %v9510_v5, 0  ;;  %v2296_v33 = vshrl.u32 %v2292_v52, 16 }
 0x271   : > { %v2880_v32 = vpop.trf.xlu0  ;;  %v2041_v0 = vor.u32 %v2040_v51, %v2039_v63  ;;  %v2044_v60 = vshll.u32 %v2043_v59, 23  ;;  %v2787_v23 = vpop.trf.xlu1  ;;  %v2302_v49 = vadd.s32 %v2300_v21, %v2294_v2  ;;  %vm2303_vm3 = vc.u32 %v2301_v4, %v2297_v56  ;;  %3285 = vst.msk [vmem:[%s8950_s24 + $0x228] sm:$0xff] %vm3215_vm6, %v2852_v22 }
 0x272   : > { %3297 = vst.msk [vmem:[%s8950_s24 + $0x288] sm:$0xff] %vm3215_vm6, %v2880_v32  ;;  %v2316_v47 = vmul.u32 %v2312_v38, %v2288_v29  ;;  %v2304_v62 = vsel %vm2303_vm3, 1, %v12646_v39  ;;  %v2319_v51 = vshll.u32 %v9873_v1, 16  ;;  %vm2321_vm11 = vc.u32 %v2313_v12, %v2317_v14 }
 0x273   : > { %v2045_v40 = vor.u32 4788187, %v2044_v60  ;;  %3252 = vst.msk [vmem:[%s8950_s24 + $0x120] sm:$0xff] %vm3215_vm6, %v2787_v23  ;;  %v2306_v59 = vadd.s32 %v2304_v62, %v2302_v49  ;;  %v2322_v43 = vsel %vm2321_vm11, 1, %v12646_v39  ;;  %v2323_v28 = vadd.s32 %v2317_v14, %v2313_v12 }
 0x274   : > { %v2086_v19 = vand.u32 2139095040, %v9864_v55  ;;  %v2048_v21 = vcvt.s32.f32 %v2041_v0  ;;  %v2254_v29 = vshrl.u32 %v12642_v8, %v9749_v54  ;;  %v2324_v38 = vadd.s32 %v2322_v43, %v2316_v47 }
 0x275   : > { %v2046_v52 = vand.u32 2147483647, %v2045_v40  ;;  %v2275_v63 = vsel %vm2273_vm13, %v9805_v36, 2102212464  ;;  %v2307_v2 = vadd.s32 %v2306_v59, %v2296_v33  ;;  %vm2325_vm10 = vc.u32 %v2323_v28, %v2319_v51 }
 0x276   : > { %v2087_v56 = vshrl.u32 %v2086_v19, 23  ;;  %v9895_v4 = vmul.f32 %v1759_v53, %v9723_v42  ;;  %v2298_v32 = vshrl.u32 %v9870_v61, 16  ;;  %v2326_v0 = vsel %vm2325_vm10, 1, %v12646_v39 }
 0x277   : > { %v2049_v12 = vmul.f32 %v2048_v21, %v2046_v52  ;;  %v9899_v22 = vadd.f32 1.0, %v1751_v10  ;;  %v2318_v54 = vshrl.u32 %v2314_v58, 16  ;;  %v2328_v60 = vadd.s32 %v2326_v0, %v2324_v38 }
 0x278   : > { %v7842_v14 = vadd.s32 4294967169, %v2087_v56  ;;  %v2853_v23 = vpop.trf.xlu2  ;;  %v2274_v42 = vsel %vm2270_vm0, %v2254_v29, %v9787_v27  ;;  %v2276_v61 = vsel %vm2272_vm4, %v9789_v18, %v2275_v63  ;;  %v9907_v53 = vadd.s32 %v2307_v2, %v2298_v32 }
 0x279   : > { %12678 = vst [vmem:[#allocation28_spill] sm:$0xff] %v9899_v22  ;;  %v2881_v36 = vpop.trf.xlu0  ;;  %v2050_v33 = vxor.u32 2147483648, %v2049_v12  ;;  %v1763_v10 = vand.u32 3, %v9850_v16  ;;  %v2320_v58 = vshrl.u32 %v9873_v1, 16  ;;  %v2329_v49 = vadd.s32 %v2328_v60, %v2318_v54 }
 0x27a   : > { %3298 = vst.msk [vmem:[%s8950_s24 + $0x290] sm:$0xff] %vm3215_vm6, %v2881_v36  ;;  %v2093_v47 = vadd.s32 1, %v7842_v14  ;;  %v12602_v40 = vxor.u32 2147483648, %v9895_v4  ;;  %v9918_v62 = vadd.s32 %v2323_v28, %v2319_v51  ;;  %v2277_v18 = vsel %vm2271_vm8, %v2274_v42, %v2276_v61 }
 0x27b   : > { %3286 = vst.msk [vmem:[%s8950_s24 + $0x230] sm:$0xff] %vm3215_vm6, %v2853_v23  ;;  %v2051_v27 = vsel %vm1930_vm14, %v2050_v33, %v2049_v12  ;;  %v2330_v59 = vadd.s32 %v2329_v49, %v2320_v58  ;;  %v12601_v16 = vxor.u32 2147483648, %v9899_v22  ;;  %v12679_v1 = vand.u32 2147483647, %v9510_v5 }
 0x27c   : > { %vm2094_vm0 = vcmp.gt.s32.totalorder %v2093_v47, 0  ;;  %vm2333_vm4 = vc.u32 %v9907_v53, %v9918_v62  ;;  %vm1765_vm3 = vcmp.eq.s32.totalorder %v1763_v10, 0  ;;  %v2331_v21 = vmul.u32 %v9816_v46, %v2277_v18 }
 0x27d   : > { %vm9927_vm13 = vcmp.le.f32.partialorder %v12679_v1, 0.7853982  ;;  %v2095_v51 = vsel %vm2094_vm0, %v2093_v47, 0  ;;  %v2334_v28 = vadd.s32 1, %v2330_v59  ;;  %v1767_v52 = vsel %vm1765_vm3, %v9899_v22, %v12602_v40 }
 0x27e   : > { %3023 = vxpose.xlu2.b32.start.end [1/1] (short) %v1927_v57, 128  ;;  %v2788_v57 = vpop.trf.xlu1  ;;  %v9936_v30 = vsel %vm9927_vm13, %v9510_v5, %v2051_v27  ;;  %v2097_v19 = vand.u32 31, %v2095_v51  ;;  %v12603_v29 = vand.u32 2147483647, %v9864_v55  ;;  %vm1768_vm8 = vcmp.eq.s32.totalorder %v1763_v10, 2 }
 0x27f   : > { %3253 = vst.msk [vmem:[%s8950_s24 + $0x128] sm:$0xff] %vm3215_vm6, %v2788_v57  ;;  %v2335_v38 = vsel %vm2333_vm4, %v2334_v28, %v2330_v59  ;;  %vm1764_vm11 = vcmp.lt.s32.totalorder %v1763_v10, 2  ;;  %v1770_v12 = vsel %vm1768_vm8, %v12601_v16, %v9895_v4  ;;  %v9950_v32 = vmul.f32 %v9936_v30, %v9936_v30 }
 0x280   : > { %v9943_v63 = vsub.s32 32, %v2097_v19  ;;  %v2854_v56 = vpop.trf.xlu2  ;;  %v2336_v0 = vadd.s32 %v2335_v38, %v2331_v21  ;;  %vm12617_vm10 = vweird.f32 %v9256_v34  ;;  %v1771_v54 = vsel %vm1764_vm11, %v1767_v52, %v1770_v12 }
 0x281   : > { %v2882_v2 = vpop.trf.xlu0  ;;  %3287 = vst.msk [vmem:[%s8950_s24 + $0x238] sm:$0xff] %vm3215_vm6, %v2854_v56  ;;  %v2090_v14 = vand.u32 8388607, %v12603_v29  ;;  %v9965_v33 = vshrl.u32 %v2095_v51, 5  ;;  %v2109_v61 = vshll.u32 %v12643_v41, %v2097_v19  ;;  %v2057_v10 = vmul.f32 -0.001358992, %v9950_v32 }
 0x282   : > { %3299 = vst.msk [vmem:[%s8950_s24 + $0x298] sm:$0xff] %vm3215_vm6, %v2882_v2  ;;  %v2337_v60 = vadd.s32 536870912, %v2336_v0  ;;  %v2101_v36 = vshrl.u32 %v12653_v25, %v9943_v63  ;;  %v2104_v23 = vshrl.u32 %v12654_v26, %v9943_v63  ;;  %v2107_v42 = vshrl.u32 %v12643_v41, %v9943_v63 }
 0x283   : > { %v2110_v57 = vshrl.u32 %v12655_v17, %v9943_v63  ;;  %v2100_v49 = vshll.u32 %v12642_v8, %v2097_v19  ;;  %v2103_v47 = vshll.u32 %v12653_v25, %v2097_v19  ;;  %v2064_v27 = vmul.f32 -0.00019511016, %v9950_v32 }
 0x284   : > { %v9973_v58 = vshrl.u32 %v2337_v60, 30  ;;  %v2106_v18 = vshll.u32 %v12654_v26, %v2097_v19  ;;  %v2113_v1 = vshrl.u32 %v12644_v20, %v9943_v63  ;;  %v2052_v51 = vsub.s32 4, %v9774_v50 }
 0x285   : > { %v2111_v59 = vor.u32 %v2110_v57, %v2109_v61  ;;  %v9983_v52 = vor.u32 %v2101_v36, %v2100_v49  ;;  %v9985_v21 = vor.u32 %v2104_v23, %v2103_v47  ;;  %v2091_v38 = vor.u32 8388608, %v2090_v14 }
 0x286   : > { %v2789_v46 = vpop.trf.xlu1  ;;  %v2339_v28 = vshll.u32 %v9973_v58, 30  ;;  %v9987_v2 = vor.u32 %v2107_v42, %v2106_v18  ;;  %v2112_v56 = vshll.u32 %v12655_v17, %v2097_v19  ;;  %v189_v12 = vperm.slane %v9504_v37, 6 }
 0x287   : > { %3254 = vst.msk [vmem:[%s8950_s24 + $0x130] sm:$0xff] %vm3215_vm6, %v2789_v46  ;;  %v1772_v61 = vsel %vm12617_vm10, nan, %v1771_v54  ;;  %v2058_v57 = vadd.f32 0.041655596, %v2057_v10  ;;  %vm2118_vm0 = vcmp.lt.s32.totalorder %v9965_v33, 4  ;;  %vm2115_vm4 = vcmp.lt.s32.totalorder %v9965_v33, 1 }
 0x288   : > { %v2855_v60 = vpop.trf.xlu2  ;;  %v9993_v16 = vsub.s32 %v2336_v0, %v2339_v28  ;;  %v2065_v36 = vadd.f32 0.008332121, %v2064_v27  ;;  %v2114_v23 = vor.u32 %v2113_v1, %v2112_v56  ;;  %v2124_v37 = vsel %vm2118_vm0, %v2111_v59, 920167782 }
 0x289   : > { %v2883_v46 = vpop.trf.xlu0  ;;  %3288 = vst.msk [vmem:[%s8950_s24 + $0x240] sm:$0xff] %vm3215_vm6, %v2855_v60  ;;  %vm2117_vm8 = vcmp.lt.s32.totalorder %v9965_v33, 3  ;;  %v2123_v0 = vsel %vm2115_vm4, %v9983_v52, %v9985_v21  ;;  %v10015_v42 = vshll.u32 %v2091_v38, 8  ;;  %v10018_v10 = vmul.f32 %v189_v12, %v8132_v6 }
 0x28a   : > { %3300 = vst.msk [vmem:[%s8950_s24 + $0x2a0] sm:$0xff] %vm3215_vm6, %v2883_v46  ;;  %vm2341_vm3 = vcmp.lt.s32.totalorder %v9993_v16, 0  ;;  %v2342_v19 = vsub.s32 0, %v9993_v16  ;;  %v2125_v54 = vsel %vm2117_vm8, %v9987_v2, %v2124_v37  ;;  %v2053_v49 = vsel %vm1930_vm14, %v2052_v51, %v9774_v50 }
 0x28b   : > { %v2059_v47 = vmul.f32 %v2058_v57, %v9950_v32  ;;  %vm2116_vm11 = vcmp.lt.s32.totalorder %v9965_v33, 2  ;;  %v2066_v18 = vmul.f32 %v2065_v36, %v9950_v32  ;;  %v2127_v28 = vsel %vm2115_vm4, %v9985_v21, %v9987_v2 }
 0x28c   : > { %v2343_v27 = vsel %vm2341_vm3, %v2342_v19, %v9993_v16  ;;  %v2126_v1 = vsel %vm2116_vm11, %v2123_v0, %v2125_v54  ;;  %v2128_v50 = vsel %vm2118_vm0, %v2114_v23, 1326507024  ;;  %v2132_v12 = vand.u32 65535, %v10015_v42 }
 0x28d   : > { %v2344_v51 = vclz %v2343_v27  ;;  %v2129_v38 = vsel %vm2117_vm8, %v2111_v59, %v2128_v50  ;;  %v2157_v56 = vshrl.u32 %v2126_v1, 16  ;;  %v2156_v46 = vand.u32 65535, %v2126_v1 }
 0x28e   : > { %v2790_v14 = vpop.trf.xlu1  ;;  %v2396_v60 = vand.u32 2139095040, %v10018_v10  ;;  %v2060_v57 = vadd.f32 -0.4999988, %v2059_v47  ;;  %v2130_v23 = vsel %vm2116_vm11, %v2127_v28, %v2129_v38  ;;  %v2133_v59 = vshrl.u32 %v10015_v42, 16 }
 0x28f   : > { %3255 = vst.msk [vmem:[%s8950_s24 + $0x138] sm:$0xff] %vm3215_vm6, %v2790_v14  ;;  %v2067_v37 = vadd.f32 -0.16666654, %v2066_v18  ;;  %v2134_v0 = vand.u32 65535, %v2130_v23  ;;  %v2135_v54 = vshrl.u32 %v2130_v23, 16  ;;  %v2159_v27 = vmul.u32 %v2157_v56, %v2132_v12 }
 0x290   : > { %v2856_v36 = vpop.trf.xlu2  ;;  %v7846_v43 = vadd.s32 4294967294, %v2344_v51  ;;  %v2160_v47 = vmul.u32 %v2156_v46, %v2133_v59  ;;  %v2397_v1 = vshrl.u32 %v2396_v60, 23  ;;  %v2099_v28 = vshrl.u32 %v12642_v8, %v9943_v63 }
 0x291   : > { %2991 = vxpose.xlu1.b32.start.end [1/1] (short) %v1772_v61, 128  ;;  %v10041_v61 = vsel %vm9927_vm13, 0, %v2053_v49  ;;  %v2884_v14 = vpop.trf.xlu0  ;;  %3289 = vst.msk [vmem:[%s8950_s24 + $0x248] sm:$0xff] %vm3215_vm6, %v2856_v36  ;;  %v2137_v50 = vmul.u32 %v2135_v54, %v2132_v12  ;;  %v2138_v18 = vmul.u32 %v2134_v0, %v2133_v59  ;;  %v2162_v38 = vshll.u32 %v2159_v27, 16 }
 0x292   : > { %12682 = vst [vmem:[#allocation29_spill] sm:$0xff] %v10041_v61  ;;  %v2072_v49 = vadd.s32 3, %v10041_v61  ;;  %v2068_v23 = vmul.f32 %v2067_v37, %v9950_v32  ;;  %v2120_v51 = vsel %vm2118_vm0, %v9987_v2, 2102212464  ;;  %v2158_v36 = vmul.u32 %v2156_v46, %v2132_v12 }
 0x293   : > { %3301 = vst.msk [vmem:[%s8950_s24 + $0x2a8] sm:$0xff] %vm3215_vm6, %v2884_v14  ;;  %v2061_v14 = vmul.f32 %v2060_v57, %v9950_v32  ;;  %vm7847_vm14 = vcmp.lt.s32.totalorder %v7846_v43, 0  ;;  %v2140_v40 = vshll.u32 %v2137_v50, 16  ;;  %v2161_v60 = vmul.u32 %v2157_v56, %v2133_v59 }
 0x294   : > { %v2139_v29 = vmul.u32 %v2135_v54, %v2133_v59  ;;  %v2142_v63 = vshll.u32 %v2138_v18, 16  ;;  %v2164_v61 = vshll.u32 %v2160_v47, 16  ;;  %vm2166_vm13 = vc.u32 %v2158_v36, %v2162_v38 }
 0x295   : > { %v2167_v57 = vsel %vm2166_vm13, 1, %v12646_v39  ;;  %v2168_v37 = vadd.s32 %v2162_v38, %v2158_v36  ;;  %v2069_v2 = vadd.f32 1.0, %v2068_v23  ;;  %v2119_v56 = vsel %vm2115_vm4, %v2099_v28, %v9983_v52 }
 0x296   : > { %v2791_v19 = vpop.trf.xlu1  ;;  %v2169_v59 = vadd.s32 %v2167_v57, %v2161_v60  ;;  %v7848_v28 = vadd.s32 4294967169, %v2397_v1  ;;  %v2141_v38 = vshrl.u32 %v2137_v50, 16  ;;  %v2073_v57 = vand.u32 3, %v2072_v49 }
 0x297   : > { %3256 = vst.msk [vmem:[%s8950_s24 + $0x140] sm:$0xff] %vm3215_vm6, %v2791_v19  ;;  %v2136_v19 = vmul.u32 %v2134_v0, %v2132_v12  ;;  %v10070_v0 = vsel %vm7847_vm14, 0, %v7846_v43  ;;  %vm2170_vm13 = vc.u32 %v2168_v37, %v2164_v61  ;;  %v10079_v43 = vadd.f32 1.0, %v2061_v14 }
 0x298   : > { %v2857_v22 = vpop.trf.xlu2  ;;  %v2171_v52 = vsel %vm2170_vm13, 1, %v12646_v39  ;;  %v2403_v60 = vadd.s32 1, %v7848_v28  ;;  %vm2075_vm14 = vcmp.eq.s32.totalorder %v2073_v57, 0  ;;  %vm12608_vm13 = vweird.f32 %v9510_v5 }
 0x299   : > { %v2885_v34 = vpop.trf.xlu0  ;;  %vm2144_vm3 = vc.u32 %v2136_v19, %v2140_v40  ;;  %v2146_v32 = vadd.s32 %v2140_v40, %v2136_v19  ;;  %3290 = vst.msk [vmem:[%s8950_s24 + $0x250] sm:$0xff] %vm3215_vm6, %v2857_v22  ;;  %v2163_v22 = vshrl.u32 %v2159_v27, 16  ;;  %v2173_v36 = vadd.s32 %v2171_v52, %v2169_v59 }
 0x29a   : > { %3302 = vst.msk [vmem:[%s8950_s24 + $0x2b0] sm:$0xff] %vm3215_vm6, %v2885_v34  ;;  %v2145_v12 = vsel %vm2144_vm3, 1, %v12646_v39  ;;  %v2121_v34 = vsel %vm2117_vm8, %v9985_v21, %v2120_v51  ;;  %v2352_v19 = vsub.s32 4294967266, %v10070_v0  ;;  %v2165_v51 = vshrl.u32 %v2160_v47, 16 }
 0x29b   : > { %v2147_v40 = vadd.s32 %v2145_v12, %v2139_v29  ;;  %vm2148_vm0 = vc.u32 %v2146_v32, %v2142_v63  ;;  %v10082_v29 = vmul.f32 %v2069_v2, %v9936_v30  ;;  %v2143_v63 = vshrl.u32 %v2138_v18, 16 }
 0x29c   : > { %v2149_v54 = vsel %vm2148_vm0, 1, %v12646_v39  ;;  %v2174_v32 = vadd.s32 %v2173_v36, %v2163_v22  ;;  %v2122_v1 = vsel %vm2116_vm11, %v2119_v56, %v2121_v34  ;;  %v12611_v27 = vand.u32 2147483647, %v10018_v10 }
 0x29d   : > { %v2151_v23 = vadd.s32 %v2149_v54, %v2147_v40  ;;  %vm2404_vm4 = vcmp.gt.s32.totalorder %v2403_v60, 0  ;;  %v10090_v2 = vadd.s32 %v2168_v37, %v2164_v61  ;;  %v12610_v47 = vxor.u32 2147483648, %v10082_v29 }
 0x29e   : > { %v2792_v46 = vpop.trf.xlu1  ;;  %v2175_v18 = vadd.s32 %v2174_v32, %v2165_v51  ;;  %v12609_v49 = vxor.u32 2147483648, %v10079_v43  ;;  %v2353_v56 = vadd.s32 127, %v2352_v19  ;;  %v2348_v59 = vsub.s32 32, %v10070_v0 }
 0x29f   : > { %3257 = vst.msk [vmem:[%s8950_s24 + $0x148] sm:$0xff] %vm3215_vm6, %v2792_v46  ;;  %v2152_v21 = vadd.s32 %v2151_v23, %v2141_v38  ;;  %v2405_v46 = vsel %vm2404_vm4, %v2403_v60, 0  ;;  %vm2074_vm11 = vcmp.lt.s32.totalorder %v2073_v57, 2  ;;  %v2176_v37 = vmul.u32 %v10015_v42, %v2122_v1 }
 0x2a0   : > { %v2858_v14 = vpop.trf.xlu2  ;;  %v2407_v12 = vand.u32 31, %v2405_v46  ;;  %v2179_v61 = vadd.s32 1, %v2175_v18  ;;  %vm2078_vm3 = vcmp.eq.s32.totalorder %v2073_v57, 2  ;;  %v2332_v34 = vadd.s32 %v9918_v62, %v9907_v53 }
 0x2a1   : > { %v2886_v50 = vpop.trf.xlu0  ;;  %v10088_v30 = vadd.s32 %v2152_v21, %v2143_v63  ;;  %3291 = vst.msk [vmem:[%s8950_s24 + $0x258] sm:$0xff] %vm3215_vm6, %v2858_v14  ;;  %v2400_v52 = vand.u32 8388607, %v12611_v27  ;;  %v2077_v28 = vsel %vm2075_vm14, %v10079_v43, %v12610_v47  ;;  %v2080_v38 = vsel %vm2078_vm3, %v12609_v49, %v10082_v29 }
 0x2a2   : > { %3303 = vst.msk [vmem:[%s8950_s24 + $0x2b8] sm:$0xff] %vm3215_vm6, %v2886_v50  ;;  %v10104_v40 = vsub.s32 32, %v2407_v12  ;;  %v2354_v23 = vshll.u32 %v2353_v56, 23  ;;  %v2350_v22 = vshrl.u32 %v2332_v34, %v2348_v59  ;;  %v2419_v53 = vshll.u32 %v12643_v41, %v2407_v12 }
 0x2a3   : > { %vm2178_vm8 = vc.u32 %v10088_v30, %v10090_v2  ;;  %v10121_v60 = vshrl.u32 %v2405_v46, 5  ;;  %v2349_v1 = vshll.u32 %v9993_v16, %v10070_v0  ;;  %v2410_v50 = vshll.u32 %v12642_v8, %v2407_v12 }
 0x2a4   : > { %v2180_v54 = vsel %vm2178_vm8, %v2179_v61, %v2175_v18  ;;  %v2411_v36 = vshrl.u32 %v12653_v25, %v10104_v40  ;;  %v2420_v62 = vshrl.u32 %v12655_v17, %v10104_v40  ;;  %v2414_v63 = vshrl.u32 %v12654_v26, %v10104_v40 }
 0x2a5   : > { %v2181_v42 = vadd.s32 %v2180_v54, %v2176_v37  ;;  %v2417_v21 = vshrl.u32 %v12643_v41, %v10104_v40  ;;  %v2423_v18 = vshrl.u32 %v12644_v20, %v10104_v40  ;;  %v2413_v59 = vshll.u32 %v12653_v25, %v2407_v12 }
 0x2a6   : > { %v2793_v33 = vpop.trf.xlu1  ;;  %v2421_v14 = vor.u32 %v2420_v62, %v2419_v53  ;;  %v2416_v61 = vshll.u32 %v12654_v26, %v2407_v12  ;;  %v2081_v37 = vsel %vm2074_vm11, %v2077_v28, %v2080_v38  ;;  %v2351_v16 = vor.u32 %v2350_v22, %v2349_v1 }
 0x2a7   : > { %3258 = vst.msk [vmem:[%s8950_s24 + $0x150] sm:$0xff] %vm3215_vm6, %v2793_v33  ;;  %v2182_v19 = vadd.s32 536870912, %v2181_v42  ;;  %v2355_v33 = vor.u32 4788187, %v2354_v23  ;;  %v10141_v0 = vor.u32 %v2411_v36, %v2410_v50  ;;  %v2422_v34 = vshll.u32 %v12655_v17, %v2407_v12 }
 0x2a8   : > { %v2859_v32 = vpop.trf.xlu2  ;;  %v10147_v23 = vor.u32 %v2414_v63, %v2413_v59  ;;  %v10149_v53 = vor.u32 %v2417_v21, %v2416_v61  ;;  %vm2428_vm0 = vcmp.lt.s32.totalorder %v10121_v60, 4  ;;  %v2401_v62 = vor.u32 8388608, %v2400_v52 }
 0x2a9   : > { %v2887_v51 = vpop.trf.xlu0  ;;  %v10134_v56 = vshrl.u32 %v2182_v19, 30  ;;  %3292 = vst.msk [vmem:[%s8950_s24 + $0x260] sm:$0xff] %vm3215_vm6, %v2859_v32  ;;  %v2424_v57 = vor.u32 %v2423_v18, %v2422_v34  ;;  %v2434_v28 = vsel %vm2428_vm0, %v2421_v14, 920167782  ;;  %v2356_v38 = vand.u32 2147483647, %v2355_v33 }
 0x2aa   : > { %3304 = vst.msk [vmem:[%s8950_s24 + $0x2c0] sm:$0xff] %vm3215_vm6, %v2887_v51  ;;  %v2082_v22 = vsel %vm12608_vm13, nan, %v2081_v37  ;;  %v2358_v36 = vcvt.s32.f32 %v2351_v16  ;;  %vm2425_vm4 = vcmp.lt.s32.totalorder %v10121_v60, 1  ;;  %vm2427_vm8 = vcmp.lt.s32.totalorder %v10121_v60, 3 }
 0x2ab   : > { %v2184_v54 = vshll.u32 %v10134_v56, 30  ;;  %v2433_v19 = vsel %vm2425_vm4, %v10141_v0, %v10147_v23  ;;  %v2437_v51 = vsel %vm2425_vm4, %v10147_v23, %v10149_v53  ;;  %v2438_v32 = vsel %vm2428_vm0, %v2424_v57, 1326507024 }
 0x2ac   : > { %v10176_v1 = vshll.u32 %v2401_v62, 8  ;;  %v2359_v18 = vmul.f32 %v2358_v36, %v2356_v38  ;;  %vm2426_vm14 = vcmp.lt.s32.totalorder %v10121_v60, 2  ;;  %v2439_v61 = vsel %vm2427_vm8, %v2421_v14, %v2438_v32 }
 0x2ad   : > { %v10155_v12 = vsub.s32 %v2181_v42, %v2184_v54  ;;  %v2435_v42 = vsel %vm2427_vm8, %v10149_v53, %v2434_v28  ;;  %v2440_v37 = vsel %vm2426_vm14, %v2437_v51, %v2439_v61 }
 0x2ae   : > { %v2794_v46 = vpop.trf.xlu1  ;;  %v2436_v59 = vsel %vm2426_vm14, %v2433_v19, %v2435_v42  ;;  %v2442_v34 = vand.u32 65535, %v10176_v1  ;;  %v2444_v54 = vand.u32 65535, %v2440_v37  ;;  %v2445_v62 = vshrl.u32 %v2440_v37, 16  ;;  %v7955_v19 = vld [vmem:[%s8116_s20 + $0x8] sm:$0xff] }
 0x2af   : > { %3259 = vst.msk [vmem:[%s8950_s24 + $0x158] sm:$0xff] %vm3215_vm6, %v2794_v46  ;;  %vm2186_vm11 = vcmp.lt.s32.totalorder %v10155_v12, 0  ;;  %v2187_v52 = vsub.s32 0, %v10155_v12  ;;  %v2360_v57 = vxor.u32 2147483648, %v2359_v18  ;;  %v2443_v28 = vshrl.u32 %v10176_v1, 16 }
 0x2b0   : > { %v2860_v21 = vpop.trf.xlu2  ;;  %v2467_v38 = vshrl.u32 %v2436_v59, 16  ;;  %v190_v42 = vperm.slane %v7955_v19, 7  ;;  %v2446_v32 = vmul.u32 %v2444_v54, %v2442_v34 }
 0x2b1   : > { %v2888_v63 = vpop.trf.xlu0  ;;  %v2188_v46 = vsel %vm2186_vm11, %v2187_v52, %v10155_v12  ;;  %3293 = vst.msk [vmem:[%s8950_s24 + $0x268] sm:$0xff] %vm3215_vm6, %v2860_v21  ;;  %v10196_v14 = vmul.u32 %v2444_v54, %v2443_v28  ;;  %v2466_v52 = vand.u32 65535, %v2436_v59  ;;  %vm2240_vm11 = vcmp.lt.s32.totalorder %v9601_v31, 0 }
 0x2b2   : > { %3305 = vst.msk [vmem:[%s8950_s24 + $0x2c8] sm:$0xff] %vm3215_vm6, %v2888_v63  ;;  %v2189_v33 = vclz %v2188_v46  ;;  %v2361_v59 = vsel %vm2240_vm11, %v2360_v57, %v2359_v18  ;;  %v2469_v37 = vmul.u32 %v2467_v38, %v2442_v34  ;;  %v10218_v47 = vmul.f32 %v190_v42, %v8132_v6 }
 0x2b3   : > { %v2452_v19 = vshll.u32 %v10196_v14, 16  ;;  %v2470_v49 = vmul.u32 %v2466_v52, %v2443_v28  ;;  %v2468_v18 = vmul.u32 %v2466_v52, %v2442_v34  ;;  %v2177_v57 = vadd.s32 %v10090_v2, %v10088_v30 }
 0x2b4   : > { %v7843_v16 = vadd.s32 4294967294, %v2189_v33  ;;  %v12683_v33 = vand.u32 2147483647, %v9601_v31  ;;  %v2471_v42 = vmul.u32 %v2467_v38, %v2443_v28 }
 0x2b5   : > { %v2474_v52 = vshll.u32 %v2470_v49, 16 }
 0x2b6   : > { %v2795_v50 = vpop.trf.xlu1  ;;  %vm7844_vm3 = vcmp.lt.s32.totalorder %v7843_v16, 0 }
 0x2b7   : > { %3055 = vxpose.xlu0.b32.start.end [1/1] (short) %v2082_v22, 128  ;;  %3260 = vst.msk [vmem:[%s8950_s24 + $0x160] sm:$0xff] %vm3215_vm6, %v2795_v50  ;;  %v2447_v22 = vmul.u32 %v2445_v62, %v2442_v34  ;;  %v10194_v36 = vsel %vm7844_vm3, 0, %v7843_v16  ;;  %vm10205_vm3 = vcmp.le.f32.partialorder %v12683_v33, 0.7853982  ;;  %v2449_v16 = vmul.u32 %v2445_v62, %v2443_v28 }
 0x2b8   : > { %v2861_v21 = vpop.trf.xlu2  ;;  %v2197_v51 = vsub.s32 4294967266, %v10194_v36  ;;  %v2472_v33 = vshll.u32 %v2469_v37, 16  ;;  %v10223_v62 = vsel %vm10205_vm3, %v9601_v31, %v2361_v59  ;;  %v2430_v34 = vsel %vm2428_vm0, %v10149_v53, 2102212464 }
 0x2b9   : > { %v2889_v63 = vpop.trf.xlu0  ;;  %v2450_v50 = vshll.u32 %v2447_v22, 16  ;;  %3294 = vst.msk [vmem:[%s8950_s24 + $0x270] sm:$0xff] %vm3215_vm6, %v2861_v21  ;;  %v2193_v21 = vsub.s32 32, %v10194_v36  ;;  %v10238_v28 = vmul.f32 %v10223_v62, %v10223_v62  ;;  %v2409_v53 = vshrl.u32 %v12642_v8, %v10104_v40 }
 0x2ba   : > { %3306 = vst.msk [vmem:[%s8950_s24 + $0x2d0] sm:$0xff] %vm3215_vm6, %v2889_v63  ;;  %v2198_v27 = vadd.s32 127, %v2197_v51  ;;  %v2473_v40 = vshrl.u32 %v2469_v37, 16 }
 0x2bb   : > { %vm2454_vm13 = vc.u32 %v2446_v32, %v2450_v50  ;;  %v2456_v54 = vadd.s32 %v2450_v50, %v2446_v32  ;;  %v2451_v50 = vshrl.u32 %v2447_v22, 16  ;;  %v2551_v22 = vand.u32 2139095040, %v10218_v47 }
 0x2bc   : > { %v2455_v63 = vsel %vm2454_vm13, 1, %v12646_v39  ;;  %vm2476_vm13 = vc.u32 %v2468_v18, %v2472_v33  ;;  %v2199_v2 = vshll.u32 %v2198_v27, 23  ;;  %v2195_v38 = vshrl.u32 %v2177_v57, %v2193_v21 }
 0x2bd   : > { %v2457_v5 = vadd.s32 %v2455_v63, %v2449_v16  ;;  %vm2458_vm5 = vc.u32 %v2456_v54, %v2452_v19  ;;  %v2477_v51 = vsel %vm2476_vm13, 1, %v12646_v39  ;;  %v2453_v27 = vshrl.u32 %v10196_v14, 16 }
 0x2be   : > { %v2796_v46 = vpop.trf.xlu1  ;;  %v2459_v32 = vsel %vm2458_vm5, 1, %v12646_v39  ;;  %v2479_v19 = vadd.s32 %v2477_v51, %v2471_v42  ;;  %v2552_v63 = vshrl.u32 %v2551_v22, 23  ;;  %v2194_v57 = vshll.u32 %v10155_v12, %v10194_v36 }
 0x2bf   : > { %3261 = vst.msk [vmem:[%s8950_s24 + $0x168] sm:$0xff] %vm3215_vm6, %v2796_v46  ;;  %v2461_v6 = vadd.s32 %v2459_v32, %v2457_v5  ;;  %v2478_v46 = vadd.s32 %v2472_v33, %v2468_v18  ;;  %v2429_v33 = vsel %vm2425_vm4, %v2409_v53, %v10141_v0  ;;  %v2431_v18 = vsel %vm2427_vm8, %v10147_v23, %v2430_v34 }
 0x2c0   : > { %v2862_v30 = vpop.trf.xlu2  ;;  %v2200_v21 = vor.u32 4788187, %v2199_v2  ;;  %v2374_v51 = vmul.f32 -0.00019511016, %v10238_v28  ;;  %v2196_v0 = vor.u32 %v2195_v38, %v2194_v57  ;;  %v2432_v23 = vsel %vm2426_vm14, %v2429_v33, %v2431_v18 }
 0x2c1   : > { %v2890_v59 = vpop.trf.xlu0  ;;  %v2462_v16 = vadd.s32 %v2461_v6, %v2451_v50  ;;  %vm2480_vm5 = vc.u32 %v2478_v46, %v2474_v52  ;;  %3295 = vst.msk [vmem:[%s8950_s24 + $0x278] sm:$0xff] %vm3215_vm6, %v2862_v30  ;;  %v7851_v50 = vadd.s32 4294967169, %v2552_v63  ;;  %v2475_v6 = vshrl.u32 %v2470_v49, 16 }
 0x2c2   : > { %3307 = vst.msk [vmem:[%s8950_s24 + $0x2d8] sm:$0xff] %vm3215_vm6, %v2890_v59  ;;  %v2481_v54 = vsel %vm2480_vm5, 1, %v12646_v39  ;;  %v10259_v59 = vadd.s32 %v2478_v46, %v2474_v52  ;;  %v2362_v34 = vsub.s32 4, %v9973_v58  ;;  %v2201_v2 = vand.u32 2147483647, %v2200_v21 }
 0x2c3   : > { %v2483_v32 = vadd.s32 %v2481_v54, %v2479_v19  ;;  %v10256_v14 = vadd.s32 %v2462_v16, %v2453_v27  ;;  %v2558_v30 = vadd.s32 1, %v7851_v50  ;;  %v2367_v60 = vmul.f32 -0.001358992, %v10238_v28 }
 0x2c4   : > { %v2375_v16 = vadd.f32 0.008332121, %v2374_v51  ;;  %v2203_v19 = vcvt.s32.f32 %v2196_v0  ;;  %v2486_v22 = vmul.u32 %v10176_v1, %v2432_v23  ;;  %v12614_v53 = vand.u32 2147483647, %v10218_v47 }
 0x2c5   : > { %v2484_v42 = vadd.s32 %v2483_v32, %v2473_v40  ;;  %vm2488_vm0 = vc.u32 %v10256_v14, %v10259_v59  ;;  %vm2559_vm4 = vcmp.gt.s32.totalorder %v2558_v30, 0  ;;  %v2363_v27 = vsel %vm2240_vm11, %v2362_v34, %v9973_v58 }
 0x2c6   : > { %v2797_v5 = vpop.trf.xlu1  ;;  %v2560_v46 = vsel %vm2559_vm4, %v2558_v30, 0  ;;  %v2204_v54 = vmul.f32 %v2203_v19, %v2201_v2  ;;  %v2368_v18 = vadd.f32 0.041655596, %v2367_v60  ;;  %v2376_v40 = vmul.f32 %v2375_v16, %v10238_v28 }
 0x2c7   : > { %3262 = vst.msk [vmem:[%s8950_s24 + $0x170] sm:$0xff] %vm3215_vm6, %v2797_v5  ;;  %v2485_v37 = vadd.s32 %v2484_v42, %v2475_v6  ;;  %v2562_v38 = vand.u32 31, %v2560_v46  ;;  %vm2085_vm8 = vcmp.lt.s32.totalorder %v9864_v55, 0  ;;  %v10284_v32 = vsel %vm10205_vm3, 0, %v2363_v27 }
 0x2c8   : > { %v2943_v36 = vpop.trf.xlu2  ;;  %12686 = vst [vmem:[#allocation30_spill] sm:$0xff] %v10284_v32  ;;  %v2555_v57 = vand.u32 8388607, %v12614_v53  ;;  %v2205_v42 = vxor.u32 2147483648, %v2204_v54  ;;  %v10294_v0 = vshrl.u32 %v2560_v46, 5  ;;  %v2369_v34 = vmul.f32 %v2368_v18, %v10238_v28 }
 0x2c9   : > { %v2891_v12 = vpop.trf.xlu0  ;;  %v2489_v52 = vadd.s32 1, %v2485_v37  ;;  %3328 = vst.msk [vmem:[%s8950_s24 + $0x380] sm:$0xff] %vm3215_vm6, %v2943_v36  ;;  %v10278_v33 = vsub.s32 32, %v2562_v38  ;;  %v2565_v23 = vshll.u32 %v12642_v8, %v2562_v38  ;;  %v2574_v36 = vshll.u32 %v12643_v41, %v2562_v38 }
 0x2ca   : > { %3308 = vst.msk [vmem:[%s8950_s24 + $0x2e0] sm:$0xff] %vm3215_vm6, %v2891_v12  ;;  %v2377_v2 = vadd.f32 -0.16666654, %v2376_v40  ;;  %v12687_v27 = vand.u32 2147483647, %v9864_v55  ;;  %vm2580_vm11 = vcmp.lt.s32.totalorder %v10294_v0, 1 }
 0x2cb   : > { %v2490_v5 = vsel %vm2488_vm0, %v2489_v52, %v2485_v37  ;;  %v2566_v58 = vshrl.u32 %v12653_v25, %v10278_v33  ;;  %v2569_v21 = vshrl.u32 %v12654_v26, %v10278_v33  ;;  %v2575_v61 = vshrl.u32 %v12655_v17, %v10278_v33 }
 0x2cc   : > { %v2491_v63 = vadd.s32 %v2490_v5, %v2486_v22  ;;  %v2568_v37 = vshll.u32 %v12653_v25, %v2562_v38  ;;  %v2572_v12 = vshrl.u32 %v12643_v41, %v10278_v33  ;;  %v2571_v52 = vshll.u32 %v12654_v26, %v2562_v38 }
 0x2cd   : > { %v10312_v46 = vor.u32 %v2566_v58, %v2565_v23  ;;  %v2576_v25 = vor.u32 %v2575_v61, %v2574_v36  ;;  %v2578_v16 = vshrl.u32 %v12644_v20, %v10278_v33  ;;  %v2206_v41 = vsel %vm2085_vm8, %v2205_v42, %v2204_v54 }
 0x2ce   : > { %v2798_v49 = vpop.trf.xlu1  ;;  %v2492_v1 = vadd.s32 536870912, %v2491_v63  ;;  %v10314_v60 = vor.u32 %v2569_v21, %v2568_v37  ;;  %v2556_v22 = vor.u32 8388608, %v2555_v57  ;;  %v2577_v5 = vshll.u32 %v12655_v17, %v2562_v38 }
 0x2cf   : > { %3263 = vst.msk [vmem:[%s8950_s24 + $0x178] sm:$0xff] %vm3215_vm6, %v2798_v49  ;;  %v2382_v26 = vadd.s32 3, %v10284_v32  ;;  %vm10326_vm14 = vcmp.le.f32.partialorder %v12687_v27, 0.7853982  ;;  %v10330_v40 = vor.u32 %v2572_v12, %v2571_v52  ;;  %vm2583_vm13 = vcmp.lt.s32.totalorder %v10294_v0, 4 }
 0x2d0   : > { %v2944_v6 = vpop.trf.xlu2  ;;  %v10292_v51 = vshrl.u32 %v2492_v1, 30  ;;  %v2579_v54 = vor.u32 %v2578_v16, %v2577_v5  ;;  %v2370_v17 = vadd.f32 -0.4999988, %v2369_v34  ;;  %v10339_v38 = vsel %vm10326_vm14, %v9864_v55, %v2206_v41 }
 0x2d1   : > { %v2892_v50 = vpop.trf.xlu0  ;;  %3329 = vst.msk [vmem:[%s8950_s24 + $0x388] sm:$0xff] %vm3215_vm6, %v2944_v6  ;;  %v2589_v1 = vsel %vm2583_vm13, %v2576_v25, 920167782  ;;  %v2378_v21 = vmul.f32 %v2377_v2, %v10238_v28  ;;  %vm2582_vm5 = vcmp.lt.s32.totalorder %v10294_v0, 3  ;;  %v10350_v6 = vshll.u32 %v2556_v22, 8 }
 0x2d2   : > { %3309 = vst.msk [vmem:[%s8950_s24 + $0x2e8] sm:$0xff] %vm3215_vm6, %v2892_v50  ;;  %v2494_v49 = vshll.u32 %v10292_v51, 30  ;;  %vm2581_vm0 = vcmp.lt.s32.totalorder %v10294_v0, 2  ;;  %v10362_v23 = vmul.f32 %v10339_v38, %v10339_v38  ;;  %v2592_v12 = vsel %vm2580_vm11, %v10314_v60, %v10330_v40 }
 0x2d3   : > { %v2593_v36 = vsel %vm2583_vm13, %v2579_v54, 1326507024  ;;  %v2371_v34 = vmul.f32 %v2370_v17, %v10238_v28  ;;  %v10375_v2 = vand.u32 3, %v2382_v26  ;;  %v2379_v52 = vadd.f32 1.0, %v2378_v21 }
 0x2d4   : > { %v10320_v19 = vsub.s32 %v2491_v63, %v2494_v49  ;;  %v2588_v63 = vsel %vm2580_vm11, %v10312_v46, %v10314_v60  ;;  %v2594_v16 = vsel %vm2582_vm5, %v2576_v25, %v2593_v36  ;;  %v2597_v41 = vand.u32 65535, %v10350_v6 }
 0x2d5   : > { %v2598_v22 = vshrl.u32 %v10350_v6, 16  ;;  %v2595_v5 = vsel %vm2581_vm0, %v2592_v12, %v2594_v16  ;;  %v2219_v28 = vmul.f32 -0.00019511016, %v10362_v23 }
 0x2d6   : > { %v2911_v30 = vpop.trf.xlu1  ;;  %vm2496_vm3 = vcmp.lt.s32.totalorder %v10320_v19, 0  ;;  %v2497_v20 = vsub.s32 0, %v10320_v19  ;;  %v2599_v54 = vand.u32 65535, %v2595_v5  ;;  %v2600_v17 = vshrl.u32 %v2595_v5, 16 }
 0x2d7   : > { %3312 = vst.msk [vmem:[%s8950_s24 + $0x300] sm:$0xff] %vm3215_vm6, %v2911_v30  ;;  %v2590_v30 = vsel %vm2582_vm5, %v10330_v40, %v2589_v1 }
 0x2d8   : > { %v2945_v58 = vpop.trf.xlu2  ;;  %v2498_v50 = vsel %vm2496_vm3, %v2497_v20, %v10320_v19  ;;  %v2591_v37 = vsel %vm2581_vm0, %v2588_v63, %v2590_v30  ;;  %v2487_v63 = vadd.s32 %v10259_v59, %v10256_v14  ;;  %v2603_v30 = vmul.u32 %v2599_v54, %v2598_v22 }
 0x2d9   : > { %v2893_v57 = vpop.trf.xlu0  ;;  %v2499_v61 = vclz %v2498_v50  ;;  %3330 = vst.msk [vmem:[%s8950_s24 + $0x390] sm:$0xff] %vm3215_vm6, %v2945_v58  ;;  %v2621_v27 = vand.u32 65535, %v2591_v37  ;;  %v2622_v20 = vshrl.u32 %v2591_v37, 16  ;;  %v10388_v50 = vadd.f32 1.0, %v2371_v34 }
 0x2da   : > { %3310 = vst.msk [vmem:[%s8950_s24 + $0x2f0] sm:$0xff] %vm3215_vm6, %v2893_v57  ;;  %v2601_v16 = vmul.u32 %v2599_v54, %v2597_v41  ;;  %v2604_v53 = vmul.u32 %v2600_v17, %v2598_v22  ;;  %vm2395_vm3 = vcmp.lt.s32.totalorder %v10018_v10, 0 }
 0x2db   : > { %v7849_v49 = vadd.s32 4294967294, %v2499_v61  ;;  %v10386_v57 = vmul.u32 %v2622_v20, %v2597_v41  ;;  %v2602_v61 = vmul.u32 %v2600_v17, %v2597_v41  ;;  %v2625_v36 = vmul.u32 %v2621_v27, %v2598_v22 }
 0x2dc   : > { %v2623_v34 = vmul.u32 %v2621_v27, %v2597_v41 }
 0x2dd   : > { %vm7850_vm4 = vcmp.lt.s32.totalorder %v7849_v49, 0  ;;  %v2605_v5 = vshll.u32 %v2602_v61, 16  ;;  %v2627_v32 = vshll.u32 %v10386_v57, 16 }
 0x2de   : > { %v2912_v42 = vpop.trf.xlu1  ;;  %v2502_v26 = vsel %vm7850_vm4, 0, %v7849_v49  ;;  %v2220_v49 = vadd.f32 0.008332121, %v2219_v28  ;;  %v2629_v28 = vshll.u32 %v2625_v36, 16 }
 0x2df   : > { %3313 = vst.msk [vmem:[%s8950_s24 + $0x308] sm:$0xff] %vm3215_vm6, %v2912_v42  ;;  %v2503_v25 = vsub.s32 32, %v2502_v26  ;;  %v2507_v1 = vsub.s32 4294967266, %v2502_v26  ;;  %v10391_v42 = vmul.f32 %v2379_v52, %v10223_v62  ;;  %v2504_v14 = vshll.u32 %v10320_v19, %v2502_v26 }
 0x2e0   : > { %v2946_v21 = vpop.trf.xlu2  ;;  %vm2609_vm4 = vc.u32 %v2601_v16, %v2605_v5  ;;  %v2611_v19 = vadd.s32 %v2605_v5, %v2601_v16  ;;  %v2626_v26 = vmul.u32 %v2622_v20, %v2598_v22  ;;  %vm2631_vm1 = vc.u32 %v2623_v34, %v2627_v32 }
 0x2e1   : > { %v2894_v58 = vpop.trf.xlu0  ;;  %v2505_v59 = vshrl.u32 %v2487_v63, %v2503_v25  ;;  %v2508_v12 = vadd.s32 127, %v2507_v1  ;;  %3331 = vst.msk [vmem:[%s8950_s24 + $0x398] sm:$0xff] %vm3215_vm6, %v2946_v21  ;;  %v2610_v25 = vsel %vm2609_vm4, 1, %v12646_v39  ;;  %v2632_v27 = vsel %vm2631_vm1, 1, %v12646_v39 }
 0x2e2   : > { %3311 = vst.msk [vmem:[%s8950_s24 + $0x2f8] sm:$0xff] %vm3215_vm6, %v2894_v58  ;;  %v2607_v58 = vshll.u32 %v2603_v30, 16  ;;  %v2612_v41 = vadd.s32 %v2610_v25, %v2604_v53  ;;  %v2633_v54 = vadd.s32 %v2627_v32, %v2623_v34  ;;  %v2585_v22 = vsel %vm2583_vm13, %v10330_v40, 2102212464 }
 0x2e3   : > { %v2506_v62 = vor.u32 %v2505_v59, %v2504_v14  ;;  %v2509_v52 = vshll.u32 %v2508_v12, 23  ;;  %v2606_v20 = vshrl.u32 %v2602_v61, 16  ;;  %v2212_v32 = vmul.f32 -0.001358992, %v10362_v23 }
 0x2e4   : > { %vm2613_vm10 = vc.u32 %v2611_v19, %v2607_v58  ;;  %vm2635_vm4 = vc.u32 %v2633_v54, %v2629_v28  ;;  %v2564_v5 = vshrl.u32 %v12642_v8, %v10278_v33  ;;  %v2628_v40 = vshrl.u32 %v10386_v57, 16 }
 0x2e5   : > { %v2510_v63 = vor.u32 4788187, %v2509_v52  ;;  %v2513_v1 = vcvt.s32.f32 %v2506_v62  ;;  %v2614_v21 = vsel %vm2613_vm10, 1, %v12646_v39  ;;  %v2636_v34 = vsel %vm2635_vm4, 1, %v12646_v39 }
 0x2e6   : > { %v2913_v37 = vpop.trf.xlu1  ;;  %v2616_v12 = vadd.s32 %v2614_v21, %v2612_v41  ;;  %v2608_v62 = vshrl.u32 %v2603_v30, 16  ;;  %v2221_v58 = vmul.f32 %v2220_v49, %v10362_v23  ;;  %v2586_v8 = vsel %vm2582_vm5, %v10314_v60, %v2585_v22 }
 0x2e7   : > { %3314 = vst.msk [vmem:[%s8950_s24 + $0x310] sm:$0xff] %vm3215_vm6, %v2913_v37  ;;  %v2511_v17 = vand.u32 2147483647, %v2510_v63  ;;  %v2634_v37 = vadd.s32 %v2632_v27, %v2626_v26  ;;  %v2584_v26 = vsel %vm2580_vm11, %v2564_v5, %v10312_v46  ;;  %v12619_v39 = vxor.u32 2147483648, %v10391_v42 }
 0x2e8   : > { %v2947_v59 = vpop.trf.xlu2  ;;  %v2617_v52 = vadd.s32 %v2616_v12, %v2606_v20  ;;  %v2630_v30 = vshrl.u32 %v2625_v36, 16  ;;  %v2213_v63 = vadd.f32 0.041655596, %v2212_v32  ;;  %v12690_v25 = vand.u32 2147483647, %v10018_v10 }
 0x2e9   : > { %v2975_v14 = vpop.trf.xlu0  ;;  %v2514_v16 = vmul.f32 %v2513_v1, %v2511_v17  ;;  %3332 = vst.msk [vmem:[%s8950_s24 + $0x3a0] sm:$0xff] %vm3215_vm6, %v2947_v59  ;;  %v2638_v61 = vadd.s32 %v2636_v34, %v2634_v37  ;;  %v10437_v41 = vadd.s32 %v2633_v54, %v2629_v28  ;;  %v12618_v60 = vxor.u32 2147483648, %v10388_v50 }
 0x2ea   : > { %3344 = vst.msk [vmem:[%s8950_s24 + $0x400] sm:$0xff] %vm3215_vm6, %v2975_v14  ;;  %v10427_v33 = vadd.s32 %v2617_v52, %v2608_v62  ;;  %vm10431_vm1 = vcmp.le.f32.partialorder %v12690_v25, 0.7853982  ;;  %v2587_v27 = vsel %vm2581_vm0, %v2584_v26, %v2586_v8  ;;  %vm2385_vm10 = vcmp.eq.s32.totalorder %v10375_v2, 0 }
 0x2eb   : > { %v2515_v19 = vxor.u32 2147483648, %v2514_v16  ;;  %v2639_v57 = vadd.s32 %v2638_v61, %v2628_v40  ;;  %v2222_v1 = vadd.f32 -0.16666654, %v2221_v58  ;;  %v2387_v21 = vsel %vm2385_vm10, %v10388_v50, %v12619_v39 }
 0x2ec   : > { %vm2643_vm11 = vc.u32 %v10427_v33, %v10437_v41  ;;  %v2207_v37 = vsub.s32 4, %v10134_v56  ;;  %vm2388_vm13 = vcmp.eq.s32.totalorder %v10375_v2, 2  ;;  %v2214_v22 = vmul.f32 %v2213_v63, %v10362_v23 }
 0x2ed   : > { %v2516_v46 = vsel %vm2395_vm3, %v2515_v19, %v2514_v16  ;;  %v2640_v17 = vadd.s32 %v2639_v57, %v2630_v30  ;;  %v2641_v20 = vmul.u32 %v10350_v6, %v2587_v27  ;;  %vm2384_vm5 = vcmp.lt.s32.totalorder %v10375_v2, 2 }
 0x2ee   : > { %v2914_v53 = vpop.trf.xlu1  ;;  %v10443_v36 = vsel %vm10431_vm1, %v10018_v10, %v2516_v46  ;;  %v2390_v12 = vsel %vm2388_vm13, %v12618_v60, %v10391_v42  ;;  %v2223_v16 = vmul.f32 %v2222_v1, %v10362_v23  ;;  %v2208_v6 = vsel %vm2085_vm8, %v2207_v37, %v10134_v56  ;;  %v12730_v60 = vld [vmem:[#allocation17_spill] sm:$0xff] }
 0x2ef   : > { %3315 = vst.msk [vmem:[%s8950_s24 + $0x318] sm:$0xff] %vm3215_vm6, %v2914_v53  ;;  %v10456_v0 = vmul.f32 %v10443_v36, %v10443_v36  ;;  %v2644_v14 = vadd.s32 1, %v2640_v17  ;;  %v2391_v32 = vsel %vm2384_vm5, %v2387_v21, %v2390_v12  ;;  %vm2381_vm0 = vweird.f32 %v9601_v31 }
 0x2f0   : > { %v2948_v54 = vpop.trf.xlu2  ;;  %v2215_v2 = vadd.f32 -0.4999988, %v2214_v22  ;;  %v2392_v52 = vsel %vm2381_vm0, nan, %v2391_v32  ;;  %v10481_v40 = vsel %vm10326_vm14, 0, %v2208_v6  ;;  %v2224_v61 = vadd.f32 1.0, %v2223_v16 }
 0x2f1   : > { %v2976_v28 = vpop.trf.xlu0  ;;  %3333 = vst.msk [vmem:[%s8950_s24 + $0x3a8] sm:$0xff] %vm3215_vm6, %v2948_v54  ;;  %v2645_v53 = vsel %vm2643_vm11, %v2644_v14, %v2640_v17  ;;  %v2529_v34 = vmul.f32 -0.00019511016, %v10456_v0  ;;  %v2522_v57 = vmul.f32 -0.001358992, %v10456_v0  ;;  %v2227_v18 = vadd.s32 3, %v10481_v40 }
 0x2f2   : > { %3345 = vst.msk [vmem:[%s8950_s24 + $0x408] sm:$0xff] %vm3215_vm6, %v2976_v28  ;;  %v2646_v5 = vadd.s32 %v2645_v53, %v2641_v20  ;;  %v2216_v30 = vmul.f32 %v2215_v2, %v10362_v23  ;;  %v10496_v25 = vmul.f32 %v2224_v61, %v10339_v38  ;;  %v2517_v6 = vsub.s32 4, %v10292_v51 }
 0x2f3   : > { %v2530_v26 = vadd.f32 0.008332121, %v2529_v34  ;;  %v2523_v23 = vadd.f32 0.041655596, %v2522_v57  ;;  %v2228_v28 = vand.u32 3, %v2227_v18  ;;  %vm2226_vm13 = vweird.f32 %v9864_v55 }
 0x2f4   : > { %v2647_v62 = vadd.s32 536870912, %v2646_v5  ;;  %v10499_v17 = vadd.f32 1.0, %v2216_v30  ;;  %v2231_v54 = vxor.u32 2147483648, %v10496_v25 }
 0x2f5   : > { %v2531_v27 = vmul.f32 %v2530_v26, %v10456_v0  ;;  %v2524_v12 = vmul.f32 %v2523_v23, %v10456_v0  ;;  %vm2230_vm14 = vcmp.eq.s32.totalorder %v2228_v28, 0  ;;  %vm2229_vm4 = vcmp.lt.s32.totalorder %v2228_v28, 2 }
 0x2f6   : > { %v2915_v59 = vpop.trf.xlu1  ;;  %v10483_v58 = vshrl.u32 %v2647_v62, 30  ;;  %v2234_v20 = vxor.u32 2147483648, %v10499_v17  ;;  %v2232_v32 = vsel %vm2230_vm14, %v10499_v17, %v2231_v54  ;;  %vm2233_vm10 = vcmp.eq.s32.totalorder %v2228_v28, 2 }
 0x2f7   : > { %3316 = vst.msk [vmem:[%s8950_s24 + $0x320] sm:$0xff] %vm3215_vm6, %v2915_v59  ;;  %v2532_v59 = vadd.f32 -0.16666654, %v2531_v27  ;;  %v2525_v34 = vadd.f32 -0.4999988, %v2524_v12 }
 0x2f8   : > { %v2949_v19 = vpop.trf.xlu2  ;;  %v2649_v63 = vshll.u32 %v10483_v58, 30 }
 0x2f9   : > { %v2977_v56 = vpop.trf.xlu0  ;;  %3334 = vst.msk [vmem:[%s8950_s24 + $0x3b0] sm:$0xff] %vm3215_vm6, %v2949_v19  ;;  %v2533_v16 = vmul.f32 %v2532_v59, %v10456_v0 }
 0x2fa   : > { %3346 = vst.msk [vmem:[%s8950_s24 + $0x410] sm:$0xff] %vm3215_vm6, %v2977_v56  ;;  %v2650_v46 = vsub.s32 %v2646_v5, %v2649_v63  ;;  %v2235_v5 = vsel %vm2233_vm10, %v2234_v20, %v10496_v25 }
 0x2fb   : > { %v2236_v62 = vsel %vm2229_vm4, %v2232_v32, %v2235_v5 }
 0x2fc   : > { %vm2651_vm8 = vcmp.lt.s32.totalorder %v2650_v46, 0  ;;  %v2652_v1 = vsub.s32 0, %v2650_v46  ;;  %v2237_v27 = vsel %vm2226_vm13, nan, %v2236_v62 }
 0x2fe   : > { %3119 = vxpose.xlu2.b32.start.end [1/1] (short) %v2392_v52, 128  ;;  %v2916_v8 = vpop.trf.xlu1  ;;  %v2653_v21 = vsel %vm2651_vm8, %v2652_v1, %v2650_v46  ;;  %v2642_v52 = vadd.s32 %v10437_v41, %v10427_v33  ;;  %v2518_v33 = vsel %vm2395_vm3, %v2517_v6, %v10292_v51  ;;  %v2526_v41 = vmul.f32 %v2525_v34, %v10456_v0 }
 0x2ff   : > { %3317 = vst.msk [vmem:[%s8950_s24 + $0x328] sm:$0xff] %vm3215_vm6, %v2916_v8  ;;  %v2654_v22 = vclz %v2653_v21  ;;  %v2534_v8 = vadd.f32 1.0, %v2533_v16  ;;  %v2520_v1 = vsel %vm10431_vm1, 0, %v2518_v33  ;;  %v5464_v51 = vand.u32 3, %v10481_v40 }
 0x300   : > { %v2950_v14 = vpop.trf.xlu2  ;;  %v5772_v59 = vand.u32 3, %v2520_v1  ;;  %vm2550_vm1 = vcmp.lt.s32.totalorder %v10218_v47, 0  ;;  %v12693_v16 = vand.u32 2147483647, %v10218_v47 }
 0x301   : > { %v2978_v37 = vpop.trf.xlu0  ;;  %3335 = vst.msk [vmem:[%s8950_s24 + $0x3b8] sm:$0xff] %vm3215_vm6, %v2950_v14  ;;  %v7852_v53 = vadd.s32 4294967294, %v2654_v22  ;;  %v10534_v28 = vmul.f32 %v2534_v8, %v10443_v36  ;;  %vm5466_vm3 = vcmp.eq.s32.totalorder %v5464_v51, 0  ;;  %vm5469_vm5 = vcmp.eq.s32.totalorder %v5464_v51, 2 }
 0x302   : > { %3347 = vst.msk [vmem:[%s8950_s24 + $0x418] sm:$0xff] %vm3215_vm6, %v2978_v37  ;;  %v10536_v37 = vadd.f32 1.0, %v2526_v41  ;;  %v5468_v32 = vsel %vm5466_vm3, %v10499_v17, %v2231_v54  ;;  %vm10553_vm8 = vcmp.le.f32.partialorder %v12693_v16, 0.7853982  ;;  %vm5465_vm14 = vcmp.lt.s32.totalorder %v5464_v51, 2 }
 0x303   : > { %vm7853_vm11 = vcmp.lt.s32.totalorder %v7852_v53, 0  ;;  %v2541_v22 = vxor.u32 2147483648, %v10534_v28  ;;  %v5471_v6 = vsel %vm5469_vm5, %v2234_v20, %v10496_v25  ;;  %vm5774_vm4 = vcmp.eq.s32.totalorder %v5772_v59, 0 }
 0x304   : > { %v2657_v2 = vsel %vm7853_vm11, 0, %v7852_v53  ;;  %v2544_v49 = vxor.u32 2147483648, %v10536_v37  ;;  %vm5777_vm10 = vcmp.eq.s32.totalorder %v5772_v59, 2  ;;  %vm5773_vm11 = vcmp.lt.s32.totalorder %v5772_v59, 2 }
 0x305   : > { %v2658_v61 = vsub.s32 32, %v2657_v2  ;;  %v2662_v56 = vsub.s32 4294967266, %v2657_v2  ;;  %v2659_v30 = vshll.u32 %v2650_v46, %v2657_v2  ;;  %v5472_v2 = vsel %vm5465_vm14, %v5468_v32, %v5471_v6 }
 0x306   : > { %v2917_v38 = vpop.trf.xlu1  ;;  %v5776_v17 = vsel %vm5774_vm4, %v10536_v37, %v2541_v22  ;;  %v10568_v62 = vsel %vm2226_vm13, nan, %v5472_v2  ;;  %v5779_v25 = vsel %vm5777_vm10, %v2544_v49, %v10534_v28  ;;  %vm2536_vm3 = vweird.f32 %v10018_v10 }
 0x307   : > { %3318 = vst.msk [vmem:[%s8950_s24 + $0x330] sm:$0xff] %vm3215_vm6, %v2917_v38  ;;  %v2660_v57 = vshrl.u32 %v2642_v52, %v2658_v61  ;;  %v2663_v63 = vadd.s32 127, %v2662_v56  ;;  %v5780_v52 = vsel %vm5773_vm11, %v5776_v17, %v5779_v25  ;;  %v2672_v61 = vsub.s32 4, %v10483_v58 }
 0x308   : > { %v2951_v26 = vpop.trf.xlu2  ;;  %v10577_v56 = vsel %vm2536_vm3, nan, %v5780_v52  ;;  %vm2691_vm14 = vweird.f32 %v10218_v47 }
 0x309   : > { %v2979_v19 = vpop.trf.xlu0  ;;  %3336 = vst.msk [vmem:[%s8950_s24 + $0x3c0] sm:$0xff] %vm3215_vm6, %v2951_v26  ;;  %v2661_v23 = vor.u32 %v2660_v57, %v2659_v30  ;;  %v2664_v46 = vshll.u32 %v2663_v63, 23 }
 0x30a   : > { %3348 = vst.msk [vmem:[%s8950_s24 + $0x420] sm:$0xff] %vm3215_vm6, %v2979_v19 }
 0x30b   : > { %v2665_v21 = vor.u32 4788187, %v2664_v46  ;;  %v2668_v14 = vcvt.s32.f32 %v2661_v23 }
 0x30d   : > { %v2666_v0 = vand.u32 2147483647, %v2665_v21  ;;  %v2537_v21 = vadd.s32 3, %v2520_v1 }
 0x30e   : > { %v2918_v18 = vpop.trf.xlu1 }
 0x30f   : > { %3319 = vst.msk [vmem:[%s8950_s24 + $0x338] sm:$0xff] %vm3215_vm6, %v2918_v18  ;;  %v2669_v53 = vmul.f32 %v2668_v14, %v2666_v0  ;;  %v2673_v18 = vsel %vm2550_vm1, %v2672_v61, %v10483_v58 }
 0x310   : > { %v2952_v12 = vpop.trf.xlu2  ;;  %v10590_v41 = vsel %vm10553_vm8, 0, %v2673_v18 }
 0x311   : > { %3087 = vxpose.xlu1.b32.start.end [1/1] (short) %v2237_v27, 128  ;;  %v2980_v38 = vpop.trf.xlu0  ;;  %3337 = vst.msk [vmem:[%s8950_s24 + $0x3c8] sm:$0xff] %vm3215_vm6, %v2952_v12  ;;  %v2670_v40 = vxor.u32 2147483648, %v2669_v53  ;;  %v5926_v12 = vand.u32 3, %v10590_v41 }
 0x312   : > { %3349 = vst.msk [vmem:[%s8950_s24 + $0x428] sm:$0xff] %vm3215_vm6, %v2980_v38 }
 0x313   : > { %v2671_v34 = vsel %vm2550_vm1, %v2670_v40, %v2669_v53  ;;  %vm5931_vm13 = vcmp.eq.s32.totalorder %v5926_v12, 2  ;;  %vm5928_vm1 = vcmp.eq.s32.totalorder %v5926_v12, 0 }
 0x314   : > { %v2674_v54 = vsel %vm10553_vm8, %v10218_v47, %v2671_v34  ;;  %vm5927_vm8 = vcmp.lt.s32.totalorder %v5926_v12, 2 }
 0x315   : > { %v2676_v20 = vmul.f32 %v2674_v54, %v2674_v54 }
 0x316   : > { %v2919_v36 = vpop.trf.xlu1 }
 0x317   : > { %3320 = vst.msk [vmem:[%s8950_s24 + $0x340] sm:$0xff] %vm3215_vm6, %v2919_v36  ;;  %v2677_v26 = vmul.f32 -0.001358992, %v2676_v20  ;;  %v2684_v8 = vmul.f32 -0.00019511016, %v2676_v20  ;;  %v2538_v36 = vand.u32 3, %v2537_v21 }
 0x318   : > { %v2953_v55 = vpop.trf.xlu2 }
 0x319   : > { %v2981_v19 = vpop.trf.xlu0  ;;  %3338 = vst.msk [vmem:[%s8950_s24 + $0x3d0] sm:$0xff] %vm3215_vm6, %v2953_v55  ;;  %v2678_v57 = vadd.f32 0.041655596, %v2677_v26  ;;  %v2685_v63 = vadd.f32 0.008332121, %v2684_v8  ;;  %vm2540_vm5 = vcmp.eq.s32.totalorder %v2538_v36, 0 }
 0x31a   : > { %3350 = vst.msk [vmem:[%s8950_s24 + $0x430] sm:$0xff] %vm3215_vm6, %v2981_v19  ;;  %v2542_v2 = vsel %vm2540_vm5, %v10536_v37, %v2541_v22  ;;  %vm2543_vm4 = vcmp.eq.s32.totalorder %v2538_v36, 2  ;;  %vm2539_vm10 = vcmp.lt.s32.totalorder %v2538_v36, 2 }
 0x31b   : > { %v2679_v27 = vmul.f32 %v2678_v57, %v2676_v20  ;;  %v2686_v33 = vmul.f32 %v2685_v63, %v2676_v20  ;;  %v2545_v22 = vsel %vm2543_vm4, %v2544_v49, %v10534_v28 }
 0x31d   : > { %v2680_v23 = vadd.f32 -0.4999988, %v2679_v27  ;;  %v2687_v46 = vadd.f32 -0.16666654, %v2686_v33 }
 0x31e   : > { %v2920_v30 = vpop.trf.xlu1 }
 0x31f   : > { %3321 = vst.msk [vmem:[%s8950_s24 + $0x348] sm:$0xff] %vm3215_vm6, %v2920_v30  ;;  %v2681_v14 = vmul.f32 %v2680_v23, %v2676_v20  ;;  %v2688_v59 = vmul.f32 %v2687_v46, %v2676_v20  ;;  %v2546_v20 = vsel %vm2539_vm10, %v2542_v2, %v2545_v22 }
 0x320   : > { %v2954_v0 = vpop.trf.xlu2  ;;  %v2547_v52 = vsel %vm2536_vm3, nan, %v2546_v20 }
 0x321   : > { %v2982_v51 = vpop.trf.xlu0  ;;  %3339 = vst.msk [vmem:[%s8950_s24 + $0x3d8] sm:$0xff] %vm3215_vm6, %v2954_v0  ;;  %v10597_v58 = vadd.f32 1.0, %v2681_v14  ;;  %v2689_v53 = vadd.f32 1.0, %v2688_v59 }
 0x322   : > { %3351 = vst.msk [vmem:[%s8950_s24 + $0x438] sm:$0xff] %vm3215_vm6, %v2982_v51 }
 0x323   : > { %v10601_v40 = vmul.f32 %v2689_v53, %v2674_v54  ;;  %v2699_v1 = vxor.u32 2147483648, %v10597_v58  ;;  %v3616_v53 = vand.u32 3, %v8510_v13  ;;  %v12697_v13 = vxor.u32 2147483648, %v8611_v48 }
 0x325   : > { %v2696_v32 = vxor.u32 2147483648, %v10601_v40  ;;  %v5933_v16 = vsel %vm5931_vm13, %v2699_v1, %v10601_v40  ;;  %vm3618_vm11 = vcmp.eq.s32.totalorder %v3616_v53, 0  ;;  %vm3621_vm3 = vcmp.eq.s32.totalorder %v3616_v53, 2 }
 0x326   : > { %v2921_v38 = vpop.trf.xlu1  ;;  %vm3617_vm13 = vcmp.lt.s32.totalorder %v3616_v53, 2  ;;  %v3623_v2 = vsel %vm3621_vm3, %v12697_v13, %v8621_v11 }
 0x327   : > { %3322 = vst.msk [vmem:[%s8950_s24 + $0x350] sm:$0xff] %vm3215_vm6, %v2921_v38  ;;  %v5930_v34 = vsel %vm5928_vm1, %v10597_v58, %v2696_v32 }
 0x328   : > { %v2955_v6 = vpop.trf.xlu2  ;;  %v5934_v54 = vsel %vm5927_vm8, %v5930_v34, %v5933_v16 }
 0x329   : > { %v2983_v5 = vpop.trf.xlu0  ;;  %3340 = vst.msk [vmem:[%s8950_s24 + $0x3e0] sm:$0xff] %vm3215_vm6, %v2955_v6  ;;  %v10621_v25 = vsel %vm2691_vm14, nan, %v5934_v54 }
 0x32a   : > { %3352 = vst.msk [vmem:[%s8950_s24 + $0x440] sm:$0xff] %vm3215_vm6, %v2983_v5  ;;  %v12696_v5 = vxor.u32 2147483648, %v8621_v11 }
 0x32c   : > { %v3620_v6 = vsel %vm3618_vm11, %v8611_v48, %v12696_v5  ;;  %v2692_v48 = vadd.s32 3, %v10590_v41 }
 0x32e   : > { %v2922_v17 = vpop.trf.xlu1  ;;  %v2693_v11 = vand.u32 3, %v2692_v48 }
 0x32f   : > { %3323 = vst.msk [vmem:[%s8950_s24 + $0x358] sm:$0xff] %vm3215_vm6, %v2922_v17  ;;  %v3624_v17 = vsel %vm3617_vm13, %v3620_v6, %v3623_v2 }
 0x330   : > { %v2956_v19 = vpop.trf.xlu2  ;;  %v3625_v54 = vsel %vm366_vm2, nan, %v3624_v17  ;;  %vm2695_vm2 = vcmp.eq.s32.totalorder %v2693_v11, 0  ;;  %vm2698_vm1 = vcmp.eq.s32.totalorder %v2693_v11, 2  ;;  %vm2694_vm5 = vcmp.lt.s32.totalorder %v2693_v11, 2 }
 0x331   : > { %v2984_v61 = vpop.trf.xlu0  ;;  %3341 = vst.msk [vmem:[%s8950_s24 + $0x3e8] sm:$0xff] %vm3215_vm6, %v2956_v19  ;;  %v2697_v41 = vsel %vm2695_vm2, %v10597_v58, %v2696_v32  ;;  %v4078_v11 = vand.u32 3, %v8321_v3  ;;  %v12699_v3 = vxor.u32 2147483648, %v8421_v15 }
 0x332   : > { %3353 = vst.msk [vmem:[%s8950_s24 + $0x448] sm:$0xff] %vm3215_vm6, %v2984_v61 }
 0x333   : > { %vm4080_vm8 = vcmp.eq.s32.totalorder %v4078_v11, 0  ;;  %vm4079_vm4 = vcmp.lt.s32.totalorder %v4078_v11, 2 }
 0x336   : > { %v2923_v55 = vpop.trf.xlu1 }
 0x337   : > { %3151 = vxpose.xlu0.b32.start.end [1/1] (short) %v2547_v52, 128  ;;  %3324 = vst.msk [vmem:[%s8950_s24 + $0x360] sm:$0xff] %vm3215_vm6, %v2923_v55  ;;  %v2700_v55 = vsel %vm2698_vm1, %v2699_v1, %v10601_v40 }
 0x338   : > { %v2957_v37 = vpop.trf.xlu2 }
 0x339   : > { %v2985_v28 = vpop.trf.xlu0  ;;  %3342 = vst.msk [vmem:[%s8950_s24 + $0x3f0] sm:$0xff] %vm3215_vm6, %v2957_v37 }
 0x33a   : > { %3354 = vst.msk [vmem:[%s8950_s24 + $0x450] sm:$0xff] %vm3215_vm6, %v2985_v28  ;;  %v2701_v28 = vsel %vm2694_vm5, %v2697_v41, %v2700_v55 }
 0x33b   : > { %v2702_v32 = vsel %vm2691_vm14, nan, %v2701_v28  ;;  %vm4083_vm14 = vcmp.eq.s32.totalorder %v4078_v11, 2 }
 0x33c   : > { %v4085_v28 = vsel %vm4083_vm14, %v12699_v3, %v8428_v35 }
 0x33e   : > { %v2924_v10 = vpop.trf.xlu1 }
 0x33f   : > { %3325 = vst.msk [vmem:[%s8950_s24 + $0x368] sm:$0xff] %vm3215_vm6, %v2924_v10 }
 0x340   : > { %v2958_v26 = vpop.trf.xlu2 }
 0x341   : > { %v2986_v49 = vpop.trf.xlu0  ;;  %3343 = vst.msk [vmem:[%s8950_s24 + $0x3f8] sm:$0xff] %vm3215_vm6, %v2958_v26 }
 0x342   : > { %3355 = vst.msk [vmem:[%s8950_s24 + $0x458] sm:$0xff] %vm3215_vm6, %v2986_v49 }
 0x346   : > { %v2925_v8 = vpop.trf.xlu1 }
 0x347   : > { %3326 = vst.msk [vmem:[%s8950_s24 + $0x370] sm:$0xff] %vm3215_vm6, %v2925_v8 }
 0x348   : > { %v3039_v57 = vpop.trf.xlu2 }
 0x349   : > { %v2987_v30 = vpop.trf.xlu0  ;;  %3376 = vst.msk [vmem:[%s8950_s24 + $0x500] sm:$0xff] %vm3215_vm6, %v3039_v57 }
 0x34a   : > { %3356 = vst.msk [vmem:[%s8950_s24 + $0x460] sm:$0xff] %vm3215_vm6, %v2987_v30 }
 0x34e   : > { %v2926_v63 = vpop.trf.xlu1 }
 0x34f   : > { %3327 = vst.msk [vmem:[%s8950_s24 + $0x378] sm:$0xff] %vm3215_vm6, %v2926_v63 }
 0x350   : > { %v3040_v27 = vpop.trf.xlu2 }
 0x351   : > { %v2988_v18 = vpop.trf.xlu0  ;;  %3377 = vst.msk [vmem:[%s8950_s24 + $0x508] sm:$0xff] %vm3215_vm6, %v3040_v27 }
 0x352   : > { %3357 = vst.msk [vmem:[%s8950_s24 + $0x468] sm:$0xff] %vm3215_vm6, %v2988_v18 }
 0x356   : > { %v3007_v33 = vpop.trf.xlu1 }
 0x357   : > { %3360 = vst.msk [vmem:[%s8950_s24 + $0x480] sm:$0xff] %vm3215_vm6, %v3007_v33 }
 0x358   : > { %v3041_v46 = vpop.trf.xlu2 }
 0x359   : > { %v2989_v23 = vpop.trf.xlu0  ;;  %3378 = vst.msk [vmem:[%s8950_s24 + $0x510] sm:$0xff] %vm3215_vm6, %v3041_v46 }
 0x35a   : > { %3358 = vst.msk [vmem:[%s8950_s24 + $0x470] sm:$0xff] %vm3215_vm6, %v2989_v23 }
 0x35e   : > { %v3008_v21 = vpop.trf.xlu1 }
 0x35f   : > { %3361 = vst.msk [vmem:[%s8950_s24 + $0x488] sm:$0xff] %vm3215_vm6, %v3008_v21 }
 0x360   : > { %v3042_v0 = vpop.trf.xlu2 }
 0x361   : > { %v2990_v51 = vpop.trf.xlu0  ;;  %3379 = vst.msk [vmem:[%s8950_s24 + $0x518] sm:$0xff] %vm3215_vm6, %v3042_v0 }
 0x362   : > { %3359 = vst.msk [vmem:[%s8950_s24 + $0x478] sm:$0xff] %vm3215_vm6, %v2990_v51 }
 0x366   : > { %v3009_v14 = vpop.trf.xlu1 }
 0x367   : > { %3362 = vst.msk [vmem:[%s8950_s24 + $0x490] sm:$0xff] %vm3215_vm6, %v3009_v14 }
 0x368   : > { %v3043_v38 = vpop.trf.xlu2 }
 0x369   : > { %v3071_v59 = vpop.trf.xlu0  ;;  %3380 = vst.msk [vmem:[%s8950_s24 + $0x520] sm:$0xff] %vm3215_vm6, %v3043_v38 }
 0x36a   : > { %3392 = vst.msk [vmem:[%s8950_s24 + $0x580] sm:$0xff] %vm3215_vm6, %v3071_v59 }
 0x36e   : > { %v3010_v12 = vpop.trf.xlu1 }
 0x36f   : > { %3363 = vst.msk [vmem:[%s8950_s24 + $0x498] sm:$0xff] %vm3215_vm6, %v3010_v12 }
 0x370   : > { %v3044_v16 = vpop.trf.xlu2 }
 0x371   : > { %v3072_v36 = vpop.trf.xlu0  ;;  %3381 = vst.msk [vmem:[%s8950_s24 + $0x528] sm:$0xff] %vm3215_vm6, %v3044_v16 }
 0x372   : > { %3393 = vst.msk [vmem:[%s8950_s24 + $0x588] sm:$0xff] %vm3215_vm6, %v3072_v36 }
 0x376   : > { %v3011_v34 = vpop.trf.xlu1 }
 0x377   : > { %3364 = vst.msk [vmem:[%s8950_s24 + $0x4a0] sm:$0xff] %vm3215_vm6, %v3011_v34 }
 0x378   : > { %v3045_v20 = vpop.trf.xlu2 }
 0x379   : > { %v3073_v22 = vpop.trf.xlu0  ;;  %3382 = vst.msk [vmem:[%s8950_s24 + $0x530] sm:$0xff] %vm3215_vm6, %v3045_v20 }
 0x37a   : > { %3394 = vst.msk [vmem:[%s8950_s24 + $0x590] sm:$0xff] %vm3215_vm6, %v3073_v22 }
 0x37e   : > { %5936 = vxpose.xlu2.b32.start.end [1/1] (short) %v3625_v54, 128  ;;  %v3012_v52 = vpop.trf.xlu1 }
 0x37f   : > { %3365 = vst.msk [vmem:[%s8950_s24 + $0x4a8] sm:$0xff] %vm3215_vm6, %v3012_v52 }
 0x380   : > { %v3046_v19 = vpop.trf.xlu2 }
 0x381   : > { %v3074_v61 = vpop.trf.xlu0  ;;  %3383 = vst.msk [vmem:[%s8950_s24 + $0x538] sm:$0xff] %vm3215_vm6, %v3046_v19 }
 0x382   : > { %3395 = vst.msk [vmem:[%s8950_s24 + $0x598] sm:$0xff] %vm3215_vm6, %v3074_v61 }
 0x386   : > { %v3013_v9 = vpop.trf.xlu1 }
 0x387   : > { %3366 = vst.msk [vmem:[%s8950_s24 + $0x4b0] sm:$0xff] %vm3215_vm6, %v3013_v9  ;;  %v12698_v9 = vxor.u32 2147483648, %v8428_v35 }
 0x388   : > { %v3047_v10 = vpop.trf.xlu2 }
 0x389   : > { %v3075_v37 = vpop.trf.xlu0  ;;  %3384 = vst.msk [vmem:[%s8950_s24 + $0x540] sm:$0xff] %vm3215_vm6, %v3047_v10  ;;  %v4082_v41 = vsel %vm4080_vm8, %v8421_v15, %v12698_v9  ;;  %v3924_v15 = vand.u32 3, %v8759_v24  ;;  %vm12731_vm8 = vweird.f32 %v12730_v60  ;;  %v12739_v60 = vld [vmem:[#allocation21_spill] sm:$0xff] }
 0x38a   : > { %3396 = vst.msk [vmem:[%s8950_s24 + $0x5a0] sm:$0xff] %vm3215_vm6, %v3075_v37  ;;  %v4086_v37 = vsel %vm4079_vm4, %v4082_v41, %v4085_v28 }
 0x38b   : > { %v4087_v10 = vsel %vm831_vm9, nan, %v4086_v37  ;;  %vm3926_vm9 = vcmp.eq.s32.totalorder %v3924_v15, 0  ;;  %vm3929_vm10 = vcmp.eq.s32.totalorder %v3924_v15, 2  ;;  %vm3925_vm11 = vcmp.lt.s32.totalorder %v3924_v15, 2 }
 0x38e   : > { %v3014_v49 = vpop.trf.xlu1 }
 0x38f   : > { %3367 = vst.msk [vmem:[%s8950_s24 + $0x4b8] sm:$0xff] %vm3215_vm6, %v3014_v49 }
 0x390   : > { %v3048_v40 = vpop.trf.xlu2 }
 0x391   : > { %3183 = vxpose.xlu1.b32.start.end [1/1] (short) %v2702_v32, 128  ;;  %v3076_v58 = vpop.trf.xlu0  ;;  %3385 = vst.msk [vmem:[%s8950_s24 + $0x548] sm:$0xff] %vm3215_vm6, %v3048_v40 }
 0x392   : > { %3397 = vst.msk [vmem:[%s8950_s24 + $0x5a8] sm:$0xff] %vm3215_vm6, %v3076_v58 }
 0x396   : > { %v3015_v1 = vpop.trf.xlu1 }
 0x397   : > { %3368 = vst.msk [vmem:[%s8950_s24 + $0x4c0] sm:$0xff] %vm3215_vm6, %v3015_v1  ;;  %v12700_v1 = vxor.u32 2147483648, %v8888_v45 }
 0x398   : > { %v3049_v26 = vpop.trf.xlu2 }
 0x399   : > { %v3077_v47 = vpop.trf.xlu0  ;;  %3386 = vst.msk [vmem:[%s8950_s24 + $0x550] sm:$0xff] %vm3215_vm6, %v3049_v26 }
 0x39a   : > { %3398 = vst.msk [vmem:[%s8950_s24 + $0x5b0] sm:$0xff] %vm3215_vm6, %v3077_v47  ;;  %v12701_v47 = vld [vmem:[#allocation8_spill] sm:$0xff] }
 0x39b   : > { %v3928_v26 = vsel %vm3926_vm9, %v12701_v47, %v12700_v1  ;;  %v12702_v24 = vxor.u32 2147483648, %v12701_v47  ;;  %v12708_v47 = vld [vmem:[#allocation18_spill] sm:$0xff] }
 0x39e   : > { %v3016_v8 = vpop.trf.xlu1 }
 0x39f   : > { %3369 = vst.msk [vmem:[%s8950_s24 + $0x4c8] sm:$0xff] %vm3215_vm6, %v3016_v8  ;;  %v3931_v8 = vsel %vm3929_vm10, %v12702_v24, %v8888_v45 }
 0x3a0   : > { %v3050_v57 = vpop.trf.xlu2 }
 0x3a1   : > { %v3078_v30 = vpop.trf.xlu0  ;;  %3387 = vst.msk [vmem:[%s8950_s24 + $0x558] sm:$0xff] %vm3215_vm6, %v3050_v57 }
 0x3a2   : > { %3399 = vst.msk [vmem:[%s8950_s24 + $0x5b8] sm:$0xff] %vm3215_vm6, %v3078_v30  ;;  %v3932_v30 = vsel %vm3925_vm11, %v3928_v26, %v3931_v8  ;;  %v12709_v8 = vxor.u32 2147483648, %v12708_v47 }
 0x3a6   : > { %v3017_v63 = vpop.trf.xlu1 }
 0x3a7   : > { %3370 = vst.msk [vmem:[%s8950_s24 + $0x4d0] sm:$0xff] %vm3215_vm6, %v3017_v63 }
 0x3a8   : > { %v3051_v27 = vpop.trf.xlu2 }
 0x3a9   : > { %v3079_v18 = vpop.trf.xlu0  ;;  %3388 = vst.msk [vmem:[%s8950_s24 + $0x560] sm:$0xff] %vm3215_vm6, %v3051_v27 }
 0x3aa   : > { %3400 = vst.msk [vmem:[%s8950_s24 + $0x5c0] sm:$0xff] %vm3215_vm6, %v3079_v18 }
 0x3ae   : > { %v3018_v33 = vpop.trf.xlu1 }
 0x3af   : > { %3371 = vst.msk [vmem:[%s8950_s24 + $0x4d8] sm:$0xff] %vm3215_vm6, %v3018_v33  ;;  %v3933_v33 = vsel %vm676_vm12, nan, %v3932_v30 }
 0x3b0   : > { %v3052_v46 = vpop.trf.xlu2 }
 0x3b1   : > { %v3080_v23 = vpop.trf.xlu0  ;;  %3389 = vst.msk [vmem:[%s8950_s24 + $0x568] sm:$0xff] %vm3215_vm6, %v3052_v46 }
 0x3b2   : > { %3401 = vst.msk [vmem:[%s8950_s24 + $0x5c8] sm:$0xff] %vm3215_vm6, %v3080_v23 }
 0x3b6   : > { %v3019_v21 = vpop.trf.xlu1 }
 0x3b7   : > { %5968 = vxpose.xlu0.b32.start.end [1/1] (short) %v8532_v44, 128  ;;  %3372 = vst.msk [vmem:[%s8950_s24 + $0x4e0] sm:$0xff] %vm3215_vm6, %v3019_v21 }
 0x3b8   : > { %v3053_v0 = vpop.trf.xlu2 }
 0x3b9   : > { %v3081_v51 = vpop.trf.xlu0  ;;  %3390 = vst.msk [vmem:[%s8950_s24 + $0x570] sm:$0xff] %vm3215_vm6, %v3053_v0 }
 0x3ba   : > { %3402 = vst.msk [vmem:[%s8950_s24 + $0x5d0] sm:$0xff] %vm3215_vm6, %v3081_v51 }
 0x3be   : > { %v3020_v14 = vpop.trf.xlu1 }
 0x3bf   : > { %3373 = vst.msk [vmem:[%s8950_s24 + $0x4e8] sm:$0xff] %vm3215_vm6, %v3020_v14 }
 0x3c0   : > { %v3054_v59 = vpop.trf.xlu2 }
 0x3c1   : > { %v3082_v44 = vpop.trf.xlu0  ;;  %3391 = vst.msk [vmem:[%s8950_s24 + $0x578] sm:$0xff] %vm3215_vm6, %v3054_v59 }
 0x3c2   : > { %3403 = vst.msk [vmem:[%s8950_s24 + $0x5d8] sm:$0xff] %vm3215_vm6, %v3082_v44 }
 0x3c6   : > { %v3021_v38 = vpop.trf.xlu1 }
 0x3c7   : > { %3374 = vst.msk [vmem:[%s8950_s24 + $0x4f0] sm:$0xff] %vm3215_vm6, %v3021_v38 }
 0x3c8   : > { %v3135_v53 = vpop.trf.xlu2 }
 0x3c9   : > { %v3083_v12 = vpop.trf.xlu0  ;;  %3424 = vst.msk [vmem:[%s8950_s24 + $0x680] sm:$0xff] %vm3215_vm6, %v3135_v53 }
 0x3ca   : > { %3404 = vst.msk [vmem:[%s8950_s24 + $0x5e0] sm:$0xff] %vm3215_vm6, %v3083_v12 }
 0x3ce   : > { %v3022_v36 = vpop.trf.xlu1 }
 0x3cf   : > { %3375 = vst.msk [vmem:[%s8950_s24 + $0x4f8] sm:$0xff] %vm3215_vm6, %v3022_v36  ;;  %v12704_v36 = vld [vmem:[#allocation7_spill] sm:$0xff] }
 0x3d0   : > { %v3136_v5 = vpop.trf.xlu2 }
 0x3d1   : > { %v3084_v16 = vpop.trf.xlu0  ;;  %3425 = vst.msk [vmem:[%s8950_s24 + $0x688] sm:$0xff] %vm3215_vm6, %v3136_v5 }
 0x3d2   : > { %3405 = vst.msk [vmem:[%s8950_s24 + $0x5e8] sm:$0xff] %vm3215_vm6, %v3084_v16 }
 0x3d6   : > { %v3103_v6 = vpop.trf.xlu1 }
 0x3d7   : > { %3408 = vst.msk [vmem:[%s8950_s24 + $0x600] sm:$0xff] %vm3215_vm6, %v3103_v6 }
 0x3d8   : > { %v3137_v13 = vpop.trf.xlu2 }
 0x3d9   : > { %v3085_v34 = vpop.trf.xlu0  ;;  %3426 = vst.msk [vmem:[%s8950_s24 + $0x690] sm:$0xff] %vm3215_vm6, %v3137_v13 }
 0x3da   : > { %3406 = vst.msk [vmem:[%s8950_s24 + $0x5f0] sm:$0xff] %vm3215_vm6, %v3085_v34 }
 0x3de   : > { %v3104_v2 = vpop.trf.xlu1 }
 0x3df   : > { %3409 = vst.msk [vmem:[%s8950_s24 + $0x608] sm:$0xff] %vm3215_vm6, %v3104_v2 }
 0x3e0   : > { %v3138_v54 = vpop.trf.xlu2 }
 0x3e1   : > { %v3086_v17 = vpop.trf.xlu0  ;;  %3427 = vst.msk [vmem:[%s8950_s24 + $0x698] sm:$0xff] %vm3215_vm6, %v3138_v54 }
 0x3e2   : > { %3407 = vst.msk [vmem:[%s8950_s24 + $0x5f8] sm:$0xff] %vm3215_vm6, %v3086_v17 }
 0x3e6   : > { %v3105_v22 = vpop.trf.xlu1 }
 0x3e7   : > { %3410 = vst.msk [vmem:[%s8950_s24 + $0x610] sm:$0xff] %vm3215_vm6, %v3105_v22 }
 0x3e8   : > { %v3139_v52 = vpop.trf.xlu2 }
 0x3e9   : > { %v3167_v20 = vpop.trf.xlu0  ;;  %3428 = vst.msk [vmem:[%s8950_s24 + $0x6a0] sm:$0xff] %vm3215_vm6, %v3139_v52 }
 0x3ea   : > { %3440 = vst.msk [vmem:[%s8950_s24 + $0x700] sm:$0xff] %vm3215_vm6, %v3167_v20 }
 0x3ee   : > { %v3106_v48 = vpop.trf.xlu1 }
 0x3ef   : > { %3411 = vst.msk [vmem:[%s8950_s24 + $0x618] sm:$0xff] %vm3215_vm6, %v3106_v48 }
 0x3f0   : > { %v3140_v19 = vpop.trf.xlu2 }
 0x3f1   : > { %v3168_v61 = vpop.trf.xlu0  ;;  %3429 = vst.msk [vmem:[%s8950_s24 + $0x6a8] sm:$0xff] %vm3215_vm6, %v3140_v19 }
 0x3f2   : > { %3441 = vst.msk [vmem:[%s8950_s24 + $0x708] sm:$0xff] %vm3215_vm6, %v3168_v61 }
 0x3f6   : > { %v3107_v55 = vpop.trf.xlu1 }
 0x3f7   : > { %3412 = vst.msk [vmem:[%s8950_s24 + $0x620] sm:$0xff] %vm3215_vm6, %v3107_v55 }
 0x3f8   : > { %v3141_v32 = vpop.trf.xlu2 }
 0x3f9   : > { %v3169_v49 = vpop.trf.xlu0  ;;  %3430 = vst.msk [vmem:[%s8950_s24 + $0x6b0] sm:$0xff] %vm3215_vm6, %v3141_v32 }
 0x3fa   : > { %3442 = vst.msk [vmem:[%s8950_s24 + $0x710] sm:$0xff] %vm3215_vm6, %v3169_v49 }
 0x3fe   : > { %6032 = vxpose.xlu2.b32.start.end [1/1] (short) %v4087_v10, 128  ;;  %v3108_v58 = vpop.trf.xlu1 }
 0x3ff   : > { %3413 = vst.msk [vmem:[%s8950_s24 + $0x628] sm:$0xff] %vm3215_vm6, %v3108_v58  ;;  %v12705_v58 = vld [vmem:[#allocation16_spill] sm:$0xff] }
 0x400   : > { %v3142_v40 = vpop.trf.xlu2  ;;  %v4540_v15 = vand.u32 3, %v12705_v58 }
 0x401   : > { %v3170_v35 = vpop.trf.xlu0  ;;  %3431 = vst.msk [vmem:[%s8950_s24 + $0x6b8] sm:$0xff] %vm3215_vm6, %v3142_v40 }
 0x402   : > { %3443 = vst.msk [vmem:[%s8950_s24 + $0x718] sm:$0xff] %vm3215_vm6, %v3170_v35  ;;  %vm4542_vm12 = vcmp.eq.s32.totalorder %v4540_v15, 0  ;;  %vm4545_vm3 = vcmp.eq.s32.totalorder %v4540_v15, 2  ;;  %vm4541_vm13 = vcmp.lt.s32.totalorder %v4540_v15, 2 }
 0x406   : > { %v3109_v7 = vpop.trf.xlu1 }
 0x407   : > { %3414 = vst.msk [vmem:[%s8950_s24 + $0x630] sm:$0xff] %vm3215_vm6, %v3109_v7  ;;  %v12706_v7 = vld [vmem:[#allocation19_spill] sm:$0xff] }
 0x408   : > { %v3143_v63 = vpop.trf.xlu2  ;;  %v12707_v1 = vxor.u32 2147483648, %v12706_v7  ;;  %v4547_v30 = vsel %vm4545_vm3, %v12709_v8, %v12706_v7 }
 0x409   : > { %v3171_v57 = vpop.trf.xlu0  ;;  %3432 = vst.msk [vmem:[%s8950_s24 + $0x6c0] sm:$0xff] %vm3215_vm6, %v3143_v63 }
 0x40a   : > { %3444 = vst.msk [vmem:[%s8950_s24 + $0x720] sm:$0xff] %vm3215_vm6, %v3171_v57  ;;  %v4544_v26 = vsel %vm4542_vm12, %v12708_v47, %v12707_v1 }
 0x40b   : > { %v4548_v57 = vsel %vm4541_vm13, %v4544_v26, %v4547_v30 }
 0x40e   : > { %v3110_v18 = vpop.trf.xlu1 }
 0x40f   : > { %3415 = vst.msk [vmem:[%s8950_s24 + $0x638] sm:$0xff] %vm3215_vm6, %v3110_v18  ;;  %v4549_v18 = vsel %vm1296_vm7, nan, %v4548_v57 }
 0x410   : > { %v3144_v45 = vpop.trf.xlu2 }
 0x411   : > { %6000 = vxpose.xlu1.b32.start.end [1/1] (short) %v3933_v33, 128  ;;  %v3172_v23 = vpop.trf.xlu0  ;;  %3433 = vst.msk [vmem:[%s8950_s24 + $0x6c8] sm:$0xff] %vm3215_vm6, %v3144_v45  ;;  %v12711_v45 = vld [vmem:[#allocation10_spill] sm:$0xff] }
 0x412   : > { %3445 = vst.msk [vmem:[%s8950_s24 + $0x728] sm:$0xff] %vm3215_vm6, %v3172_v23 }
 0x416   : > { %v3111_v46 = vpop.trf.xlu1 }
 0x417   : > { %3416 = vst.msk [vmem:[%s8950_s24 + $0x640] sm:$0xff] %vm3215_vm6, %v3111_v46  ;;  %v4386_v46 = vand.u32 3, %v12711_v45 }
 0x418   : > { %v3145_v51 = vpop.trf.xlu2 }
 0x419   : > { %v3173_v21 = vpop.trf.xlu0  ;;  %3434 = vst.msk [vmem:[%s8950_s24 + $0x6d0] sm:$0xff] %vm3215_vm6, %v3145_v51  ;;  %vm4388_vm7 = vcmp.eq.s32.totalorder %v4386_v46, 0  ;;  %vm4391_vm2 = vcmp.eq.s32.totalorder %v4386_v46, 2  ;;  %vm4387_vm1 = vcmp.lt.s32.totalorder %v4386_v46, 2 }
 0x41a   : > { %3446 = vst.msk [vmem:[%s8950_s24 + $0x730] sm:$0xff] %vm3215_vm6, %v3173_v21 }
 0x41e   : > { %v3112_v0 = vpop.trf.xlu1 }
 0x41f   : > { %3417 = vst.msk [vmem:[%s8950_s24 + $0x648] sm:$0xff] %vm3215_vm6, %v3112_v0 }
 0x420   : > { %v3146_v44 = vpop.trf.xlu2 }
 0x421   : > { %v3174_v14 = vpop.trf.xlu0  ;;  %3435 = vst.msk [vmem:[%s8950_s24 + $0x6d8] sm:$0xff] %vm3215_vm6, %v3146_v44 }
 0x422   : > { %3447 = vst.msk [vmem:[%s8950_s24 + $0x738] sm:$0xff] %vm3215_vm6, %v3174_v14  ;;  %v12712_v14 = vld [vmem:[#allocation13_spill] sm:$0xff] }
 0x423   : > { %v12713_v44 = vxor.u32 2147483648, %v12712_v14 }
 0x426   : > { %v3113_v59 = vpop.trf.xlu1 }
 0x427   : > { %3418 = vst.msk [vmem:[%s8950_s24 + $0x650] sm:$0xff] %vm3215_vm6, %v3113_v59  ;;  %v12714_v59 = vld [vmem:[#allocation12_spill] sm:$0xff] }
 0x428   : > { %v3147_v12 = vpop.trf.xlu2 }
 0x429   : > { %v3175_v38 = vpop.trf.xlu0  ;;  %3436 = vst.msk [vmem:[%s8950_s24 + $0x6e0] sm:$0xff] %vm3215_vm6, %v3147_v12  ;;  %v12715_v12 = vxor.u32 2147483648, %v12714_v59 }
 0x42a   : > { %3448 = vst.msk [vmem:[%s8950_s24 + $0x740] sm:$0xff] %vm3215_vm6, %v3175_v38  ;;  %v4390_v38 = vsel %vm4388_vm7, %v12714_v59, %v12713_v44 }
 0x42e   : > { %v3114_v53 = vpop.trf.xlu1 }
 0x42f   : > { %3419 = vst.msk [vmem:[%s8950_s24 + $0x658] sm:$0xff] %vm3215_vm6, %v3114_v53  ;;  %v4393_v53 = vsel %vm4391_vm2, %v12715_v12, %v12712_v14 }
 0x430   : > { %v3148_v5 = vpop.trf.xlu2 }
 0x431   : > { %v3176_v16 = vpop.trf.xlu0  ;;  %3437 = vst.msk [vmem:[%s8950_s24 + $0x6e8] sm:$0xff] %vm3215_vm6, %v3148_v5 }
 0x432   : > { %3449 = vst.msk [vmem:[%s8950_s24 + $0x748] sm:$0xff] %vm3215_vm6, %v3176_v16 }
 0x436   : > { %v3115_v6 = vpop.trf.xlu1 }
 0x437   : > { %6064 = vxpose.xlu0.b32.start.end [1/1] (short) %v12704_v36, 128  ;;  %3420 = vst.msk [vmem:[%s8950_s24 + $0x660] sm:$0xff] %vm3215_vm6, %v3115_v6  ;;  %v4394_v36 = vsel %vm4387_vm1, %v4390_v38, %v4393_v53 }
 0x438   : > { %v3149_v13 = vpop.trf.xlu2 }
 0x439   : > { %v3177_v34 = vpop.trf.xlu0  ;;  %3438 = vst.msk [vmem:[%s8950_s24 + $0x6f0] sm:$0xff] %vm3215_vm6, %v3149_v13  ;;  %v4395_v13 = vsel %vm1141_vm15, nan, %v4394_v36 }
 0x43a   : > { %3450 = vst.msk [vmem:[%s8950_s24 + $0x750] sm:$0xff] %vm3215_vm6, %v3177_v34  ;;  %v12724_v34 = vld [vmem:[#allocation27_spill] sm:$0xff] }
 0x43e   : > { %v3116_v2 = vpop.trf.xlu1 }
 0x43f   : > { %3421 = vst.msk [vmem:[%s8950_s24 + $0x668] sm:$0xff] %vm3215_vm6, %v3116_v2 }
 0x440   : > { %v3150_v54 = vpop.trf.xlu2 }
 0x441   : > { %v3178_v17 = vpop.trf.xlu0  ;;  %3439 = vst.msk [vmem:[%s8950_s24 + $0x6f8] sm:$0xff] %vm3215_vm6, %v3150_v54 }
 0x442   : > { %3451 = vst.msk [vmem:[%s8950_s24 + $0x758] sm:$0xff] %vm3215_vm6, %v3178_v17 }
 0x446   : > { %v3117_v22 = vpop.trf.xlu1 }
 0x447   : > { %3422 = vst.msk [vmem:[%s8950_s24 + $0x670] sm:$0xff] %vm3215_vm6, %v3117_v22 }
 0x448   : > { %v10878_v52 = vpop.trf.xlu2 }
 0x449   : > { %v3179_v20 = vpop.trf.xlu0 }
 0x44a   : > { %3452 = vst.msk [vmem:[%s8950_s24 + $0x760] sm:$0xff] %vm3215_vm6, %v3179_v20 }
 0x44e   : > { %v3118_v48 = vpop.trf.xlu1 }
 0x44f   : > { %3423 = vst.msk [vmem:[%s8950_s24 + $0x678] sm:$0xff] %vm3215_vm6, %v3118_v48 }
 0x450   : > { %v10884_v61 = vpop.trf.xlu2 }
 0x451   : > { %v3180_v11 = vpop.trf.xlu0 }
 0x452   : > { %3453 = vst.msk [vmem:[%s8950_s24 + $0x768] sm:$0xff] %vm3215_vm6, %v3180_v11 }
 0x456   : > { %v3199_v19 = vpop.trf.xlu1 }
 0x457   : > { %3456 = vst.msk [vmem:[%s8950_s24 + $0x780] sm:$0xff] %vm3215_vm6, %v3199_v19 }
 0x458   : > { %v10890_v41 = vpop.trf.xlu2 }
 0x459   : > { %v3181_v9 = vpop.trf.xlu0 }
 0x45a   : > { %3454 = vst.msk [vmem:[%s8950_s24 + $0x770] sm:$0xff] %vm3215_vm6, %v3181_v9 }
 0x45e   : > { %v3200_v55 = vpop.trf.xlu1 }
 0x45f   : > { %3457 = vst.msk [vmem:[%s8950_s24 + $0x788] sm:$0xff] %vm3215_vm6, %v3200_v55 }
 0x460   : > { %v10896_v28 = vpop.trf.xlu2 }
 0x461   : > { %v3182_v3 = vpop.trf.xlu0 }
 0x462   : > { %3455 = vst.msk [vmem:[%s8950_s24 + $0x778] sm:$0xff] %vm3215_vm6, %v3182_v3 }
 0x466   : > { %v3201_v37 = vpop.trf.xlu1 }
 0x467   : > { %3458 = vst.msk [vmem:[%s8950_s24 + $0x790] sm:$0xff] %vm3215_vm6, %v3201_v37 }
 0x468   : > { %v10904_v49 = vpop.trf.xlu2 }
 0x469   : > { %v10902_v10 = vpop.trf.xlu0 }
 0x46e   : > { %v3202_v32 = vpop.trf.xlu1 }
 0x46f   : > { %3459 = vst.msk [vmem:[%s8950_s24 + $0x798] sm:$0xff] %vm3215_vm6, %v3202_v32  ;;  %v12717_v32 = vld [vmem:[#allocation14_spill] sm:$0xff] }
 0x470   : > { %v10911_v40 = vpop.trf.xlu2 }
 0x471   : > { %v10909_v35 = vpop.trf.xlu0 }
 0x476   : > { %v3203_v24 = vpop.trf.xlu1 }
 0x477   : > { %3460 = vst.msk [vmem:[%s8950_s24 + $0x7a0] sm:$0xff] %vm3215_vm6, %v3203_v24 }
 0x478   : > { %v10925_v33 = vpop.trf.xlu2 }
 0x479   : > { %v10923_v27 = vpop.trf.xlu0 }
 0x47e   : > { %6128 = vxpose.xlu2.b32.start.end [1/1] (short) %v4549_v18, 128  ;;  %v3204_v23 = vpop.trf.xlu1 }
 0x47f   : > { %3461 = vst.msk [vmem:[%s8950_s24 + $0x7a8] sm:$0xff] %vm3215_vm6, %v3204_v23 }
 0x480   : > { %v10932_v51 = vpop.trf.xlu2 }
 0x481   : > { %v10930_v21 = vpop.trf.xlu0 }
 0x486   : > { %v3205_v0 = vpop.trf.xlu1 }
 0x487   : > { %3462 = vst.msk [vmem:[%s8950_s24 + $0x7b0] sm:$0xff] %vm3215_vm6, %v3205_v0 }
 0x488   : > { %v10944_v5 = vpop.trf.xlu2 }
 0x489   : > { %v10942_v16 = vpop.trf.xlu0 }
 0x48e   : > { %v3206_v6 = vpop.trf.xlu1 }
 0x48f   : > { %3463 = vst.msk [vmem:[%s8950_s24 + $0x7b8] sm:$0xff] %vm3215_vm6, %v3206_v6 }
 0x490   : > { %v10952_v17 = vpop.trf.xlu2 }
 0x491   : > { %6096 = vxpose.xlu1.b32.start.end [1/1] (short) %v4395_v13, 128  ;;  %v10950_v2 = vpop.trf.xlu0  ;;  %v5002_v13 = vand.u32 3, %v12724_v34 }
 0x493   : > { %vm5007_vm15 = vcmp.eq.s32.totalorder %v5002_v13, 2  ;;  %vm5003_vm5 = vcmp.lt.s32.totalorder %v5002_v13, 2 }
 0x496   : > { %v3207_v54 = vpop.trf.xlu1 }
 0x497   : > { %3464 = vst.msk [vmem:[%s8950_s24 + $0x7c0] sm:$0xff] %vm3215_vm6, %v3207_v54 }
 0x498   : > { %v10958_v20 = vpop.trf.xlu2 }
 0x499   : > { %v10956_v22 = vpop.trf.xlu0 }
 0x49e   : > { %v3208_v48 = vpop.trf.xlu1 }
 0x49f   : > { %3465 = vst.msk [vmem:[%s8950_s24 + $0x7c8] sm:$0xff] %vm3215_vm6, %v3208_v48 }
 0x4a0   : > { %v10964_v19 = vpop.trf.xlu2 }
 0x4a1   : > { %v10962_v11 = vpop.trf.xlu0 }
 0x4a6   : > { %v3209_v9 = vpop.trf.xlu1 }
 0x4a7   : > { %3466 = vst.msk [vmem:[%s8950_s24 + $0x7d0] sm:$0xff] %vm3215_vm6, %v3209_v9  ;;  %v12727_v9 = vxor.u32 2147483648, %v9895_v4 }
 0x4a8   : > { %v10970_v3 = vpop.trf.xlu2 }
 0x4a9   : > { %v10968_v55 = vpop.trf.xlu0 }
 0x4ae   : > { %v3210_v37 = vpop.trf.xlu1 }
 0x4af   : > { %3467 = vst.msk [vmem:[%s8950_s24 + $0x7d8] sm:$0xff] %vm3215_vm6, %v3210_v37  ;;  %v12728_v37 = vld [vmem:[#allocation28_spill] sm:$0xff] }
 0x4b0   : > { %v10977_v15 = vpop.trf.xlu2 }
 0x4b1   : > { %v10975_v58 = vpop.trf.xlu0 }
 0x4b6   : > { %v3211_v7 = vpop.trf.xlu1 }
 0x4b7   : > { %6160 = vxpose.xlu0.b32.start.end [1/1] (short) %v12717_v32, 128  ;;  %3468 = vst.msk [vmem:[%s8950_s24 + $0x7e0] sm:$0xff] %vm3215_vm6, %v3211_v7 }
 0x4b8   : > { %v10983_v47 = vpop.trf.xlu2 }
 0x4b9   : > { %v10981_v1 = vpop.trf.xlu0 }
 0x4be   : > { %v3212_v26 = vpop.trf.xlu1 }
 0x4bf   : > { %3469 = vst.msk [vmem:[%s8950_s24 + $0x7e8] sm:$0xff] %vm3215_vm6, %v3212_v26  ;;  %v12729_v26 = vxor.u32 2147483648, %v12728_v37 }
 0x4c0   : > { %v10989_v8 = vpop.trf.xlu2 }
 0x4c1   : > { %v10987_v24 = vpop.trf.xlu0 }
 0x4c6   : > { %v3213_v30 = vpop.trf.xlu1 }
 0x4c7   : > { %3470 = vst.msk [vmem:[%s8950_s24 + $0x7f0] sm:$0xff] %vm3215_vm6, %v3213_v30  ;;  %v5009_v30 = vsel %vm5007_vm15, %v12729_v26, %v9895_v4  ;;  %v12737_v4 = vld [vmem:[#allocation22_spill] sm:$0xff]  ;;  %v12740_v26 = vxor.u32 2147483648, %v12739_v60 }
 0x4c8   : > { %v10995_v63 = vpop.trf.xlu2 }
 0x4c9   : > { %v10993_v57 = vpop.trf.xlu0  ;;  %12718 = vst [vmem:[#allocation8_spill] sm:$0xff] %v10995_v63 }
 0x4ce   : > { %v3214_v18 = vpop.trf.xlu1 }
 0x4cf   : > { %3471 = vst.msk [vmem:[%s8950_s24 + $0x7f8] sm:$0xff] %vm3215_vm6, %v3214_v18  ;;  %vm5004_vm6 = vcmp.eq.s32.totalorder %v5002_v13, 0 }
 0x4d0   : > { %v11001_v45 = vpop.trf.xlu2  ;;  %v5006_v32 = vsel %vm5004_vm6, %v12728_v37, %v12727_v9  ;;  %v12734_v9 = vld [vmem:[#allocation20_spill] sm:$0xff]  ;;  %v12738_v37 = vxor.u32 2147483648, %v12737_v4 }
 0x4d1   : > { %v10999_v23 = vpop.trf.xlu0  ;;  %12719 = vst [vmem:[#allocation5_spill] sm:$0xff] %v11001_v45  ;;  %v5010_v18 = vsel %vm5003_vm5, %v5006_v32, %v5009_v30 }
 0x4d2   : > { %v5011_v34 = vsel %vm12731_vm8, nan, %v5010_v18 }
 0x4d6   : > { %v11003_v46 = vpop.trf.xlu1 }
 0x4d8   : > { %v11007_v14 = vpop.trf.xlu2 }
 0x4d9   : > { %v11005_v0 = vpop.trf.xlu0  ;;  %12720 = vst [vmem:[#allocation7_spill] sm:$0xff] %v11007_v14  ;;  %v12761_v14 = vld [vmem:[#allocation15_spill] sm:$0xff] }
 0x4da   : > { %vm12762_vm13 = vweird.f32 %v12761_v14 }
 0x4de   : > { %v11009_v44 = vpop.trf.xlu1 }
 0x4e0   : > { %v11013_v38 = vpop.trf.xlu2 }
 0x4e1   : > { %v11011_v59 = vpop.trf.xlu0  ;;  %12721 = vst [vmem:[#allocation16_spill] sm:$0xff] %v11013_v38 }
 0x4e6   : > { %v11015_v12 = vpop.trf.xlu1 }
 0x4e8   : > { %v11019_v36 = vpop.trf.xlu2 }
 0x4e9   : > { %v11017_v53 = vpop.trf.xlu0  ;;  %12723 = vst [vmem:[#allocation18_spill] sm:$0xff] %v11019_v36  ;;  %v4848_v36 = vand.u32 3, %v12734_v9 }
 0x4ea   : > { %12722 = vst [vmem:[#allocation19_spill] sm:$0xff] %v11017_v53 }
 0x4eb   : > { %vm4850_vm14 = vcmp.eq.s32.totalorder %v4848_v36, 0  ;;  %vm4853_vm4 = vcmp.eq.s32.totalorder %v4848_v36, 2  ;;  %vm4849_vm9 = vcmp.lt.s32.totalorder %v4848_v36, 2 }
 0x4ec   : > { %v4852_v32 = vsel %vm4850_vm14, %v12739_v60, %v12738_v37  ;;  %v4855_v30 = vsel %vm4853_vm4, %v12740_v26, %v12737_v4 }
 0x4ed   : > { %v4856_v18 = vsel %vm4849_vm9, %v4852_v32, %v4855_v30 }
 0x4ee   : > { %v11021_v6 = vpop.trf.xlu1 }
 0x4f0   : > { %v11026_v48 = vpop.trf.xlu2 }
 0x4f1   : > { %v11024_v54 = vpop.trf.xlu0  ;;  %12726 = vst [vmem:[#allocation10_spill] sm:$0xff] %v11026_v48 }
 0x4f2   : > { %12725 = vst [vmem:[#allocation9_spill] sm:$0xff] %v11024_v54 }
 0x4f6   : > { %v11031_v7 = vpop.trf.xlu1 }
 0x4f8   : > { %v11040_v53 = vpop.trf.xlu2 }
 0x4f9   : > { %v11038_v39 = vpop.trf.xlu0  ;;  %12733 = vst [vmem:[#allocation12_spill] sm:$0xff] %v11040_v53 }
 0x4fa   : > { %12732 = vst [vmem:[#allocation13_spill] sm:$0xff] %v11038_v39  ;;  %v12743_v39 = vld [vmem:[#allocation11_spill] sm:$0xff] }
 0x4fb   : > { %vm12744_vm10 = vweird.f32 %v12743_v39  ;;  %v12753_v39 = vld [vmem:[#allocation24_spill] sm:$0xff] }
 0x4fe   : > { %6224 = vxpose.xlu2.b32.start.end [1/1] (short) %v5011_v34, 128  ;;  %v11042_v54 = vpop.trf.xlu1 }
 0x500   : > { %v11047_v13 = vpop.trf.xlu2 }
 0x501   : > { %v11045_v45 = vpop.trf.xlu0  ;;  %12736 = vst [vmem:[#allocation14_spill] sm:$0xff] %v11047_v13  ;;  %v4857_v13 = vsel %vm12744_vm10, nan, %v4856_v18 }
 0x502   : > { %12735 = vst [vmem:[#allocation6_spill] sm:$0xff] %v11045_v45 }
 0x506   : > { %v11049_v38 = vpop.trf.xlu1 }
 0x508   : > { %v11059_v9 = vpop.trf.xlu2 }
 0x509   : > { %v11057_v34 = vpop.trf.xlu0  ;;  %12742 = vst [vmem:[#allocation28_spill] sm:$0xff] %v11059_v9 }
 0x50a   : > { %12741 = vst [vmem:[#allocation27_spill] sm:$0xff] %v11057_v34  ;;  %v12756_v34 = vld [vmem:[#allocation26_spill] sm:$0xff] }
 0x50e   : > { %v11061_v45 = vpop.trf.xlu1 }
 0x510   : > { %v11067_v37 = vpop.trf.xlu2 }
 0x511   : > { %6192 = vxpose.xlu1.b32.start.end [1/1] (short) %v4857_v13, 128  ;;  %v11065_v53 = vpop.trf.xlu0  ;;  %12746 = vst [vmem:[#allocation20_spill] sm:$0xff] %v11067_v37  ;;  %v5156_v13 = vand.u32 3, %v12753_v39  ;;  %v12757_v37 = vxor.u32 2147483648, %v12756_v34 }
 0x512   : > { %12745 = vst [vmem:[#allocation17_spill] sm:$0xff] %v11065_v53 }
 0x513   : > { %vm5158_vm11 = vcmp.eq.s32.totalorder %v5156_v13, 0  ;;  %vm5161_vm12 = vcmp.eq.s32.totalorder %v5156_v13, 2  ;;  %vm5157_vm3 = vcmp.lt.s32.totalorder %v5156_v13, 2 }
 0x516   : > { %v11069_v36 = vpop.trf.xlu1 }
 0x517   : > { %12747 = vst [vmem:[#allocation22_spill] sm:$0xff] %v11069_v36 }
 0x518   : > { %v11073_v4 = vpop.trf.xlu2 }
 0x519   : > { %v11071_v63 = vpop.trf.xlu0  ;;  %12749 = vst [vmem:[#allocation11_spill] sm:$0xff] %v11073_v4 }
 0x51a   : > { %12748 = vst [vmem:[#allocation21_spill] sm:$0xff] %v11071_v63  ;;  %v12758_v63 = vld [vmem:[#allocation25_spill] sm:$0xff] }
 0x51b   : > { %v5160_v9 = vsel %vm5158_vm11, %v12758_v63, %v12757_v37 }
 0x51e   : > { %v11075_v60 = vpop.trf.xlu1 }
 0x520   : > { %v11079_v26 = vpop.trf.xlu2 }
 0x521   : > { %v11077_v32 = vpop.trf.xlu0  ;;  %12751 = vst [vmem:[#allocation32_spill] sm:$0xff] %v11079_v26 }
 0x522   : > { %12750 = vst [vmem:[#allocation31_spill] sm:$0xff] %v11077_v32  ;;  %v12760_v32 = vxor.u32 2147483648, %v12758_v63 }
 0x524   : > { %v5163_v26 = vsel %vm5161_vm12, %v12760_v32, %v12756_v34 }
 0x525   : > { %v5164_v48 = vsel %vm5157_vm3, %v5160_v9, %v5163_v26 }
 0x526   : > { %v11081_v30 = vpop.trf.xlu1  ;;  %v5165_v39 = vsel %vm12762_vm13, nan, %v5164_v48 }
 0x527   : > { %12752 = vst [vmem:[#allocation33_spill] sm:$0xff] %v11081_v30 }
 0x528   : > { %v11086_v53 = vpop.trf.xlu2 }
 0x529   : > { %v11084_v18 = vpop.trf.xlu0  ;;  %12755 = vst [vmem:[#allocation34_spill] sm:$0xff] %v11086_v53 }
 0x52a   : > { %12754 = vst [vmem:[#allocation24_spill] sm:$0xff] %v11084_v18 }
 0x52e   : > { %v11091_v4 = vpop.trf.xlu1 }
 0x52f   : > { %12759 = vst [vmem:[#allocation26_spill] sm:$0xff] %v11091_v4 }
 0x530   : > { %v11100_v53 = vpop.trf.xlu2 }
 0x531   : > { %v11098_v18 = vpop.trf.xlu0  ;;  %12764 = vst [vmem:[#allocation15_spill] sm:$0xff] %v11100_v53 }
 0x532   : > { %12763 = vst [vmem:[#allocation25_spill] sm:$0xff] %v11098_v18 }
 0x536   : > { %v11102_v36 = vpop.trf.xlu1 }
 0x537   : > { %6256 = vxpose.xlu0.b32.start.end [1/1] (short) %v5165_v39, 128 }
 0x538   : > { %v11106_v4 = vpop.trf.xlu2 }
 0x539   : > { %v11104_v37 = vpop.trf.xlu0  ;;  %12766 = vst [vmem:[#allocation36_spill] sm:$0xff] %v11106_v4 }
 0x53a   : > { %12765 = vst [vmem:[#allocation35_spill] sm:$0xff] %v11104_v37 }
 0x53e   : > { %v11108_v13 = vpop.trf.xlu1 }
 0x540   : > { %v11112_v63 = vpop.trf.xlu2 }
 0x541   : > { %v11110_v30 = vpop.trf.xlu0  ;;  %12768 = vst [vmem:[#allocation38_spill] sm:$0xff] %v11112_v63 }
 0x542   : > { %12767 = vst [vmem:[#allocation37_spill] sm:$0xff] %v11110_v30 }
 0x546   : > { %v11114_v34 = vpop.trf.xlu1 }
 0x547   : > { %12769 = vst [vmem:[#allocation39_spill] sm:$0xff] %v11114_v34 }
 0x548   : > { %v11118_v48 = vpop.trf.xlu2 }
 0x549   : > { %v11116_v14 = vpop.trf.xlu0  ;;  %12771 = vst [vmem:[#allocation41_spill] sm:$0xff] %v11118_v48 }
 0x54a   : > { %12770 = vst [vmem:[#allocation40_spill] sm:$0xff] %v11116_v14 }
 0x54e   : > { %v11120_v9 = vpop.trf.xlu1 }
 0x550   : > { %v11124_v26 = vpop.trf.xlu2 }
 0x551   : > { %v11122_v32 = vpop.trf.xlu0  ;;  %12773 = vst [vmem:[#allocation43_spill] sm:$0xff] %v11124_v26 }
 0x552   : > { %12772 = vst [vmem:[#allocation42_spill] sm:$0xff] %v11122_v32 }
 0x556   : > { %v11126_v39 = vpop.trf.xlu1 }
 0x557   : > { %12774 = vst [vmem:[#allocation44_spill] sm:$0xff] %v11126_v39 }
 0x558   : > { %v11130_v37 = vpop.trf.xlu2 }
 0x559   : > { %v11128_v18 = vpop.trf.xlu0  ;;  %12776 = vst [vmem:[#allocation46_spill] sm:$0xff] %v11130_v37 }
 0x55a   : > { %12775 = vst [vmem:[#allocation45_spill] sm:$0xff] %v11128_v18 }
 0x55e   : > { %v11132_v30 = vpop.trf.xlu1 }
 0x55f   : > { %12777 = vst [vmem:[#allocation47_spill] sm:$0xff] %v11132_v30 }
 0x560   : > { %v11136_v63 = vpop.trf.xlu2 }
 0x561   : > { %v11134_v53 = vpop.trf.xlu0  ;;  %12779 = vst [vmem:[#allocation49_spill] sm:$0xff] %v11136_v63 }
 0x562   : > { %12778 = vst [vmem:[#allocation48_spill] sm:$0xff] %v11134_v53 }
 0x566   : > { %v11138_v14 = vpop.trf.xlu1 }
 0x567   : > { %12780 = vst [vmem:[#allocation50_spill] sm:$0xff] %v11138_v14  ;;  %v12790_v14 = vld [vmem:[#allocation29_spill] sm:$0xff] }
 0x568   : > { %v11142_v4 = vpop.trf.xlu2 }
 0x569   : > { %v11140_v48 = vpop.trf.xlu0  ;;  %12782 = vst [vmem:[#allocation52_spill] sm:$0xff] %v11142_v4 }
 0x56a   : > { %12781 = vst [vmem:[#allocation51_spill] sm:$0xff] %v11140_v48  ;;  %v5310_v48 = vand.u32 3, %v12790_v14 }
 0x56c   : > { %vm5312_vm7 = vcmp.eq.s32.totalorder %v5310_v48, 0  ;;  %vm5315_vm2 = vcmp.eq.s32.totalorder %v5310_v48, 2  ;;  %vm5311_vm1 = vcmp.lt.s32.totalorder %v5310_v48, 2 }
 0x56e   : > { %v11144_v32 = vpop.trf.xlu1 }
 0x56f   : > { %12783 = vst [vmem:[#allocation53_spill] sm:$0xff] %v11144_v32 }
 0x570   : > { %v11148_v39 = vpop.trf.xlu2 }
 0x571   : > { %v11146_v26 = vpop.trf.xlu0  ;;  %12785 = vst [vmem:[#allocation55_spill] sm:$0xff] %v11148_v39 }
 0x572   : > { %12784 = vst [vmem:[#allocation54_spill] sm:$0xff] %v11146_v26  ;;  %v12794_v26 = vxor.u32 2147483648, %v10082_v29 }
 0x574   : > { %v5314_v39 = vsel %vm5312_vm7, %v10079_v43, %v12794_v26 }
 0x576   : > { %v11150_v18 = vpop.trf.xlu1 }
 0x577   : > { %12786 = vst [vmem:[#allocation56_spill] sm:$0xff] %v11150_v18 }
 0x578   : > { %v11155_v53 = vpop.trf.xlu2 }
 0x579   : > { %v11153_v37 = vpop.trf.xlu0  ;;  %12788 = vst [vmem:[#allocation58_spill] sm:$0xff] %v11155_v53 }
 0x57a   : > { %12787 = vst [vmem:[#allocation57_spill] sm:$0xff] %v11153_v37 }
 0x57e   : > { %6320 = vxpose.xlu2.b32.start.end [1/1] (short) %v10568_v62, 128  ;;  %v11157_v63 = vpop.trf.xlu1  ;;  %v12795_v62 = vxor.u32 2147483648, %v10079_v43 }
 0x57f   : > { %12789 = vst [vmem:[#allocation59_spill] sm:$0xff] %v11157_v63 }
 0x580   : > { %v11162_v4 = vpop.trf.xlu2  ;;  %v5317_v37 = vsel %vm5315_vm2, %v12795_v62, %v10082_v29 }
 0x581   : > { %v11160_v30 = vpop.trf.xlu0  ;;  %12792 = vst [vmem:[#allocation60_spill] sm:$0xff] %v11162_v4  ;;  %v5318_v53 = vsel %vm5311_vm1, %v5314_v39, %v5317_v37  ;;  %v12798_v4 = vld [vmem:[#allocation23_spill] sm:$0xff] }
 0x582   : > { %12791 = vst [vmem:[#allocation29_spill] sm:$0xff] %v11160_v30  ;;  %vm12799_vm6 = vweird.f32 %v12798_v4 }
 0x583   : > { %v5319_v18 = vsel %vm12799_vm6, nan, %v5318_v53  ;;  %v12807_v53 = vld [vmem:[#allocation30_spill] sm:$0xff] }
 0x584   : > { %v5618_v4 = vand.u32 3, %v12807_v53 }
 0x586   : > { %v11164_v32 = vpop.trf.xlu1  ;;  %vm5620_vm15 = vcmp.eq.s32.totalorder %v5618_v4, 0  ;;  %vm5623_vm5 = vcmp.eq.s32.totalorder %v5618_v4, 2  ;;  %vm5619_vm8 = vcmp.lt.s32.totalorder %v5618_v4, 2 }
 0x587   : > { %12793 = vst [vmem:[#allocation61_spill] sm:$0xff] %v11164_v32 }
 0x588   : > { %v11174_v14 = vpop.trf.xlu2 }
 0x589   : > { %v11172_v63 = vpop.trf.xlu0  ;;  %12797 = vst [vmem:[#allocation63_spill] sm:$0xff] %v11174_v14 }
 0x58a   : > { %12796 = vst [vmem:[#allocation62_spill] sm:$0xff] %v11172_v63  ;;  %v12810_v63 = vxor.u32 2147483648, %v10391_v42 }
 0x58e   : > { %v11176_v30 = vpop.trf.xlu1 }
 0x590   : > { %v11182_v26 = vpop.trf.xlu2 }
 0x591   : > { %6288 = vxpose.xlu1.b32.start.end [1/1] (short) %v5319_v18, 128  ;;  %v11180_v32 = vpop.trf.xlu0  ;;  %12801 = vst [vmem:[#allocation64_spill] sm:$0xff] %v11182_v26 }
 0x592   : > { %12800 = vst [vmem:[#allocation23_spill] sm:$0xff] %v11180_v32 }
 0x596   : > { %v11184_v48 = vpop.trf.xlu1 }
 0x597   : > { %12802 = vst [vmem:[#allocation65_spill] sm:$0xff] %v11184_v48 }
 0x598   : > { %v11188_v43 = vpop.trf.xlu2 }
 0x599   : > { %v11186_v34 = vpop.trf.xlu0  ;;  %12804 = vst [vmem:[#allocation67_spill] sm:$0xff] %v11188_v43 }
 0x59a   : > { %12803 = vst [vmem:[#allocation66_spill] sm:$0xff] %v11186_v34  ;;  %v5622_v34 = vsel %vm5620_vm15, %v10388_v50, %v12810_v63 }
 0x59e   : > { %v11190_v29 = vpop.trf.xlu1 }
 0x5a0   : > { %v11194_v39 = vpop.trf.xlu2 }
 0x5a1   : > { %v11192_v37 = vpop.trf.xlu0  ;;  %12806 = vst [vmem:[#allocation69_spill] sm:$0xff] %v11194_v39 }
 0x5a2   : > { %12805 = vst [vmem:[#allocation68_spill] sm:$0xff] %v11192_v37  ;;  %v12812_v37 = vxor.u32 2147483648, %v10388_v50 }
 0x5a4   : > { %v5625_v26 = vsel %vm5623_vm5, %v12812_v37, %v10391_v42 }
 0x5a5   : > { %v5626_v39 = vsel %vm5619_vm8, %v5622_v34, %v5625_v26 }
 0x5a6   : > { %v11196_v62 = vpop.trf.xlu1  ;;  %v5627_v53 = vsel %vm2381_vm0, nan, %v5626_v39  ;;  %vm7472_vm0 = vcmask 130112  }
 0x5a8   : > { %v11201_v32 = vpop.trf.xlu2 }
 0x5a9   : > { %v11199_v18 = vpop.trf.xlu0  ;;  %12809 = vst [vmem:[#allocation70_spill] sm:$0xff] %v11201_v32 }
 0x5aa   : > { %12808 = vst [vmem:[#allocation30_spill] sm:$0xff] %v11199_v18 }
 0x5ae   : > { %v11206_v43 = vpop.trf.xlu1 }
 0x5af   : > { %12811 = vst [vmem:[#allocation71_spill] sm:$0xff] %v11206_v43 }
 0x5b0   : > { %v11215_v32 = vpop.trf.xlu2 }
 0x5b1   : > { %v11213_v18 = vpop.trf.xlu0  ;;  %12814 = vst [vmem:[#allocation73_spill] sm:$0xff] %v11215_v32 }
 0x5b2   : > { %12813 = vst [vmem:[#allocation72_spill] sm:$0xff] %v11213_v18 }
 0x5b6   : > { %v11217_v14 = vpop.trf.xlu1 }
 0x5b7   : > { %6352 = vxpose.xlu0.b32.start.end [1/1] (short) %v5627_v53, 128 }
 0x5b8   : > { %v11221_v43 = vpop.trf.xlu2 }
 0x5b9   : > { %v11219_v63 = vpop.trf.xlu0  ;;  %12816 = vst [vmem:[#allocation75_spill] sm:$0xff] %v11221_v43 }
 0x5ba   : > { %12815 = vst [vmem:[#allocation74_spill] sm:$0xff] %v11219_v63 }
 0x5be   : > { %v11223_v4 = vpop.trf.xlu1 }
 0x5c0   : > { %v11227_v50 = vpop.trf.xlu2 }
 0x5c1   : > { %v11225_v48 = vpop.trf.xlu0  ;;  %12818 = vst [vmem:[#allocation77_spill] sm:$0xff] %v11227_v50 }
 0x5c2   : > { %12817 = vst [vmem:[#allocation76_spill] sm:$0xff] %v11225_v48 }
 0x5c6   : > { %v11229_v42 = vpop.trf.xlu1 }
 0x5c8   : > { %v11233_v34 = vpop.trf.xlu2 }
 0x5c9   : > { %v11231_v31 = vpop.trf.xlu0  ;;  %12820 = vst [vmem:[#allocation79_spill] sm:$0xff] %v11233_v34 }
 0x5ca   : > { %12819 = vst [vmem:[#allocation78_spill] sm:$0xff] %v11231_v31 }
 0x5ce   : > { %v11235_v26 = vpop.trf.xlu1 }
 0x5d0   : > { %v11239_v39 = vpop.trf.xlu2 }
 0x5d1   : > { %v11237_v37 = vpop.trf.xlu0  ;;  %12822 = vst [vmem:[#allocation81_spill] sm:$0xff] %v11239_v39 }
 0x5d2   : > { %12821 = vst [vmem:[#allocation80_spill] sm:$0xff] %v11237_v37 }
 0x5d6   : > { %v11241_v53 = vpop.trf.xlu1 }
 0x5d7   : > { %12823 = vst [vmem:[#allocation82_spill] sm:$0xff] %v11241_v53 }
 0x5d8   : > { %v11245_v63 = vpop.trf.xlu2 }
 0x5d9   : > { %v11243_v18 = vpop.trf.xlu0  ;;  %12825 = vst [vmem:[#allocation84_spill] sm:$0xff] %v11245_v63 }
 0x5da   : > { %12824 = vst [vmem:[#allocation83_spill] sm:$0xff] %v11243_v18 }
 0x5de   : > { %v11247_v48 = vpop.trf.xlu1 }
 0x5df   : > { %12826 = vst [vmem:[#allocation85_spill] sm:$0xff] %v11247_v48 }
 0x5e0   : > { %v11251_v50 = vpop.trf.xlu2 }
 0x5e1   : > { %v11249_v32 = vpop.trf.xlu0  ;;  %12828 = vst [vmem:[#allocation87_spill] sm:$0xff] %v11251_v50 }
 0x5e2   : > { %12827 = vst [vmem:[#allocation86_spill] sm:$0xff] %v11249_v32 }
 0x5e6   : > { %v11253_v31 = vpop.trf.xlu1 }
 0x5e7   : > { %12829 = vst [vmem:[#allocation88_spill] sm:$0xff] %v11253_v31 }
 0x5e8   : > { %v11257_v43 = vpop.trf.xlu2 }
 0x5e9   : > { %v11255_v34 = vpop.trf.xlu0  ;;  %12831 = vst [vmem:[#allocation90_spill] sm:$0xff] %v11257_v43 }
 0x5ea   : > { %12830 = vst [vmem:[#allocation89_spill] sm:$0xff] %v11255_v34 }
 0x5ee   : > { %v11259_v37 = vpop.trf.xlu1 }
 0x5f0   : > { %v11263_v53 = vpop.trf.xlu2 }
 0x5f1   : > { %v11261_v39 = vpop.trf.xlu0  ;;  %12833 = vst [vmem:[#allocation92_spill] sm:$0xff] %v11263_v53 }
 0x5f2   : > { %12832 = vst [vmem:[#allocation91_spill] sm:$0xff] %v11261_v39 }
 0x5f6   : > { %v11265_v18 = vpop.trf.xlu1 }
 0x5f7   : > { %12834 = vst [vmem:[#allocation93_spill] sm:$0xff] %v11265_v18 }
 0x5f8   : > { %v11270_v32 = vpop.trf.xlu2 }
 0x5f9   : > { %v11268_v63 = vpop.trf.xlu0  ;;  %12836 = vst [vmem:[#allocation95_spill] sm:$0xff] %v11270_v32 }
 0x5fa   : > { %12835 = vst [vmem:[#allocation94_spill] sm:$0xff] %v11268_v63 }
 0x5fe   : > { %6416 = vxpose.xlu2.b32.start.end [1/1] (short) %v10621_v25, 128  ;;  %v11272_v50 = vpop.trf.xlu1 }
 0x5ff   : > { %12837 = vst [vmem:[#allocation96_spill] sm:$0xff] %v11272_v50 }
 0x600   : > { %v11276_v34 = vpop.trf.xlu2 }
 0x601   : > { %v11274_v31 = vpop.trf.xlu0  ;;  %12839 = vst [vmem:[#allocation98_spill] sm:$0xff] %v11276_v34 }
 0x602   : > { %12838 = vst [vmem:[#allocation97_spill] sm:$0xff] %v11274_v31 }
 0x606   : > { %v11278_v43 = vpop.trf.xlu1 }
 0x608   : > { %v11282_v39 = vpop.trf.xlu2 }
 0x609   : > { %v11280_v48 = vpop.trf.xlu0  ;;  %12841 = vst [vmem:[#allocation100_spill] sm:$0xff] %v11282_v39 }
 0x60a   : > { %12840 = vst [vmem:[#allocation99_spill] sm:$0xff] %v11280_v48 }
 0x60e   : > { %v11284_v53 = vpop.trf.xlu1 }
 0x60f   : > { %12842 = vst [vmem:[#allocation101_spill] sm:$0xff] %v11284_v53 }
 0x610   : > { %v11289_v63 = vpop.trf.xlu2 }
 0x611   : > { %6384 = vxpose.xlu1.b32.start.end [1/1] (short) %v10577_v56, 128  ;;  %v11287_v25 = vpop.trf.xlu0  ;;  %12844 = vst [vmem:[#allocation103_spill] sm:$0xff] %v11289_v63 }
 0x612   : > { %12843 = vst [vmem:[#allocation102_spill] sm:$0xff] %v11287_v25 }
 0x616   : > { %v11291_v32 = vpop.trf.xlu1 }
 0x617   : > { %12845 = vst [vmem:[#allocation104_spill] sm:$0xff] %v11291_v32 }
 0x618   : > { %v11295_v31 = vpop.trf.xlu2 }
 0x619   : > { %v11293_v50 = vpop.trf.xlu0  ;;  %12847 = vst [vmem:[#allocation106_spill] sm:$0xff] %v11295_v31 }
 0x61a   : > { %12846 = vst [vmem:[#allocation105_spill] sm:$0xff] %v11293_v50 }
 0x61e   : > { %v11297_v34 = vpop.trf.xlu1 }
 0x61f   : > { %12848 = vst [vmem:[#allocation107_spill] sm:$0xff] %v11297_v34 }
 0x620   : > { %v11301_v48 = vpop.trf.xlu2 }
 0x621   : > { %v11299_v18 = vpop.trf.xlu0  ;;  %12850 = vst [vmem:[#allocation109_spill] sm:$0xff] %v11301_v48 }
 0x622   : > { %12849 = vst [vmem:[#allocation108_spill] sm:$0xff] %v11299_v18 }
 0x626   : > { %v11303_v39 = vpop.trf.xlu1 }
 0x627   : > { %12851 = vst [vmem:[#allocation110_spill] sm:$0xff] %v11303_v39 }
 0x628   : > { %v11307_v56 = vpop.trf.xlu2 }
 0x629   : > { %v11305_v53 = vpop.trf.xlu0  ;;  %12853 = vst [vmem:[#allocation112_spill] sm:$0xff] %v11307_v56 }
 0x62a   : > { %12852 = vst [vmem:[#allocation111_spill] sm:$0xff] %v11305_v53 }
 0x62e   : > { %v11309_v25 = vpop.trf.xlu1 }
 0x62f   : > { %12854 = vst [vmem:[#allocation113_spill] sm:$0xff] %v11309_v25 }
 0x630   : > { %v11313_v32 = vpop.trf.xlu2 }
 0x631   : > { %v11311_v63 = vpop.trf.xlu0  ;;  %12856 = vst [vmem:[#allocation115_spill] sm:$0xff] %v11313_v32 }
 0x632   : > { %12855 = vst [vmem:[#allocation114_spill] sm:$0xff] %v11311_v63 }
 0x636   : > { %v11315_v50 = vpop.trf.xlu1 }
 0x637   : > { %12857 = vst [vmem:[#allocation116_spill] sm:$0xff] %v11315_v50 }
 0x638   : > { %v11319_v34 = vpop.trf.xlu2 }
 0x639   : > { %v11317_v31 = vpop.trf.xlu0  ;;  %12859 = vst [vmem:[#allocation118_spill] sm:$0xff] %v11319_v34 }
 0x63a   : > { %12858 = vst [vmem:[#allocation117_spill] sm:$0xff] %v11317_v31 }
 0x63e   : > { %v11321_v18 = vpop.trf.xlu1 }
 0x63f   : > { %12860 = vst [vmem:[#allocation119_spill] sm:$0xff] %v11321_v18 }
 0x640   : > { %v11325_v39 = vpop.trf.xlu2 }
 0x641   : > { %v11323_v48 = vpop.trf.xlu0  ;;  %12862 = vst [vmem:[#allocation121_spill] sm:$0xff] %v11325_v39 }
 0x642   : > { %12861 = vst [vmem:[#allocation120_spill] sm:$0xff] %v11323_v48 }
 0x646   : > { %v11327_v53 = vpop.trf.xlu1 }
 0x647   : > { %12863 = vst [vmem:[#allocation122_spill] sm:$0xff] %v11327_v53 }
 0x648   : > { %v11331_v25 = vpop.trf.xlu2 }
 0x649   : > { %v11329_v56 = vpop.trf.xlu0  ;;  %12865 = vst [vmem:[#allocation124_spill] sm:$0xff] %v11331_v25 }
 0x64a   : > { %12864 = vst [vmem:[#allocation123_spill] sm:$0xff] %v11329_v56 }
 0x64e   : > { %v11333_v63 = vpop.trf.xlu1 }
 0x64f   : > { %12866 = vst [vmem:[#allocation125_spill] sm:$0xff] %v11333_v63 }
 0x650   : > { %v11337_v50 = vpop.trf.xlu2 }
 0x651   : > { %v11335_v32 = vpop.trf.xlu0  ;;  %12868 = vst [vmem:[#allocation127_spill] sm:$0xff] %v11337_v50 }
 0x652   : > { %12867 = vst [vmem:[#allocation126_spill] sm:$0xff] %v11335_v32 }
 0x656   : > { %v11339_v31 = vpop.trf.xlu1 }
 0x657   : > { %12869 = vst [vmem:[#allocation128_spill] sm:$0xff] %v11339_v31 }
 0x658   : > { %v11343_v18 = vpop.trf.xlu2 }
 0x659   : > { %v11341_v34 = vpop.trf.xlu0  ;;  %12871 = vst [vmem:[#allocation130_spill] sm:$0xff] %v11343_v18 }
 0x65a   : > { %12870 = vst [vmem:[#allocation129_spill] sm:$0xff] %v11341_v34 }
 0x65e   : > { %v11345_v48 = vpop.trf.xlu1 }
 0x65f   : > { %12872 = vst [vmem:[#allocation131_spill] sm:$0xff] %v11345_v48 }
 0x660   : > { %v11349_v53 = vpop.trf.xlu2 }
 0x661   : > { %v11347_v39 = vpop.trf.xlu0  ;;  %12874 = vst [vmem:[#allocation133_spill] sm:$0xff] %v11349_v53 }
 0x662   : > { %12873 = vst [vmem:[#allocation132_spill] sm:$0xff] %v11347_v39 }
 0x666   : > { %v11351_v56 = vpop.trf.xlu1 }
 0x667   : > { %12875 = vst [vmem:[#allocation134_spill] sm:$0xff] %v11351_v56 }
 0x668   : > { %v11355_v63 = vpop.trf.xlu2 }
 0x669   : > { %v11353_v25 = vpop.trf.xlu0  ;;  %12877 = vst [vmem:[#allocation136_spill] sm:$0xff] %v11355_v63 }
 0x66a   : > { %12876 = vst [vmem:[#allocation135_spill] sm:$0xff] %v11353_v25 }
 0x66e   : > { %v11357_v32 = vpop.trf.xlu1 }
 0x66f   : > { %12878 = vst [vmem:[#allocation137_spill] sm:$0xff] %v11357_v32 }
 0x670   : > { %v11359_v50 = vpop.trf.xlu2 }
 0x671   : > { %12879 = vst [vmem:[#allocation138_spill] sm:$0xff] %v11359_v50  ;;  %v11363_v34 = vpop.trf.xlu0 }
 0x672   : > { %12881 = vst [vmem:[#allocation140_spill] sm:$0xff] %v11363_v34 }
 0x676   : > { %v11361_v31 = vpop.trf.xlu1 }
 0x677   : > { %12880 = vst [vmem:[#allocation139_spill] sm:$0xff] %v11361_v31 }
 0x678   : > { %v11365_v18 = vpop.trf.xlu2 }
 0x679   : > { %12882 = vst [vmem:[#allocation141_spill] sm:$0xff] %v11365_v18  ;;  %v11369_v39 = vpop.trf.xlu0 }
 0x67a   : > { %12883 = vst [vmem:[#allocation142_spill] sm:$0xff] %v11369_v39 }
 0x67e   : > { %v11367_v48 = vpop.trf.xlu1 }
 0x680   : > { %v11371_v53 = vpop.trf.xlu2 }
 0x681   : > { %12884 = vst [vmem:[#allocation143_spill] sm:$0xff] %v11371_v53  ;;  %v11375_v25 = vpop.trf.xlu0 }
 0x682   : > { %12885 = vst [vmem:[#allocation144_spill] sm:$0xff] %v11375_v25 }
 0x686   : > { %v11373_v56 = vpop.trf.xlu1 }
 0x688   : > { %v11377_v63 = vpop.trf.xlu2 }
 0x689   : > { %12886 = vst [vmem:[#allocation145_spill] sm:$0xff] %v11377_v63  ;;  %v11381_v50 = vpop.trf.xlu0 }
 0x68a   : > { %12887 = vst [vmem:[#allocation146_spill] sm:$0xff] %v11381_v50 }
 0x68e   : > { %v11379_v32 = vpop.trf.xlu1 }
 0x690   : > { %v11383_v31 = vpop.trf.xlu2 }
 0x691   : > { %12888 = vst [vmem:[#allocation147_spill] sm:$0xff] %v11383_v31  ;;  %v11393_v18 = vpop.trf.xlu0 }
 0x692   : > { %12890 = vst [vmem:[#allocation149_spill] sm:$0xff] %v11393_v18 }
 0x696   : > { %v11385_v34 = vpop.trf.xlu1 }
 0x698   : > { %v11389_v39 = vpop.trf.xlu2 }
 0x699   : > { %12889 = vst [vmem:[#allocation148_spill] sm:$0xff] %v11389_v39  ;;  %v11401_v31 = vpop.trf.xlu0 }
 0x69a   : > { %12892 = vst [vmem:[#allocation151_spill] sm:$0xff] %v11401_v31 }
 0x69d   : > { %6704 = vrot.lane.b32.xlu0 %v10878_v52, %s8029_s25 }
 0x69e   : > { %v11391_v53 = vpop.trf.xlu1 }
 0x6a0   : > { %v11397_v25 = vpop.trf.xlu2 }
 0x6a1   : > { %12891 = vst [vmem:[#allocation150_spill] sm:$0xff] %v11397_v25  ;;  %v11411_v18 = vpop.trf.xlu0 }
 0x6a2   : > { %12894 = vst [vmem:[#allocation153_spill] sm:$0xff] %v11411_v18 }
 0x6a5   : > { %6710 = vrot.lane.b32.xlu0 %v10896_v28, %s8029_s25 }
 0x6a6   : > { %v11399_v50 = vpop.trf.xlu1 }
 0x6a8   : > { %v11405_v63 = vpop.trf.xlu2 }
 0x6a9   : > { %12893 = vst [vmem:[#allocation152_spill] sm:$0xff] %v11405_v63  ;;  %v11419_v31 = vpop.trf.xlu0 }
 0x6aa   : > { %12896 = vst [vmem:[#allocation155_spill] sm:$0xff] %v11419_v31 }
 0x6ad   : > { %6712 = vrot.lane.b32.xlu0 %v10904_v49, %s8029_s25 }
 0x6ae   : > { %v11407_v52 = vpop.trf.xlu1 }
 0x6b0   : > { %v11413_v39 = vpop.trf.xlu2 }
 0x6b1   : > { %12895 = vst [vmem:[#allocation154_spill] sm:$0xff] %v11413_v39  ;;  %v11431_v18 = vpop.trf.xlu0 }
 0x6b2   : > { %12899 = vst [vmem:[#allocation158_spill] sm:$0xff] %v11431_v18 }
 0x6b5   : > { %6714 = vrot.lane.b32.xlu0 %v10911_v40, %s8029_s25 }
 0x6b6   : > { %v11415_v28 = vpop.trf.xlu1 }
 0x6b8   : > { %v11421_v25 = vpop.trf.xlu2 }
 0x6b9   : > { %12897 = vst [vmem:[#allocation156_spill] sm:$0xff] %v11421_v25  ;;  %v11439_v31 = vpop.trf.xlu0 }
 0x6bd   : > { %6716 = vrot.lane.b32.xlu0 %v10925_v33, %s8029_s25 }
 0x6be   : > { %v11423_v49 = vpop.trf.xlu1 }
 0x6c0   : > { %v11427_v63 = vpop.trf.xlu2 }
 0x6c1   : > { %12898 = vst [vmem:[#allocation157_spill] sm:$0xff] %v11427_v63  ;;  %v11449_v18 = vpop.trf.xlu0 }
 0x6c5   : > { %6718 = vrot.lane.b32.xlu0 %v10932_v51, %s8029_s25 }
 0x6c6   : > { %v11429_v40 = vpop.trf.xlu1 }
 0x6c8   : > { %v11435_v39 = vpop.trf.xlu2 }
 0x6cd   : > { %6720 = vrot.lane.b32.xlu0 %v10944_v5, %s8029_s25 }
 0x6ce   : > { %v11437_v33 = vpop.trf.xlu1 }
 0x6d0   : > { %v11443_v25 = vpop.trf.xlu2 }
 0x6d1   : > { %12900 = vst [vmem:[#allocation159_spill] sm:$0xff] %v11443_v25 }
 0x6d5   : > { %6722 = vrot.lane.b32.xlu0 %v10952_v17, %s8029_s25  ;;  %v11461_v17 = vpop.trf.xlu0 }
 0x6d6   : > { %v11445_v51 = vpop.trf.xlu1 }
 0x6d8   : > { %v11451_v63 = vpop.trf.xlu2 }
 0x6dd   : > { %6724 = vrot.lane.b32.xlu0 %v10958_v20, %s8029_s25 }
 0x6de   : > { %v11455_v5 = vpop.trf.xlu1 }
 0x6df   : > { %6708 = vrot.lane.b32.xlu2 %v10890_v41, %s8029_s25 }
 0x6e0   : > { %v11463_v25 = vpop.trf.xlu2 }
 0x6e3   : > { %6706 = vrot.lane.b32.xlu1 %v10884_v61, %s8029_s25 }
 0x6e5   : > { %6726 = vrot.lane.b32.xlu0 %v10964_v19, %s8029_s25  ;;  %v11479_v19 = vpop.trf.xlu0 }
 0x6e6   : > { %v11467_v20 = vpop.trf.xlu1 }
 0x6e7   : > { %6738 = vrot.lane.b32.xlu2 %v10909_v35, %s8029_s25 }
 0x6e8   : > { %v11475_v61 = vpop.trf.xlu2 }
 0x6eb   : > { %6730 = vrot.lane.b32.xlu1 %v10977_v15, %s8029_s25 }
 0x6ed   : > { %6728 = vrot.lane.b32.xlu0 %v10970_v3, %s8029_s25 }
 0x6ee   : > { %v11477_v41 = vpop.trf.xlu1 }
 0x6ef   : > { %6744 = vrot.lane.b32.xlu2 %v10942_v16, %s8029_s25  ;;  %v11491_v16 = vpop.trf.xlu0 }
 0x6f0   : > { %v11487_v35 = vpop.trf.xlu2 }
 0x6f3   : > { %6734 = vrot.lane.b32.xlu1 %v10989_v8, %s8029_s25 }
 0x6f5   : > { %6732 = vrot.lane.b32.xlu0 %v10983_v47, %s8029_s25 }
 0x6f6   : > { %v11489_v3 = vpop.trf.xlu1 }
 0x6f7   : > { %6750 = vrot.lane.b32.xlu2 %v10962_v11, %s8029_s25  ;;  %v11507_v11 = vpop.trf.xlu0 }
 0x6f8   : > { %v11499_v15 = vpop.trf.xlu2 }
 0x6fb   : > { %6740 = vrot.lane.b32.xlu1 %v10923_v27, %s8029_s25 }
 0x6fd   : > { %6736 = vrot.lane.b32.xlu0 %v10902_v10, %s8029_s25 }
 0x6fe   : > { %v11501_v47 = vpop.trf.xlu1 }
 0x6ff   : > { %6756 = vrot.lane.b32.xlu2 %v10981_v1, %s8029_s25 }
 0x700   : > { %v11511_v10 = vpop.trf.xlu2 }
 0x703   : > { %6746 = vrot.lane.b32.xlu1 %v10950_v2, %s8029_s25 }
 0x705   : > { %6742 = vrot.lane.b32.xlu0 %v10930_v21, %s8029_s25 }
 0x706   : > { %v11513_v27 = vpop.trf.xlu1 }
 0x707   : > { %6762 = vrot.lane.b32.xlu2 %v10999_v23, %s8029_s25 }
 0x708   : > { %v11523_v21 = vpop.trf.xlu2 }
 0x70b   : > { %6752 = vrot.lane.b32.xlu1 %v10968_v55, %s8029_s25 }
 0x70d   : > { %6748 = vrot.lane.b32.xlu0 %v10956_v22, %s8029_s25 }
 0x70e   : > { %v11525_v1 = vpop.trf.xlu1 }
 0x70f   : > { %v6705_v2 = vpop.permute.xlu0 %6704  ;;  %6768 = vrot.lane.b32.xlu2 %v11003_v46, %s8029_s25 }
 0x710   : > { %7473 = vst.msk [vmem:[%s8950_s24] sm:$0xff] %vm7472_vm0, %v6705_v2  ;;  %v11535_v22 = vpop.trf.xlu2 }
 0x713   : > { %6758 = vrot.lane.b32.xlu1 %v10987_v24, %s8029_s25 }
 0x715   : > { %6754 = vrot.lane.b32.xlu0 %v10975_v58, %s8029_s25 }
 0x716   : > { %v11537_v8 = vpop.trf.xlu1 }
 0x717   : > { %v6711_v55 = vpop.permute.xlu0 %6710  ;;  %6774 = vrot.lane.b32.xlu2 %v11021_v6, %s8029_s25 }
 0x718   : > { %7476 = vst.msk [vmem:[%s8950_s24 + $0x18] sm:$0xff] %vm7472_vm0, %v6711_v55  ;;  %v11547_v58 = vpop.trf.xlu2  ;;  %v12905_v55 = vld [vmem:[#allocation26_spill] sm:$0xff] }
 0x71b   : > { %6764 = vrot.lane.b32.xlu1 %v11005_v0, %s8029_s25 }
 0x71d   : > { %6760 = vrot.lane.b32.xlu0 %v10993_v57, %s8029_s25 }
 0x71e   : > { %v11549_v23 = vpop.trf.xlu1 }
 0x71f   : > { %v6713_v24 = vpop.permute.xlu0 %6712  ;;  %6780 = vrot.lane.b32.xlu2 %v11049_v38, %s8029_s25 }
 0x720   : > { %7477 = vst.msk [vmem:[%s8950_s24 + $0x20] sm:$0xff] %vm7472_vm0, %v6713_v24  ;;  %v11559_v57 = vpop.trf.xlu2 }
 0x723   : > { %6770 = vrot.lane.b32.xlu1 %v11009_v44, %s8029_s25 }
 0x725   : > { %6766 = vrot.lane.b32.xlu0 %v11011_v59, %s8029_s25 }
 0x726   : > { %v11561_v0 = vpop.trf.xlu1 }
 0x727   : > { %v6715_v46 = vpop.permute.xlu0 %6714  ;;  %6786 = vrot.lane.b32.xlu2 %v11075_v60, %s8029_s25  ;;  %v12903_v60 = vld [vmem:[#allocation22_spill] sm:$0xff] }
 0x728   : > { %7478 = vst.msk [vmem:[%s8950_s24 + $0x28] sm:$0xff] %vm7472_vm0, %v6715_v46  ;;  %v11571_v59 = vpop.trf.xlu2  ;;  %v12906_v46 = vld [vmem:[#allocation10_spill] sm:$0xff] }
 0x72b   : > { %6776 = vrot.lane.b32.xlu1 %v11031_v7, %s8029_s25 }
 0x72d   : > { %6772 = vrot.lane.b32.xlu0 %v11015_v12, %s8029_s25 }
 0x72e   : > { %v11573_v38 = vpop.trf.xlu1 }
 0x72f   : > { %v6717_v44 = vpop.permute.xlu0 %6716  ;;  %6792 = vrot.lane.b32.xlu2 %v11102_v36, %s8029_s25  ;;  %v12902_v36 = vld [vmem:[#allocation33_spill] sm:$0xff] }
 0x730   : > { %7479 = vst.msk [vmem:[%s8950_s24 + $0x30] sm:$0xff] %vm7472_vm0, %v6717_v44  ;;  %v11583_v12 = vpop.trf.xlu2 }
 0x731   : > { %12901 = vst [vmem:[#allocation160_spill] sm:$0xff] %v11583_v12 }
 0x733   : > { %6782 = vrot.lane.b32.xlu1 %v11061_v45, %s8029_s25 }
 0x735   : > { %6778 = vrot.lane.b32.xlu0 %v11042_v54, %s8029_s25  ;;  %v12904_v54 = vld [vmem:[#allocation7_spill] sm:$0xff] }
 0x736   : > { %v11585_v7 = vpop.trf.xlu1 }
 0x737   : > { %v6719_v6 = vpop.permute.xlu0 %6718  ;;  %6798 = vrot.lane.b32.xlu2 %v11120_v9, %s8029_s25 }
 0x738   : > { %7480 = vst.msk [vmem:[%s8950_s24 + $0x38] sm:$0xff] %vm7472_vm0, %v6719_v6  ;;  %v11595_v9 = vpop.trf.xlu2 }
 0x73b   : > { %6788 = vrot.lane.b32.xlu1 %v12902_v36, %s8029_s25  ;;  %v12907_v36 = vld [vmem:[#allocation8_spill] sm:$0xff] }
 0x73d   : > { %6784 = vrot.lane.b32.xlu0 %v12903_v60, %s8029_s25 }
 0x73e   : > { %v11597_v2 = vpop.trf.xlu1 }
 0x73f   : > { %v6721_v45 = vpop.permute.xlu0 %6720  ;;  %6804 = vrot.lane.b32.xlu2 %v12904_v54, %s8029_s25 }
 0x740   : > { %7481 = vst.msk [vmem:[%s8950_s24 + $0x40] sm:$0xff] %vm7472_vm0, %v6721_v45  ;;  %v11607_v44 = vpop.trf.xlu2  ;;  %v12909_v45 = vld [vmem:[#allocation28_spill] sm:$0xff] }
 0x743   : > { %6794 = vrot.lane.b32.xlu1 %v11108_v13, %s8029_s25  ;;  %v12908_v13 = vld [vmem:[#allocation39_spill] sm:$0xff] }
 0x745   : > { %6790 = vrot.lane.b32.xlu0 %v12905_v55, %s8029_s25 }
 0x746   : > { %v11609_v6 = vpop.trf.xlu1 }
 0x747   : > { %v6723_v24 = vpop.permute.xlu0 %6722  ;;  %6810 = vrot.lane.b32.xlu2 %v12906_v46, %s8029_s25  ;;  %v12911_v46 = vld [vmem:[#allocation5_spill] sm:$0xff] }
 0x748   : > { %7482 = vst.msk [vmem:[%s8950_s24 + $0x48] sm:$0xff] %vm7472_vm0, %v6723_v24  ;;  %v6709_v54 = vpop.permute.xlu2 %6708  ;;  %v12910_v24 = vld [vmem:[#allocation16_spill] sm:$0xff] }
 0x749   : > { %7475 = vst.msk [vmem:[%s8950_s24 + $0x10] sm:$0xff] %vm7472_vm0, %v6709_v54  ;;  %v12913_v54 = vld [vmem:[#allocation12_spill] sm:$0xff] }
 0x74b   : > { %6800 = vrot.lane.b32.xlu1 %v12907_v36, %s8029_s25 }
 0x74d   : > { %6796 = vrot.lane.b32.xlu0 %v12908_v13, %s8029_s25  ;;  %v12912_v13 = vld [vmem:[#allocation32_spill] sm:$0xff] }
 0x74e   : > { %v11619_v55 = vpop.trf.xlu1 }
 0x74f   : > { %v6725_v60 = vpop.permute.xlu0 %6724  ;;  %6816 = vrot.lane.b32.xlu2 %v12909_v45, %s8029_s25 }
 0x750   : > { %7483 = vst.msk [vmem:[%s8950_s24 + $0x50] sm:$0xff] %vm7472_vm0, %v6725_v60  ;;  %v6739_v60 = vpop.permute.xlu2 %6738 }
 0x751   : > { %7490 = vst.msk [vmem:[%s8950_s24 + $0x88] sm:$0xff] %vm7472_vm0, %v6739_v60  ;;  %v12916_v60 = vld [vmem:[#allocation20_spill] sm:$0xff] }
 0x753   : > { %6806 = vrot.lane.b32.xlu1 %v12910_v24, %s8029_s25  ;;  %v12914_v24 = vld [vmem:[#allocation18_spill] sm:$0xff] }
 0x755   : > { %6802 = vrot.lane.b32.xlu0 %v12911_v46, %s8029_s25 }
 0x756   : > { %v6707_v45 = vpop.permute.xlu1 %6706 }
 0x757   : > { %v6727_v36 = vpop.permute.xlu0 %6726  ;;  %6822 = vrot.lane.b32.xlu2 %v12912_v13, %s8029_s25  ;;  %7474 = vst.msk [vmem:[%s8950_s24 + $0x8] sm:$0xff] %vm7472_vm0, %v6707_v45  ;;  %v12915_v13 = vld [vmem:[#allocation36_spill] sm:$0xff]  ;;  %v12917_v45 = vld [vmem:[#allocation14_spill] sm:$0xff] }
 0x758   : > { %7484 = vst.msk [vmem:[%s8950_s24 + $0x58] sm:$0xff] %vm7472_vm0, %v6727_v36  ;;  %v6745_v36 = vpop.permute.xlu2 %6744 }
 0x759   : > { %7493 = vst.msk [vmem:[%s8950_s24 + $0xa0] sm:$0xff] %vm7472_vm0, %v6745_v36  ;;  %v12920_v36 = vld [vmem:[#allocation11_spill] sm:$0xff] }
 0x75b   : > { %6812 = vrot.lane.b32.xlu1 %v12913_v54, %s8029_s25 }
 0x75d   : > { %6808 = vrot.lane.b32.xlu0 %v12914_v24, %s8029_s25  ;;  %v12918_v24 = vld [vmem:[#allocation9_spill] sm:$0xff] }
 0x75e   : > { %v6731_v12 = vpop.permute.xlu1 %6730 }
 0x75f   : > { %v6729_v46 = vpop.permute.xlu0 %6728  ;;  %6828 = vrot.lane.b32.xlu2 %v12915_v13, %s8029_s25  ;;  %7486 = vst.msk [vmem:[%s8950_s24 + $0x68] sm:$0xff] %vm7472_vm0, %v6731_v12  ;;  %v12919_v12 = vld [vmem:[#allocation34_spill] sm:$0xff] }
 0x760   : > { %7485 = vst.msk [vmem:[%s8950_s24 + $0x60] sm:$0xff] %vm7472_vm0, %v6729_v46  ;;  %v6751_v46 = vpop.permute.xlu2 %6750 }
 0x761   : > { %7496 = vst.msk [vmem:[%s8950_s24 + $0xb8] sm:$0xff] %vm7472_vm0, %v6751_v46  ;;  %v12922_v46 = vld [vmem:[#allocation38_spill] sm:$0xff] }
 0x763   : > { %6818 = vrot.lane.b32.xlu1 %v12916_v60, %s8029_s25 }
 0x765   : > { %6814 = vrot.lane.b32.xlu0 %v12917_v45, %s8029_s25  ;;  %v12921_v45 = vld [vmem:[#allocation27_spill] sm:$0xff] }
 0x766   : > { %v6735_v13 = vpop.permute.xlu1 %6734 }
 0x767   : > { %v6733_v54 = vpop.permute.xlu0 %6732  ;;  %6834 = vrot.lane.b32.xlu2 %v12918_v24, %s8029_s25  ;;  %7488 = vst.msk [vmem:[%s8950_s24 + $0x78] sm:$0xff] %vm7472_vm0, %v6735_v13  ;;  %v12923_v13 = vld [vmem:[#allocation15_spill] sm:$0xff] }
 0x768   : > { %7487 = vst.msk [vmem:[%s8950_s24 + $0x70] sm:$0xff] %vm7472_vm0, %v6733_v54  ;;  %v6757_v54 = vpop.permute.xlu2 %6756 }
 0x769   : > { %7499 = vst.msk [vmem:[%s8950_s24 + $0xd0] sm:$0xff] %vm7472_vm0, %v6757_v54  ;;  %v12925_v54 = vld [vmem:[#allocation13_spill] sm:$0xff] }
 0x76b   : > { %6824 = vrot.lane.b32.xlu1 %v12919_v12, %s8029_s25 }
 0x76d   : > { %6820 = vrot.lane.b32.xlu0 %v12920_v36, %s8029_s25  ;;  %v12924_v36 = vld [vmem:[#allocation31_spill] sm:$0xff] }
 0x76e   : > { %v6741_v24 = vpop.permute.xlu1 %6740 }
 0x76f   : > { %v6737_v60 = vpop.permute.xlu0 %6736  ;;  %6840 = vrot.lane.b32.xlu2 %v12921_v45, %s8029_s25  ;;  %7491 = vst.msk [vmem:[%s8950_s24 + $0x90] sm:$0xff] %vm7472_vm0, %v6741_v24  ;;  %v12926_v24 = vld [vmem:[#allocation19_spill] sm:$0xff] }
 0x770   : > { %7489 = vst.msk [vmem:[%s8950_s24 + $0x80] sm:$0xff] %vm7472_vm0, %v6737_v60  ;;  %v6763_v60 = vpop.permute.xlu2 %6762 }
 0x771   : > { %7502 = vst.msk [vmem:[%s8950_s24 + $0xe8] sm:$0xff] %vm7472_vm0, %v6763_v60  ;;  %v12928_v60 = vld [vmem:[#allocation17_spill] sm:$0xff] }
 0x773   : > { %6830 = vrot.lane.b32.xlu1 %v12922_v46, %s8029_s25 }
 0x775   : > { %6826 = vrot.lane.b32.xlu0 %v12923_v13, %s8029_s25  ;;  %v12927_v13 = vld [vmem:[#allocation35_spill] sm:$0xff] }
 0x776   : > { %v6747_v45 = vpop.permute.xlu1 %6746 }
 0x777   : > { %v6743_v12 = vpop.permute.xlu0 %6742  ;;  %6846 = vrot.lane.b32.xlu2 %v12924_v36, %s8029_s25  ;;  %7494 = vst.msk [vmem:[%s8950_s24 + $0xa8] sm:$0xff] %vm7472_vm0, %v6747_v45  ;;  %v12929_v45 = vld [vmem:[#allocation6_spill] sm:$0xff] }
 0x778   : > { %7492 = vst.msk [vmem:[%s8950_s24 + $0x98] sm:$0xff] %vm7472_vm0, %v6743_v12  ;;  %v6769_v12 = vpop.permute.xlu2 %6768 }
 0x779   : > { %7505 = vst.msk [vmem:[%s8950_s24 + $0x100] sm:$0xff] %vm7472_vm0, %v6769_v12  ;;  %v12931_v12 = vld [vmem:[#allocation24_spill] sm:$0xff] }
 0x77b   : > { %6836 = vrot.lane.b32.xlu1 %v12925_v54, %s8029_s25 }
 0x77d   : > { %6832 = vrot.lane.b32.xlu0 %v12926_v24, %s8029_s25  ;;  %v12930_v24 = vld [vmem:[#allocation42_spill] sm:$0xff] }
 0x77e   : > { %v6753_v36 = vpop.permute.xlu1 %6752 }
 0x77f   : > { %v6749_v46 = vpop.permute.xlu0 %6748  ;;  %6852 = vrot.lane.b32.xlu2 %v12927_v13, %s8029_s25  ;;  %7497 = vst.msk [vmem:[%s8950_s24 + $0xc0] sm:$0xff] %vm7472_vm0, %v6753_v36  ;;  %v12932_v36 = vld [vmem:[#allocation21_spill] sm:$0xff] }
 0x780   : > { %7495 = vst.msk [vmem:[%s8950_s24 + $0xb0] sm:$0xff] %vm7472_vm0, %v6749_v46  ;;  %v6775_v46 = vpop.permute.xlu2 %6774 }
 0x781   : > { %7508 = vst.msk [vmem:[%s8950_s24 + $0x118] sm:$0xff] %vm7472_vm0, %v6775_v46  ;;  %v12934_v46 = vld [vmem:[#allocation37_spill] sm:$0xff] }
 0x783   : > { %6842 = vrot.lane.b32.xlu1 %v12928_v60, %s8029_s25 }
 0x785   : > { %6838 = vrot.lane.b32.xlu0 %v12929_v45, %s8029_s25  ;;  %v12933_v45 = vld [vmem:[#allocation44_spill] sm:$0xff] }
 0x786   : > { %v6759_v13 = vpop.permute.xlu1 %6758 }
 0x787   : > { %v6755_v54 = vpop.permute.xlu0 %6754  ;;  %6858 = vrot.lane.b32.xlu2 %v12930_v24, %s8029_s25  ;;  %7500 = vst.msk [vmem:[%s8950_s24 + $0xd8] sm:$0xff] %vm7472_vm0, %v6759_v13  ;;  %v12935_v13 = vld [vmem:[#allocation25_spill] sm:$0xff] }
 0x788   : > { %7498 = vst.msk [vmem:[%s8950_s24 + $0xc8] sm:$0xff] %vm7472_vm0, %v6755_v54  ;;  %v6781_v54 = vpop.permute.xlu2 %6780 }
 0x789   : > { %7511 = vst.msk [vmem:[%s8950_s24 + $0x130] sm:$0xff] %vm7472_vm0, %v6781_v54  ;;  %v12937_v54 = vld [vmem:[#allocation45_spill] sm:$0xff] }
 0x78b   : > { %6848 = vrot.lane.b32.xlu1 %v12931_v12, %s8029_s25 }
 0x78d   : > { %6844 = vrot.lane.b32.xlu0 %v12932_v36, %s8029_s25  ;;  %v12936_v36 = vld [vmem:[#allocation53_spill] sm:$0xff] }
 0x78e   : > { %v6765_v24 = vpop.permute.xlu1 %6764 }
 0x78f   : > { %v6761_v60 = vpop.permute.xlu0 %6760  ;;  %6864 = vrot.lane.b32.xlu2 %v12933_v45, %s8029_s25  ;;  %7503 = vst.msk [vmem:[%s8950_s24 + $0xf0] sm:$0xff] %vm7472_vm0, %v6765_v24  ;;  %v12938_v24 = vld [vmem:[#allocation40_spill] sm:$0xff] }
 0x790   : > { %7501 = vst.msk [vmem:[%s8950_s24 + $0xe0] sm:$0xff] %vm7472_vm0, %v6761_v60  ;;  %v6787_v60 = vpop.permute.xlu2 %6786 }
 0x791   : > { %7514 = vst.msk [vmem:[%s8950_s24 + $0x148] sm:$0xff] %vm7472_vm0, %v6787_v60  ;;  %v12940_v60 = vld [vmem:[#allocation47_spill] sm:$0xff] }
 0x793   : > { %6854 = vrot.lane.b32.xlu1 %v12934_v46, %s8029_s25 }
 0x795   : > { %6850 = vrot.lane.b32.xlu0 %v12935_v13, %s8029_s25  ;;  %v12939_v13 = vld [vmem:[#allocation61_spill] sm:$0xff] }
 0x796   : > { %v6771_v45 = vpop.permute.xlu1 %6770 }
 0x797   : > { %v6767_v12 = vpop.permute.xlu0 %6766  ;;  %6870 = vrot.lane.b32.xlu2 %v12936_v36, %s8029_s25  ;;  %7506 = vst.msk [vmem:[%s8950_s24 + $0x108] sm:$0xff] %vm7472_vm0, %v6771_v45  ;;  %v12941_v45 = vld [vmem:[#allocation48_spill] sm:$0xff] }
 0x798   : > { %7504 = vst.msk [vmem:[%s8950_s24 + $0xf8] sm:$0xff] %vm7472_vm0, %v6767_v12  ;;  %v6793_v12 = vpop.permute.xlu2 %6792 }
 0x799   : > { %7517 = vst.msk [vmem:[%s8950_s24 + $0x160] sm:$0xff] %vm7472_vm0, %v6793_v12  ;;  %v12943_v12 = vld [vmem:[#allocation50_spill] sm:$0xff] }
 0x79b   : > { %6860 = vrot.lane.b32.xlu1 %v12937_v54, %s8029_s25 }
 0x79d   : > { %6856 = vrot.lane.b32.xlu0 %v12938_v24, %s8029_s25 }
 0x79e   : > { %v6777_v36 = vpop.permute.xlu1 %6776 }
 0x79f   : > { %v6773_v46 = vpop.permute.xlu0 %6772  ;;  %6876 = vrot.lane.b32.xlu2 %v12939_v13, %s8029_s25  ;;  %7509 = vst.msk [vmem:[%s8950_s24 + $0x120] sm:$0xff] %vm7472_vm0, %v6777_v36  ;;  %v12942_v13 = vld [vmem:[#allocation56_spill] sm:$0xff] }
 0x7a0   : > { %7507 = vst.msk [vmem:[%s8950_s24 + $0x110] sm:$0xff] %vm7472_vm0, %v6773_v46  ;;  %v6799_v24 = vpop.permute.xlu2 %6798 }
 0x7a1   : > { %7520 = vst.msk [vmem:[%s8950_s24 + $0x178] sm:$0xff] %vm7472_vm0, %v6799_v24 }
 0x7a3   : > { %6866 = vrot.lane.b32.xlu1 %v12940_v60, %s8029_s25 }
 0x7a5   : > { %6862 = vrot.lane.b32.xlu0 %v12941_v45, %s8029_s25  ;;  %v12944_v45 = vld [vmem:[#allocation59_spill] sm:$0xff] }
 0x7a6   : > { %v6783_v46 = vpop.permute.xlu1 %6782 }
 0x7a7   : > { %v6779_v54 = vpop.permute.xlu0 %6778  ;;  %6882 = vrot.lane.b32.xlu2 %v11190_v29, %s8029_s25  ;;  %7512 = vst.msk [vmem:[%s8950_s24 + $0x138] sm:$0xff] %vm7472_vm0, %v6783_v46 }
 0x7a8   : > { %7510 = vst.msk [vmem:[%s8950_s24 + $0x128] sm:$0xff] %vm7472_vm0, %v6779_v54  ;;  %v6805_v29 = vpop.permute.xlu2 %6804 }
 0x7a9   : > { %7523 = vst.msk [vmem:[%s8950_s24 + $0x190] sm:$0xff] %vm7472_vm0, %v6805_v29  ;;  %v12948_v29 = vld [vmem:[#allocation55_spill] sm:$0xff] }
 0x7ab   : > { %6872 = vrot.lane.b32.xlu1 %v12942_v13, %s8029_s25 }
 0x7ad   : > { %6868 = vrot.lane.b32.xlu0 %v12943_v12, %s8029_s25 }
 0x7ae   : > { %v6789_v60 = vpop.permute.xlu1 %6788 }
 0x7af   : > { %v6785_v36 = vpop.permute.xlu0 %6784  ;;  %6888 = vrot.lane.b32.xlu2 %v11217_v14, %s8029_s25  ;;  %7515 = vst.msk [vmem:[%s8950_s24 + $0x150] sm:$0xff] %vm7472_vm0, %v6789_v60 }
 0x7b0   : > { %7513 = vst.msk [vmem:[%s8950_s24 + $0x140] sm:$0xff] %vm7472_vm0, %v6785_v36  ;;  %v6811_v14 = vpop.permute.xlu2 %6810 }
 0x7b1   : > { %7526 = vst.msk [vmem:[%s8950_s24 + $0x1a8] sm:$0xff] %vm7472_vm0, %v6811_v14  ;;  %v12950_v14 = vld [vmem:[#allocation63_spill] sm:$0xff] }
 0x7b3   : > { %6878 = vrot.lane.b32.xlu1 %v11176_v30, %s8029_s25  ;;  %v12945_v30 = vld [vmem:[#allocation65_spill] sm:$0xff] }
 0x7b5   : > { %6874 = vrot.lane.b32.xlu0 %v12944_v45, %s8029_s25 }
 0x7b6   : > { %v6795_v24 = vpop.permute.xlu1 %6794 }
 0x7b7   : > { %v6791_v54 = vpop.permute.xlu0 %6790  ;;  %6894 = vrot.lane.b32.xlu2 %v11235_v26, %s8029_s25  ;;  %7518 = vst.msk [vmem:[%s8950_s24 + $0x168] sm:$0xff] %vm7472_vm0, %v6795_v24  ;;  %v12946_v26 = vld [vmem:[#allocation46_spill] sm:$0xff] }
 0x7b8   : > { %7516 = vst.msk [vmem:[%s8950_s24 + $0x158] sm:$0xff] %vm7472_vm0, %v6791_v54  ;;  %v6817_v13 = vpop.permute.xlu2 %6816 }
 0x7b9   : > { %7529 = vst.msk [vmem:[%s8950_s24 + $0x1c0] sm:$0xff] %vm7472_vm0, %v6817_v13  ;;  %v12953_v13 = vld [vmem:[#allocation69_spill] sm:$0xff] }
 0x7bb   : > { %6884 = vrot.lane.b32.xlu1 %v11196_v62, %s8029_s25  ;;  %v12947_v62 = vld [vmem:[#allocation71_spill] sm:$0xff] }
 0x7bd   : > { %6880 = vrot.lane.b32.xlu0 %v12945_v30, %s8029_s25 }
 0x7be   : > { %v6801_v12 = vpop.permute.xlu1 %6800 }
 0x7bf   : > { %v6797_v46 = vpop.permute.xlu0 %6796  ;;  %6900 = vrot.lane.b32.xlu2 %v12946_v26, %s8029_s25  ;;  %7521 = vst.msk [vmem:[%s8950_s24 + $0x180] sm:$0xff] %vm7472_vm0, %v6801_v12  ;;  %v12952_v26 = vld [vmem:[#allocation43_spill] sm:$0xff] }
 0x7c0   : > { %7519 = vst.msk [vmem:[%s8950_s24 + $0x170] sm:$0xff] %vm7472_vm0, %v6797_v46  ;;  %v6823_v60 = vpop.permute.xlu2 %6822  ;;  %v12951_v46 = vld [vmem:[#allocation49_spill] sm:$0xff] }
 0x7c1   : > { %7532 = vst.msk [vmem:[%s8950_s24 + $0x1d8] sm:$0xff] %vm7472_vm0, %v6823_v60 }
 0x7c3   : > { %6890 = vrot.lane.b32.xlu1 %v11223_v4, %s8029_s25  ;;  %v12949_v4 = vld [vmem:[#allocation41_spill] sm:$0xff] }
 0x7c5   : > { %6886 = vrot.lane.b32.xlu0 %v12947_v62, %s8029_s25 }
 0x7c6   : > { %v6807_v45 = vpop.permute.xlu1 %6806 }
 0x7c7   : > { %v6803_v36 = vpop.permute.xlu0 %6802  ;;  %6906 = vrot.lane.b32.xlu2 %v12948_v29, %s8029_s25  ;;  %7524 = vst.msk [vmem:[%s8950_s24 + $0x198] sm:$0xff] %vm7472_vm0, %v6807_v45  ;;  %v12955_v29 = vld [vmem:[#allocation52_spill] sm:$0xff]  ;;  %v12956_v45 = vld [vmem:[#allocation75_spill] sm:$0xff] }
 0x7c8   : > { %7522 = vst.msk [vmem:[%s8950_s24 + $0x188] sm:$0xff] %vm7472_vm0, %v6803_v36  ;;  %v6829_v24 = vpop.permute.xlu2 %6828  ;;  %v12954_v36 = vld [vmem:[#allocation58_spill] sm:$0xff] }
 0x7c9   : > { %7535 = vst.msk [vmem:[%s8950_s24 + $0x1f0] sm:$0xff] %vm7472_vm0, %v6829_v24  ;;  %v12958_v24 = vld [vmem:[#allocation60_spill] sm:$0xff] }
 0x7cb   : > { %6896 = vrot.lane.b32.xlu1 %v12949_v4, %s8029_s25 }
 0x7cd   : > { %6892 = vrot.lane.b32.xlu0 %v11229_v42, %s8029_s25 }
 0x7ce   : > { %v6813_v30 = vpop.permute.xlu1 %6812 }
 0x7cf   : > { %v6809_v54 = vpop.permute.xlu0 %6808  ;;  %6912 = vrot.lane.b32.xlu2 %v12950_v14, %s8029_s25  ;;  %7527 = vst.msk [vmem:[%s8950_s24 + $0x1b0] sm:$0xff] %vm7472_vm0, %v6813_v30  ;;  %v12957_v14 = vld [vmem:[#allocation64_spill] sm:$0xff] }
 0x7d0   : > { %7525 = vst.msk [vmem:[%s8950_s24 + $0x1a0] sm:$0xff] %vm7472_vm0, %v6809_v54  ;;  %v6835_v12 = vpop.permute.xlu2 %6834 }
 0x7d1   : > { %7538 = vst.msk [vmem:[%s8950_s24 + $0x208] sm:$0xff] %vm7472_vm0, %v6835_v12  ;;  %v12961_v12 = vld [vmem:[#allocation67_spill] sm:$0xff] }
 0x7d3   : > { %6902 = vrot.lane.b32.xlu1 %v12951_v46, %s8029_s25  ;;  %v12959_v46 = vld [vmem:[#allocation54_spill] sm:$0xff] }
 0x7d5   : > { %6898 = vrot.lane.b32.xlu0 %v12952_v26, %s8029_s25 }
 0x7d6   : > { %v6819_v62 = vpop.permute.xlu1 %6818 }
 0x7d7   : > { %v6815_v42 = vpop.permute.xlu0 %6814  ;;  %6918 = vrot.lane.b32.xlu2 %v12953_v13, %s8029_s25  ;;  %7530 = vst.msk [vmem:[%s8950_s24 + $0x1c8] sm:$0xff] %vm7472_vm0, %v6819_v62  ;;  %v12960_v13 = vld [vmem:[#allocation70_spill] sm:$0xff] }
 0x7d8   : > { %7528 = vst.msk [vmem:[%s8950_s24 + $0x1b8] sm:$0xff] %vm7472_vm0, %v6815_v42  ;;  %v6841_v4 = vpop.permute.xlu2 %6840 }
 0x7d9   : > { %7541 = vst.msk [vmem:[%s8950_s24 + $0x220] sm:$0xff] %vm7472_vm0, %v6841_v4  ;;  %v12964_v4 = vld [vmem:[#allocation73_spill] sm:$0xff] }
 0x7db   : > { %6908 = vrot.lane.b32.xlu1 %v12954_v36, %s8029_s25  ;;  %v12962_v36 = vld [vmem:[#allocation62_spill] sm:$0xff] }
 0x7dd   : > { %6904 = vrot.lane.b32.xlu0 %v12955_v29, %s8029_s25 }
 0x7de   : > { %v6825_v54 = vpop.permute.xlu1 %6824 }
 0x7df   : > { %v6821_v60 = vpop.permute.xlu0 %6820  ;;  %6924 = vrot.lane.b32.xlu2 %v12956_v45, %s8029_s25  ;;  %7533 = vst.msk [vmem:[%s8950_s24 + $0x1e0] sm:$0xff] %vm7472_vm0, %v6825_v54  ;;  %v12963_v45 = vld [vmem:[#allocation77_spill] sm:$0xff] }
 0x7e0   : > { %7531 = vst.msk [vmem:[%s8950_s24 + $0x1d0] sm:$0xff] %vm7472_vm0, %v6821_v60  ;;  %v6847_v26 = vpop.permute.xlu2 %6846 }
 0x7e1   : > { %7544 = vst.msk [vmem:[%s8950_s24 + $0x238] sm:$0xff] %vm7472_vm0, %v6847_v26  ;;  %v12967_v26 = vld [vmem:[#allocation51_spill] sm:$0xff] }
 0x7e3   : > { %6914 = vrot.lane.b32.xlu1 %v12957_v14, %s8029_s25  ;;  %v12965_v14 = vld [vmem:[#allocation68_spill] sm:$0xff] }
 0x7e5   : > { %6910 = vrot.lane.b32.xlu0 %v12958_v24, %s8029_s25 }
 0x7e6   : > { %v6831_v42 = vpop.permute.xlu1 %6830 }
 0x7e7   : > { %v6827_v30 = vpop.permute.xlu0 %6826  ;;  %6930 = vrot.lane.b32.xlu2 %v12959_v46, %s8029_s25  ;;  %7536 = vst.msk [vmem:[%s8950_s24 + $0x1f8] sm:$0xff] %vm7472_vm0, %v6831_v42  ;;  %v12966_v46 = vld [vmem:[#allocation57_spill] sm:$0xff] }
 0x7e8   : > { %7534 = vst.msk [vmem:[%s8950_s24 + $0x1e8] sm:$0xff] %vm7472_vm0, %v6827_v30  ;;  %v6853_v29 = vpop.permute.xlu2 %6852 }
 0x7e9   : > { %7547 = vst.msk [vmem:[%s8950_s24 + $0x250] sm:$0xff] %vm7472_vm0, %v6853_v29  ;;  %v12970_v29 = vld [vmem:[#allocation29_spill] sm:$0xff] }
 0x7eb   : > { %6920 = vrot.lane.b32.xlu1 %v12960_v13, %s8029_s25  ;;  %v12968_v13 = vld [vmem:[#allocation74_spill] sm:$0xff] }
 0x7ed   : > { %6916 = vrot.lane.b32.xlu0 %v12961_v12, %s8029_s25 }
 0x7ee   : > { %v6837_v60 = vpop.permute.xlu1 %6836 }
 0x7ef   : > { %v6833_v62 = vpop.permute.xlu0 %6832  ;;  %6936 = vrot.lane.b32.xlu2 %v12962_v36, %s8029_s25  ;;  %7539 = vst.msk [vmem:[%s8950_s24 + $0x210] sm:$0xff] %vm7472_vm0, %v6837_v60  ;;  %v12969_v36 = vld [vmem:[#allocation23_spill] sm:$0xff] }
 0x7f0   : > { %7537 = vst.msk [vmem:[%s8950_s24 + $0x200] sm:$0xff] %vm7472_vm0, %v6833_v62  ;;  %v6859_v24 = vpop.permute.xlu2 %6858 }
 0x7f1   : > { %7550 = vst.msk [vmem:[%s8950_s24 + $0x268] sm:$0xff] %vm7472_vm0, %v6859_v24  ;;  %v12973_v24 = vld [vmem:[#allocation66_spill] sm:$0xff] }
 0x7f3   : > { %6926 = vrot.lane.b32.xlu1 %v12963_v45, %s8029_s25  ;;  %v12971_v45 = vld [vmem:[#allocation80_spill] sm:$0xff] }
 0x7f5   : > { %6922 = vrot.lane.b32.xlu0 %v12964_v4, %s8029_s25 }
 0x7f6   : > { %v6843_v30 = vpop.permute.xlu1 %6842 }
 0x7f7   : > { %v6839_v54 = vpop.permute.xlu0 %6838  ;;  %6942 = vrot.lane.b32.xlu2 %v12965_v14, %s8029_s25  ;;  %7542 = vst.msk [vmem:[%s8950_s24 + $0x228] sm:$0xff] %vm7472_vm0, %v6843_v30  ;;  %v12972_v14 = vld [vmem:[#allocation30_spill] sm:$0xff] }
 0x7f8   : > { %7540 = vst.msk [vmem:[%s8950_s24 + $0x218] sm:$0xff] %vm7472_vm0, %v6839_v54  ;;  %v6865_v12 = vpop.permute.xlu2 %6864 }
 0x7f9   : > { %7553 = vst.msk [vmem:[%s8950_s24 + $0x280] sm:$0xff] %vm7472_vm0, %v6865_v12  ;;  %v12976_v12 = vld [vmem:[#allocation72_spill] sm:$0xff] }
 0x7fb   : > { %6932 = vrot.lane.b32.xlu1 %v12966_v46, %s8029_s25  ;;  %v12974_v46 = vld [vmem:[#allocation82_spill] sm:$0xff] }
 0x7fd   : > { %6928 = vrot.lane.b32.xlu0 %v12967_v26, %s8029_s25 }
 0x7fe   : > { %v6849_v62 = vpop.permute.xlu1 %6848 }
 0x7ff   : > { %v6845_v42 = vpop.permute.xlu0 %6844  ;;  %6948 = vrot.lane.b32.xlu2 %v12968_v13, %s8029_s25  ;;  %7545 = vst.msk [vmem:[%s8950_s24 + $0x240] sm:$0xff] %vm7472_vm0, %v6849_v62  ;;  %v12975_v13 = vld [vmem:[#allocation76_spill] sm:$0xff] }
 0x800   : > { %7543 = vst.msk [vmem:[%s8950_s24 + $0x230] sm:$0xff] %vm7472_vm0, %v6845_v42  ;;  %v6871_v4 = vpop.permute.xlu2 %6870 }
 0x801   : > { %7556 = vst.msk [vmem:[%s8950_s24 + $0x298] sm:$0xff] %vm7472_vm0, %v6871_v4 }
 0x803   : > { %6938 = vrot.lane.b32.xlu1 %v12969_v36, %s8029_s25 }
 0x805   : > { %6934 = vrot.lane.b32.xlu0 %v12970_v29, %s8029_s25 }
 0x806   : > { %v6855_v54 = vpop.permute.xlu1 %6854 }
 0x807   : > { %v6851_v60 = vpop.permute.xlu0 %6850  ;;  %6954 = vrot.lane.b32.xlu2 %v12971_v45, %s8029_s25  ;;  %7548 = vst.msk [vmem:[%s8950_s24 + $0x258] sm:$0xff] %vm7472_vm0, %v6855_v54  ;;  %v12978_v45 = vld [vmem:[#allocation78_spill] sm:$0xff] }
 0x808   : > { %7546 = vst.msk [vmem:[%s8950_s24 + $0x248] sm:$0xff] %vm7472_vm0, %v6851_v60  ;;  %v6877_v26 = vpop.permute.xlu2 %6876  ;;  %v12977_v60 = vld [vmem:[#allocation83_spill] sm:$0xff] }
 0x809   : > { %7559 = vst.msk [vmem:[%s8950_s24 + $0x2b0] sm:$0xff] %vm7472_vm0, %v6877_v26 }
 0x80b   : > { %6944 = vrot.lane.b32.xlu1 %v12972_v14, %s8029_s25  ;;  %v12979_v14 = vld [vmem:[#allocation85_spill] sm:$0xff] }
 0x80d   : > { %6940 = vrot.lane.b32.xlu0 %v12973_v24, %s8029_s25  ;;  %v12980_v24 = vld [vmem:[#allocation86_spill] sm:$0xff] }
 0x80e   : > { %v6861_v42 = vpop.permute.xlu1 %6860 }
 0x80f   : > { %v6857_v30 = vpop.permute.xlu0 %6856  ;;  %6960 = vrot.lane.b32.xlu2 %v12974_v46, %s8029_s25  ;;  %7551 = vst.msk [vmem:[%s8950_s24 + $0x270] sm:$0xff] %vm7472_vm0, %v6861_v42  ;;  %v12982_v42 = vld [vmem:[#allocation93_spill] sm:$0xff] }
 0x810   : > { %7549 = vst.msk [vmem:[%s8950_s24 + $0x260] sm:$0xff] %vm7472_vm0, %v6857_v30  ;;  %v6883_v36 = vpop.permute.xlu2 %6882 }
 0x811   : > { %7562 = vst.msk [vmem:[%s8950_s24 + $0x2c8] sm:$0xff] %vm7472_vm0, %v6883_v36 }
 0x813   : > { %6950 = vrot.lane.b32.xlu1 %v12975_v13, %s8029_s25  ;;  %v12983_v13 = vld [vmem:[#allocation88_spill] sm:$0xff] }
 0x815   : > { %6946 = vrot.lane.b32.xlu0 %v12976_v12, %s8029_s25 }
 0x816   : > { %v6867_v29 = vpop.permute.xlu1 %6866 }
 0x817   : > { %v6863_v62 = vpop.permute.xlu0 %6862  ;;  %6966 = vrot.lane.b32.xlu2 %v11259_v37, %s8029_s25  ;;  %7554 = vst.msk [vmem:[%s8950_s24 + $0x288] sm:$0xff] %vm7472_vm0, %v6867_v29 }
 0x818   : > { %7552 = vst.msk [vmem:[%s8950_s24 + $0x278] sm:$0xff] %vm7472_vm0, %v6863_v62  ;;  %v6889_v37 = vpop.permute.xlu2 %6888  ;;  %v12984_v62 = vld [vmem:[#allocation116_spill] sm:$0xff] }
 0x819   : > { %7565 = vst.msk [vmem:[%s8950_s24 + $0x2e0] sm:$0xff] %vm7472_vm0, %v6889_v37  ;;  %v12987_v37 = vld [vmem:[#allocation125_spill] sm:$0xff] }
 0x81b   : > { %6956 = vrot.lane.b32.xlu1 %v12977_v60, %s8029_s25  ;;  %v12985_v60 = vld [vmem:[#allocation101_spill] sm:$0xff] }
 0x81d   : > { %6952 = vrot.lane.b32.xlu0 %v12978_v45, %s8029_s25  ;;  %v12986_v45 = vld [vmem:[#allocation96_spill] sm:$0xff] }
 0x81e   : > { %v6873_v54 = vpop.permute.xlu1 %6872 }
 0x81f   : > { %v6869_v4 = vpop.permute.xlu0 %6868  ;;  %6972 = vrot.lane.b32.xlu2 %v11278_v43, %s8029_s25  ;;  %7557 = vst.msk [vmem:[%s8950_s24 + $0x2a0] sm:$0xff] %vm7472_vm0, %v6873_v54  ;;  %v12981_v43 = vld [vmem:[#allocation107_spill] sm:$0xff] }
 0x820   : > { %7555 = vst.msk [vmem:[%s8950_s24 + $0x290] sm:$0xff] %vm7472_vm0, %v6869_v4  ;;  %v6895_v46 = vpop.permute.xlu2 %6894 }
 0x821   : > { %7568 = vst.msk [vmem:[%s8950_s24 + $0x2f8] sm:$0xff] %vm7472_vm0, %v6895_v46  ;;  %v12990_v46 = vld [vmem:[#allocation84_spill] sm:$0xff] }
 0x823   : > { %6962 = vrot.lane.b32.xlu1 %v12979_v14, %s8029_s25 }
 0x825   : > { %6958 = vrot.lane.b32.xlu0 %v12980_v24, %s8029_s25  ;;  %v12988_v24 = vld [vmem:[#allocation110_spill] sm:$0xff] }
 0x826   : > { %v6879_v26 = vpop.permute.xlu1 %6878 }
 0x827   : > { %v6875_v30 = vpop.permute.xlu0 %6874  ;;  %6978 = vrot.lane.b32.xlu2 %v12981_v43, %s8029_s25  ;;  %7560 = vst.msk [vmem:[%s8950_s24 + $0x2b8] sm:$0xff] %vm7472_vm0, %v6879_v26 }
 0x828   : > { %7558 = vst.msk [vmem:[%s8950_s24 + $0x2a8] sm:$0xff] %vm7472_vm0, %v6875_v30  ;;  %v6901_v36 = vpop.permute.xlu2 %6900  ;;  %v12989_v30 = vld [vmem:[#allocation104_spill] sm:$0xff] }
 0x829   : > { %7571 = vst.msk [vmem:[%s8950_s24 + $0x310] sm:$0xff] %vm7472_vm0, %v6901_v36  ;;  %v12993_v36 = vld [vmem:[#allocation92_spill] sm:$0xff] }
 0x82b   : > { %6968 = vrot.lane.b32.xlu1 %v12982_v42, %s8029_s25 }
 0x82d   : > { %6964 = vrot.lane.b32.xlu0 %v12983_v13, %s8029_s25  ;;  %v12991_v13 = vld [vmem:[#allocation119_spill] sm:$0xff] }
 0x82e   : > { %v6885_v29 = vpop.permute.xlu1 %6884 }
 0x82f   : > { %v6881_v12 = vpop.permute.xlu0 %6880  ;;  %6984 = vrot.lane.b32.xlu2 %v12984_v62, %s8029_s25  ;;  %7563 = vst.msk [vmem:[%s8950_s24 + $0x2d0] sm:$0xff] %vm7472_vm0, %v6885_v29 }
 0x830   : > { %7561 = vst.msk [vmem:[%s8950_s24 + $0x2c0] sm:$0xff] %vm7472_vm0, %v6881_v12  ;;  %v6907_v54 = vpop.permute.xlu2 %6906  ;;  %v12992_v12 = vld [vmem:[#allocation113_spill] sm:$0xff] }
 0x831   : > { %7574 = vst.msk [vmem:[%s8950_s24 + $0x328] sm:$0xff] %vm7472_vm0, %v6907_v54  ;;  %v12996_v54 = vld [vmem:[#allocation100_spill] sm:$0xff] }
 0x833   : > { %6974 = vrot.lane.b32.xlu1 %v12985_v60, %s8029_s25 }
 0x835   : > { %6970 = vrot.lane.b32.xlu0 %v12986_v45, %s8029_s25  ;;  %v12994_v45 = vld [vmem:[#allocation79_spill] sm:$0xff] }
 0x836   : > { %v6891_v14 = vpop.permute.xlu1 %6890 }
 0x837   : > { %v6887_v4 = vpop.permute.xlu0 %6886  ;;  %6990 = vrot.lane.b32.xlu2 %v12987_v37, %s8029_s25  ;;  %7566 = vst.msk [vmem:[%s8950_s24 + $0x2e8] sm:$0xff] %vm7472_vm0, %v6891_v14 }
 0x838   : > { %7564 = vst.msk [vmem:[%s8950_s24 + $0x2d8] sm:$0xff] %vm7472_vm0, %v6887_v4  ;;  %v6913_v26 = vpop.permute.xlu2 %6912  ;;  %v12995_v4 = vld [vmem:[#allocation122_spill] sm:$0xff] }
 0x839   : > { %7577 = vst.msk [vmem:[%s8950_s24 + $0x340] sm:$0xff] %vm7472_vm0, %v6913_v26  ;;  %v12999_v26 = vld [vmem:[#allocation109_spill] sm:$0xff] }
 0x83b   : > { %6980 = vrot.lane.b32.xlu1 %v12988_v24, %s8029_s25 }
 0x83d   : > { %6976 = vrot.lane.b32.xlu0 %v12989_v30, %s8029_s25  ;;  %v12997_v30 = vld [vmem:[#allocation87_spill] sm:$0xff] }
 0x83e   : > { %v6897_v42 = vpop.permute.xlu1 %6896 }
 0x83f   : > { %v6893_v43 = vpop.permute.xlu0 %6892  ;;  %6996 = vrot.lane.b32.xlu2 %v12990_v46, %s8029_s25  ;;  %7569 = vst.msk [vmem:[%s8950_s24 + $0x300] sm:$0xff] %vm7472_vm0, %v6897_v42 }
 0x840   : > { %7567 = vst.msk [vmem:[%s8950_s24 + $0x2f0] sm:$0xff] %vm7472_vm0, %v6893_v43  ;;  %v6919_v29 = vpop.permute.xlu2 %6918  ;;  %v12998_v43 = vld [vmem:[#allocation81_spill] sm:$0xff] }
 0x841   : > { %7580 = vst.msk [vmem:[%s8950_s24 + $0x358] sm:$0xff] %vm7472_vm0, %v6919_v29  ;;  %v13002_v29 = vld [vmem:[#allocation118_spill] sm:$0xff] }
 0x843   : > { %6986 = vrot.lane.b32.xlu1 %v12991_v13, %s8029_s25 }
 0x845   : > { %6982 = vrot.lane.b32.xlu0 %v12992_v12, %s8029_s25  ;;  %v13000_v12 = vld [vmem:[#allocation95_spill] sm:$0xff] }
 0x846   : > { %v6903_v60 = vpop.permute.xlu1 %6902 }
 0x847   : > { %v6899_v62 = vpop.permute.xlu0 %6898  ;;  %7002 = vrot.lane.b32.xlu2 %v12993_v36, %s8029_s25  ;;  %7572 = vst.msk [vmem:[%s8950_s24 + $0x318] sm:$0xff] %vm7472_vm0, %v6903_v60 }
 0x848   : > { %7570 = vst.msk [vmem:[%s8950_s24 + $0x308] sm:$0xff] %vm7472_vm0, %v6899_v62  ;;  %v6925_v14 = vpop.permute.xlu2 %6924  ;;  %v13001_v62 = vld [vmem:[#allocation90_spill] sm:$0xff] }
 0x849   : > { %7583 = vst.msk [vmem:[%s8950_s24 + $0x370] sm:$0xff] %vm7472_vm0, %v6925_v14  ;;  %v13005_v14 = vld [vmem:[#allocation91_spill] sm:$0xff] }
 0x84b   : > { %6992 = vrot.lane.b32.xlu1 %v12994_v45, %s8029_s25 }
 0x84d   : > { %6988 = vrot.lane.b32.xlu0 %v12995_v4, %s8029_s25  ;;  %v13003_v4 = vld [vmem:[#allocation103_spill] sm:$0xff] }
 0x84e   : > { %v6909_v24 = vpop.permute.xlu1 %6908 }
 0x84f   : > { %v6905_v37 = vpop.permute.xlu0 %6904  ;;  %7008 = vrot.lane.b32.xlu2 %v12996_v54, %s8029_s25  ;;  %7575 = vst.msk [vmem:[%s8950_s24 + $0x330] sm:$0xff] %vm7472_vm0, %v6909_v24 }
 0x850   : > { %7573 = vst.msk [vmem:[%s8950_s24 + $0x320] sm:$0xff] %vm7472_vm0, %v6905_v37  ;;  %v6931_v42 = vpop.permute.xlu2 %6930  ;;  %v13004_v37 = vld [vmem:[#allocation98_spill] sm:$0xff] }
 0x851   : > { %7586 = vst.msk [vmem:[%s8950_s24 + $0x388] sm:$0xff] %vm7472_vm0, %v6931_v42  ;;  %v13008_v42 = vld [vmem:[#allocation99_spill] sm:$0xff] }
 0x853   : > { %6998 = vrot.lane.b32.xlu1 %v12997_v30, %s8029_s25 }
 0x855   : > { %6994 = vrot.lane.b32.xlu0 %v12998_v43, %s8029_s25  ;;  %v13006_v43 = vld [vmem:[#allocation112_spill] sm:$0xff] }
 0x856   : > { %v6915_v13 = vpop.permute.xlu1 %6914 }
 0x857   : > { %v6911_v46 = vpop.permute.xlu0 %6910  ;;  %7014 = vrot.lane.b32.xlu2 %v12999_v26, %s8029_s25  ;;  %7578 = vst.msk [vmem:[%s8950_s24 + $0x348] sm:$0xff] %vm7472_vm0, %v6915_v13 }
 0x858   : > { %7576 = vst.msk [vmem:[%s8950_s24 + $0x338] sm:$0xff] %vm7472_vm0, %v6911_v46  ;;  %v6937_v60 = vpop.permute.xlu2 %6936  ;;  %v13007_v46 = vld [vmem:[#allocation106_spill] sm:$0xff] }
 0x859   : > { %7589 = vst.msk [vmem:[%s8950_s24 + $0x3a0] sm:$0xff] %vm7472_vm0, %v6937_v60  ;;  %v13011_v60 = vld [vmem:[#allocation108_spill] sm:$0xff] }
 0x85b   : > { %7004 = vrot.lane.b32.xlu1 %v13000_v12, %s8029_s25 }
 0x85d   : > { %7000 = vrot.lane.b32.xlu0 %v13001_v62, %s8029_s25  ;;  %v13009_v62 = vld [vmem:[#allocation121_spill] sm:$0xff] }
 0x85e   : > { %v6921_v45 = vpop.permute.xlu1 %6920 }
 0x85f   : > { %v6917_v36 = vpop.permute.xlu0 %6916  ;;  %7020 = vrot.lane.b32.xlu2 %v13002_v29, %s8029_s25  ;;  %7581 = vst.msk [vmem:[%s8950_s24 + $0x360] sm:$0xff] %vm7472_vm0, %v6921_v45 }
 0x860   : > { %7579 = vst.msk [vmem:[%s8950_s24 + $0x350] sm:$0xff] %vm7472_vm0, %v6917_v36  ;;  %v6943_v24 = vpop.permute.xlu2 %6942  ;;  %v13010_v36 = vld [vmem:[#allocation115_spill] sm:$0xff] }
 0x861   : > { %7592 = vst.msk [vmem:[%s8950_s24 + $0x3b8] sm:$0xff] %vm7472_vm0, %v6943_v24  ;;  %v13014_v24 = vld [vmem:[#allocation117_spill] sm:$0xff] }
 0x863   : > { %7010 = vrot.lane.b32.xlu1 %v13003_v4, %s8029_s25 }
 0x865   : > { %7006 = vrot.lane.b32.xlu0 %v13004_v37, %s8029_s25  ;;  %v13012_v37 = vld [vmem:[#allocation94_spill] sm:$0xff] }
 0x866   : > { %v6927_v30 = vpop.permute.xlu1 %6926 }
 0x867   : > { %v6923_v54 = vpop.permute.xlu0 %6922  ;;  %7026 = vrot.lane.b32.xlu2 %v13005_v14, %s8029_s25  ;;  %7584 = vst.msk [vmem:[%s8950_s24 + $0x378] sm:$0xff] %vm7472_vm0, %v6927_v30 }
 0x868   : > { %7582 = vst.msk [vmem:[%s8950_s24 + $0x368] sm:$0xff] %vm7472_vm0, %v6923_v54  ;;  %v6949_v13 = vpop.permute.xlu2 %6948  ;;  %v13013_v54 = vld [vmem:[#allocation89_spill] sm:$0xff] }
 0x869   : > { %7595 = vst.msk [vmem:[%s8950_s24 + $0x3d0] sm:$0xff] %vm7472_vm0, %v6949_v13  ;;  %v13017_v13 = vld [vmem:[#allocation126_spill] sm:$0xff] }
 0x86b   : > { %7016 = vrot.lane.b32.xlu1 %v13006_v43, %s8029_s25 }
 0x86d   : > { %7012 = vrot.lane.b32.xlu0 %v13007_v46, %s8029_s25  ;;  %v13015_v46 = vld [vmem:[#allocation102_spill] sm:$0xff] }
 0x86e   : > { %v6933_v12 = vpop.permute.xlu1 %6932 }
 0x86f   : > { %v6929_v26 = vpop.permute.xlu0 %6928  ;;  %7032 = vrot.lane.b32.xlu2 %v13008_v42, %s8029_s25  ;;  %7587 = vst.msk [vmem:[%s8950_s24 + $0x390] sm:$0xff] %vm7472_vm0, %v6933_v12 }
 0x870   : > { %7585 = vst.msk [vmem:[%s8950_s24 + $0x380] sm:$0xff] %vm7472_vm0, %v6929_v26  ;;  %v6955_v45 = vpop.permute.xlu2 %6954  ;;  %v13016_v26 = vld [vmem:[#allocation97_spill] sm:$0xff] }
 0x871   : > { %7598 = vst.msk [vmem:[%s8950_s24 + $0x3e8] sm:$0xff] %vm7472_vm0, %v6955_v45  ;;  %v13020_v45 = vld [vmem:[#allocation128_spill] sm:$0xff] }
 0x873   : > { %7022 = vrot.lane.b32.xlu1 %v13009_v62, %s8029_s25 }
 0x875   : > { %7018 = vrot.lane.b32.xlu0 %v13010_v36, %s8029_s25  ;;  %v13018_v36 = vld [vmem:[#allocation111_spill] sm:$0xff] }
 0x876   : > { %v6939_v4 = vpop.permute.xlu1 %6938 }
 0x877   : > { %v6935_v29 = vpop.permute.xlu0 %6934  ;;  %7038 = vrot.lane.b32.xlu2 %v13011_v60, %s8029_s25  ;;  %7590 = vst.msk [vmem:[%s8950_s24 + $0x3a8] sm:$0xff] %vm7472_vm0, %v6939_v4 }
 0x878   : > { %7588 = vst.msk [vmem:[%s8950_s24 + $0x398] sm:$0xff] %vm7472_vm0, %v6935_v29  ;;  %v6961_v30 = vpop.permute.xlu2 %6960  ;;  %v13019_v29 = vld [vmem:[#allocation105_spill] sm:$0xff] }
 0x879   : > { %7601 = vst.msk [vmem:[%s8950_s24 + $0x400] sm:$0xff] %vm7472_vm0, %v6961_v30  ;;  %v13023_v30 = vld [vmem:[#allocation137_spill] sm:$0xff] }
 0x87b   : > { %7028 = vrot.lane.b32.xlu1 %v13012_v37, %s8029_s25 }
 0x87d   : > { %7024 = vrot.lane.b32.xlu0 %v13013_v54, %s8029_s25  ;;  %v13021_v54 = vld [vmem:[#allocation120_spill] sm:$0xff] }
 0x87e   : > { %v6945_v43 = vpop.permute.xlu1 %6944 }
 0x87f   : > { %v6941_v14 = vpop.permute.xlu0 %6940  ;;  %7044 = vrot.lane.b32.xlu2 %v13014_v24, %s8029_s25  ;;  %7593 = vst.msk [vmem:[%s8950_s24 + $0x3c0] sm:$0xff] %vm7472_vm0, %v6945_v43 }
 0x880   : > { %7591 = vst.msk [vmem:[%s8950_s24 + $0x3b0] sm:$0xff] %vm7472_vm0, %v6941_v14  ;;  %v6967_v12 = vpop.permute.xlu2 %6966  ;;  %v13022_v14 = vld [vmem:[#allocation114_spill] sm:$0xff] }
 0x881   : > { %7604 = vst.msk [vmem:[%s8950_s24 + $0x418] sm:$0xff] %vm7472_vm0, %v6967_v12 }
 0x883   : > { %7034 = vrot.lane.b32.xlu1 %v13015_v46, %s8029_s25 }
 0x885   : > { %7030 = vrot.lane.b32.xlu0 %v13016_v26, %s8029_s25  ;;  %v13024_v26 = vld [vmem:[#allocation129_spill] sm:$0xff] }
 0x886   : > { %v6951_v62 = vpop.permute.xlu1 %6950 }
 0x887   : > { %v6947_v42 = vpop.permute.xlu0 %6946  ;;  %7050 = vrot.lane.b32.xlu2 %v13017_v13, %s8029_s25  ;;  %7596 = vst.msk [vmem:[%s8950_s24 + $0x3d8] sm:$0xff] %vm7472_vm0, %v6951_v62 }
 0x888   : > { %7594 = vst.msk [vmem:[%s8950_s24 + $0x3c8] sm:$0xff] %vm7472_vm0, %v6947_v42  ;;  %v6973_v4 = vpop.permute.xlu2 %6972  ;;  %v13025_v42 = vld [vmem:[#allocation123_spill] sm:$0xff] }
 0x889   : > { %7607 = vst.msk [vmem:[%s8950_s24 + $0x430] sm:$0xff] %vm7472_vm0, %v6973_v4  ;;  %v13028_v4 = vld [vmem:[#allocation139_spill] sm:$0xff] }
 0x88b   : > { %7040 = vrot.lane.b32.xlu1 %v13018_v36, %s8029_s25  ;;  %v13026_v36 = vld [vmem:[#allocation131_spill] sm:$0xff] }
 0x88d   : > { %7036 = vrot.lane.b32.xlu0 %v13019_v29, %s8029_s25  ;;  %v13027_v29 = vld [vmem:[#allocation132_spill] sm:$0xff] }
 0x88e   : > { %v6957_v37 = vpop.permute.xlu1 %6956 }
 0x88f   : > { %v6953_v60 = vpop.permute.xlu0 %6952  ;;  %7056 = vrot.lane.b32.xlu2 %v13020_v45, %s8029_s25  ;;  %7599 = vst.msk [vmem:[%s8950_s24 + $0x3f0] sm:$0xff] %vm7472_vm0, %v6957_v37  ;;  %v13029_v37 = vld [vmem:[#allocation134_spill] sm:$0xff] }
 0x890   : > { %7597 = vst.msk [vmem:[%s8950_s24 + $0x3e0] sm:$0xff] %vm7472_vm0, %v6953_v60  ;;  %v6979_v43 = vpop.permute.xlu2 %6978 }
 0x891   : > { %7610 = vst.msk [vmem:[%s8950_s24 + $0x448] sm:$0xff] %vm7472_vm0, %v6979_v43 }
 0x893   : > { %7046 = vrot.lane.b32.xlu1 %v13021_v54, %s8029_s25 }
 0x895   : > { %7042 = vrot.lane.b32.xlu0 %v13022_v14, %s8029_s25 }
 0x896   : > { %v6963_v46 = vpop.permute.xlu1 %6962 }
 0x897   : > { %v6959_v24 = vpop.permute.xlu0 %6958  ;;  %7062 = vrot.lane.b32.xlu2 %v13023_v30, %s8029_s25  ;;  %7602 = vst.msk [vmem:[%s8950_s24 + $0x408] sm:$0xff] %vm7472_vm0, %v6963_v46 }
 0x898   : > { %7600 = vst.msk [vmem:[%s8950_s24 + $0x3f8] sm:$0xff] %vm7472_vm0, %v6959_v24  ;;  %v6985_v12 = vpop.permute.xlu2 %6984 }
 0x899   : > { %7613 = vst.msk [vmem:[%s8950_s24 + $0x460] sm:$0xff] %vm7472_vm0, %v6985_v12 }
 0x89b   : > { %7052 = vrot.lane.b32.xlu1 %v13024_v26, %s8029_s25 }
 0x89d   : > { %7048 = vrot.lane.b32.xlu0 %v13025_v42, %s8029_s25  ;;  %v13033_v42 = vld [vmem:[#allocation145_spill] sm:$0xff] }
 0x89e   : > { %v6969_v62 = vpop.permute.xlu1 %6968 }
 0x89f   : > { %v6965_v13 = vpop.permute.xlu0 %6964  ;;  %7068 = vrot.lane.b32.xlu2 %v11373_v56, %s8029_s25  ;;  %7605 = vst.msk [vmem:[%s8950_s24 + $0x420] sm:$0xff] %vm7472_vm0, %v6969_v62  ;;  %v13034_v62 = vld [vmem:[#allocation133_spill] sm:$0xff] }
 0x8a0   : > { %7603 = vst.msk [vmem:[%s8950_s24 + $0x410] sm:$0xff] %vm7472_vm0, %v6965_v13  ;;  %v6991_v56 = vpop.permute.xlu2 %6990 }
 0x8a1   : > { %7616 = vst.msk [vmem:[%s8950_s24 + $0x478] sm:$0xff] %vm7472_vm0, %v6991_v56 }
 0x8a3   : > { %7058 = vrot.lane.b32.xlu1 %v13026_v36, %s8029_s25  ;;  %v13035_v36 = vld [vmem:[#allocation127_spill] sm:$0xff] }
 0x8a5   : > { %7054 = vrot.lane.b32.xlu0 %v13027_v29, %s8029_s25  ;;  %v13036_v29 = vld [vmem:[#allocation150_spill] sm:$0xff] }
 0x8a6   : > { %v6975_v45 = vpop.permute.xlu1 %6974 }
 0x8a7   : > { %v6971_v60 = vpop.permute.xlu0 %6970  ;;  %7074 = vrot.lane.b32.xlu2 %v11391_v53, %s8029_s25  ;;  %7608 = vst.msk [vmem:[%s8950_s24 + $0x438] sm:$0xff] %vm7472_vm0, %v6975_v45  ;;  %v13037_v45 = vld [vmem:[#allocation141_spill] sm:$0xff] }
 0x8a8   : > { %7606 = vst.msk [vmem:[%s8950_s24 + $0x428] sm:$0xff] %vm7472_vm0, %v6971_v60  ;;  %v6997_v53 = vpop.permute.xlu2 %6996 }
 0x8a9   : > { %7619 = vst.msk [vmem:[%s8950_s24 + $0x490] sm:$0xff] %vm7472_vm0, %v6997_v53 }
 0x8ab   : > { %7064 = vrot.lane.b32.xlu1 %v13028_v4, %s8029_s25  ;;  %v13038_v4 = vld [vmem:[#allocation136_spill] sm:$0xff] }
 0x8ad   : > { %7060 = vrot.lane.b32.xlu0 %v13029_v37, %s8029_s25 }
 0x8ae   : > { %v6981_v14 = vpop.permute.xlu1 %6980 }
 0x8af   : > { %v6977_v54 = vpop.permute.xlu0 %6976  ;;  %7080 = vrot.lane.b32.xlu2 %v11415_v28, %s8029_s25  ;;  %7611 = vst.msk [vmem:[%s8950_s24 + $0x450] sm:$0xff] %vm7472_vm0, %v6981_v14 }
 0x8b0   : > { %7609 = vst.msk [vmem:[%s8950_s24 + $0x440] sm:$0xff] %vm7472_vm0, %v6977_v54  ;;  %v7003_v28 = vpop.permute.xlu2 %7002  ;;  %v13039_v54 = vld [vmem:[#allocation156_spill] sm:$0xff] }
 0x8b1   : > { %7622 = vst.msk [vmem:[%s8950_s24 + $0x4a8] sm:$0xff] %vm7472_vm0, %v7003_v28  ;;  %v13041_v28 = vld [vmem:[#allocation143_spill] sm:$0xff] }
 0x8b3   : > { %7070 = vrot.lane.b32.xlu1 %v11379_v32, %s8029_s25 }
 0x8b5   : > { %7066 = vrot.lane.b32.xlu0 %v11367_v48, %s8029_s25  ;;  %v13030_v48 = vld [vmem:[#allocation130_spill] sm:$0xff] }
 0x8b6   : > { %v6987_v30 = vpop.permute.xlu1 %6986 }
 0x8b7   : > { %v6983_v24 = vpop.permute.xlu0 %6982  ;;  %7086 = vrot.lane.b32.xlu2 %v11437_v33, %s8029_s25  ;;  %7614 = vst.msk [vmem:[%s8950_s24 + $0x468] sm:$0xff] %vm7472_vm0, %v6987_v30 }
 0x8b8   : > { %7612 = vst.msk [vmem:[%s8950_s24 + $0x458] sm:$0xff] %vm7472_vm0, %v6983_v24  ;;  %v7009_v33 = vpop.permute.xlu2 %7008  ;;  %v13040_v24 = vld [vmem:[#allocation147_spill] sm:$0xff] }
 0x8b9   : > { %7625 = vst.msk [vmem:[%s8950_s24 + $0x4c0] sm:$0xff] %vm7472_vm0, %v7009_v33 }
 0x8bb   : > { %7076 = vrot.lane.b32.xlu1 %v11399_v50, %s8029_s25 }
 0x8bd   : > { %7072 = vrot.lane.b32.xlu0 %v11385_v34, %s8029_s25  ;;  %v13031_v34 = vld [vmem:[#allocation138_spill] sm:$0xff] }
 0x8be   : > { %v6993_v43 = vpop.permute.xlu1 %6992 }
 0x8bf   : > { %v6989_v32 = vpop.permute.xlu0 %6988  ;;  %7092 = vrot.lane.b32.xlu2 %v13030_v48, %s8029_s25  ;;  %7617 = vst.msk [vmem:[%s8950_s24 + $0x480] sm:$0xff] %vm7472_vm0, %v6993_v43  ;;  %v13043_v43 = vld [vmem:[#allocation152_spill] sm:$0xff] }
 0x8c0   : > { %7615 = vst.msk [vmem:[%s8950_s24 + $0x470] sm:$0xff] %vm7472_vm0, %v6989_v32  ;;  %v7015_v46 = vpop.permute.xlu2 %7014  ;;  %v13042_v32 = vld [vmem:[#allocation140_spill] sm:$0xff] }
 0x8c1   : > { %7628 = vst.msk [vmem:[%s8950_s24 + $0x4d8] sm:$0xff] %vm7472_vm0, %v7015_v46  ;;  %v13045_v46 = vld [vmem:[#allocation146_spill] sm:$0xff] }
 0x8c3   : > { %7082 = vrot.lane.b32.xlu1 %v11423_v49, %s8029_s25  ;;  %v13032_v49 = vld [vmem:[#allocation124_spill] sm:$0xff] }
 0x8c5   : > { %7078 = vrot.lane.b32.xlu0 %v11407_v52, %s8029_s25 }
 0x8c6   : > { %v6999_v26 = vpop.permute.xlu1 %6998 }
 0x8c7   : > { %v6995_v50 = vpop.permute.xlu0 %6994  ;;  %7098 = vrot.lane.b32.xlu2 %v13031_v34, %s8029_s25  ;;  %7620 = vst.msk [vmem:[%s8950_s24 + $0x498] sm:$0xff] %vm7472_vm0, %v6999_v26 }
 0x8c8   : > { %7618 = vst.msk [vmem:[%s8950_s24 + $0x488] sm:$0xff] %vm7472_vm0, %v6995_v50  ;;  %v7021_v13 = vpop.permute.xlu2 %7020  ;;  %v13044_v50 = vld [vmem:[#allocation148_spill] sm:$0xff] }
 0x8c9   : > { %7631 = vst.msk [vmem:[%s8950_s24 + $0x4f0] sm:$0xff] %vm7472_vm0, %v7021_v13 }
 0x8cb   : > { %7088 = vrot.lane.b32.xlu1 %v13032_v49, %s8029_s25 }
 0x8cd   : > { %7084 = vrot.lane.b32.xlu0 %v11429_v40, %s8029_s25 }
 0x8ce   : > { %v7005_v12 = vpop.permute.xlu1 %7004 }
 0x8cf   : > { %v7001_v52 = vpop.permute.xlu0 %7000  ;;  %7104 = vrot.lane.b32.xlu2 %v13033_v42, %s8029_s25  ;;  %7623 = vst.msk [vmem:[%s8950_s24 + $0x4b0] sm:$0xff] %vm7472_vm0, %v7005_v12  ;;  %v13047_v42 = vld [vmem:[#allocation154_spill] sm:$0xff]  ;;  %v13048_v12 = vld [vmem:[#allocation153_spill] sm:$0xff] }
 0x8d0   : > { %7621 = vst.msk [vmem:[%s8950_s24 + $0x4a0] sm:$0xff] %vm7472_vm0, %v7001_v52  ;;  %v7027_v60 = vpop.permute.xlu2 %7026  ;;  %v13046_v52 = vld [vmem:[#allocation157_spill] sm:$0xff] }
 0x8d1   : > { %7634 = vst.msk [vmem:[%s8950_s24 + $0x508] sm:$0xff] %vm7472_vm0, %v7027_v60 }
 0x8d3   : > { %7094 = vrot.lane.b32.xlu1 %v13034_v62, %s8029_s25 }
 0x8d5   : > { %7090 = vrot.lane.b32.xlu0 %v13035_v36, %s8029_s25 }
 0x8d6   : > { %v7011_v56 = vpop.permute.xlu1 %7010 }
 0x8d7   : > { %v7007_v40 = vpop.permute.xlu0 %7006  ;;  %7110 = vrot.lane.b32.xlu2 %v13036_v29, %s8029_s25  ;;  %7626 = vst.msk [vmem:[%s8950_s24 + $0x4c8] sm:$0xff] %vm7472_vm0, %v7011_v56  ;;  %v13050_v29 = vld [vmem:[#allocation135_spill] sm:$0xff] }
 0x8d8   : > { %7624 = vst.msk [vmem:[%s8950_s24 + $0x4b8] sm:$0xff] %vm7472_vm0, %v7007_v40  ;;  %v7033_v53 = vpop.permute.xlu2 %7032  ;;  %v13049_v40 = vld [vmem:[#allocation142_spill] sm:$0xff] }
 0x8d9   : > { %7637 = vst.msk [vmem:[%s8950_s24 + $0x520] sm:$0xff] %vm7472_vm0, %v7033_v53 }
 0x8db   : > { %7100 = vrot.lane.b32.xlu1 %v13037_v45, %s8029_s25 }
 0x8dd   : > { %7096 = vrot.lane.b32.xlu0 %v13038_v4, %s8029_s25  ;;  %v13051_v4 = vld [vmem:[#allocation149_spill] sm:$0xff] }
 0x8de   : > { %v7017_v14 = vpop.permute.xlu1 %7016 }
 0x8df   : > { %v7013_v37 = vpop.permute.xlu0 %7012  ;;  %7116 = vrot.lane.b32.xlu2 %v13039_v54, %s8029_s25  ;;  %7629 = vst.msk [vmem:[%s8950_s24 + $0x4e0] sm:$0xff] %vm7472_vm0, %v7017_v14  ;;  %v13053_v14 = vld [vmem:[#allocation155_spill] sm:$0xff] }
 0x8e0   : > { %7627 = vst.msk [vmem:[%s8950_s24 + $0x4d0] sm:$0xff] %vm7472_vm0, %v7013_v37  ;;  %v7039_v48 = vpop.permute.xlu2 %7038  ;;  %v13052_v37 = vld [vmem:[#allocation144_spill] sm:$0xff] }
 0x8e1   : > { %7640 = vst.msk [vmem:[%s8950_s24 + $0x538] sm:$0xff] %vm7472_vm0, %v7039_v48 }
 0x8e3   : > { %7106 = vrot.lane.b32.xlu1 %v13040_v24, %s8029_s25  ;;  %v13054_v24 = vld [vmem:[#allocation151_spill] sm:$0xff] }
 0x8e5   : > { %7102 = vrot.lane.b32.xlu0 %v13041_v28, %s8029_s25 }
 0x8e6   : > { %v7023_v33 = vpop.permute.xlu1 %7022 }
 0x8e7   : > { %v7019_v30 = vpop.permute.xlu0 %7018  ;;  %7122 = vrot.lane.b32.xlu2 %v13042_v32, %s8029_s25  ;;  %7632 = vst.msk [vmem:[%s8950_s24 + $0x4f8] sm:$0xff] %vm7472_vm0, %v7023_v33  ;;  %v13055_v32 = vld [vmem:[#allocation158_spill] sm:$0xff] }
 0x8e8   : > { %7630 = vst.msk [vmem:[%s8950_s24 + $0x4e8] sm:$0xff] %vm7472_vm0, %v7019_v30  ;;  %v7045_v26 = vpop.permute.xlu2 %7044 }
 0x8e9   : > { %7643 = vst.msk [vmem:[%s8950_s24 + $0x550] sm:$0xff] %vm7472_vm0, %v7045_v26 }
 0x8eb   : > { %7112 = vrot.lane.b32.xlu1 %v13043_v43, %s8029_s25 }
 0x8ed   : > { %7108 = vrot.lane.b32.xlu0 %v13044_v50, %s8029_s25 }
 0x8ee   : > { %v7029_v49 = vpop.permute.xlu1 %7028 }
 0x8ef   : > { %v7025_v34 = vpop.permute.xlu0 %7024  ;;  %7128 = vrot.lane.b32.xlu2 %v13045_v46, %s8029_s25  ;;  %7635 = vst.msk [vmem:[%s8950_s24 + $0x510] sm:$0xff] %vm7472_vm0, %v7029_v49 }
 0x8f0   : > { %7633 = vst.msk [vmem:[%s8950_s24 + $0x500] sm:$0xff] %vm7472_vm0, %v7025_v34  ;;  %v7051_v62 = vpop.permute.xlu2 %7050 }
 0x8f1   : > { %7646 = vst.msk [vmem:[%s8950_s24 + $0x568] sm:$0xff] %vm7472_vm0, %v7051_v62 }
 0x8f3   : > { %7118 = vrot.lane.b32.xlu1 %v13046_v52, %s8029_s25 }
 0x8f5   : > { %7114 = vrot.lane.b32.xlu0 %v13047_v42, %s8029_s25 }
 0x8f6   : > { %v7035_v36 = vpop.permute.xlu1 %7034 }
 0x8f7   : > { %v7031_v13 = vpop.permute.xlu0 %7030  ;;  %7134 = vrot.lane.b32.xlu2 %v13048_v12, %s8029_s25  ;;  %7638 = vst.msk [vmem:[%s8950_s24 + $0x528] sm:$0xff] %vm7472_vm0, %v7035_v36 }
 0x8f8   : > { %7636 = vst.msk [vmem:[%s8950_s24 + $0x518] sm:$0xff] %vm7472_vm0, %v7031_v13  ;;  %v7057_v56 = vpop.permute.xlu2 %7056 }
 0x8f9   : > { %7649 = vst.msk [vmem:[%s8950_s24 + $0x580] sm:$0xff] %vm7472_vm0, %v7057_v56 }
 0x8fb   : > { %7124 = vrot.lane.b32.xlu1 %v13049_v40, %s8029_s25 }
 0x8fd   : > { %7120 = vrot.lane.b32.xlu0 %v13050_v29, %s8029_s25 }
 0x8fe   : > { %v7041_v45 = vpop.permute.xlu1 %7040 }
 0x8ff   : > { %v7037_v60 = vpop.permute.xlu0 %7036  ;;  %7140 = vrot.lane.b32.xlu2 %v11439_v31, %s8029_s25  ;;  %7641 = vst.msk [vmem:[%s8950_s24 + $0x540] sm:$0xff] %vm7472_vm0, %v7041_v45 }
 0x900   : > { %7639 = vst.msk [vmem:[%s8950_s24 + $0x530] sm:$0xff] %vm7472_vm0, %v7037_v60  ;;  %v7063_v31 = vpop.permute.xlu2 %7062 }
 0x901   : > { %7652 = vst.msk [vmem:[%s8950_s24 + $0x598] sm:$0xff] %vm7472_vm0, %v7063_v31 }
 0x903   : > { %7130 = vrot.lane.b32.xlu1 %v13051_v4, %s8029_s25 }
 0x905   : > { %7126 = vrot.lane.b32.xlu0 %v13052_v37, %s8029_s25 }
 0x906   : > { %v7047_v53 = vpop.permute.xlu1 %7046 }
 0x907   : > { %v7043_v54 = vpop.permute.xlu0 %7042  ;;  %7146 = vrot.lane.b32.xlu2 %v11479_v19, %s8029_s25  ;;  %7644 = vst.msk [vmem:[%s8950_s24 + $0x558] sm:$0xff] %vm7472_vm0, %v7047_v53 }
 0x908   : > { %7642 = vst.msk [vmem:[%s8950_s24 + $0x548] sm:$0xff] %vm7472_vm0, %v7043_v54  ;;  %v7069_v19 = vpop.permute.xlu2 %7068 }
 0x909   : > { %7655 = vst.msk [vmem:[%s8950_s24 + $0x5b0] sm:$0xff] %vm7472_vm0, %v7069_v19 }
 0x90b   : > { %7136 = vrot.lane.b32.xlu1 %v13053_v14, %s8029_s25 }
 0x90d   : > { %7132 = vrot.lane.b32.xlu0 %v13054_v24, %s8029_s25 }
 0x90e   : > { %v7053_v30 = vpop.permute.xlu1 %7052 }
 0x90f   : > { %v7049_v28 = vpop.permute.xlu0 %7048  ;;  %7152 = vrot.lane.b32.xlu2 %v11445_v51, %s8029_s25  ;;  %7647 = vst.msk [vmem:[%s8950_s24 + $0x570] sm:$0xff] %vm7472_vm0, %v7053_v30 }
 0x910   : > { %7645 = vst.msk [vmem:[%s8950_s24 + $0x560] sm:$0xff] %vm7472_vm0, %v7049_v28  ;;  %v7075_v51 = vpop.permute.xlu2 %7074 }
 0x911   : > { %7658 = vst.msk [vmem:[%s8950_s24 + $0x5c8] sm:$0xff] %vm7472_vm0, %v7075_v51 }
 0x913   : > { %7142 = vrot.lane.b32.xlu1 %v11449_v18, %s8029_s25 }
 0x915   : > { %7138 = vrot.lane.b32.xlu0 %v13055_v32, %s8029_s25 }
 0x916   : > { %v7059_v33 = vpop.permute.xlu1 %7058 }
 0x917   : > { %v7055_v48 = vpop.permute.xlu0 %7054  ;;  %7158 = vrot.lane.b32.xlu2 %v11477_v41, %s8029_s25  ;;  %7650 = vst.msk [vmem:[%s8950_s24 + $0x588] sm:$0xff] %vm7472_vm0, %v7059_v33 }
 0x918   : > { %7648 = vst.msk [vmem:[%s8950_s24 + $0x578] sm:$0xff] %vm7472_vm0, %v7055_v48  ;;  %v7081_v41 = vpop.permute.xlu2 %7080 }
 0x919   : > { %7661 = vst.msk [vmem:[%s8950_s24 + $0x5e0] sm:$0xff] %vm7472_vm0, %v7081_v41 }
 0x91b   : > { %7148 = vrot.lane.b32.xlu1 %v11491_v16, %s8029_s25 }
 0x91d   : > { %7144 = vrot.lane.b32.xlu0 %v11461_v17, %s8029_s25 }
 0x91e   : > { %v7065_v43 = vpop.permute.xlu1 %7064 }
 0x91f   : > { %v7061_v18 = vpop.permute.xlu0 %7060  ;;  %7164 = vrot.lane.b32.xlu2 %v11513_v27, %s8029_s25  ;;  %7653 = vst.msk [vmem:[%s8950_s24 + $0x5a0] sm:$0xff] %vm7472_vm0, %v7065_v43 }
 0x920   : > { %7651 = vst.msk [vmem:[%s8950_s24 + $0x590] sm:$0xff] %vm7472_vm0, %v7061_v18  ;;  %v7087_v16 = vpop.permute.xlu2 %7086 }
 0x921   : > { %7664 = vst.msk [vmem:[%s8950_s24 + $0x5f8] sm:$0xff] %vm7472_vm0, %v7087_v16 }
 0x923   : > { %7154 = vrot.lane.b32.xlu1 %v11455_v5, %s8029_s25 }
 0x925   : > { %7150 = vrot.lane.b32.xlu0 %v11507_v11, %s8029_s25 }
 0x926   : > { %v7071_v27 = vpop.permute.xlu1 %7070 }
 0x927   : > { %v7067_v17 = vpop.permute.xlu0 %7066  ;;  %7170 = vrot.lane.b32.xlu2 %v11549_v23, %s8029_s25  ;;  %7656 = vst.msk [vmem:[%s8950_s24 + $0x5b8] sm:$0xff] %vm7472_vm0, %v7071_v27 }
 0x928   : > { %7654 = vst.msk [vmem:[%s8950_s24 + $0x5a8] sm:$0xff] %vm7472_vm0, %v7067_v17  ;;  %v7093_v11 = vpop.permute.xlu2 %7092 }
 0x929   : > { %7667 = vst.msk [vmem:[%s8950_s24 + $0x610] sm:$0xff] %vm7472_vm0, %v7093_v11 }
 0x92b   : > { %7160 = vrot.lane.b32.xlu1 %v11489_v3, %s8029_s25 }
 0x92d   : > { %7156 = vrot.lane.b32.xlu0 %v11467_v20, %s8029_s25 }
 0x92e   : > { %v7077_v23 = vpop.permute.xlu1 %7076 }
 0x92f   : > { %v7073_v5 = vpop.permute.xlu0 %7072  ;;  %7176 = vrot.lane.b32.xlu2 %v11585_v7, %s8029_s25  ;;  %7659 = vst.msk [vmem:[%s8950_s24 + $0x5d0] sm:$0xff] %vm7472_vm0, %v7077_v23 }
 0x930   : > { %7657 = vst.msk [vmem:[%s8950_s24 + $0x5c0] sm:$0xff] %vm7472_vm0, %v7073_v5  ;;  %v7099_v3 = vpop.permute.xlu2 %7098 }
 0x931   : > { %7670 = vst.msk [vmem:[%s8950_s24 + $0x628] sm:$0xff] %vm7472_vm0, %v7099_v3 }
 0x933   : > { %7166 = vrot.lane.b32.xlu1 %v11525_v1, %s8029_s25 }
 0x935   : > { %7162 = vrot.lane.b32.xlu0 %v11501_v47, %s8029_s25 }
 0x936   : > { %v7083_v7 = vpop.permute.xlu1 %7082 }
 0x937   : > { %v7079_v20 = vpop.permute.xlu0 %7078  ;;  %7182 = vrot.lane.b32.xlu2 %v11619_v55, %s8029_s25  ;;  %7662 = vst.msk [vmem:[%s8950_s24 + $0x5e8] sm:$0xff] %vm7472_vm0, %v7083_v7 }
 0x938   : > { %7660 = vst.msk [vmem:[%s8950_s24 + $0x5d8] sm:$0xff] %vm7472_vm0, %v7079_v20  ;;  %v7105_v1 = vpop.permute.xlu2 %7104 }
 0x939   : > { %7673 = vst.msk [vmem:[%s8950_s24 + $0x640] sm:$0xff] %vm7472_vm0, %v7105_v1 }
 0x93b   : > { %7172 = vrot.lane.b32.xlu1 %v11561_v0, %s8029_s25 }
 0x93d   : > { %7168 = vrot.lane.b32.xlu0 %v11537_v8, %s8029_s25 }
 0x93e   : > { %v7089_v55 = vpop.permute.xlu1 %7088 }
 0x93f   : > { %v7085_v47 = vpop.permute.xlu0 %7084  ;;  %7188 = vrot.lane.b32.xlu2 %v11451_v63, %s8029_s25  ;;  %7665 = vst.msk [vmem:[%s8950_s24 + $0x600] sm:$0xff] %vm7472_vm0, %v7089_v55 }
 0x940   : > { %7663 = vst.msk [vmem:[%s8950_s24 + $0x5f0] sm:$0xff] %vm7472_vm0, %v7085_v47  ;;  %v7111_v63 = vpop.permute.xlu2 %7110 }
 0x941   : > { %7676 = vst.msk [vmem:[%s8950_s24 + $0x658] sm:$0xff] %vm7472_vm0, %v7111_v63 }
 0x943   : > { %7178 = vrot.lane.b32.xlu1 %v11597_v2, %s8029_s25 }
 0x945   : > { %7174 = vrot.lane.b32.xlu0 %v11573_v38, %s8029_s25 }
 0x946   : > { %v7095_v0 = vpop.permute.xlu1 %7094 }
 0x947   : > { %v7091_v8 = vpop.permute.xlu0 %7090  ;;  %7194 = vrot.lane.b32.xlu2 %v11487_v35, %s8029_s25  ;;  %7668 = vst.msk [vmem:[%s8950_s24 + $0x618] sm:$0xff] %vm7472_vm0, %v7095_v0 }
 0x948   : > { %7666 = vst.msk [vmem:[%s8950_s24 + $0x608] sm:$0xff] %vm7472_vm0, %v7091_v8  ;;  %v7117_v35 = vpop.permute.xlu2 %7116 }
 0x949   : > { %7679 = vst.msk [vmem:[%s8950_s24 + $0x670] sm:$0xff] %vm7472_vm0, %v7117_v35 }
 0x94b   : > { %7184 = vrot.lane.b32.xlu1 %v11435_v39, %s8029_s25  ;;  %v13056_v39 = vld [vmem:[#allocation159_spill] sm:$0xff] }
 0x94d   : > { %7180 = vrot.lane.b32.xlu0 %v11609_v6, %s8029_s25 }
 0x94e   : > { %v7101_v2 = vpop.permute.xlu1 %7100 }
 0x94f   : > { %v7097_v38 = vpop.permute.xlu0 %7096  ;;  %7200 = vrot.lane.b32.xlu2 %v11523_v21, %s8029_s25  ;;  %7671 = vst.msk [vmem:[%s8950_s24 + $0x630] sm:$0xff] %vm7472_vm0, %v7101_v2 }
 0x950   : > { %7669 = vst.msk [vmem:[%s8950_s24 + $0x620] sm:$0xff] %vm7472_vm0, %v7097_v38  ;;  %v7123_v21 = vpop.permute.xlu2 %7122 }
 0x951   : > { %7682 = vst.msk [vmem:[%s8950_s24 + $0x688] sm:$0xff] %vm7472_vm0, %v7123_v21 }
 0x953   : > { %7190 = vrot.lane.b32.xlu1 %v11463_v25, %s8029_s25 }
 0x955   : > { %7186 = vrot.lane.b32.xlu0 %v13056_v39, %s8029_s25 }
 0x956   : > { %v7107_v50 = vpop.permute.xlu1 %7106 }
 0x957   : > { %v7103_v6 = vpop.permute.xlu0 %7102  ;;  %7206 = vrot.lane.b32.xlu2 %v11559_v57, %s8029_s25  ;;  %7674 = vst.msk [vmem:[%s8950_s24 + $0x648] sm:$0xff] %vm7472_vm0, %v7107_v50 }
 0x958   : > { %7672 = vst.msk [vmem:[%s8950_s24 + $0x638] sm:$0xff] %vm7472_vm0, %v7103_v6  ;;  %v7129_v57 = vpop.permute.xlu2 %7128 }
 0x959   : > { %7685 = vst.msk [vmem:[%s8950_s24 + $0x6a0] sm:$0xff] %vm7472_vm0, %v7129_v57 }
 0x95b   : > { %7196 = vrot.lane.b32.xlu1 %v11499_v15, %s8029_s25 }
 0x95d   : > { %7192 = vrot.lane.b32.xlu0 %v11475_v61, %s8029_s25 }
 0x95e   : > { %v7113_v34 = vpop.permute.xlu1 %7112 }
 0x95f   : > { %v7109_v25 = vpop.permute.xlu0 %7108  ;;  %7212 = vrot.lane.b32.xlu2 %v11595_v9, %s8029_s25  ;;  %7677 = vst.msk [vmem:[%s8950_s24 + $0x660] sm:$0xff] %vm7472_vm0, %v7113_v34 }
 0x960   : > { %7675 = vst.msk [vmem:[%s8950_s24 + $0x650] sm:$0xff] %vm7472_vm0, %v7109_v25  ;;  %v7135_v15 = vpop.permute.xlu2 %7134 }
 0x961   : > { %7688 = vst.msk [vmem:[%s8950_s24 + $0x6b8] sm:$0xff] %vm7472_vm0, %v7135_v15 }
 0x963   : > { %7202 = vrot.lane.b32.xlu1 %v11535_v22, %s8029_s25 }
 0x965   : > { %7198 = vrot.lane.b32.xlu0 %v11511_v10, %s8029_s25 }
 0x966   : > { %v7119_v9 = vpop.permute.xlu1 %7118 }
 0x967   : > { %v7115_v61 = vpop.permute.xlu0 %7114  ;;  %7680 = vst.msk [vmem:[%s8950_s24 + $0x678] sm:$0xff] %vm7472_vm0, %v7119_v9 }
 0x968   : > { %7678 = vst.msk [vmem:[%s8950_s24 + $0x668] sm:$0xff] %vm7472_vm0, %v7115_v61  ;;  %v7141_v22 = vpop.permute.xlu2 %7140 }
 0x969   : > { %7691 = vst.msk [vmem:[%s8950_s24 + $0x6d0] sm:$0xff] %vm7472_vm0, %v7141_v22 }
 0x96b   : > { %7208 = vrot.lane.b32.xlu1 %v11571_v59, %s8029_s25  ;;  %v13057_v59 = vld [vmem:[#allocation160_spill] sm:$0xff] }
 0x96d   : > { %7204 = vrot.lane.b32.xlu0 %v11547_v58, %s8029_s25 }
 0x96e   : > { %v7125_v46 = vpop.permute.xlu1 %7124 }
 0x96f   : > { %v7121_v10 = vpop.permute.xlu0 %7120  ;;  %7683 = vst.msk [vmem:[%s8950_s24 + $0x690] sm:$0xff] %vm7472_vm0, %v7125_v46 }
 0x970   : > { %7681 = vst.msk [vmem:[%s8950_s24 + $0x680] sm:$0xff] %vm7472_vm0, %v7121_v10  ;;  %v7147_v26 = vpop.permute.xlu2 %7146 }
 0x971   : > { %7694 = vst.msk [vmem:[%s8950_s24 + $0x6e8] sm:$0xff] %vm7472_vm0, %v7147_v26 }
 0x973   : > { %7214 = vrot.lane.b32.xlu1 %v11607_v44, %s8029_s25 }
 0x975   : > { %7210 = vrot.lane.b32.xlu0 %v13057_v59, %s8029_s25 }
 0x976   : > { %v7131_v49 = vpop.permute.xlu1 %7130 }
 0x977   : > { %v7127_v58 = vpop.permute.xlu0 %7126  ;;  %7686 = vst.msk [vmem:[%s8950_s24 + $0x6a8] sm:$0xff] %vm7472_vm0, %v7131_v49 }
 0x978   : > { %7684 = vst.msk [vmem:[%s8950_s24 + $0x698] sm:$0xff] %vm7472_vm0, %v7127_v58  ;;  %v7153_v44 = vpop.permute.xlu2 %7152 }
 0x979   : > { %7697 = vst.msk [vmem:[%s8950_s24 + $0x700] sm:$0xff] %vm7472_vm0, %v7153_v44 }
 0x97e   : > { %v7137_v42 = vpop.permute.xlu1 %7136 }
 0x97f   : > { %v7133_v52 = vpop.permute.xlu0 %7132  ;;  %7689 = vst.msk [vmem:[%s8950_s24 + $0x6c0] sm:$0xff] %vm7472_vm0, %v7137_v42 }
 0x980   : > { %7687 = vst.msk [vmem:[%s8950_s24 + $0x6b0] sm:$0xff] %vm7472_vm0, %v7133_v52  ;;  %v7159_v12 = vpop.permute.xlu2 %7158 }
 0x981   : > { %7700 = vst.msk [vmem:[%s8950_s24 + $0x718] sm:$0xff] %vm7472_vm0, %v7159_v12 }
 0x986   : > { %v7143_v62 = vpop.permute.xlu1 %7142 }
 0x987   : > { %v7139_v13 = vpop.permute.xlu0 %7138  ;;  %7692 = vst.msk [vmem:[%s8950_s24 + $0x6d8] sm:$0xff] %vm7472_vm0, %v7143_v62 }
 0x988   : > { %7690 = vst.msk [vmem:[%s8950_s24 + $0x6c8] sm:$0xff] %vm7472_vm0, %v7139_v13  ;;  %v7165_v40 = vpop.permute.xlu2 %7164 }
 0x989   : > { %7703 = vst.msk [vmem:[%s8950_s24 + $0x730] sm:$0xff] %vm7472_vm0, %v7165_v40 }
 0x98e   : > { %v7149_v29 = vpop.permute.xlu1 %7148 }
 0x98f   : > { %v7145_v36 = vpop.permute.xlu0 %7144  ;;  %7695 = vst.msk [vmem:[%s8950_s24 + $0x6f0] sm:$0xff] %vm7472_vm0, %v7149_v29 }
 0x990   : > { %7693 = vst.msk [vmem:[%s8950_s24 + $0x6e0] sm:$0xff] %vm7472_vm0, %v7145_v36  ;;  %v7171_v56 = vpop.permute.xlu2 %7170 }
 0x991   : > { %7706 = vst.msk [vmem:[%s8950_s24 + $0x748] sm:$0xff] %vm7472_vm0, %v7171_v56 }
 0x996   : > { %v7155_v45 = vpop.permute.xlu1 %7154 }
 0x997   : > { %v7151_v60 = vpop.permute.xlu0 %7150  ;;  %7698 = vst.msk [vmem:[%s8950_s24 + $0x708] sm:$0xff] %vm7472_vm0, %v7155_v45 }
 0x998   : > { %7696 = vst.msk [vmem:[%s8950_s24 + $0x6f8] sm:$0xff] %vm7472_vm0, %v7151_v60  ;;  %v7177_v37 = vpop.permute.xlu2 %7176 }
 0x999   : > { %7709 = vst.msk [vmem:[%s8950_s24 + $0x760] sm:$0xff] %vm7472_vm0, %v7177_v37 }
 0x99e   : > { %v7161_v54 = vpop.permute.xlu1 %7160 }
 0x99f   : > { %v7157_v4 = vpop.permute.xlu0 %7156  ;;  %7701 = vst.msk [vmem:[%s8950_s24 + $0x720] sm:$0xff] %vm7472_vm0, %v7161_v54 }
 0x9a0   : > { %7699 = vst.msk [vmem:[%s8950_s24 + $0x710] sm:$0xff] %vm7472_vm0, %v7157_v4  ;;  %v7183_v53 = vpop.permute.xlu2 %7182 }
 0x9a1   : > { %7712 = vst.msk [vmem:[%s8950_s24 + $0x778] sm:$0xff] %vm7472_vm0, %v7183_v53 }
 0x9a6   : > { %v7167_v14 = vpop.permute.xlu1 %7166 }
 0x9a7   : > { %v7163_v31 = vpop.permute.xlu0 %7162  ;;  %7704 = vst.msk [vmem:[%s8950_s24 + $0x738] sm:$0xff] %vm7472_vm0, %v7167_v14 }
 0x9a8   : > { %7702 = vst.msk [vmem:[%s8950_s24 + $0x728] sm:$0xff] %vm7472_vm0, %v7163_v31  ;;  %v7189_v28 = vpop.permute.xlu2 %7188 }
 0x9a9   : > { %7715 = vst.msk [vmem:[%s8950_s24 + $0x790] sm:$0xff] %vm7472_vm0, %v7189_v28 }
 0x9ae   : > { %v7173_v19 = vpop.permute.xlu1 %7172 }
 0x9af   : > { %v7169_v24 = vpop.permute.xlu0 %7168  ;;  %7707 = vst.msk [vmem:[%s8950_s24 + $0x750] sm:$0xff] %vm7472_vm0, %v7173_v19 }
 0x9b0   : > { %7705 = vst.msk [vmem:[%s8950_s24 + $0x740] sm:$0xff] %vm7472_vm0, %v7169_v24  ;;  %v7195_v32 = vpop.permute.xlu2 %7194 }
 0x9b1   : > { %7718 = vst.msk [vmem:[%s8950_s24 + $0x7a8] sm:$0xff] %vm7472_vm0, %v7195_v32 }
 0x9b6   : > { %v7179_v48 = vpop.permute.xlu1 %7178 }
 0x9b7   : > { %v7175_v30 = vpop.permute.xlu0 %7174  ;;  %7710 = vst.msk [vmem:[%s8950_s24 + $0x768] sm:$0xff] %vm7472_vm0, %v7179_v48 }
 0x9b8   : > { %7708 = vst.msk [vmem:[%s8950_s24 + $0x758] sm:$0xff] %vm7472_vm0, %v7175_v30  ;;  %v7201_v33 = vpop.permute.xlu2 %7200 }
 0x9b9   : > { %7721 = vst.msk [vmem:[%s8950_s24 + $0x7c0] sm:$0xff] %vm7472_vm0, %v7201_v33 }
 0x9be   : > { %v7185_v18 = vpop.permute.xlu1 %7184 }
 0x9bf   : > { %v7181_v51 = vpop.permute.xlu0 %7180  ;;  %7713 = vst.msk [vmem:[%s8950_s24 + $0x780] sm:$0xff] %vm7472_vm0, %v7185_v18 }
 0x9c0   : > { %7711 = vst.msk [vmem:[%s8950_s24 + $0x770] sm:$0xff] %vm7472_vm0, %v7181_v51  ;;  %v7207_v43 = vpop.permute.xlu2 %7206 }
 0x9c1   : > { %7724 = vst.msk [vmem:[%s8950_s24 + $0x7d8] sm:$0xff] %vm7472_vm0, %v7207_v43 }
 0x9c6   : > { %v7191_v17 = vpop.permute.xlu1 %7190 }
 0x9c7   : > { %v7187_v41 = vpop.permute.xlu0 %7186  ;;  %7716 = vst.msk [vmem:[%s8950_s24 + $0x798] sm:$0xff] %vm7472_vm0, %v7191_v17 }
 0x9c8   : > { %7714 = vst.msk [vmem:[%s8950_s24 + $0x788] sm:$0xff] %vm7472_vm0, %v7187_v41  ;;  %v7213_v27 = vpop.permute.xlu2 %7212 }
 0x9c9   : > { %7727 = vst.msk [vmem:[%s8950_s24 + $0x7f0] sm:$0xff] %vm7472_vm0, %v7213_v27 }
 0x9ce   : > { %v7197_v5 = vpop.permute.xlu1 %7196 }
 0x9cf   : > { %v7193_v16 = vpop.permute.xlu0 %7192  ;;  %7719 = vst.msk [vmem:[%s8950_s24 + $0x7b0] sm:$0xff] %vm7472_vm0, %v7197_v5 }
 0x9d0   : > { %7717 = vst.msk [vmem:[%s8950_s24 + $0x7a0] sm:$0xff] %vm7472_vm0, %v7193_v16 }
 0x9d6   : > { %v7203_v23 = vpop.permute.xlu1 %7202 }
 0x9d7   : > { %v7199_v11 = vpop.permute.xlu0 %7198  ;;  %7722 = vst.msk [vmem:[%s8950_s24 + $0x7c8] sm:$0xff] %vm7472_vm0, %v7203_v23 }
 0x9d8   : > { %7720 = vst.msk [vmem:[%s8950_s24 + $0x7b8] sm:$0xff] %vm7472_vm0, %v7199_v11 }
 0x9de   : > { %v7209_v3 = vpop.permute.xlu1 %7208 }
 0x9df   : > { %v7205_v20 = vpop.permute.xlu0 %7204  ;;  %7725 = vst.msk [vmem:[%s8950_s24 + $0x7e0] sm:$0xff] %vm7472_vm0, %v7209_v3 }
 0x9e0   : > { %7723 = vst.msk [vmem:[%s8950_s24 + $0x7d0] sm:$0xff] %vm7472_vm0, %v7205_v20 }
 0x9e6   : > { %v7215_v47 = vpop.permute.xlu1 %7214 }
 0x9e7   : > { %v7211_v7 = vpop.permute.xlu0 %7210  ;;  %7728 = vst.msk [vmem:[%s8950_s24 + $0x7f8] sm:$0xff] %vm7472_vm0, %v7215_v47 }
 0x9e8   : > { %7726 = vst.msk [vmem:[%s8950_s24 + $0x7e8] sm:$0xff] %vm7472_vm0, %v7211_v7 }
 0x9e9 PF: > { %p12_p7 = scmp.ge.s32.totalorder %s8065_s14, 4   ;;  %s13058_s9 = smov %s8012_s10 }
 0x9ea   : > { %s13059_s10 = smov %s8016_s11  ;;  %s13060_s11 = smov %s8075_s17 }
 0x9eb   : > { %s13061_s12 = smov %s8065_s14  ;;  %14 = sbr.rel (!%p12_p7) target bundleno = 3 (0x3), region = 68 }
 0x9f0   :  { %7751 = vsyncpa [#allocation3], 1 }
 0x9f1   :  { %7753 = vsyncpa [#allocation3 + $0x1], 1 }

</bundles_post_ra>
